<compile_context>
chip_gen: v5e
topology: v5e:2x2
jax: 0.10.0
libtpu: 0.0.40
codegen_flags: <defaults>
</compile_context>

<pallas_src>
import math
from functools import partial

import jax
import jax.numpy as jnp
from jax.experimental import pallas as pl
from jax.experimental.pallas import tpu as pltpu


# ----------------------------------------------------------------------------
# In-kernel helpers (operate on VMEM-resident values only)
# ----------------------------------------------------------------------------

def _layernorm(x, g, b, eps=1e-5):
    mean = jnp.mean(x, axis=-1, keepdims=True)
    xc = x - mean
    var = jnp.mean(xc * xc, axis=-1, keepdims=True)
    return xc * jax.lax.rsqrt(var + eps) * g + b


def _gelu_tanh(y):
    # tanh-GELU (GPT-2 "gelu_new"); also used for the ViT MLP (EUP slot instead
    # of a long erf VPU polynomial -- small numerics delta vs. exact erf GELU).
    return 0.5 * y * (1.0 + jnp.tanh(math.sqrt(2.0 / math.pi)
                                     * (y + 0.044715 * y * y * y)))


def _scores_mxu(qh, kh):
    """(Tq, hd) x (Tk, hd) -> (Tq, Tk) on the MXU; contraction over the head
    dim of both operands, i.e. qh @ kh.T with no materialized transpose."""
    return jax.lax.dot_general(qh, kh, (((1,), (1,)), ((), ())),
                               preferred_element_type=jnp.float32)


def _mha_proj(q, k, v, o_w, o_b, n_heads, bias):
    """Multi-head attention fused with its output projection.

    q: (Tq, E), k/v: (Tk, E), o_w: (E, E), o_b: (1, E), bias: (Tq, Tk) or None.
    Heads are split with static lane slices; each head's contribution is folded
    straight into the output projection (concat_h(o_h) @ W_o == sum_h o_h @
    W_o[h]) so no concat/reshape/transpose ever materializes. QK^T, P@V and the
    per-head output projection all run on the MXU.
    """
    Tq, E = q.shape
    hd = E // n_heads
    scale = 1.0 / math.sqrt(hd)
    acc = None
    for h in range(n_heads):
        lo, hi = h * hd, (h + 1) * hd
        s = _scores_mxu(q[:, lo:hi], k[:, lo:hi]) * scale            # (Tq, Tk)
        if bias is not None:
            s = s + bias
        m = jnp.max(s, axis=-1, keepdims=True)
        p = jnp.exp(s - m)
        p = p * pl.reciprocal(jnp.sum(p, axis=-1, keepdims=True), approx=True)
        oh = jnp.dot(p, v[:, lo:hi], preferred_element_type=jnp.float32)
        contrib = jnp.dot(oh, o_w[lo:hi, :], preferred_element_type=jnp.float32)
        acc = contrib if acc is None else acc + contrib
    return acc + o_b


def _causal_bias(T, mask):
    """Additive attention bias built in-kernel (no HBM mask array)."""
    rows = jax.lax.broadcasted_iota(jnp.int32, (T, T), 0)
    cols = jax.lax.broadcasted_iota(jnp.int32, (T, T), 1)
    allowed = cols <= rows
    if mask is not None:                       # mask: (1, T) key-padding mask
        allowed = jnp.logical_and(allowed, mask > 0)
    return jnp.where(allowed, jnp.float32(0.0), jnp.float32(-1e9))


def _gpt2_stack(x, bias, n_layers, n_heads,
                ln1g, ln1b, attnw, attnb, projw, projb,
                ln2g, ln2b, fcw, fcb, mlpw, mlpb, lnfg, lnfb):
    """GPT-2 transformer blocks + final LN, entirely in VMEM. Layer weights are
    stacked along a leading axis and indexed with a static Python loop."""
    E = x.shape[1]
    for l in range(n_layers):
        h = _layernorm(x, ln1g[l], ln1b[l])
        qkv = jnp.dot(h, attnw[l], preferred_element_type=jnp.float32) + attnb[l]
        q, k, v = qkv[:, :E], qkv[:, E:2 * E], qkv[:, 2 * E:]
        x = x + _mha_proj(q, k, v, projw[l], projb[l], n_heads, bias)
        h = _layernorm(x, ln2g[l], ln2b[l])
        m = _gelu_tanh(jnp.dot(h, fcw[l], preferred_element_type=jnp.float32) + fcb[l])
        x = x + jnp.dot(m, mlpw[l], preferred_element_type=jnp.float32) + mlpb[l]
    return _layernorm(x, lnfg[...], lnfb[...])


# ----------------------------------------------------------------------------
# The single fused kernel
# ----------------------------------------------------------------------------

def _minigpt4_kernel(
        # ViT encoder + image projection
        patches_ref, pw_ref, pb_ref, cls_ref, pos_ref,
        v_ln1g, v_ln1b, v_qkvw, v_qkvb, v_ow, v_ob,
        v_ln2g, v_ln2b, v_fc1w, v_fc1b, v_fc2w, v_fc2b,
        v_lnfg, v_lnfb, iprojw_ref, iprojb_ref,
        # GPT-2 (shared by the inputs_embeds pass) + positions
        wpe_ref,
        g_ln1g, g_ln1b, g_attnw, g_attnb, g_projw, g_projb,
        g_ln2g, g_ln2b, g_fcw, g_fcb, g_mlpw, g_mlpb, g_lnfg, g_lnfb,
        # multimodal attention + tied lm_head
        mm_inw_ref, mm_inb_ref, mm_ow_ref, mm_ob_ref, wte_ref,
        # output
        out_ref,
        *, vit_layers, vit_heads, n_layer, n_head):
    # ----------------- ViT encoder -> CLS -> image projection ----------------
    # Patch embedding (conv with stride==patch == linear on flattened patches).
    # Row 0 of `patches` is a zero placeholder replaced by the CLS token.
    emb = jnp.dot(patches_ref[...], pw_ref[...],
                  preferred_element_type=jnp.float32) + pb_ref[...]      # (S, Hv)
    S, Hv = emb.shape
    row = jax.lax.broadcasted_iota(jnp.int32, (S, Hv), 0)
    xv = jnp.where(row == 0, cls_ref[...], emb) + pos_ref[...]
    for l in range(vit_layers):
        h = _layernorm(xv, v_ln1g[l], v_ln1b[l])
        qkv = jnp.dot(h, v_qkvw[l], preferred_element_type=jnp.float32) + v_qkvb[l]
        q, k, v = qkv[:, :Hv], qkv[:, Hv:2 * Hv], qkv[:, 2 * Hv:]
        xv = xv + _mha_proj(q, k, v, v_ow[l], v_ob[l], vit_heads, None)
        h = _layernorm(xv, v_ln2g[l], v_ln2b[l])
        m = _gelu_tanh(jnp.dot(h, v_fc1w[l], preferred_element_type=jnp.float32)
                       + v_fc1b[l])
        xv = xv + jnp.dot(m, v_fc2w[l], preferred_element_type=jnp.float32) + v_fc2b[l]
    xv = _layernorm(xv, v_lnfg[...], v_lnfb[...])
    img = (jnp.dot(xv[0:1, :], iprojw_ref[...], preferred_element_type=jnp.float32)
           + iprojb_ref[...])                                            # (1, E)

    # ------------- multimodal cross-attention, single KV token ---------------
    # The reference's key/value sequence has length 1 (the projected image
    # feature), so softmax over the key axis is identically 1 and the attention
    # output is query-independent:
    #     mm_out = (img @ W_v + b_v) @ W_o + b_o      (broadcast over T queries)
    # The q projection, scores, softmax and per-head loop are provably dead and
    # elided (see file header); so is the GPT-2 pass-1 text-features branch that
    # only fed that dead query path.
    E = wpe_ref.shape[1]
    v_img = (jnp.dot(img, mm_inw_ref[:, 2 * E:3 * E],
                     preferred_element_type=jnp.float32)
             + mm_inb_ref[:, 2 * E:3 * E])                               # (1, E)
    mm_row = (jnp.dot(v_img, mm_ow_ref[...], preferred_element_type=jnp.float32)
              + mm_ob_ref[...])                                          # (1, E)

    # ------------- GPT-2 on inputs_embeds (causal only, no mask) -------------
    x = mm_row + wpe_ref[...]                   # (T, E) via sublane broadcast
    T = x.shape[0]
    bias = _causal_bias(T, None)
    x = _gpt2_stack(x, bias, n_layer, n_head,
                    g_ln1g, g_ln1b, g_attnw, g_attnb, g_projw, g_projb,
                    g_ln2g, g_ln2b, g_fcw, g_fcb, g_mlpw, g_mlpb,
                    g_lnfg, g_lnfb)                                      # (T, E)

    # Tied lm_head: contract over E against wte directly (no stored transpose).
    out_ref[...] = jax.lax.dot_general(
        x, wte_ref[...], (((1,), (1,)), ((), ())),
        preferred_element_type=jnp.float32).astype(out_ref.dtype)        # (T, V)


# ----------------------------------------------------------------------------
# Parameter init (deterministic, synthetic, lane-dense small config)
# ----------------------------------------------------------------------------

class KeyGen:
    def __init__(self, key):
        self.key = key

    def __call__(self):
        self.key, sub = jax.random.split(self.key)
        return sub


def _normal(key, shape, scale=0.02):
    return scale * jax.random.normal(key, shape, dtype=jnp.float32)


def init_params(key):
    cfg = dict(img_size=16, patch=8, channels=3,
               vit_hidden=128, vit_layers=2, vit_heads=4,
               n_embd=128, n_layer=2, n_head=4, vocab=128, n_pos=32,
               mm_heads=8, seq_len=8)
    kg = KeyGen(key)
    Hv, C, P, L = cfg["vit_hidden"], cfg["channels"], cfg["patch"], cfg["vit_layers"]
    n_patches = (cfg["img_size"] // P) ** 2
    pd = C * P * P

    vit = dict(
        patch_w=_normal(kg(), (pd, Hv)), patch_b=jnp.zeros((1, Hv), jnp.float32),
        cls=_normal(kg(), (1, Hv)),
        pos=_normal(kg(), (n_patches + 1, Hv)),
        ln1_g=jnp.ones((L, 1, Hv), jnp.float32), ln1_b=jnp.zeros((L, 1, Hv), jnp.float32),
        qkv_w=_normal(kg(), (L, Hv, 3 * Hv)),            # fused Q/K/V (lane-dense)
        qkv_b=jnp.zeros((L, 1, 3 * Hv), jnp.float32),
        o_w=_normal(kg(), (L, Hv, Hv)), o_b=jnp.zeros((L, 1, Hv), jnp.float32),
        ln2_g=jnp.ones((L, 1, Hv), jnp.float32), ln2_b=jnp.zeros((L, 1, Hv), jnp.float32),
        fc1_w=_normal(kg(), (L, Hv, 4 * Hv)), fc1_b=jnp.zeros((L, 1, 4 * Hv), jnp.float32),
        fc2_w=_normal(kg(), (L, 4 * Hv, Hv)), fc2_b=jnp.zeros((L, 1, Hv), jnp.float32),
        lnf_g=jnp.ones((1, Hv), jnp.float32), lnf_b=jnp.zeros((1, Hv), jnp.float32),
    )

    E, V, Lg = cfg["n_embd"], cfg["vocab"], cfg["n_layer"]
    gpt2 = dict(
        wte=_normal(kg(), (V, E)),                       # single copy; lm_head uses
        wpe=_normal(kg(), (cfg["n_pos"], E)),            # dot_general, no wte.T dup
        ln1_g=jnp.ones((Lg, 1, E), jnp.float32), ln1_b=jnp.zeros((Lg, 1, E), jnp.float32),
        attn_w=_normal(kg(), (Lg, E, 3 * E)), attn_b=jnp.zeros((Lg, 1, 3 * E), jnp.float32),
        proj_w=_normal(kg(), (Lg, E, E)), proj_b=jnp.zeros((Lg, 1, E), jnp.float32),
        ln2_g=jnp.ones((Lg, 1, E), jnp.float32), ln2_b=jnp.zeros((Lg, 1, E), jnp.float32),
        fc_w=_normal(kg(), (Lg, E, 4 * E)), fc_b=jnp.zeros((Lg, 1, 4 * E), jnp.float32),
        mlp_w=_normal(kg(), (Lg, 4 * E, E)), mlp_b=jnp.zeros((Lg, 1, E), jnp.float32),
        lnf_g=jnp.ones((1, E), jnp.float32), lnf_b=jnp.zeros((1, E), jnp.float32),
    )

    mm = dict(                                           # (in, out) layout at init
        in_w=_normal(kg(), (E, 3 * E)), in_b=jnp.zeros((1, 3 * E), jnp.float32),
        out_w=_normal(kg(), (E, E)), out_b=jnp.zeros((1, E), jnp.float32),
    )

    return dict(cfg=cfg, vit=vit, gpt2=gpt2, mm=mm,
                img_proj_w=_normal(kg(), (Hv, E)),
                img_proj_b=jnp.zeros((1, E), jnp.float32))


# ----------------------------------------------------------------------------
# Wrapper: exactly ONE pallas_call
# ----------------------------------------------------------------------------

def _operand_bytes(arrays):
    return sum(int(a.size) * a.dtype.itemsize for a in arrays)


def minigpt4_forward(params, images, text_input_ids, text_attention_mask):
    """Matches MiniGPT4Model.forward. `text_attention_mask` is accepted for
    signature fidelity but (exactly as in the degenerate B=1 reference) cannot
    influence the logits, which depend only on the image and the text length."""
    del text_attention_mask
    cfg = params["cfg"]
    vp, gp, mp = params["vit"], params["gpt2"], params["mm"]
    P = cfg["patch"]
    B, C, H, W = images.shape
    assert B == 1, "reference multimodal attention is only shape-consistent for B==1"
    nh, nw = H // P, W // P
    pd = C * P * P

    # Patch extraction (pure layout glue). Row 0 is a zero placeholder for the
    # CLS token, replaced inside the kernel, so the patch-embed matmul directly
    # produces the full (S, Hv) sequence slab.
    patches = images.reshape(B, C, nh, P, nw, P)
    patches = jnp.transpose(patches, (0, 2, 4, 1, 3, 5)).reshape(B, nh * nw, pd)[0]
    patches = jnp.concatenate([jnp.zeros((1, pd), jnp.float32), patches], axis=0)

    T = text_input_ids.shape[1]
    V = cfg["vocab"]
    wpe = gp["wpe"][:T]

    operands = (
        patches, vp["patch_w"], vp["patch_b"], vp["cls"], vp["pos"],
        vp["ln1_g"], vp["ln1_b"], vp["qkv_w"], vp["qkv_b"], vp["o_w"], vp["o_b"],
        vp["ln2_g"], vp["ln2_b"], vp["fc1_w"], vp["fc1_b"], vp["fc2_w"], vp["fc2_b"],
        vp["lnf_g"], vp["lnf_b"], params["img_proj_w"], params["img_proj_b"],
        wpe,
        gp["ln1_g"], gp["ln1_b"], gp["attn_w"], gp["attn_b"], gp["proj_w"], gp["proj_b"],
        gp["ln2_g"], gp["ln2_b"], gp["fc_w"], gp["fc_b"], gp["mlp_w"], gp["mlp_b"],
        gp["lnf_g"], gp["lnf_b"],
        mp["in_w"], mp["in_b"], mp["out_w"], mp["out_b"], gp["wte"],
    )

    kernel = partial(_minigpt4_kernel,
                     vit_layers=cfg["vit_layers"], vit_heads=cfg["vit_heads"],
                     n_layer=cfg["n_layer"], n_head=cfg["n_head"])

    # Deterministic VMEM placement + explicit scoped-VMEM budget sized from the
    # actual operand footprint (with headroom for activations / double buffers).
    vmem_spec = pl.BlockSpec(memory_space=pltpu.MemorySpace.VMEM)
    vmem_limit = int(min(2 * (_operand_bytes(operands) + T * V * 4) + (16 << 20),
                         48 << 20))

    logits = pl.pallas_call(
        kernel,
        out_shape=jax.ShapeDtypeStruct((T, V), jnp.float32),
        in_specs=[vmem_spec] * len(operands),
        out_specs=vmem_spec,
        compiler_params=pltpu.CompilerParams(vmem_limit_bytes=vmem_limit),
    )(*operands)
    return logits[None]                                                  # (1, T, V)


# ----------------------------------------------------------------------------

if __name__ == "__main__":
    root = jax.random.PRNGKey(0)
    kp, ki, kt = jax.random.split(root, 3)
    params = init_params(kp)
    cfg = params["cfg"]

    images = jax.random.normal(
        ki, (1, cfg["channels"], cfg["img_size"], cfg["img_size"]), dtype=jnp.float32)
    text_input_ids = jax.random.randint(
        kt, (1, cfg["seq_len"]), 0, cfg["vocab"]).astype(jnp.int32)
    text_attention_mask = jnp.ones((1, cfg["seq_len"]), dtype=jnp.int32)

    fwd = jax.jit(lambda im, ids, msk: minigpt4_forward(params, im, ids, msk))
    logits = fwd(images, text_input_ids, text_attention_mask)
    jax.block_until_ready(logits)

    assert logits.shape == (1, cfg["seq_len"], cfg["vocab"]), logits.shape
    assert bool(jnp.all(jnp.isfinite(logits)))
    print("KERNEL_OK")
</pallas_src>

<mosaic_0001>
module attributes {stable_mosaic.version = 11 : i64} {
  func.func @_minigpt4_kernel(%arg0: memref<5x192xf32, #tpu.memory_space<vmem>>, %arg1: memref<192x128xf32, #tpu.memory_space<vmem>>, %arg2: memref<1x128xf32, #tpu.memory_space<vmem>>, %arg3: memref<1x128xf32, #tpu.memory_space<vmem>>, %arg4: memref<5x128xf32, #tpu.memory_space<vmem>>, %arg5: memref<2x1x128xf32, #tpu.memory_space<vmem>>, %arg6: memref<2x1x128xf32, #tpu.memory_space<vmem>>, %arg7: memref<2x128x384xf32, #tpu.memory_space<vmem>>, %arg8: memref<2x1x384xf32, #tpu.memory_space<vmem>>, %arg9: memref<2x128x128xf32, #tpu.memory_space<vmem>>, %arg10: memref<2x1x128xf32, #tpu.memory_space<vmem>>, %arg11: memref<2x1x128xf32, #tpu.memory_space<vmem>>, %arg12: memref<2x1x128xf32, #tpu.memory_space<vmem>>, %arg13: memref<2x128x512xf32, #tpu.memory_space<vmem>>, %arg14: memref<2x1x512xf32, #tpu.memory_space<vmem>>, %arg15: memref<2x512x128xf32, #tpu.memory_space<vmem>>, %arg16: memref<2x1x128xf32, #tpu.memory_space<vmem>>, %arg17: memref<1x128xf32, #tpu.memory_space<vmem>>, %arg18: memref<1x128xf32, #tpu.memory_space<vmem>>, %arg19: memref<128x128xf32, #tpu.memory_space<vmem>>, %arg20: memref<1x128xf32, #tpu.memory_space<vmem>>, %arg21: memref<8x128xf32, #tpu.memory_space<vmem>>, %arg22: memref<2x1x128xf32, #tpu.memory_space<vmem>>, %arg23: memref<2x1x128xf32, #tpu.memory_space<vmem>>, %arg24: memref<2x128x384xf32, #tpu.memory_space<vmem>>, %arg25: memref<2x1x384xf32, #tpu.memory_space<vmem>>, %arg26: memref<2x128x128xf32, #tpu.memory_space<vmem>>, %arg27: memref<2x1x128xf32, #tpu.memory_space<vmem>>, %arg28: memref<2x1x128xf32, #tpu.memory_space<vmem>>, %arg29: memref<2x1x128xf32, #tpu.memory_space<vmem>>, %arg30: memref<2x128x512xf32, #tpu.memory_space<vmem>>, %arg31: memref<2x1x512xf32, #tpu.memory_space<vmem>>, %arg32: memref<2x512x128xf32, #tpu.memory_space<vmem>>, %arg33: memref<2x1x128xf32, #tpu.memory_space<vmem>>, %arg34: memref<1x128xf32, #tpu.memory_space<vmem>>, %arg35: memref<1x128xf32, #tpu.memory_space<vmem>>, %arg36: memref<128x384xf32, #tpu.memory_space<vmem>>, %arg37: memref<1x384xf32, #tpu.memory_space<vmem>>, %arg38: memref<128x128xf32, #tpu.memory_space<vmem>>, %arg39: memref<1x128xf32, #tpu.memory_space<vmem>>, %arg40: memref<128x128xf32, #tpu.memory_space<vmem>>, %arg41: memref<8x128xf32, #tpu.memory_space<vmem>>) attributes {dimension_semantics = [], scalar_prefetch = 0 : i64, scratch_operands = 0 : i64, tpu.core_type = #tpu.core_type<tc>} {
    %c0 = arith.constant 0 : index
    %c0_0 = arith.constant 0 : index
    %0 = vector.load %arg0[%c0, %c0_0] : memref<5x192xf32, #tpu.memory_space<vmem>>, vector<5x192xf32>
    %c0_1 = arith.constant 0 : index
    %c0_2 = arith.constant 0 : index
    %1 = vector.load %arg1[%c0_1, %c0_2] : memref<192x128xf32, #tpu.memory_space<vmem>>, vector<192x128xf32>
    %cst = arith.constant dense<0.000000e+00> : vector<5x128xf32>
    %2 = tpu.matmul %0, %1, %cst {dimension_numbers = #tpu.dot_dimension_numbers<[1], [0], [0], [1], [0, 0, 1, 1], [], []>} : vector<5x192xf32>, vector<192x128xf32>, vector<5x128xf32> -> vector<5x128xf32>
    %c0_3 = arith.constant 0 : index
    %c0_4 = arith.constant 0 : index
    %3 = vector.load %arg2[%c0_3, %c0_4] : memref<1x128xf32, #tpu.memory_space<vmem>>, vector<1x128xf32>
    %4 = vector.broadcast %3 : vector<1x128xf32> to vector<5x128xf32>
    %5 = arith.addf %2, %4 : vector<5x128xf32>
    %6 = tpu.iota {dimensions = array<i32: 0>} : vector<5x128xi32>
    %c0_i32 = arith.constant 0 : i32
    %7 = vector.broadcast %c0_i32 : i32 to vector<5x128xi32>
    %8 = arith.cmpi eq, %6, %7 : vector<5x128xi32>
    %c0_5 = arith.constant 0 : index
    %c0_6 = arith.constant 0 : index
    %9 = vector.load %arg3[%c0_5, %c0_6] : memref<1x128xf32, #tpu.memory_space<vmem>>, vector<1x128xf32>
    %10 = vector.shape_cast %9 : vector<1x128xf32> to vector<1x128xf32>
    %11 = vector.broadcast %10 : vector<1x128xf32> to vector<5x128xf32>
    %12 = arith.select %8, %11, %5 : vector<5x128xi1>, vector<5x128xf32>
    %c0_7 = arith.constant 0 : index
    %c0_8 = arith.constant 0 : index
    %13 = vector.load %arg4[%c0_7, %c0_8] : memref<5x128xf32, #tpu.memory_space<vmem>>, vector<5x128xf32>
    %14 = arith.addf %12, %13 : vector<5x128xf32>
    %c0_9 = arith.constant 0 : index
    %c0_10 = arith.constant 0 : index
    %c0_11 = arith.constant 0 : index
    %15 = vector.load %arg5[%c0_9, %c0_10, %c0_11] : memref<2x1x128xf32, #tpu.memory_space<vmem>>, vector<1x1x128xf32>
    %16 = vector.shape_cast %15 : vector<1x1x128xf32> to vector<1x128xf32>
    %c0_12 = arith.constant 0 : index
    %c0_13 = arith.constant 0 : index
    %c0_14 = arith.constant 0 : index
    %17 = vector.load %arg6[%c0_12, %c0_13, %c0_14] : memref<2x1x128xf32, #tpu.memory_space<vmem>>, vector<1x1x128xf32>
    %18 = vector.shape_cast %17 : vector<1x1x128xf32> to vector<1x128xf32>
    %cst_15 = arith.constant dense<0.000000e+00> : vector<5xf32>
    %19 = vector.multi_reduction <add>, %14, %cst_15 [1] : vector<5x128xf32> to vector<5xf32>
    %20 = vector.shape_cast %19 : vector<5xf32> to vector<5x1xf32>
    %cst_16 = arith.constant 1.280000e+02 : f32
    %21 = vector.broadcast %cst_16 : f32 to vector<5x1xf32>
    %22 = arith.divf %20, %21 : vector<5x1xf32>
    %23 = vector.broadcast %22 : vector<5x1xf32> to vector<5x128xf32>
    %24 = arith.subf %14, %23 : vector<5x128xf32>
    %25 = arith.mulf %24, %24 : vector<5x128xf32>
    %cst_17 = arith.constant dense<0.000000e+00> : vector<5xf32>
    %26 = vector.multi_reduction <add>, %25, %cst_17 [1] : vector<5x128xf32> to vector<5xf32>
    %27 = vector.shape_cast %26 : vector<5xf32> to vector<5x1xf32>
    %cst_18 = arith.constant 1.280000e+02 : f32
    %28 = vector.broadcast %cst_18 : f32 to vector<5x1xf32>
    %29 = arith.divf %27, %28 : vector<5x1xf32>
    %cst_19 = arith.constant 9.99999974E-6 : f32
    %30 = vector.broadcast %cst_19 : f32 to vector<5x1xf32>
    %31 = arith.addf %29, %30 : vector<5x1xf32>
    %32 = math.rsqrt %31 : vector<5x1xf32>
    %33 = vector.broadcast %32 : vector<5x1xf32> to vector<5x128xf32>
    %34 = arith.mulf %24, %33 : vector<5x128xf32>
    %35 = vector.broadcast %16 : vector<1x128xf32> to vector<5x128xf32>
    %36 = arith.mulf %34, %35 : vector<5x128xf32>
    %37 = vector.broadcast %18 : vector<1x128xf32> to vector<5x128xf32>
    %38 = arith.addf %36, %37 : vector<5x128xf32>
    %c0_20 = arith.constant 0 : index
    %c0_21 = arith.constant 0 : index
    %c0_22 = arith.constant 0 : index
    %39 = vector.load %arg7[%c0_20, %c0_21, %c0_22] : memref<2x128x384xf32, #tpu.memory_space<vmem>>, vector<1x128x384xf32>
    %40 = vector.shape_cast %39 : vector<1x128x384xf32> to vector<128x384xf32>
    %cst_23 = arith.constant dense<0.000000e+00> : vector<5x384xf32>
    %41 = tpu.matmul %38, %40, %cst_23 {dimension_numbers = #tpu.dot_dimension_numbers<[1], [0], [0], [1], [0, 0, 1, 1], [], []>} : vector<5x128xf32>, vector<128x384xf32>, vector<5x384xf32> -> vector<5x384xf32>
    %c0_24 = arith.constant 0 : index
    %c0_25 = arith.constant 0 : index
    %c0_26 = arith.constant 0 : index
    %42 = vector.load %arg8[%c0_24, %c0_25, %c0_26] : memref<2x1x384xf32, #tpu.memory_space<vmem>>, vector<1x1x384xf32>
    %43 = vector.shape_cast %42 : vector<1x1x384xf32> to vector<1x384xf32>
    %44 = vector.broadcast %43 : vector<1x384xf32> to vector<5x384xf32>
    %45 = arith.addf %41, %44 : vector<5x384xf32>
    %46 = vector.extract_strided_slice %45 {offsets = [0, 0], sizes = [5, 128], strides = [1, 1]} : vector<5x384xf32> to vector<5x128xf32>
    %47 = vector.extract_strided_slice %45 {offsets = [0, 128], sizes = [5, 128], strides = [1, 1]} : vector<5x384xf32> to vector<5x128xf32>
    %48 = vector.extract_strided_slice %45 {offsets = [0, 256], sizes = [5, 128], strides = [1, 1]} : vector<5x384xf32> to vector<5x128xf32>
    %c0_27 = arith.constant 0 : index
    %c0_28 = arith.constant 0 : index
    %c0_29 = arith.constant 0 : index
    %49 = vector.load %arg9[%c0_27, %c0_28, %c0_29] : memref<2x128x128xf32, #tpu.memory_space<vmem>>, vector<1x128x128xf32>
    %50 = vector.shape_cast %49 : vector<1x128x128xf32> to vector<128x128xf32>
    %c0_30 = arith.constant 0 : index
    %c0_31 = arith.constant 0 : index
    %c0_32 = arith.constant 0 : index
    %51 = vector.load %arg10[%c0_30, %c0_31, %c0_32] : memref<2x1x128xf32, #tpu.memory_space<vmem>>, vector<1x1x128xf32>
    %52 = vector.shape_cast %51 : vector<1x1x128xf32> to vector<1x128xf32>
    %53 = vector.extract_strided_slice %46 {offsets = [0, 0], sizes = [5, 32], strides = [1, 1]} : vector<5x128xf32> to vector<5x32xf32>
    %54 = vector.extract_strided_slice %47 {offsets = [0, 0], sizes = [5, 32], strides = [1, 1]} : vector<5x128xf32> to vector<5x32xf32>
    %cst_33 = arith.constant dense<0.000000e+00> : vector<5x5xf32>
    %55 = tpu.matmul %53, %54, %cst_33 {dimension_numbers = #tpu.dot_dimension_numbers<[1], [1], [0], [0], [0, 0, 1, 0], [], []>} : vector<5x32xf32>, vector<5x32xf32>, vector<5x5xf32> -> vector<5x5xf32>
    %cst_34 = arith.constant 0.176776692 : f32
    %56 = vector.broadcast %cst_34 : f32 to vector<5x5xf32>
    %57 = arith.mulf %55, %56 : vector<5x5xf32>
    %cst_35 = arith.constant dense<0xFF800000> : vector<5xf32>
    %58 = vector.multi_reduction <maximumf>, %57, %cst_35 [1] : vector<5x5xf32> to vector<5xf32>
    %59 = vector.shape_cast %58 : vector<5xf32> to vector<5x1xf32>
    %60 = vector.broadcast %59 : vector<5x1xf32> to vector<5x5xf32>
    %61 = arith.subf %57, %60 : vector<5x5xf32>
    %62 = math.exp %61 : vector<5x5xf32>
    %cst_36 = arith.constant dense<0.000000e+00> : vector<5xf32>
    %63 = vector.multi_reduction <add>, %62, %cst_36 [1] : vector<5x5xf32> to vector<5xf32>
    %64 = vector.shape_cast %63 : vector<5xf32> to vector<5x1xf32>
    %65 = tpu.reciprocal %64 {approx = true} : vector<5x1xf32> -> vector<5x1xf32>
    %66 = vector.broadcast %65 : vector<5x1xf32> to vector<5x5xf32>
    %67 = arith.mulf %62, %66 : vector<5x5xf32>
    %68 = vector.extract_strided_slice %48 {offsets = [0, 0], sizes = [5, 32], strides = [1, 1]} : vector<5x128xf32> to vector<5x32xf32>
    %cst_37 = arith.constant dense<0.000000e+00> : vector<5x32xf32>
    %69 = tpu.matmul %67, %68, %cst_37 {dimension_numbers = #tpu.dot_dimension_numbers<[1], [0], [0], [1], [0, 0, 1, 1], [], []>} : vector<5x5xf32>, vector<5x32xf32>, vector<5x32xf32> -> vector<5x32xf32>
    %70 = vector.extract_strided_slice %50 {offsets = [0, 0], sizes = [32, 128], strides = [1, 1]} : vector<128x128xf32> to vector<32x128xf32>
    %cst_38 = arith.constant dense<0.000000e+00> : vector<5x128xf32>
    %71 = tpu.matmul %69, %70, %cst_38 {dimension_numbers = #tpu.dot_dimension_numbers<[1], [0], [0], [1], [0, 0, 1, 1], [], []>} : vector<5x32xf32>, vector<32x128xf32>, vector<5x128xf32> -> vector<5x128xf32>
    %72 = vector.extract_strided_slice %46 {offsets = [0, 32], sizes = [5, 32], strides = [1, 1]} : vector<5x128xf32> to vector<5x32xf32>
    %73 = vector.extract_strided_slice %47 {offsets = [0, 32], sizes = [5, 32], strides = [1, 1]} : vector<5x128xf32> to vector<5x32xf32>
    %cst_39 = arith.constant dense<0.000000e+00> : vector<5x5xf32>
    %74 = tpu.matmul %72, %73, %cst_39 {dimension_numbers = #tpu.dot_dimension_numbers<[1], [1], [0], [0], [0, 0, 1, 0], [], []>} : vector<5x32xf32>, vector<5x32xf32>, vector<5x5xf32> -> vector<5x5xf32>
    %cst_40 = arith.constant 0.176776692 : f32
    %75 = vector.broadcast %cst_40 : f32 to vector<5x5xf32>
    %76 = arith.mulf %74, %75 : vector<5x5xf32>
    %cst_41 = arith.constant dense<0xFF800000> : vector<5xf32>
    %77 = vector.multi_reduction <maximumf>, %76, %cst_41 [1] : vector<5x5xf32> to vector<5xf32>
    %78 = vector.shape_cast %77 : vector<5xf32> to vector<5x1xf32>
    %79 = vector.broadcast %78 : vector<5x1xf32> to vector<5x5xf32>
    %80 = arith.subf %76, %79 : vector<5x5xf32>
    %81 = math.exp %80 : vector<5x5xf32>
    %cst_42 = arith.constant dense<0.000000e+00> : vector<5xf32>
    %82 = vector.multi_reduction <add>, %81, %cst_42 [1] : vector<5x5xf32> to vector<5xf32>
    %83 = vector.shape_cast %82 : vector<5xf32> to vector<5x1xf32>
    %84 = tpu.reciprocal %83 {approx = true} : vector<5x1xf32> -> vector<5x1xf32>
    %85 = vector.broadcast %84 : vector<5x1xf32> to vector<5x5xf32>
    %86 = arith.mulf %81, %85 : vector<5x5xf32>
    %87 = vector.extract_strided_slice %48 {offsets = [0, 32], sizes = [5, 32], strides = [1, 1]} : vector<5x128xf32> to vector<5x32xf32>
    %cst_43 = arith.constant dense<0.000000e+00> : vector<5x32xf32>
    %88 = tpu.matmul %86, %87, %cst_43 {dimension_numbers = #tpu.dot_dimension_numbers<[1], [0], [0], [1], [0, 0, 1, 1], [], []>} : vector<5x5xf32>, vector<5x32xf32>, vector<5x32xf32> -> vector<5x32xf32>
    %89 = vector.extract_strided_slice %50 {offsets = [32, 0], sizes = [32, 128], strides = [1, 1]} : vector<128x128xf32> to vector<32x128xf32>
    %cst_44 = arith.constant dense<0.000000e+00> : vector<5x128xf32>
    %90 = tpu.matmul %88, %89, %cst_44 {dimension_numbers = #tpu.dot_dimension_numbers<[1], [0], [0], [1], [0, 0, 1, 1], [], []>} : vector<5x32xf32>, vector<32x128xf32>, vector<5x128xf32> -> vector<5x128xf32>
    %91 = arith.addf %71, %90 : vector<5x128xf32>
    %92 = vector.extract_strided_slice %46 {offsets = [0, 64], sizes = [5, 32], strides = [1, 1]} : vector<5x128xf32> to vector<5x32xf32>
    %93 = vector.extract_strided_slice %47 {offsets = [0, 64], sizes = [5, 32], strides = [1, 1]} : vector<5x128xf32> to vector<5x32xf32>
    %cst_45 = arith.constant dense<0.000000e+00> : vector<5x5xf32>
    %94 = tpu.matmul %92, %93, %cst_45 {dimension_numbers = #tpu.dot_dimension_numbers<[1], [1], [0], [0], [0, 0, 1, 0], [], []>} : vector<5x32xf32>, vector<5x32xf32>, vector<5x5xf32> -> vector<5x5xf32>
    %cst_46 = arith.constant 0.176776692 : f32
    %95 = vector.broadcast %cst_46 : f32 to vector<5x5xf32>
    %96 = arith.mulf %94, %95 : vector<5x5xf32>
    %cst_47 = arith.constant dense<0xFF800000> : vector<5xf32>
    %97 = vector.multi_reduction <maximumf>, %96, %cst_47 [1] : vector<5x5xf32> to vector<5xf32>
    %98 = vector.shape_cast %97 : vector<5xf32> to vector<5x1xf32>
    %99 = vector.broadcast %98 : vector<5x1xf32> to vector<5x5xf32>
    %100 = arith.subf %96, %99 : vector<5x5xf32>
    %101 = math.exp %100 : vector<5x5xf32>
    %cst_48 = arith.constant dense<0.000000e+00> : vector<5xf32>
    %102 = vector.multi_reduction <add>, %101, %cst_48 [1] : vector<5x5xf32> to vector<5xf32>
    %103 = vector.shape_cast %102 : vector<5xf32> to vector<5x1xf32>
    %104 = tpu.reciprocal %103 {approx = true} : vector<5x1xf32> -> vector<5x1xf32>
    %105 = vector.broadcast %104 : vector<5x1xf32> to vector<5x5xf32>
    %106 = arith.mulf %101, %105 : vector<5x5xf32>
    %107 = vector.extract_strided_slice %48 {offsets = [0, 64], sizes = [5, 32], strides = [1, 1]} : vector<5x128xf32> to vector<5x32xf32>
    %cst_49 = arith.constant dense<0.000000e+00> : vector<5x32xf32>
    %108 = tpu.matmul %106, %107, %cst_49 {dimension_numbers = #tpu.dot_dimension_numbers<[1], [0], [0], [1], [0, 0, 1, 1], [], []>} : vector<5x5xf32>, vector<5x32xf32>, vector<5x32xf32> -> vector<5x32xf32>
    %109 = vector.extract_strided_slice %50 {offsets = [64, 0], sizes = [32, 128], strides = [1, 1]} : vector<128x128xf32> to vector<32x128xf32>
    %cst_50 = arith.constant dense<0.000000e+00> : vector<5x128xf32>
    %110 = tpu.matmul %108, %109, %cst_50 {dimension_numbers = #tpu.dot_dimension_numbers<[1], [0], [0], [1], [0, 0, 1, 1], [], []>} : vector<5x32xf32>, vector<32x128xf32>, vector<5x128xf32> -> vector<5x128xf32>
    %111 = arith.addf %91, %110 : vector<5x128xf32>
    %112 = vector.extract_strided_slice %46 {offsets = [0, 96], sizes = [5, 32], strides = [1, 1]} : vector<5x128xf32> to vector<5x32xf32>
    %113 = vector.extract_strided_slice %47 {offsets = [0, 96], sizes = [5, 32], strides = [1, 1]} : vector<5x128xf32> to vector<5x32xf32>
    %cst_51 = arith.constant dense<0.000000e+00> : vector<5x5xf32>
    %114 = tpu.matmul %112, %113, %cst_51 {dimension_numbers = #tpu.dot_dimension_numbers<[1], [1], [0], [0], [0, 0, 1, 0], [], []>} : vector<5x32xf32>, vector<5x32xf32>, vector<5x5xf32> -> vector<5x5xf32>
    %cst_52 = arith.constant 0.176776692 : f32
    %115 = vector.broadcast %cst_52 : f32 to vector<5x5xf32>
    %116 = arith.mulf %114, %115 : vector<5x5xf32>
    %cst_53 = arith.constant dense<0xFF800000> : vector<5xf32>
    %117 = vector.multi_reduction <maximumf>, %116, %cst_53 [1] : vector<5x5xf32> to vector<5xf32>
    %118 = vector.shape_cast %117 : vector<5xf32> to vector<5x1xf32>
    %119 = vector.broadcast %118 : vector<5x1xf32> to vector<5x5xf32>
    %120 = arith.subf %116, %119 : vector<5x5xf32>
    %121 = math.exp %120 : vector<5x5xf32>
    %cst_54 = arith.constant dense<0.000000e+00> : vector<5xf32>
    %122 = vector.multi_reduction <add>, %121, %cst_54 [1] : vector<5x5xf32> to vector<5xf32>
    %123 = vector.shape_cast %122 : vector<5xf32> to vector<5x1xf32>
    %124 = tpu.reciprocal %123 {approx = true} : vector<5x1xf32> -> vector<5x1xf32>
    %125 = vector.broadcast %124 : vector<5x1xf32> to vector<5x5xf32>
    %126 = arith.mulf %121, %125 : vector<5x5xf32>
    %127 = vector.extract_strided_slice %48 {offsets = [0, 96], sizes = [5, 32], strides = [1, 1]} : vector<5x128xf32> to vector<5x32xf32>
    %cst_55 = arith.constant dense<0.000000e+00> : vector<5x32xf32>
    %128 = tpu.matmul %126, %127, %cst_55 {dimension_numbers = #tpu.dot_dimension_numbers<[1], [0], [0], [1], [0, 0, 1, 1], [], []>} : vector<5x5xf32>, vector<5x32xf32>, vector<5x32xf32> -> vector<5x32xf32>
    %129 = vector.extract_strided_slice %50 {offsets = [96, 0], sizes = [32, 128], strides = [1, 1]} : vector<128x128xf32> to vector<32x128xf32>
    %cst_56 = arith.constant dense<0.000000e+00> : vector<5x128xf32>
    %130 = tpu.matmul %128, %129, %cst_56 {dimension_numbers = #tpu.dot_dimension_numbers<[1], [0], [0], [1], [0, 0, 1, 1], [], []>} : vector<5x32xf32>, vector<32x128xf32>, vector<5x128xf32> -> vector<5x128xf32>
    %131 = arith.addf %111, %130 : vector<5x128xf32>
    %132 = vector.broadcast %52 : vector<1x128xf32> to vector<5x128xf32>
    %133 = arith.addf %131, %132 : vector<5x128xf32>
    %134 = arith.addf %14, %133 : vector<5x128xf32>
    %c0_57 = arith.constant 0 : index
    %c0_58 = arith.constant 0 : index
    %c0_59 = arith.constant 0 : index
    %135 = vector.load %arg11[%c0_57, %c0_58, %c0_59] : memref<2x1x128xf32, #tpu.memory_space<vmem>>, vector<1x1x128xf32>
    %136 = vector.shape_cast %135 : vector<1x1x128xf32> to vector<1x128xf32>
    %c0_60 = arith.constant 0 : index
    %c0_61 = arith.constant 0 : index
    %c0_62 = arith.constant 0 : index
    %137 = vector.load %arg12[%c0_60, %c0_61, %c0_62] : memref<2x1x128xf32, #tpu.memory_space<vmem>>, vector<1x1x128xf32>
    %138 = vector.shape_cast %137 : vector<1x1x128xf32> to vector<1x128xf32>
    %cst_63 = arith.constant dense<0.000000e+00> : vector<5xf32>
    %139 = vector.multi_reduction <add>, %134, %cst_63 [1] : vector<5x128xf32> to vector<5xf32>
    %140 = vector.shape_cast %139 : vector<5xf32> to vector<5x1xf32>
    %cst_64 = arith.constant 1.280000e+02 : f32
    %141 = vector.broadcast %cst_64 : f32 to vector<5x1xf32>
    %142 = arith.divf %140, %141 : vector<5x1xf32>
    %143 = vector.broadcast %142 : vector<5x1xf32> to vector<5x128xf32>
    %144 = arith.subf %134, %143 : vector<5x128xf32>
    %145 = arith.mulf %144, %144 : vector<5x128xf32>
    %cst_65 = arith.constant dense<0.000000e+00> : vector<5xf32>
    %146 = vector.multi_reduction <add>, %145, %cst_65 [1] : vector<5x128xf32> to vector<5xf32>
    %147 = vector.shape_cast %146 : vector<5xf32> to vector<5x1xf32>
    %cst_66 = arith.constant 1.280000e+02 : f32
    %148 = vector.broadcast %cst_66 : f32 to vector<5x1xf32>
    %149 = arith.divf %147, %148 : vector<5x1xf32>
    %cst_67 = arith.constant 9.99999974E-6 : f32
    %150 = vector.broadcast %cst_67 : f32 to vector<5x1xf32>
    %151 = arith.addf %149, %150 : vector<5x1xf32>
    %152 = math.rsqrt %151 : vector<5x1xf32>
    %153 = vector.broadcast %152 : vector<5x1xf32> to vector<5x128xf32>
    %154 = arith.mulf %144, %153 : vector<5x128xf32>
    %155 = vector.broadcast %136 : vector<1x128xf32> to vector<5x128xf32>
    %156 = arith.mulf %154, %155 : vector<5x128xf32>
    %157 = vector.broadcast %138 : vector<1x128xf32> to vector<5x128xf32>
    %158 = arith.addf %156, %157 : vector<5x128xf32>
    %c0_68 = arith.constant 0 : index
    %c0_69 = arith.constant 0 : index
    %c0_70 = arith.constant 0 : index
    %159 = vector.load %arg13[%c0_68, %c0_69, %c0_70] : memref<2x128x512xf32, #tpu.memory_space<vmem>>, vector<1x128x512xf32>
    %160 = vector.shape_cast %159 : vector<1x128x512xf32> to vector<128x512xf32>
    %cst_71 = arith.constant dense<0.000000e+00> : vector<5x512xf32>
    %161 = tpu.matmul %158, %160, %cst_71 {dimension_numbers = #tpu.dot_dimension_numbers<[1], [0], [0], [1], [0, 0, 1, 1], [], []>} : vector<5x128xf32>, vector<128x512xf32>, vector<5x512xf32> -> vector<5x512xf32>
    %c0_72 = arith.constant 0 : index
    %c0_73 = arith.constant 0 : index
    %c0_74 = arith.constant 0 : index
    %162 = vector.load %arg14[%c0_72, %c0_73, %c0_74] : memref<2x1x512xf32, #tpu.memory_space<vmem>>, vector<1x1x512xf32>
    %163 = vector.shape_cast %162 : vector<1x1x512xf32> to vector<1x512xf32>
    %164 = vector.broadcast %163 : vector<1x512xf32> to vector<5x512xf32>
    %165 = arith.addf %161, %164 : vector<5x512xf32>
    %cst_75 = arith.constant 5.000000e-01 : f32
    %166 = vector.broadcast %cst_75 : f32 to vector<5x512xf32>
    %167 = arith.mulf %166, %165 : vector<5x512xf32>
    %cst_76 = arith.constant 4.471500e-02 : f32
    %168 = vector.broadcast %cst_76 : f32 to vector<5x512xf32>
    %169 = arith.mulf %168, %165 : vector<5x512xf32>
    %170 = arith.mulf %169, %165 : vector<5x512xf32>
    %171 = arith.mulf %170, %165 : vector<5x512xf32>
    %172 = arith.addf %165, %171 : vector<5x512xf32>
    %cst_77 = arith.constant 0.797884583 : f32
    %173 = vector.broadcast %cst_77 : f32 to vector<5x512xf32>
    %174 = arith.mulf %173, %172 : vector<5x512xf32>
    %175 = math.tanh %174 : vector<5x512xf32>
    %cst_78 = arith.constant 1.000000e+00 : f32
    %176 = vector.broadcast %cst_78 : f32 to vector<5x512xf32>
    %177 = arith.addf %176, %175 : vector<5x512xf32>
    %178 = arith.mulf %167, %177 : vector<5x512xf32>
    %c0_79 = arith.constant 0 : index
    %c0_80 = arith.constant 0 : index
    %c0_81 = arith.constant 0 : index
    %179 = vector.load %arg15[%c0_79, %c0_80, %c0_81] : memref<2x512x128xf32, #tpu.memory_space<vmem>>, vector<1x512x128xf32>
    %180 = vector.shape_cast %179 : vector<1x512x128xf32> to vector<512x128xf32>
    %cst_82 = arith.constant dense<0.000000e+00> : vector<5x128xf32>
    %181 = tpu.matmul %178, %180, %cst_82 {dimension_numbers = #tpu.dot_dimension_numbers<[1], [0], [0], [1], [0, 0, 1, 1], [], []>} : vector<5x512xf32>, vector<512x128xf32>, vector<5x128xf32> -> vector<5x128xf32>
    %182 = arith.addf %134, %181 : vector<5x128xf32>
    %c0_83 = arith.constant 0 : index
    %c0_84 = arith.constant 0 : index
    %c0_85 = arith.constant 0 : index
    %183 = vector.load %arg16[%c0_83, %c0_84, %c0_85] : memref<2x1x128xf32, #tpu.memory_space<vmem>>, vector<1x1x128xf32>
    %184 = vector.shape_cast %183 : vector<1x1x128xf32> to vector<1x128xf32>
    %185 = vector.broadcast %184 : vector<1x128xf32> to vector<5x128xf32>
    %186 = arith.addf %182, %185 : vector<5x128xf32>
    %c1 = arith.constant 1 : index
    %c0_86 = arith.constant 0 : index
    %c0_87 = arith.constant 0 : index
    %187 = vector.load %arg5[%c1, %c0_86, %c0_87] : memref<2x1x128xf32, #tpu.memory_space<vmem>>, vector<1x1x128xf32>
    %188 = vector.shape_cast %187 : vector<1x1x128xf32> to vector<1x128xf32>
    %c1_88 = arith.constant 1 : index
    %c0_89 = arith.constant 0 : index
    %c0_90 = arith.constant 0 : index
    %189 = vector.load %arg6[%c1_88, %c0_89, %c0_90] : memref<2x1x128xf32, #tpu.memory_space<vmem>>, vector<1x1x128xf32>
    %190 = vector.shape_cast %189 : vector<1x1x128xf32> to vector<1x128xf32>
    %cst_91 = arith.constant dense<0.000000e+00> : vector<5xf32>
    %191 = vector.multi_reduction <add>, %186, %cst_91 [1] : vector<5x128xf32> to vector<5xf32>
    %192 = vector.shape_cast %191 : vector<5xf32> to vector<5x1xf32>
    %cst_92 = arith.constant 1.280000e+02 : f32
    %193 = vector.broadcast %cst_92 : f32 to vector<5x1xf32>
    %194 = arith.divf %192, %193 : vector<5x1xf32>
    %195 = vector.broadcast %194 : vector<5x1xf32> to vector<5x128xf32>
    %196 = arith.subf %186, %195 : vector<5x128xf32>
    %197 = arith.mulf %196, %196 : vector<5x128xf32>
    %cst_93 = arith.constant dense<0.000000e+00> : vector<5xf32>
    %198 = vector.multi_reduction <add>, %197, %cst_93 [1] : vector<5x128xf32> to vector<5xf32>
    %199 = vector.shape_cast %198 : vector<5xf32> to vector<5x1xf32>
    %cst_94 = arith.constant 1.280000e+02 : f32
    %200 = vector.broadcast %cst_94 : f32 to vector<5x1xf32>
    %201 = arith.divf %199, %200 : vector<5x1xf32>
    %cst_95 = arith.constant 9.99999974E-6 : f32
    %202 = vector.broadcast %cst_95 : f32 to vector<5x1xf32>
    %203 = arith.addf %201, %202 : vector<5x1xf32>
    %204 = math.rsqrt %203 : vector<5x1xf32>
    %205 = vector.broadcast %204 : vector<5x1xf32> to vector<5x128xf32>
    %206 = arith.mulf %196, %205 : vector<5x128xf32>
    %207 = vector.broadcast %188 : vector<1x128xf32> to vector<5x128xf32>
    %208 = arith.mulf %206, %207 : vector<5x128xf32>
    %209 = vector.broadcast %190 : vector<1x128xf32> to vector<5x128xf32>
    %210 = arith.addf %208, %209 : vector<5x128xf32>
    %c1_96 = arith.constant 1 : index
    %c0_97 = arith.constant 0 : index
    %c0_98 = arith.constant 0 : index
    %211 = vector.load %arg7[%c1_96, %c0_97, %c0_98] : memref<2x128x384xf32, #tpu.memory_space<vmem>>, vector<1x128x384xf32>
    %212 = vector.shape_cast %211 : vector<1x128x384xf32> to vector<128x384xf32>
    %cst_99 = arith.constant dense<0.000000e+00> : vector<5x384xf32>
    %213 = tpu.matmul %210, %212, %cst_99 {dimension_numbers = #tpu.dot_dimension_numbers<[1], [0], [0], [1], [0, 0, 1, 1], [], []>} : vector<5x128xf32>, vector<128x384xf32>, vector<5x384xf32> -> vector<5x384xf32>
    %c1_100 = arith.constant 1 : index
    %c0_101 = arith.constant 0 : index
    %c0_102 = arith.constant 0 : index
    %214 = vector.load %arg8[%c1_100, %c0_101, %c0_102] : memref<2x1x384xf32, #tpu.memory_space<vmem>>, vector<1x1x384xf32>
    %215 = vector.shape_cast %214 : vector<1x1x384xf32> to vector<1x384xf32>
    %216 = vector.broadcast %215 : vector<1x384xf32> to vector<5x384xf32>
    %217 = arith.addf %213, %216 : vector<5x384xf32>
    %218 = vector.extract_strided_slice %217 {offsets = [0, 0], sizes = [5, 128], strides = [1, 1]} : vector<5x384xf32> to vector<5x128xf32>
    %219 = vector.extract_strided_slice %217 {offsets = [0, 128], sizes = [5, 128], strides = [1, 1]} : vector<5x384xf32> to vector<5x128xf32>
    %220 = vector.extract_strided_slice %217 {offsets = [0, 256], sizes = [5, 128], strides = [1, 1]} : vector<5x384xf32> to vector<5x128xf32>
    %c1_103 = arith.constant 1 : index
    %c0_104 = arith.constant 0 : index
    %c0_105 = arith.constant 0 : index
    %221 = vector.load %arg9[%c1_103, %c0_104, %c0_105] : memref<2x128x128xf32, #tpu.memory_space<vmem>>, vector<1x128x128xf32>
    %222 = vector.shape_cast %221 : vector<1x128x128xf32> to vector<128x128xf32>
    %c1_106 = arith.constant 1 : index
    %c0_107 = arith.constant 0 : index
    %c0_108 = arith.constant 0 : index
    %223 = vector.load %arg10[%c1_106, %c0_107, %c0_108] : memref<2x1x128xf32, #tpu.memory_space<vmem>>, vector<1x1x128xf32>
    %224 = vector.shape_cast %223 : vector<1x1x128xf32> to vector<1x128xf32>
    %225 = vector.extract_strided_slice %218 {offsets = [0, 0], sizes = [5, 32], strides = [1, 1]} : vector<5x128xf32> to vector<5x32xf32>
    %226 = vector.extract_strided_slice %219 {offsets = [0, 0], sizes = [5, 32], strides = [1, 1]} : vector<5x128xf32> to vector<5x32xf32>
    %cst_109 = arith.constant dense<0.000000e+00> : vector<5x5xf32>
    %227 = tpu.matmul %225, %226, %cst_109 {dimension_numbers = #tpu.dot_dimension_numbers<[1], [1], [0], [0], [0, 0, 1, 0], [], []>} : vector<5x32xf32>, vector<5x32xf32>, vector<5x5xf32> -> vector<5x5xf32>
    %cst_110 = arith.constant 0.176776692 : f32
    %228 = vector.broadcast %cst_110 : f32 to vector<5x5xf32>
    %229 = arith.mulf %227, %228 : vector<5x5xf32>
    %cst_111 = arith.constant dense<0xFF800000> : vector<5xf32>
    %230 = vector.multi_reduction <maximumf>, %229, %cst_111 [1] : vector<5x5xf32> to vector<5xf32>
    %231 = vector.shape_cast %230 : vector<5xf32> to vector<5x1xf32>
    %232 = vector.broadcast %231 : vector<5x1xf32> to vector<5x5xf32>
    %233 = arith.subf %229, %232 : vector<5x5xf32>
    %234 = math.exp %233 : vector<5x5xf32>
    %cst_112 = arith.constant dense<0.000000e+00> : vector<5xf32>
    %235 = vector.multi_reduction <add>, %234, %cst_112 [1] : vector<5x5xf32> to vector<5xf32>
    %236 = vector.shape_cast %235 : vector<5xf32> to vector<5x1xf32>
    %237 = tpu.reciprocal %236 {approx = true} : vector<5x1xf32> -> vector<5x1xf32>
    %238 = vector.broadcast %237 : vector<5x1xf32> to vector<5x5xf32>
    %239 = arith.mulf %234, %238 : vector<5x5xf32>
    %240 = vector.extract_strided_slice %220 {offsets = [0, 0], sizes = [5, 32], strides = [1, 1]} : vector<5x128xf32> to vector<5x32xf32>
    %cst_113 = arith.constant dense<0.000000e+00> : vector<5x32xf32>
    %241 = tpu.matmul %239, %240, %cst_113 {dimension_numbers = #tpu.dot_dimension_numbers<[1], [0], [0], [1], [0, 0, 1, 1], [], []>} : vector<5x5xf32>, vector<5x32xf32>, vector<5x32xf32> -> vector<5x32xf32>
    %242 = vector.extract_strided_slice %222 {offsets = [0, 0], sizes = [32, 128], strides = [1, 1]} : vector<128x128xf32> to vector<32x128xf32>
    %cst_114 = arith.constant dense<0.000000e+00> : vector<5x128xf32>
    %243 = tpu.matmul %241, %242, %cst_114 {dimension_numbers = #tpu.dot_dimension_numbers<[1], [0], [0], [1], [0, 0, 1, 1], [], []>} : vector<5x32xf32>, vector<32x128xf32>, vector<5x128xf32> -> vector<5x128xf32>
    %244 = vector.extract_strided_slice %218 {offsets = [0, 32], sizes = [5, 32], strides = [1, 1]} : vector<5x128xf32> to vector<5x32xf32>
    %245 = vector.extract_strided_slice %219 {offsets = [0, 32], sizes = [5, 32], strides = [1, 1]} : vector<5x128xf32> to vector<5x32xf32>
    %cst_115 = arith.constant dense<0.000000e+00> : vector<5x5xf32>
    %246 = tpu.matmul %244, %245, %cst_115 {dimension_numbers = #tpu.dot_dimension_numbers<[1], [1], [0], [0], [0, 0, 1, 0], [], []>} : vector<5x32xf32>, vector<5x32xf32>, vector<5x5xf32> -> vector<5x5xf32>
    %cst_116 = arith.constant 0.176776692 : f32
    %247 = vector.broadcast %cst_116 : f32 to vector<5x5xf32>
    %248 = arith.mulf %246, %247 : vector<5x5xf32>
    %cst_117 = arith.constant dense<0xFF800000> : vector<5xf32>
    %249 = vector.multi_reduction <maximumf>, %248, %cst_117 [1] : vector<5x5xf32> to vector<5xf32>
    %250 = vector.shape_cast %249 : vector<5xf32> to vector<5x1xf32>
    %251 = vector.broadcast %250 : vector<5x1xf32> to vector<5x5xf32>
    %252 = arith.subf %248, %251 : vector<5x5xf32>
    %253 = math.exp %252 : vector<5x5xf32>
    %cst_118 = arith.constant dense<0.000000e+00> : vector<5xf32>
    %254 = vector.multi_reduction <add>, %253, %cst_118 [1] : vector<5x5xf32> to vector<5xf32>
    %255 = vector.shape_cast %254 : vector<5xf32> to vector<5x1xf32>
    %256 = tpu.reciprocal %255 {approx = true} : vector<5x1xf32> -> vector<5x1xf32>
    %257 = vector.broadcast %256 : vector<5x1xf32> to vector<5x5xf32>
    %258 = arith.mulf %253, %257 : vector<5x5xf32>
    %259 = vector.extract_strided_slice %220 {offsets = [0, 32], sizes = [5, 32], strides = [1, 1]} : vector<5x128xf32> to vector<5x32xf32>
    %cst_119 = arith.constant dense<0.000000e+00> : vector<5x32xf32>
    %260 = tpu.matmul %258, %259, %cst_119 {dimension_numbers = #tpu.dot_dimension_numbers<[1], [0], [0], [1], [0, 0, 1, 1], [], []>} : vector<5x5xf32>, vector<5x32xf32>, vector<5x32xf32> -> vector<5x32xf32>
    %261 = vector.extract_strided_slice %222 {offsets = [32, 0], sizes = [32, 128], strides = [1, 1]} : vector<128x128xf32> to vector<32x128xf32>
    %cst_120 = arith.constant dense<0.000000e+00> : vector<5x128xf32>
    %262 = tpu.matmul %260, %261, %cst_120 {dimension_numbers = #tpu.dot_dimension_numbers<[1], [0], [0], [1], [0, 0, 1, 1], [], []>} : vector<5x32xf32>, vector<32x128xf32>, vector<5x128xf32> -> vector<5x128xf32>
    %263 = arith.addf %243, %262 : vector<5x128xf32>
    %264 = vector.extract_strided_slice %218 {offsets = [0, 64], sizes = [5, 32], strides = [1, 1]} : vector<5x128xf32> to vector<5x32xf32>
    %265 = vector.extract_strided_slice %219 {offsets = [0, 64], sizes = [5, 32], strides = [1, 1]} : vector<5x128xf32> to vector<5x32xf32>
    %cst_121 = arith.constant dense<0.000000e+00> : vector<5x5xf32>
    %266 = tpu.matmul %264, %265, %cst_121 {dimension_numbers = #tpu.dot_dimension_numbers<[1], [1], [0], [0], [0, 0, 1, 0], [], []>} : vector<5x32xf32>, vector<5x32xf32>, vector<5x5xf32> -> vector<5x5xf32>
    %cst_122 = arith.constant 0.176776692 : f32
    %267 = vector.broadcast %cst_122 : f32 to vector<5x5xf32>
    %268 = arith.mulf %266, %267 : vector<5x5xf32>
    %cst_123 = arith.constant dense<0xFF800000> : vector<5xf32>
    %269 = vector.multi_reduction <maximumf>, %268, %cst_123 [1] : vector<5x5xf32> to vector<5xf32>
    %270 = vector.shape_cast %269 : vector<5xf32> to vector<5x1xf32>
    %271 = vector.broadcast %270 : vector<5x1xf32> to vector<5x5xf32>
    %272 = arith.subf %268, %271 : vector<5x5xf32>
    %273 = math.exp %272 : vector<5x5xf32>
    %cst_124 = arith.constant dense<0.000000e+00> : vector<5xf32>
    %274 = vector.multi_reduction <add>, %273, %cst_124 [1] : vector<5x5xf32> to vector<5xf32>
    %275 = vector.shape_cast %274 : vector<5xf32> to vector<5x1xf32>
    %276 = tpu.reciprocal %275 {approx = true} : vector<5x1xf32> -> vector<5x1xf32>
    %277 = vector.broadcast %276 : vector<5x1xf32> to vector<5x5xf32>
    %278 = arith.mulf %273, %277 : vector<5x5xf32>
    %279 = vector.extract_strided_slice %220 {offsets = [0, 64], sizes = [5, 32], strides = [1, 1]} : vector<5x128xf32> to vector<5x32xf32>
    %cst_125 = arith.constant dense<0.000000e+00> : vector<5x32xf32>
    %280 = tpu.matmul %278, %279, %cst_125 {dimension_numbers = #tpu.dot_dimension_numbers<[1], [0], [0], [1], [0, 0, 1, 1], [], []>} : vector<5x5xf32>, vector<5x32xf32>, vector<5x32xf32> -> vector<5x32xf32>
    %281 = vector.extract_strided_slice %222 {offsets = [64, 0], sizes = [32, 128], strides = [1, 1]} : vector<128x128xf32> to vector<32x128xf32>
    %cst_126 = arith.constant dense<0.000000e+00> : vector<5x128xf32>
    %282 = tpu.matmul %280, %281, %cst_126 {dimension_numbers = #tpu.dot_dimension_numbers<[1], [0], [0], [1], [0, 0, 1, 1], [], []>} : vector<5x32xf32>, vector<32x128xf32>, vector<5x128xf32> -> vector<5x128xf32>
    %283 = arith.addf %263, %282 : vector<5x128xf32>
    %284 = vector.extract_strided_slice %218 {offsets = [0, 96], sizes = [5, 32], strides = [1, 1]} : vector<5x128xf32> to vector<5x32xf32>
    %285 = vector.extract_strided_slice %219 {offsets = [0, 96], sizes = [5, 32], strides = [1, 1]} : vector<5x128xf32> to vector<5x32xf32>
    %cst_127 = arith.constant dense<0.000000e+00> : vector<5x5xf32>
    %286 = tpu.matmul %284, %285, %cst_127 {dimension_numbers = #tpu.dot_dimension_numbers<[1], [1], [0], [0], [0, 0, 1, 0], [], []>} : vector<5x32xf32>, vector<5x32xf32>, vector<5x5xf32> -> vector<5x5xf32>
    %cst_128 = arith.constant 0.176776692 : f32
    %287 = vector.broadcast %cst_128 : f32 to vector<5x5xf32>
    %288 = arith.mulf %286, %287 : vector<5x5xf32>
    %cst_129 = arith.constant dense<0xFF800000> : vector<5xf32>
    %289 = vector.multi_reduction <maximumf>, %288, %cst_129 [1] : vector<5x5xf32> to vector<5xf32>
    %290 = vector.shape_cast %289 : vector<5xf32> to vector<5x1xf32>
    %291 = vector.broadcast %290 : vector<5x1xf32> to vector<5x5xf32>
    %292 = arith.subf %288, %291 : vector<5x5xf32>
    %293 = math.exp %292 : vector<5x5xf32>
    %cst_130 = arith.constant dense<0.000000e+00> : vector<5xf32>
    %294 = vector.multi_reduction <add>, %293, %cst_130 [1] : vector<5x5xf32> to vector<5xf32>
    %295 = vector.shape_cast %294 : vector<5xf32> to vector<5x1xf32>
    %296 = tpu.reciprocal %295 {approx = true} : vector<5x1xf32> -> vector<5x1xf32>
    %297 = vector.broadcast %296 : vector<5x1xf32> to vector<5x5xf32>
    %298 = arith.mulf %293, %297 : vector<5x5xf32>
    %299 = vector.extract_strided_slice %220 {offsets = [0, 96], sizes = [5, 32], strides = [1, 1]} : vector<5x128xf32> to vector<5x32xf32>
    %cst_131 = arith.constant dense<0.000000e+00> : vector<5x32xf32>
    %300 = tpu.matmul %298, %299, %cst_131 {dimension_numbers = #tpu.dot_dimension_numbers<[1], [0], [0], [1], [0, 0, 1, 1], [], []>} : vector<5x5xf32>, vector<5x32xf32>, vector<5x32xf32> -> vector<5x32xf32>
    %301 = vector.extract_strided_slice %222 {offsets = [96, 0], sizes = [32, 128], strides = [1, 1]} : vector<128x128xf32> to vector<32x128xf32>
    %cst_132 = arith.constant dense<0.000000e+00> : vector<5x128xf32>
    %302 = tpu.matmul %300, %301, %cst_132 {dimension_numbers = #tpu.dot_dimension_numbers<[1], [0], [0], [1], [0, 0, 1, 1], [], []>} : vector<5x32xf32>, vector<32x128xf32>, vector<5x128xf32> -> vector<5x128xf32>
    %303 = arith.addf %283, %302 : vector<5x128xf32>
    %304 = vector.broadcast %224 : vector<1x128xf32> to vector<5x128xf32>
    %305 = arith.addf %303, %304 : vector<5x128xf32>
    %306 = arith.addf %186, %305 : vector<5x128xf32>
    %c1_133 = arith.constant 1 : index
    %c0_134 = arith.constant 0 : index
    %c0_135 = arith.constant 0 : index
    %307 = vector.load %arg11[%c1_133, %c0_134, %c0_135] : memref<2x1x128xf32, #tpu.memory_space<vmem>>, vector<1x1x128xf32>
    %308 = vector.shape_cast %307 : vector<1x1x128xf32> to vector<1x128xf32>
    %c1_136 = arith.constant 1 : index
    %c0_137 = arith.constant 0 : index
    %c0_138 = arith.constant 0 : index
    %309 = vector.load %arg12[%c1_136, %c0_137, %c0_138] : memref<2x1x128xf32, #tpu.memory_space<vmem>>, vector<1x1x128xf32>
    %310 = vector.shape_cast %309 : vector<1x1x128xf32> to vector<1x128xf32>
    %cst_139 = arith.constant dense<0.000000e+00> : vector<5xf32>
    %311 = vector.multi_reduction <add>, %306, %cst_139 [1] : vector<5x128xf32> to vector<5xf32>
    %312 = vector.shape_cast %311 : vector<5xf32> to vector<5x1xf32>
    %cst_140 = arith.constant 1.280000e+02 : f32
    %313 = vector.broadcast %cst_140 : f32 to vector<5x1xf32>
    %314 = arith.divf %312, %313 : vector<5x1xf32>
    %315 = vector.broadcast %314 : vector<5x1xf32> to vector<5x128xf32>
    %316 = arith.subf %306, %315 : vector<5x128xf32>
    %317 = arith.mulf %316, %316 : vector<5x128xf32>
    %cst_141 = arith.constant dense<0.000000e+00> : vector<5xf32>
    %318 = vector.multi_reduction <add>, %317, %cst_141 [1] : vector<5x128xf32> to vector<5xf32>
    %319 = vector.shape_cast %318 : vector<5xf32> to vector<5x1xf32>
    %cst_142 = arith.constant 1.280000e+02 : f32
    %320 = vector.broadcast %cst_142 : f32 to vector<5x1xf32>
    %321 = arith.divf %319, %320 : vector<5x1xf32>
    %cst_143 = arith.constant 9.99999974E-6 : f32
    %322 = vector.broadcast %cst_143 : f32 to vector<5x1xf32>
    %323 = arith.addf %321, %322 : vector<5x1xf32>
    %324 = math.rsqrt %323 : vector<5x1xf32>
    %325 = vector.broadcast %324 : vector<5x1xf32> to vector<5x128xf32>
    %326 = arith.mulf %316, %325 : vector<5x128xf32>
    %327 = vector.broadcast %308 : vector<1x128xf32> to vector<5x128xf32>
    %328 = arith.mulf %326, %327 : vector<5x128xf32>
    %329 = vector.broadcast %310 : vector<1x128xf32> to vector<5x128xf32>
    %330 = arith.addf %328, %329 : vector<5x128xf32>
    %c1_144 = arith.constant 1 : index
    %c0_145 = arith.constant 0 : index
    %c0_146 = arith.constant 0 : index
    %331 = vector.load %arg13[%c1_144, %c0_145, %c0_146] : memref<2x128x512xf32, #tpu.memory_space<vmem>>, vector<1x128x512xf32>
    %332 = vector.shape_cast %331 : vector<1x128x512xf32> to vector<128x512xf32>
    %cst_147 = arith.constant dense<0.000000e+00> : vector<5x512xf32>
    %333 = tpu.matmul %330, %332, %cst_147 {dimension_numbers = #tpu.dot_dimension_numbers<[1], [0], [0], [1], [0, 0, 1, 1], [], []>} : vector<5x128xf32>, vector<128x512xf32>, vector<5x512xf32> -> vector<5x512xf32>
    %c1_148 = arith.constant 1 : index
    %c0_149 = arith.constant 0 : index
    %c0_150 = arith.constant 0 : index
    %334 = vector.load %arg14[%c1_148, %c0_149, %c0_150] : memref<2x1x512xf32, #tpu.memory_space<vmem>>, vector<1x1x512xf32>
    %335 = vector.shape_cast %334 : vector<1x1x512xf32> to vector<1x512xf32>
    %336 = vector.broadcast %335 : vector<1x512xf32> to vector<5x512xf32>
    %337 = arith.addf %333, %336 : vector<5x512xf32>
    %cst_151 = arith.constant 5.000000e-01 : f32
    %338 = vector.broadcast %cst_151 : f32 to vector<5x512xf32>
    %339 = arith.mulf %338, %337 : vector<5x512xf32>
    %cst_152 = arith.constant 4.471500e-02 : f32
    %340 = vector.broadcast %cst_152 : f32 to vector<5x512xf32>
    %341 = arith.mulf %340, %337 : vector<5x512xf32>
    %342 = arith.mulf %341, %337 : vector<5x512xf32>
    %343 = arith.mulf %342, %337 : vector<5x512xf32>
    %344 = arith.addf %337, %343 : vector<5x512xf32>
    %cst_153 = arith.constant 0.797884583 : f32
    %345 = vector.broadcast %cst_153 : f32 to vector<5x512xf32>
    %346 = arith.mulf %345, %344 : vector<5x512xf32>
    %347 = math.tanh %346 : vector<5x512xf32>
    %cst_154 = arith.constant 1.000000e+00 : f32
    %348 = vector.broadcast %cst_154 : f32 to vector<5x512xf32>
    %349 = arith.addf %348, %347 : vector<5x512xf32>
    %350 = arith.mulf %339, %349 : vector<5x512xf32>
    %c1_155 = arith.constant 1 : index
    %c0_156 = arith.constant 0 : index
    %c0_157 = arith.constant 0 : index
    %351 = vector.load %arg15[%c1_155, %c0_156, %c0_157] : memref<2x512x128xf32, #tpu.memory_space<vmem>>, vector<1x512x128xf32>
    %352 = vector.shape_cast %351 : vector<1x512x128xf32> to vector<512x128xf32>
    %cst_158 = arith.constant dense<0.000000e+00> : vector<5x128xf32>
    %353 = tpu.matmul %350, %352, %cst_158 {dimension_numbers = #tpu.dot_dimension_numbers<[1], [0], [0], [1], [0, 0, 1, 1], [], []>} : vector<5x512xf32>, vector<512x128xf32>, vector<5x128xf32> -> vector<5x128xf32>
    %354 = arith.addf %306, %353 : vector<5x128xf32>
    %c1_159 = arith.constant 1 : index
    %c0_160 = arith.constant 0 : index
    %c0_161 = arith.constant 0 : index
    %355 = vector.load %arg16[%c1_159, %c0_160, %c0_161] : memref<2x1x128xf32, #tpu.memory_space<vmem>>, vector<1x1x128xf32>
    %356 = vector.shape_cast %355 : vector<1x1x128xf32> to vector<1x128xf32>
    %357 = vector.broadcast %356 : vector<1x128xf32> to vector<5x128xf32>
    %358 = arith.addf %354, %357 : vector<5x128xf32>
    %c0_162 = arith.constant 0 : index
    %c0_163 = arith.constant 0 : index
    %359 = vector.load %arg17[%c0_162, %c0_163] : memref<1x128xf32, #tpu.memory_space<vmem>>, vector<1x128xf32>
    %c0_164 = arith.constant 0 : index
    %c0_165 = arith.constant 0 : index
    %360 = vector.load %arg18[%c0_164, %c0_165] : memref<1x128xf32, #tpu.memory_space<vmem>>, vector<1x128xf32>
    %cst_166 = arith.constant dense<0.000000e+00> : vector<5xf32>
    %361 = vector.multi_reduction <add>, %358, %cst_166 [1] : vector<5x128xf32> to vector<5xf32>
    %362 = vector.shape_cast %361 : vector<5xf32> to vector<5x1xf32>
    %cst_167 = arith.constant 1.280000e+02 : f32
    %363 = vector.broadcast %cst_167 : f32 to vector<5x1xf32>
    %364 = arith.divf %362, %363 : vector<5x1xf32>
    %365 = vector.broadcast %364 : vector<5x1xf32> to vector<5x128xf32>
    %366 = arith.subf %358, %365 : vector<5x128xf32>
    %367 = arith.mulf %366, %366 : vector<5x128xf32>
    %cst_168 = arith.constant dense<0.000000e+00> : vector<5xf32>
    %368 = vector.multi_reduction <add>, %367, %cst_168 [1] : vector<5x128xf32> to vector<5xf32>
    %369 = vector.shape_cast %368 : vector<5xf32> to vector<5x1xf32>
    %cst_169 = arith.constant 1.280000e+02 : f32
    %370 = vector.broadcast %cst_169 : f32 to vector<5x1xf32>
    %371 = arith.divf %369, %370 : vector<5x1xf32>
    %cst_170 = arith.constant 9.99999974E-6 : f32
    %372 = vector.broadcast %cst_170 : f32 to vector<5x1xf32>
    %373 = arith.addf %371, %372 : vector<5x1xf32>
    %374 = math.rsqrt %373 : vector<5x1xf32>
    %375 = vector.broadcast %374 : vector<5x1xf32> to vector<5x128xf32>
    %376 = arith.mulf %366, %375 : vector<5x128xf32>
    %377 = vector.broadcast %359 : vector<1x128xf32> to vector<5x128xf32>
    %378 = arith.mulf %376, %377 : vector<5x128xf32>
    %379 = vector.broadcast %360 : vector<1x128xf32> to vector<5x128xf32>
    %380 = arith.addf %378, %379 : vector<5x128xf32>
    %381 = vector.extract_strided_slice %380 {offsets = [0, 0], sizes = [1, 128], strides = [1, 1]} : vector<5x128xf32> to vector<1x128xf32>
    %c0_171 = arith.constant 0 : index
    %c0_172 = arith.constant 0 : index
    %382 = vector.load %arg19[%c0_171, %c0_172] : memref<128x128xf32, #tpu.memory_space<vmem>>, vector<128x128xf32>
    %cst_173 = arith.constant dense<0.000000e+00> : vector<1x128xf32>
    %383 = tpu.matmul %381, %382, %cst_173 {dimension_numbers = #tpu.dot_dimension_numbers<[1], [0], [0], [1], [0, 0, 1, 1], [], []>} : vector<1x128xf32>, vector<128x128xf32>, vector<1x128xf32> -> vector<1x128xf32>
    %c0_174 = arith.constant 0 : index
    %c0_175 = arith.constant 0 : index
    %384 = vector.load %arg20[%c0_174, %c0_175] : memref<1x128xf32, #tpu.memory_space<vmem>>, vector<1x128xf32>
    %385 = arith.addf %383, %384 : vector<1x128xf32>
    %c0_176 = arith.constant 0 : index
    %c256 = arith.constant 256 : index
    %386 = vector.load %arg36[%c0_176, %c256] : memref<128x384xf32, #tpu.memory_space<vmem>>, vector<128x128xf32>
    %cst_177 = arith.constant dense<0.000000e+00> : vector<1x128xf32>
    %387 = tpu.matmul %385, %386, %cst_177 {dimension_numbers = #tpu.dot_dimension_numbers<[1], [0], [0], [1], [0, 0, 1, 1], [], []>} : vector<1x128xf32>, vector<128x128xf32>, vector<1x128xf32> -> vector<1x128xf32>
    %c0_178 = arith.constant 0 : index
    %c256_179 = arith.constant 256 : index
    %388 = vector.load %arg37[%c0_178, %c256_179] : memref<1x384xf32, #tpu.memory_space<vmem>>, vector<1x128xf32>
    %389 = arith.addf %387, %388 : vector<1x128xf32>
    %c0_180 = arith.constant 0 : index
    %c0_181 = arith.constant 0 : index
    %390 = vector.load %arg38[%c0_180, %c0_181] : memref<128x128xf32, #tpu.memory_space<vmem>>, vector<128x128xf32>
    %cst_182 = arith.constant dense<0.000000e+00> : vector<1x128xf32>
    %391 = tpu.matmul %389, %390, %cst_182 {dimension_numbers = #tpu.dot_dimension_numbers<[1], [0], [0], [1], [0, 0, 1, 1], [], []>} : vector<1x128xf32>, vector<128x128xf32>, vector<1x128xf32> -> vector<1x128xf32>
    %c0_183 = arith.constant 0 : index
    %c0_184 = arith.constant 0 : index
    %392 = vector.load %arg39[%c0_183, %c0_184] : memref<1x128xf32, #tpu.memory_space<vmem>>, vector<1x128xf32>
    %393 = arith.addf %391, %392 : vector<1x128xf32>
    %c0_185 = arith.constant 0 : index
    %c0_186 = arith.constant 0 : index
    %394 = vector.load %arg21[%c0_185, %c0_186] : memref<8x128xf32, #tpu.memory_space<vmem>>, vector<8x128xf32>
    %395 = vector.broadcast %393 : vector<1x128xf32> to vector<8x128xf32>
    %396 = arith.addf %395, %394 : vector<8x128xf32>
    %397 = tpu.iota {dimensions = array<i32: 0>} : vector<8x8xi32>
    %398 = tpu.iota {dimensions = array<i32: 1>} : vector<8x8xi32>
    %399 = arith.cmpi sle, %398, %397 : vector<8x8xi32>
    %cst_187 = arith.constant 0.000000e+00 : f32
    %cst_188 = arith.constant -1.000000e+09 : f32
    %400 = vector.broadcast %cst_187 : f32 to vector<8x8xf32>
    %401 = vector.broadcast %cst_188 : f32 to vector<8x8xf32>
    %402 = arith.select %399, %400, %401 : vector<8x8xi1>, vector<8x8xf32>
    %c0_189 = arith.constant 0 : index
    %c0_190 = arith.constant 0 : index
    %c0_191 = arith.constant 0 : index
    %403 = vector.load %arg22[%c0_189, %c0_190, %c0_191] : memref<2x1x128xf32, #tpu.memory_space<vmem>>, vector<1x1x128xf32>
    %404 = vector.shape_cast %403 : vector<1x1x128xf32> to vector<1x128xf32>
    %c0_192 = arith.constant 0 : index
    %c0_193 = arith.constant 0 : index
    %c0_194 = arith.constant 0 : index
    %405 = vector.load %arg23[%c0_192, %c0_193, %c0_194] : memref<2x1x128xf32, #tpu.memory_space<vmem>>, vector<1x1x128xf32>
    %406 = vector.shape_cast %405 : vector<1x1x128xf32> to vector<1x128xf32>
    %cst_195 = arith.constant dense<0.000000e+00> : vector<8xf32>
    %407 = vector.multi_reduction <add>, %396, %cst_195 [1] : vector<8x128xf32> to vector<8xf32>
    %408 = vector.shape_cast %407 : vector<8xf32> to vector<8x1xf32>
    %cst_196 = arith.constant 1.280000e+02 : f32
    %409 = vector.broadcast %cst_196 : f32 to vector<8x1xf32>
    %410 = arith.divf %408, %409 : vector<8x1xf32>
    %411 = vector.broadcast %410 : vector<8x1xf32> to vector<8x128xf32>
    %412 = arith.subf %396, %411 : vector<8x128xf32>
    %413 = arith.mulf %412, %412 : vector<8x128xf32>
    %cst_197 = arith.constant dense<0.000000e+00> : vector<8xf32>
    %414 = vector.multi_reduction <add>, %413, %cst_197 [1] : vector<8x128xf32> to vector<8xf32>
    %415 = vector.shape_cast %414 : vector<8xf32> to vector<8x1xf32>
    %cst_198 = arith.constant 1.280000e+02 : f32
    %416 = vector.broadcast %cst_198 : f32 to vector<8x1xf32>
    %417 = arith.divf %415, %416 : vector<8x1xf32>
    %cst_199 = arith.constant 9.99999974E-6 : f32
    %418 = vector.broadcast %cst_199 : f32 to vector<8x1xf32>
    %419 = arith.addf %417, %418 : vector<8x1xf32>
    %420 = math.rsqrt %419 : vector<8x1xf32>
    %421 = vector.broadcast %420 : vector<8x1xf32> to vector<8x128xf32>
    %422 = arith.mulf %412, %421 : vector<8x128xf32>
    %423 = vector.broadcast %404 : vector<1x128xf32> to vector<8x128xf32>
    %424 = arith.mulf %422, %423 : vector<8x128xf32>
    %425 = vector.broadcast %406 : vector<1x128xf32> to vector<8x128xf32>
    %426 = arith.addf %424, %425 : vector<8x128xf32>
    %c0_200 = arith.constant 0 : index
    %c0_201 = arith.constant 0 : index
    %c0_202 = arith.constant 0 : index
    %427 = vector.load %arg24[%c0_200, %c0_201, %c0_202] : memref<2x128x384xf32, #tpu.memory_space<vmem>>, vector<1x128x384xf32>
    %428 = vector.shape_cast %427 : vector<1x128x384xf32> to vector<128x384xf32>
    %cst_203 = arith.constant dense<0.000000e+00> : vector<8x384xf32>
    %429 = tpu.matmul %426, %428, %cst_203 {dimension_numbers = #tpu.dot_dimension_numbers<[1], [0], [0], [1], [0, 0, 1, 1], [], []>} : vector<8x128xf32>, vector<128x384xf32>, vector<8x384xf32> -> vector<8x384xf32>
    %c0_204 = arith.constant 0 : index
    %c0_205 = arith.constant 0 : index
    %c0_206 = arith.constant 0 : index
    %430 = vector.load %arg25[%c0_204, %c0_205, %c0_206] : memref<2x1x384xf32, #tpu.memory_space<vmem>>, vector<1x1x384xf32>
    %431 = vector.shape_cast %430 : vector<1x1x384xf32> to vector<1x384xf32>
    %432 = vector.broadcast %431 : vector<1x384xf32> to vector<8x384xf32>
    %433 = arith.addf %429, %432 : vector<8x384xf32>
    %434 = vector.extract_strided_slice %433 {offsets = [0, 0], sizes = [8, 128], strides = [1, 1]} : vector<8x384xf32> to vector<8x128xf32>
    %435 = vector.extract_strided_slice %433 {offsets = [0, 128], sizes = [8, 128], strides = [1, 1]} : vector<8x384xf32> to vector<8x128xf32>
    %436 = vector.extract_strided_slice %433 {offsets = [0, 256], sizes = [8, 128], strides = [1, 1]} : vector<8x384xf32> to vector<8x128xf32>
    %c0_207 = arith.constant 0 : index
    %c0_208 = arith.constant 0 : index
    %c0_209 = arith.constant 0 : index
    %437 = vector.load %arg26[%c0_207, %c0_208, %c0_209] : memref<2x128x128xf32, #tpu.memory_space<vmem>>, vector<1x128x128xf32>
    %438 = vector.shape_cast %437 : vector<1x128x128xf32> to vector<128x128xf32>
    %c0_210 = arith.constant 0 : index
    %c0_211 = arith.constant 0 : index
    %c0_212 = arith.constant 0 : index
    %439 = vector.load %arg27[%c0_210, %c0_211, %c0_212] : memref<2x1x128xf32, #tpu.memory_space<vmem>>, vector<1x1x128xf32>
    %440 = vector.shape_cast %439 : vector<1x1x128xf32> to vector<1x128xf32>
    %441 = vector.extract_strided_slice %434 {offsets = [0, 0], sizes = [8, 32], strides = [1, 1]} : vector<8x128xf32> to vector<8x32xf32>
    %442 = vector.extract_strided_slice %435 {offsets = [0, 0], sizes = [8, 32], strides = [1, 1]} : vector<8x128xf32> to vector<8x32xf32>
    %cst_213 = arith.constant dense<0.000000e+00> : vector<8x8xf32>
    %443 = tpu.matmul %441, %442, %cst_213 {dimension_numbers = #tpu.dot_dimension_numbers<[1], [1], [0], [0], [0, 0, 1, 0], [], []>} : vector<8x32xf32>, vector<8x32xf32>, vector<8x8xf32> -> vector<8x8xf32>
    %cst_214 = arith.constant 0.176776692 : f32
    %444 = vector.broadcast %cst_214 : f32 to vector<8x8xf32>
    %445 = arith.mulf %443, %444 : vector<8x8xf32>
    %446 = arith.addf %445, %402 : vector<8x8xf32>
    %cst_215 = arith.constant dense<0xFF800000> : vector<8xf32>
    %447 = vector.multi_reduction <maximumf>, %446, %cst_215 [1] : vector<8x8xf32> to vector<8xf32>
    %448 = vector.shape_cast %447 : vector<8xf32> to vector<8x1xf32>
    %449 = vector.broadcast %448 : vector<8x1xf32> to vector<8x8xf32>
    %450 = arith.subf %446, %449 : vector<8x8xf32>
    %451 = math.exp %450 : vector<8x8xf32>
    %cst_216 = arith.constant dense<0.000000e+00> : vector<8xf32>
    %452 = vector.multi_reduction <add>, %451, %cst_216 [1] : vector<8x8xf32> to vector<8xf32>
    %453 = vector.shape_cast %452 : vector<8xf32> to vector<8x1xf32>
    %454 = tpu.reciprocal %453 {approx = true} : vector<8x1xf32> -> vector<8x1xf32>
    %455 = vector.broadcast %454 : vector<8x1xf32> to vector<8x8xf32>
    %456 = arith.mulf %451, %455 : vector<8x8xf32>
    %457 = vector.extract_strided_slice %436 {offsets = [0, 0], sizes = [8, 32], strides = [1, 1]} : vector<8x128xf32> to vector<8x32xf32>
    %cst_217 = arith.constant dense<0.000000e+00> : vector<8x32xf32>
    %458 = tpu.matmul %456, %457, %cst_217 {dimension_numbers = #tpu.dot_dimension_numbers<[1], [0], [0], [1], [0, 0, 1, 1], [], []>} : vector<8x8xf32>, vector<8x32xf32>, vector<8x32xf32> -> vector<8x32xf32>
    %459 = vector.extract_strided_slice %438 {offsets = [0, 0], sizes = [32, 128], strides = [1, 1]} : vector<128x128xf32> to vector<32x128xf32>
    %cst_218 = arith.constant dense<0.000000e+00> : vector<8x128xf32>
    %460 = tpu.matmul %458, %459, %cst_218 {dimension_numbers = #tpu.dot_dimension_numbers<[1], [0], [0], [1], [0, 0, 1, 1], [], []>} : vector<8x32xf32>, vector<32x128xf32>, vector<8x128xf32> -> vector<8x128xf32>
    %461 = vector.extract_strided_slice %434 {offsets = [0, 32], sizes = [8, 32], strides = [1, 1]} : vector<8x128xf32> to vector<8x32xf32>
    %462 = vector.extract_strided_slice %435 {offsets = [0, 32], sizes = [8, 32], strides = [1, 1]} : vector<8x128xf32> to vector<8x32xf32>
    %cst_219 = arith.constant dense<0.000000e+00> : vector<8x8xf32>
    %463 = tpu.matmul %461, %462, %cst_219 {dimension_numbers = #tpu.dot_dimension_numbers<[1], [1], [0], [0], [0, 0, 1, 0], [], []>} : vector<8x32xf32>, vector<8x32xf32>, vector<8x8xf32> -> vector<8x8xf32>
    %cst_220 = arith.constant 0.176776692 : f32
    %464 = vector.broadcast %cst_220 : f32 to vector<8x8xf32>
    %465 = arith.mulf %463, %464 : vector<8x8xf32>
    %466 = arith.addf %465, %402 : vector<8x8xf32>
    %cst_221 = arith.constant dense<0xFF800000> : vector<8xf32>
    %467 = vector.multi_reduction <maximumf>, %466, %cst_221 [1] : vector<8x8xf32> to vector<8xf32>
    %468 = vector.shape_cast %467 : vector<8xf32> to vector<8x1xf32>
    %469 = vector.broadcast %468 : vector<8x1xf32> to vector<8x8xf32>
    %470 = arith.subf %466, %469 : vector<8x8xf32>
    %471 = math.exp %470 : vector<8x8xf32>
    %cst_222 = arith.constant dense<0.000000e+00> : vector<8xf32>
    %472 = vector.multi_reduction <add>, %471, %cst_222 [1] : vector<8x8xf32> to vector<8xf32>
    %473 = vector.shape_cast %472 : vector<8xf32> to vector<8x1xf32>
    %474 = tpu.reciprocal %473 {approx = true} : vector<8x1xf32> -> vector<8x1xf32>
    %475 = vector.broadcast %474 : vector<8x1xf32> to vector<8x8xf32>
    %476 = arith.mulf %471, %475 : vector<8x8xf32>
    %477 = vector.extract_strided_slice %436 {offsets = [0, 32], sizes = [8, 32], strides = [1, 1]} : vector<8x128xf32> to vector<8x32xf32>
    %cst_223 = arith.constant dense<0.000000e+00> : vector<8x32xf32>
    %478 = tpu.matmul %476, %477, %cst_223 {dimension_numbers = #tpu.dot_dimension_numbers<[1], [0], [0], [1], [0, 0, 1, 1], [], []>} : vector<8x8xf32>, vector<8x32xf32>, vector<8x32xf32> -> vector<8x32xf32>
    %479 = vector.extract_strided_slice %438 {offsets = [32, 0], sizes = [32, 128], strides = [1, 1]} : vector<128x128xf32> to vector<32x128xf32>
    %cst_224 = arith.constant dense<0.000000e+00> : vector<8x128xf32>
    %480 = tpu.matmul %478, %479, %cst_224 {dimension_numbers = #tpu.dot_dimension_numbers<[1], [0], [0], [1], [0, 0, 1, 1], [], []>} : vector<8x32xf32>, vector<32x128xf32>, vector<8x128xf32> -> vector<8x128xf32>
    %481 = arith.addf %460, %480 : vector<8x128xf32>
    %482 = vector.extract_strided_slice %434 {offsets = [0, 64], sizes = [8, 32], strides = [1, 1]} : vector<8x128xf32> to vector<8x32xf32>
    %483 = vector.extract_strided_slice %435 {offsets = [0, 64], sizes = [8, 32], strides = [1, 1]} : vector<8x128xf32> to vector<8x32xf32>
    %cst_225 = arith.constant dense<0.000000e+00> : vector<8x8xf32>
    %484 = tpu.matmul %482, %483, %cst_225 {dimension_numbers = #tpu.dot_dimension_numbers<[1], [1], [0], [0], [0, 0, 1, 0], [], []>} : vector<8x32xf32>, vector<8x32xf32>, vector<8x8xf32> -> vector<8x8xf32>
    %cst_226 = arith.constant 0.176776692 : f32
    %485 = vector.broadcast %cst_226 : f32 to vector<8x8xf32>
    %486 = arith.mulf %484, %485 : vector<8x8xf32>
    %487 = arith.addf %486, %402 : vector<8x8xf32>
    %cst_227 = arith.constant dense<0xFF800000> : vector<8xf32>
    %488 = vector.multi_reduction <maximumf>, %487, %cst_227 [1] : vector<8x8xf32> to vector<8xf32>
    %489 = vector.shape_cast %488 : vector<8xf32> to vector<8x1xf32>
    %490 = vector.broadcast %489 : vector<8x1xf32> to vector<8x8xf32>
    %491 = arith.subf %487, %490 : vector<8x8xf32>
    %492 = math.exp %491 : vector<8x8xf32>
    %cst_228 = arith.constant dense<0.000000e+00> : vector<8xf32>
    %493 = vector.multi_reduction <add>, %492, %cst_228 [1] : vector<8x8xf32> to vector<8xf32>
    %494 = vector.shape_cast %493 : vector<8xf32> to vector<8x1xf32>
    %495 = tpu.reciprocal %494 {approx = true} : vector<8x1xf32> -> vector<8x1xf32>
    %496 = vector.broadcast %495 : vector<8x1xf32> to vector<8x8xf32>
    %497 = arith.mulf %492, %496 : vector<8x8xf32>
    %498 = vector.extract_strided_slice %436 {offsets = [0, 64], sizes = [8, 32], strides = [1, 1]} : vector<8x128xf32> to vector<8x32xf32>
    %cst_229 = arith.constant dense<0.000000e+00> : vector<8x32xf32>
    %499 = tpu.matmul %497, %498, %cst_229 {dimension_numbers = #tpu.dot_dimension_numbers<[1], [0], [0], [1], [0, 0, 1, 1], [], []>} : vector<8x8xf32>, vector<8x32xf32>, vector<8x32xf32> -> vector<8x32xf32>
    %500 = vector.extract_strided_slice %438 {offsets = [64, 0], sizes = [32, 128], strides = [1, 1]} : vector<128x128xf32> to vector<32x128xf32>
    %cst_230 = arith.constant dense<0.000000e+00> : vector<8x128xf32>
    %501 = tpu.matmul %499, %500, %cst_230 {dimension_numbers = #tpu.dot_dimension_numbers<[1], [0], [0], [1], [0, 0, 1, 1], [], []>} : vector<8x32xf32>, vector<32x128xf32>, vector<8x128xf32> -> vector<8x128xf32>
    %502 = arith.addf %481, %501 : vector<8x128xf32>
    %503 = vector.extract_strided_slice %434 {offsets = [0, 96], sizes = [8, 32], strides = [1, 1]} : vector<8x128xf32> to vector<8x32xf32>
    %504 = vector.extract_strided_slice %435 {offsets = [0, 96], sizes = [8, 32], strides = [1, 1]} : vector<8x128xf32> to vector<8x32xf32>
    %cst_231 = arith.constant dense<0.000000e+00> : vector<8x8xf32>
    %505 = tpu.matmul %503, %504, %cst_231 {dimension_numbers = #tpu.dot_dimension_numbers<[1], [1], [0], [0], [0, 0, 1, 0], [], []>} : vector<8x32xf32>, vector<8x32xf32>, vector<8x8xf32> -> vector<8x8xf32>
    %cst_232 = arith.constant 0.176776692 : f32
    %506 = vector.broadcast %cst_232 : f32 to vector<8x8xf32>
    %507 = arith.mulf %505, %506 : vector<8x8xf32>
    %508 = arith.addf %507, %402 : vector<8x8xf32>
    %cst_233 = arith.constant dense<0xFF800000> : vector<8xf32>
    %509 = vector.multi_reduction <maximumf>, %508, %cst_233 [1] : vector<8x8xf32> to vector<8xf32>
    %510 = vector.shape_cast %509 : vector<8xf32> to vector<8x1xf32>
    %511 = vector.broadcast %510 : vector<8x1xf32> to vector<8x8xf32>
    %512 = arith.subf %508, %511 : vector<8x8xf32>
    %513 = math.exp %512 : vector<8x8xf32>
    %cst_234 = arith.constant dense<0.000000e+00> : vector<8xf32>
    %514 = vector.multi_reduction <add>, %513, %cst_234 [1] : vector<8x8xf32> to vector<8xf32>
    %515 = vector.shape_cast %514 : vector<8xf32> to vector<8x1xf32>
    %516 = tpu.reciprocal %515 {approx = true} : vector<8x1xf32> -> vector<8x1xf32>
    %517 = vector.broadcast %516 : vector<8x1xf32> to vector<8x8xf32>
    %518 = arith.mulf %513, %517 : vector<8x8xf32>
    %519 = vector.extract_strided_slice %436 {offsets = [0, 96], sizes = [8, 32], strides = [1, 1]} : vector<8x128xf32> to vector<8x32xf32>
    %cst_235 = arith.constant dense<0.000000e+00> : vector<8x32xf32>
    %520 = tpu.matmul %518, %519, %cst_235 {dimension_numbers = #tpu.dot_dimension_numbers<[1], [0], [0], [1], [0, 0, 1, 1], [], []>} : vector<8x8xf32>, vector<8x32xf32>, vector<8x32xf32> -> vector<8x32xf32>
    %521 = vector.extract_strided_slice %438 {offsets = [96, 0], sizes = [32, 128], strides = [1, 1]} : vector<128x128xf32> to vector<32x128xf32>
    %cst_236 = arith.constant dense<0.000000e+00> : vector<8x128xf32>
    %522 = tpu.matmul %520, %521, %cst_236 {dimension_numbers = #tpu.dot_dimension_numbers<[1], [0], [0], [1], [0, 0, 1, 1], [], []>} : vector<8x32xf32>, vector<32x128xf32>, vector<8x128xf32> -> vector<8x128xf32>
    %523 = arith.addf %502, %522 : vector<8x128xf32>
    %524 = vector.broadcast %440 : vector<1x128xf32> to vector<8x128xf32>
    %525 = arith.addf %523, %524 : vector<8x128xf32>
    %526 = arith.addf %396, %525 : vector<8x128xf32>
    %c0_237 = arith.constant 0 : index
    %c0_238 = arith.constant 0 : index
    %c0_239 = arith.constant 0 : index
    %527 = vector.load %arg28[%c0_237, %c0_238, %c0_239] : memref<2x1x128xf32, #tpu.memory_space<vmem>>, vector<1x1x128xf32>
    %528 = vector.shape_cast %527 : vector<1x1x128xf32> to vector<1x128xf32>
    %c0_240 = arith.constant 0 : index
    %c0_241 = arith.constant 0 : index
    %c0_242 = arith.constant 0 : index
    %529 = vector.load %arg29[%c0_240, %c0_241, %c0_242] : memref<2x1x128xf32, #tpu.memory_space<vmem>>, vector<1x1x128xf32>
    %530 = vector.shape_cast %529 : vector<1x1x128xf32> to vector<1x128xf32>
    %cst_243 = arith.constant dense<0.000000e+00> : vector<8xf32>
    %531 = vector.multi_reduction <add>, %526, %cst_243 [1] : vector<8x128xf32> to vector<8xf32>
    %532 = vector.shape_cast %531 : vector<8xf32> to vector<8x1xf32>
    %cst_244 = arith.constant 1.280000e+02 : f32
    %533 = vector.broadcast %cst_244 : f32 to vector<8x1xf32>
    %534 = arith.divf %532, %533 : vector<8x1xf32>
    %535 = vector.broadcast %534 : vector<8x1xf32> to vector<8x128xf32>
    %536 = arith.subf %526, %535 : vector<8x128xf32>
    %537 = arith.mulf %536, %536 : vector<8x128xf32>
    %cst_245 = arith.constant dense<0.000000e+00> : vector<8xf32>
    %538 = vector.multi_reduction <add>, %537, %cst_245 [1] : vector<8x128xf32> to vector<8xf32>
    %539 = vector.shape_cast %538 : vector<8xf32> to vector<8x1xf32>
    %cst_246 = arith.constant 1.280000e+02 : f32
    %540 = vector.broadcast %cst_246 : f32 to vector<8x1xf32>
    %541 = arith.divf %539, %540 : vector<8x1xf32>
    %cst_247 = arith.constant 9.99999974E-6 : f32
    %542 = vector.broadcast %cst_247 : f32 to vector<8x1xf32>
    %543 = arith.addf %541, %542 : vector<8x1xf32>
    %544 = math.rsqrt %543 : vector<8x1xf32>
    %545 = vector.broadcast %544 : vector<8x1xf32> to vector<8x128xf32>
    %546 = arith.mulf %536, %545 : vector<8x128xf32>
    %547 = vector.broadcast %528 : vector<1x128xf32> to vector<8x128xf32>
    %548 = arith.mulf %546, %547 : vector<8x128xf32>
    %549 = vector.broadcast %530 : vector<1x128xf32> to vector<8x128xf32>
    %550 = arith.addf %548, %549 : vector<8x128xf32>
    %c0_248 = arith.constant 0 : index
    %c0_249 = arith.constant 0 : index
    %c0_250 = arith.constant 0 : index
    %551 = vector.load %arg30[%c0_248, %c0_249, %c0_250] : memref<2x128x512xf32, #tpu.memory_space<vmem>>, vector<1x128x512xf32>
    %552 = vector.shape_cast %551 : vector<1x128x512xf32> to vector<128x512xf32>
    %cst_251 = arith.constant dense<0.000000e+00> : vector<8x512xf32>
    %553 = tpu.matmul %550, %552, %cst_251 {dimension_numbers = #tpu.dot_dimension_numbers<[1], [0], [0], [1], [0, 0, 1, 1], [], []>} : vector<8x128xf32>, vector<128x512xf32>, vector<8x512xf32> -> vector<8x512xf32>
    %c0_252 = arith.constant 0 : index
    %c0_253 = arith.constant 0 : index
    %c0_254 = arith.constant 0 : index
    %554 = vector.load %arg31[%c0_252, %c0_253, %c0_254] : memref<2x1x512xf32, #tpu.memory_space<vmem>>, vector<1x1x512xf32>
    %555 = vector.shape_cast %554 : vector<1x1x512xf32> to vector<1x512xf32>
    %556 = vector.broadcast %555 : vector<1x512xf32> to vector<8x512xf32>
    %557 = arith.addf %553, %556 : vector<8x512xf32>
    %cst_255 = arith.constant 5.000000e-01 : f32
    %558 = vector.broadcast %cst_255 : f32 to vector<8x512xf32>
    %559 = arith.mulf %558, %557 : vector<8x512xf32>
    %cst_256 = arith.constant 4.471500e-02 : f32
    %560 = vector.broadcast %cst_256 : f32 to vector<8x512xf32>
    %561 = arith.mulf %560, %557 : vector<8x512xf32>
    %562 = arith.mulf %561, %557 : vector<8x512xf32>
    %563 = arith.mulf %562, %557 : vector<8x512xf32>
    %564 = arith.addf %557, %563 : vector<8x512xf32>
    %cst_257 = arith.constant 0.797884583 : f32
    %565 = vector.broadcast %cst_257 : f32 to vector<8x512xf32>
    %566 = arith.mulf %565, %564 : vector<8x512xf32>
    %567 = math.tanh %566 : vector<8x512xf32>
    %cst_258 = arith.constant 1.000000e+00 : f32
    %568 = vector.broadcast %cst_258 : f32 to vector<8x512xf32>
    %569 = arith.addf %568, %567 : vector<8x512xf32>
    %570 = arith.mulf %559, %569 : vector<8x512xf32>
    %c0_259 = arith.constant 0 : index
    %c0_260 = arith.constant 0 : index
    %c0_261 = arith.constant 0 : index
    %571 = vector.load %arg32[%c0_259, %c0_260, %c0_261] : memref<2x512x128xf32, #tpu.memory_space<vmem>>, vector<1x512x128xf32>
    %572 = vector.shape_cast %571 : vector<1x512x128xf32> to vector<512x128xf32>
    %cst_262 = arith.constant dense<0.000000e+00> : vector<8x128xf32>
    %573 = tpu.matmul %570, %572, %cst_262 {dimension_numbers = #tpu.dot_dimension_numbers<[1], [0], [0], [1], [0, 0, 1, 1], [], []>} : vector<8x512xf32>, vector<512x128xf32>, vector<8x128xf32> -> vector<8x128xf32>
    %574 = arith.addf %526, %573 : vector<8x128xf32>
    %c0_263 = arith.constant 0 : index
    %c0_264 = arith.constant 0 : index
    %c0_265 = arith.constant 0 : index
    %575 = vector.load %arg33[%c0_263, %c0_264, %c0_265] : memref<2x1x128xf32, #tpu.memory_space<vmem>>, vector<1x1x128xf32>
    %576 = vector.shape_cast %575 : vector<1x1x128xf32> to vector<1x128xf32>
    %577 = vector.broadcast %576 : vector<1x128xf32> to vector<8x128xf32>
    %578 = arith.addf %574, %577 : vector<8x128xf32>
    %c1_266 = arith.constant 1 : index
    %c0_267 = arith.constant 0 : index
    %c0_268 = arith.constant 0 : index
    %579 = vector.load %arg22[%c1_266, %c0_267, %c0_268] : memref<2x1x128xf32, #tpu.memory_space<vmem>>, vector<1x1x128xf32>
    %580 = vector.shape_cast %579 : vector<1x1x128xf32> to vector<1x128xf32>
    %c1_269 = arith.constant 1 : index
    %c0_270 = arith.constant 0 : index
    %c0_271 = arith.constant 0 : index
    %581 = vector.load %arg23[%c1_269, %c0_270, %c0_271] : memref<2x1x128xf32, #tpu.memory_space<vmem>>, vector<1x1x128xf32>
    %582 = vector.shape_cast %581 : vector<1x1x128xf32> to vector<1x128xf32>
    %cst_272 = arith.constant dense<0.000000e+00> : vector<8xf32>
    %583 = vector.multi_reduction <add>, %578, %cst_272 [1] : vector<8x128xf32> to vector<8xf32>
    %584 = vector.shape_cast %583 : vector<8xf32> to vector<8x1xf32>
    %cst_273 = arith.constant 1.280000e+02 : f32
    %585 = vector.broadcast %cst_273 : f32 to vector<8x1xf32>
    %586 = arith.divf %584, %585 : vector<8x1xf32>
    %587 = vector.broadcast %586 : vector<8x1xf32> to vector<8x128xf32>
    %588 = arith.subf %578, %587 : vector<8x128xf32>
    %589 = arith.mulf %588, %588 : vector<8x128xf32>
    %cst_274 = arith.constant dense<0.000000e+00> : vector<8xf32>
    %590 = vector.multi_reduction <add>, %589, %cst_274 [1] : vector<8x128xf32> to vector<8xf32>
    %591 = vector.shape_cast %590 : vector<8xf32> to vector<8x1xf32>
    %cst_275 = arith.constant 1.280000e+02 : f32
    %592 = vector.broadcast %cst_275 : f32 to vector<8x1xf32>
    %593 = arith.divf %591, %592 : vector<8x1xf32>
    %cst_276 = arith.constant 9.99999974E-6 : f32
    %594 = vector.broadcast %cst_276 : f32 to vector<8x1xf32>
    %595 = arith.addf %593, %594 : vector<8x1xf32>
    %596 = math.rsqrt %595 : vector<8x1xf32>
    %597 = vector.broadcast %596 : vector<8x1xf32> to vector<8x128xf32>
    %598 = arith.mulf %588, %597 : vector<8x128xf32>
    %599 = vector.broadcast %580 : vector<1x128xf32> to vector<8x128xf32>
    %600 = arith.mulf %598, %599 : vector<8x128xf32>
    %601 = vector.broadcast %582 : vector<1x128xf32> to vector<8x128xf32>
    %602 = arith.addf %600, %601 : vector<8x128xf32>
    %c1_277 = arith.constant 1 : index
    %c0_278 = arith.constant 0 : index
    %c0_279 = arith.constant 0 : index
    %603 = vector.load %arg24[%c1_277, %c0_278, %c0_279] : memref<2x128x384xf32, #tpu.memory_space<vmem>>, vector<1x128x384xf32>
    %604 = vector.shape_cast %603 : vector<1x128x384xf32> to vector<128x384xf32>
    %cst_280 = arith.constant dense<0.000000e+00> : vector<8x384xf32>
    %605 = tpu.matmul %602, %604, %cst_280 {dimension_numbers = #tpu.dot_dimension_numbers<[1], [0], [0], [1], [0, 0, 1, 1], [], []>} : vector<8x128xf32>, vector<128x384xf32>, vector<8x384xf32> -> vector<8x384xf32>
    %c1_281 = arith.constant 1 : index
    %c0_282 = arith.constant 0 : index
    %c0_283 = arith.constant 0 : index
    %606 = vector.load %arg25[%c1_281, %c0_282, %c0_283] : memref<2x1x384xf32, #tpu.memory_space<vmem>>, vector<1x1x384xf32>
    %607 = vector.shape_cast %606 : vector<1x1x384xf32> to vector<1x384xf32>
    %608 = vector.broadcast %607 : vector<1x384xf32> to vector<8x384xf32>
    %609 = arith.addf %605, %608 : vector<8x384xf32>
    %610 = vector.extract_strided_slice %609 {offsets = [0, 0], sizes = [8, 128], strides = [1, 1]} : vector<8x384xf32> to vector<8x128xf32>
    %611 = vector.extract_strided_slice %609 {offsets = [0, 128], sizes = [8, 128], strides = [1, 1]} : vector<8x384xf32> to vector<8x128xf32>
    %612 = vector.extract_strided_slice %609 {offsets = [0, 256], sizes = [8, 128], strides = [1, 1]} : vector<8x384xf32> to vector<8x128xf32>
    %c1_284 = arith.constant 1 : index
    %c0_285 = arith.constant 0 : index
    %c0_286 = arith.constant 0 : index
    %613 = vector.load %arg26[%c1_284, %c0_285, %c0_286] : memref<2x128x128xf32, #tpu.memory_space<vmem>>, vector<1x128x128xf32>
    %614 = vector.shape_cast %613 : vector<1x128x128xf32> to vector<128x128xf32>
    %c1_287 = arith.constant 1 : index
    %c0_288 = arith.constant 0 : index
    %c0_289 = arith.constant 0 : index
    %615 = vector.load %arg27[%c1_287, %c0_288, %c0_289] : memref<2x1x128xf32, #tpu.memory_space<vmem>>, vector<1x1x128xf32>
    %616 = vector.shape_cast %615 : vector<1x1x128xf32> to vector<1x128xf32>
    %617 = vector.extract_strided_slice %610 {offsets = [0, 0], sizes = [8, 32], strides = [1, 1]} : vector<8x128xf32> to vector<8x32xf32>
    %618 = vector.extract_strided_slice %611 {offsets = [0, 0], sizes = [8, 32], strides = [1, 1]} : vector<8x128xf32> to vector<8x32xf32>
    %cst_290 = arith.constant dense<0.000000e+00> : vector<8x8xf32>
    %619 = tpu.matmul %617, %618, %cst_290 {dimension_numbers = #tpu.dot_dimension_numbers<[1], [1], [0], [0], [0, 0, 1, 0], [], []>} : vector<8x32xf32>, vector<8x32xf32>, vector<8x8xf32> -> vector<8x8xf32>
    %cst_291 = arith.constant 0.176776692 : f32
    %620 = vector.broadcast %cst_291 : f32 to vector<8x8xf32>
    %621 = arith.mulf %619, %620 : vector<8x8xf32>
    %622 = arith.addf %621, %402 : vector<8x8xf32>
    %cst_292 = arith.constant dense<0xFF800000> : vector<8xf32>
    %623 = vector.multi_reduction <maximumf>, %622, %cst_292 [1] : vector<8x8xf32> to vector<8xf32>
    %624 = vector.shape_cast %623 : vector<8xf32> to vector<8x1xf32>
    %625 = vector.broadcast %624 : vector<8x1xf32> to vector<8x8xf32>
    %626 = arith.subf %622, %625 : vector<8x8xf32>
    %627 = math.exp %626 : vector<8x8xf32>
    %cst_293 = arith.constant dense<0.000000e+00> : vector<8xf32>
    %628 = vector.multi_reduction <add>, %627, %cst_293 [1] : vector<8x8xf32> to vector<8xf32>
    %629 = vector.shape_cast %628 : vector<8xf32> to vector<8x1xf32>
    %630 = tpu.reciprocal %629 {approx = true} : vector<8x1xf32> -> vector<8x1xf32>
    %631 = vector.broadcast %630 : vector<8x1xf32> to vector<8x8xf32>
    %632 = arith.mulf %627, %631 : vector<8x8xf32>
    %633 = vector.extract_strided_slice %612 {offsets = [0, 0], sizes = [8, 32], strides = [1, 1]} : vector<8x128xf32> to vector<8x32xf32>
    %cst_294 = arith.constant dense<0.000000e+00> : vector<8x32xf32>
    %634 = tpu.matmul %632, %633, %cst_294 {dimension_numbers = #tpu.dot_dimension_numbers<[1], [0], [0], [1], [0, 0, 1, 1], [], []>} : vector<8x8xf32>, vector<8x32xf32>, vector<8x32xf32> -> vector<8x32xf32>
    %635 = vector.extract_strided_slice %614 {offsets = [0, 0], sizes = [32, 128], strides = [1, 1]} : vector<128x128xf32> to vector<32x128xf32>
    %cst_295 = arith.constant dense<0.000000e+00> : vector<8x128xf32>
    %636 = tpu.matmul %634, %635, %cst_295 {dimension_numbers = #tpu.dot_dimension_numbers<[1], [0], [0], [1], [0, 0, 1, 1], [], []>} : vector<8x32xf32>, vector<32x128xf32>, vector<8x128xf32> -> vector<8x128xf32>
    %637 = vector.extract_strided_slice %610 {offsets = [0, 32], sizes = [8, 32], strides = [1, 1]} : vector<8x128xf32> to vector<8x32xf32>
    %638 = vector.extract_strided_slice %611 {offsets = [0, 32], sizes = [8, 32], strides = [1, 1]} : vector<8x128xf32> to vector<8x32xf32>
    %cst_296 = arith.constant dense<0.000000e+00> : vector<8x8xf32>
    %639 = tpu.matmul %637, %638, %cst_296 {dimension_numbers = #tpu.dot_dimension_numbers<[1], [1], [0], [0], [0, 0, 1, 0], [], []>} : vector<8x32xf32>, vector<8x32xf32>, vector<8x8xf32> -> vector<8x8xf32>
    %cst_297 = arith.constant 0.176776692 : f32
    %640 = vector.broadcast %cst_297 : f32 to vector<8x8xf32>
    %641 = arith.mulf %639, %640 : vector<8x8xf32>
    %642 = arith.addf %641, %402 : vector<8x8xf32>
    %cst_298 = arith.constant dense<0xFF800000> : vector<8xf32>
    %643 = vector.multi_reduction <maximumf>, %642, %cst_298 [1] : vector<8x8xf32> to vector<8xf32>
    %644 = vector.shape_cast %643 : vector<8xf32> to vector<8x1xf32>
    %645 = vector.broadcast %644 : vector<8x1xf32> to vector<8x8xf32>
    %646 = arith.subf %642, %645 : vector<8x8xf32>
    %647 = math.exp %646 : vector<8x8xf32>
    %cst_299 = arith.constant dense<0.000000e+00> : vector<8xf32>
    %648 = vector.multi_reduction <add>, %647, %cst_299 [1] : vector<8x8xf32> to vector<8xf32>
    %649 = vector.shape_cast %648 : vector<8xf32> to vector<8x1xf32>
    %650 = tpu.reciprocal %649 {approx = true} : vector<8x1xf32> -> vector<8x1xf32>
    %651 = vector.broadcast %650 : vector<8x1xf32> to vector<8x8xf32>
    %652 = arith.mulf %647, %651 : vector<8x8xf32>
    %653 = vector.extract_strided_slice %612 {offsets = [0, 32], sizes = [8, 32], strides = [1, 1]} : vector<8x128xf32> to vector<8x32xf32>
    %cst_300 = arith.constant dense<0.000000e+00> : vector<8x32xf32>
    %654 = tpu.matmul %652, %653, %cst_300 {dimension_numbers = #tpu.dot_dimension_numbers<[1], [0], [0], [1], [0, 0, 1, 1], [], []>} : vector<8x8xf32>, vector<8x32xf32>, vector<8x32xf32> -> vector<8x32xf32>
    %655 = vector.extract_strided_slice %614 {offsets = [32, 0], sizes = [32, 128], strides = [1, 1]} : vector<128x128xf32> to vector<32x128xf32>
    %cst_301 = arith.constant dense<0.000000e+00> : vector<8x128xf32>
    %656 = tpu.matmul %654, %655, %cst_301 {dimension_numbers = #tpu.dot_dimension_numbers<[1], [0], [0], [1], [0, 0, 1, 1], [], []>} : vector<8x32xf32>, vector<32x128xf32>, vector<8x128xf32> -> vector<8x128xf32>
    %657 = arith.addf %636, %656 : vector<8x128xf32>
    %658 = vector.extract_strided_slice %610 {offsets = [0, 64], sizes = [8, 32], strides = [1, 1]} : vector<8x128xf32> to vector<8x32xf32>
    %659 = vector.extract_strided_slice %611 {offsets = [0, 64], sizes = [8, 32], strides = [1, 1]} : vector<8x128xf32> to vector<8x32xf32>
    %cst_302 = arith.constant dense<0.000000e+00> : vector<8x8xf32>
    %660 = tpu.matmul %658, %659, %cst_302 {dimension_numbers = #tpu.dot_dimension_numbers<[1], [1], [0], [0], [0, 0, 1, 0], [], []>} : vector<8x32xf32>, vector<8x32xf32>, vector<8x8xf32> -> vector<8x8xf32>
    %cst_303 = arith.constant 0.176776692 : f32
    %661 = vector.broadcast %cst_303 : f32 to vector<8x8xf32>
    %662 = arith.mulf %660, %661 : vector<8x8xf32>
    %663 = arith.addf %662, %402 : vector<8x8xf32>
    %cst_304 = arith.constant dense<0xFF800000> : vector<8xf32>
    %664 = vector.multi_reduction <maximumf>, %663, %cst_304 [1] : vector<8x8xf32> to vector<8xf32>
    %665 = vector.shape_cast %664 : vector<8xf32> to vector<8x1xf32>
    %666 = vector.broadcast %665 : vector<8x1xf32> to vector<8x8xf32>
    %667 = arith.subf %663, %666 : vector<8x8xf32>
    %668 = math.exp %667 : vector<8x8xf32>
    %cst_305 = arith.constant dense<0.000000e+00> : vector<8xf32>
    %669 = vector.multi_reduction <add>, %668, %cst_305 [1] : vector<8x8xf32> to vector<8xf32>
    %670 = vector.shape_cast %669 : vector<8xf32> to vector<8x1xf32>
    %671 = tpu.reciprocal %670 {approx = true} : vector<8x1xf32> -> vector<8x1xf32>
    %672 = vector.broadcast %671 : vector<8x1xf32> to vector<8x8xf32>
    %673 = arith.mulf %668, %672 : vector<8x8xf32>
    %674 = vector.extract_strided_slice %612 {offsets = [0, 64], sizes = [8, 32], strides = [1, 1]} : vector<8x128xf32> to vector<8x32xf32>
    %cst_306 = arith.constant dense<0.000000e+00> : vector<8x32xf32>
    %675 = tpu.matmul %673, %674, %cst_306 {dimension_numbers = #tpu.dot_dimension_numbers<[1], [0], [0], [1], [0, 0, 1, 1], [], []>} : vector<8x8xf32>, vector<8x32xf32>, vector<8x32xf32> -> vector<8x32xf32>
    %676 = vector.extract_strided_slice %614 {offsets = [64, 0], sizes = [32, 128], strides = [1, 1]} : vector<128x128xf32> to vector<32x128xf32>
    %cst_307 = arith.constant dense<0.000000e+00> : vector<8x128xf32>
    %677 = tpu.matmul %675, %676, %cst_307 {dimension_numbers = #tpu.dot_dimension_numbers<[1], [0], [0], [1], [0, 0, 1, 1], [], []>} : vector<8x32xf32>, vector<32x128xf32>, vector<8x128xf32> -> vector<8x128xf32>
    %678 = arith.addf %657, %677 : vector<8x128xf32>
    %679 = vector.extract_strided_slice %610 {offsets = [0, 96], sizes = [8, 32], strides = [1, 1]} : vector<8x128xf32> to vector<8x32xf32>
    %680 = vector.extract_strided_slice %611 {offsets = [0, 96], sizes = [8, 32], strides = [1, 1]} : vector<8x128xf32> to vector<8x32xf32>
    %cst_308 = arith.constant dense<0.000000e+00> : vector<8x8xf32>
    %681 = tpu.matmul %679, %680, %cst_308 {dimension_numbers = #tpu.dot_dimension_numbers<[1], [1], [0], [0], [0, 0, 1, 0], [], []>} : vector<8x32xf32>, vector<8x32xf32>, vector<8x8xf32> -> vector<8x8xf32>
    %cst_309 = arith.constant 0.176776692 : f32
    %682 = vector.broadcast %cst_309 : f32 to vector<8x8xf32>
    %683 = arith.mulf %681, %682 : vector<8x8xf32>
    %684 = arith.addf %683, %402 : vector<8x8xf32>
    %cst_310 = arith.constant dense<0xFF800000> : vector<8xf32>
    %685 = vector.multi_reduction <maximumf>, %684, %cst_310 [1] : vector<8x8xf32> to vector<8xf32>
    %686 = vector.shape_cast %685 : vector<8xf32> to vector<8x1xf32>
    %687 = vector.broadcast %686 : vector<8x1xf32> to vector<8x8xf32>
    %688 = arith.subf %684, %687 : vector<8x8xf32>
    %689 = math.exp %688 : vector<8x8xf32>
    %cst_311 = arith.constant dense<0.000000e+00> : vector<8xf32>
    %690 = vector.multi_reduction <add>, %689, %cst_311 [1] : vector<8x8xf32> to vector<8xf32>
    %691 = vector.shape_cast %690 : vector<8xf32> to vector<8x1xf32>
    %692 = tpu.reciprocal %691 {approx = true} : vector<8x1xf32> -> vector<8x1xf32>
    %693 = vector.broadcast %692 : vector<8x1xf32> to vector<8x8xf32>
    %694 = arith.mulf %689, %693 : vector<8x8xf32>
    %695 = vector.extract_strided_slice %612 {offsets = [0, 96], sizes = [8, 32], strides = [1, 1]} : vector<8x128xf32> to vector<8x32xf32>
    %cst_312 = arith.constant dense<0.000000e+00> : vector<8x32xf32>
    %696 = tpu.matmul %694, %695, %cst_312 {dimension_numbers = #tpu.dot_dimension_numbers<[1], [0], [0], [1], [0, 0, 1, 1], [], []>} : vector<8x8xf32>, vector<8x32xf32>, vector<8x32xf32> -> vector<8x32xf32>
    %697 = vector.extract_strided_slice %614 {offsets = [96, 0], sizes = [32, 128], strides = [1, 1]} : vector<128x128xf32> to vector<32x128xf32>
    %cst_313 = arith.constant dense<0.000000e+00> : vector<8x128xf32>
    %698 = tpu.matmul %696, %697, %cst_313 {dimension_numbers = #tpu.dot_dimension_numbers<[1], [0], [0], [1], [0, 0, 1, 1], [], []>} : vector<8x32xf32>, vector<32x128xf32>, vector<8x128xf32> -> vector<8x128xf32>
    %699 = arith.addf %678, %698 : vector<8x128xf32>
    %700 = vector.broadcast %616 : vector<1x128xf32> to vector<8x128xf32>
    %701 = arith.addf %699, %700 : vector<8x128xf32>
    %702 = arith.addf %578, %701 : vector<8x128xf32>
    %c1_314 = arith.constant 1 : index
    %c0_315 = arith.constant 0 : index
    %c0_316 = arith.constant 0 : index
    %703 = vector.load %arg28[%c1_314, %c0_315, %c0_316] : memref<2x1x128xf32, #tpu.memory_space<vmem>>, vector<1x1x128xf32>
    %704 = vector.shape_cast %703 : vector<1x1x128xf32> to vector<1x128xf32>
    %c1_317 = arith.constant 1 : index
    %c0_318 = arith.constant 0 : index
    %c0_319 = arith.constant 0 : index
    %705 = vector.load %arg29[%c1_317, %c0_318, %c0_319] : memref<2x1x128xf32, #tpu.memory_space<vmem>>, vector<1x1x128xf32>
    %706 = vector.shape_cast %705 : vector<1x1x128xf32> to vector<1x128xf32>
    %cst_320 = arith.constant dense<0.000000e+00> : vector<8xf32>
    %707 = vector.multi_reduction <add>, %702, %cst_320 [1] : vector<8x128xf32> to vector<8xf32>
    %708 = vector.shape_cast %707 : vector<8xf32> to vector<8x1xf32>
    %cst_321 = arith.constant 1.280000e+02 : f32
    %709 = vector.broadcast %cst_321 : f32 to vector<8x1xf32>
    %710 = arith.divf %708, %709 : vector<8x1xf32>
    %711 = vector.broadcast %710 : vector<8x1xf32> to vector<8x128xf32>
    %712 = arith.subf %702, %711 : vector<8x128xf32>
    %713 = arith.mulf %712, %712 : vector<8x128xf32>
    %cst_322 = arith.constant dense<0.000000e+00> : vector<8xf32>
    %714 = vector.multi_reduction <add>, %713, %cst_322 [1] : vector<8x128xf32> to vector<8xf32>
    %715 = vector.shape_cast %714 : vector<8xf32> to vector<8x1xf32>
    %cst_323 = arith.constant 1.280000e+02 : f32
    %716 = vector.broadcast %cst_323 : f32 to vector<8x1xf32>
    %717 = arith.divf %715, %716 : vector<8x1xf32>
    %cst_324 = arith.constant 9.99999974E-6 : f32
    %718 = vector.broadcast %cst_324 : f32 to vector<8x1xf32>
    %719 = arith.addf %717, %718 : vector<8x1xf32>
    %720 = math.rsqrt %719 : vector<8x1xf32>
    %721 = vector.broadcast %720 : vector<8x1xf32> to vector<8x128xf32>
    %722 = arith.mulf %712, %721 : vector<8x128xf32>
    %723 = vector.broadcast %704 : vector<1x128xf32> to vector<8x128xf32>
    %724 = arith.mulf %722, %723 : vector<8x128xf32>
    %725 = vector.broadcast %706 : vector<1x128xf32> to vector<8x128xf32>
    %726 = arith.addf %724, %725 : vector<8x128xf32>
    %c1_325 = arith.constant 1 : index
    %c0_326 = arith.constant 0 : index
    %c0_327 = arith.constant 0 : index
    %727 = vector.load %arg30[%c1_325, %c0_326, %c0_327] : memref<2x128x512xf32, #tpu.memory_space<vmem>>, vector<1x128x512xf32>
    %728 = vector.shape_cast %727 : vector<1x128x512xf32> to vector<128x512xf32>
    %cst_328 = arith.constant dense<0.000000e+00> : vector<8x512xf32>
    %729 = tpu.matmul %726, %728, %cst_328 {dimension_numbers = #tpu.dot_dimension_numbers<[1], [0], [0], [1], [0, 0, 1, 1], [], []>} : vector<8x128xf32>, vector<128x512xf32>, vector<8x512xf32> -> vector<8x512xf32>
    %c1_329 = arith.constant 1 : index
    %c0_330 = arith.constant 0 : index
    %c0_331 = arith.constant 0 : index
    %730 = vector.load %arg31[%c1_329, %c0_330, %c0_331] : memref<2x1x512xf32, #tpu.memory_space<vmem>>, vector<1x1x512xf32>
    %731 = vector.shape_cast %730 : vector<1x1x512xf32> to vector<1x512xf32>
    %732 = vector.broadcast %731 : vector<1x512xf32> to vector<8x512xf32>
    %733 = arith.addf %729, %732 : vector<8x512xf32>
    %cst_332 = arith.constant 5.000000e-01 : f32
    %734 = vector.broadcast %cst_332 : f32 to vector<8x512xf32>
    %735 = arith.mulf %734, %733 : vector<8x512xf32>
    %cst_333 = arith.constant 4.471500e-02 : f32
    %736 = vector.broadcast %cst_333 : f32 to vector<8x512xf32>
    %737 = arith.mulf %736, %733 : vector<8x512xf32>
    %738 = arith.mulf %737, %733 : vector<8x512xf32>
    %739 = arith.mulf %738, %733 : vector<8x512xf32>
    %740 = arith.addf %733, %739 : vector<8x512xf32>
    %cst_334 = arith.constant 0.797884583 : f32
    %741 = vector.broadcast %cst_334 : f32 to vector<8x512xf32>
    %742 = arith.mulf %741, %740 : vector<8x512xf32>
    %743 = math.tanh %742 : vector<8x512xf32>
    %cst_335 = arith.constant 1.000000e+00 : f32
    %744 = vector.broadcast %cst_335 : f32 to vector<8x512xf32>
    %745 = arith.addf %744, %743 : vector<8x512xf32>
    %746 = arith.mulf %735, %745 : vector<8x512xf32>
    %c1_336 = arith.constant 1 : index
    %c0_337 = arith.constant 0 : index
    %c0_338 = arith.constant 0 : index
    %747 = vector.load %arg32[%c1_336, %c0_337, %c0_338] : memref<2x512x128xf32, #tpu.memory_space<vmem>>, vector<1x512x128xf32>
    %748 = vector.shape_cast %747 : vector<1x512x128xf32> to vector<512x128xf32>
    %cst_339 = arith.constant dense<0.000000e+00> : vector<8x128xf32>
    %749 = tpu.matmul %746, %748, %cst_339 {dimension_numbers = #tpu.dot_dimension_numbers<[1], [0], [0], [1], [0, 0, 1, 1], [], []>} : vector<8x512xf32>, vector<512x128xf32>, vector<8x128xf32> -> vector<8x128xf32>
    %750 = arith.addf %702, %749 : vector<8x128xf32>
    %c1_340 = arith.constant 1 : index
    %c0_341 = arith.constant 0 : index
    %c0_342 = arith.constant 0 : index
    %751 = vector.load %arg33[%c1_340, %c0_341, %c0_342] : memref<2x1x128xf32, #tpu.memory_space<vmem>>, vector<1x1x128xf32>
    %752 = vector.shape_cast %751 : vector<1x1x128xf32> to vector<1x128xf32>
    %753 = vector.broadcast %752 : vector<1x128xf32> to vector<8x128xf32>
    %754 = arith.addf %750, %753 : vector<8x128xf32>
    %c0_343 = arith.constant 0 : index
    %c0_344 = arith.constant 0 : index
    %755 = vector.load %arg34[%c0_343, %c0_344] : memref<1x128xf32, #tpu.memory_space<vmem>>, vector<1x128xf32>
    %c0_345 = arith.constant 0 : index
    %c0_346 = arith.constant 0 : index
    %756 = vector.load %arg35[%c0_345, %c0_346] : memref<1x128xf32, #tpu.memory_space<vmem>>, vector<1x128xf32>
    %cst_347 = arith.constant dense<0.000000e+00> : vector<8xf32>
    %757 = vector.multi_reduction <add>, %754, %cst_347 [1] : vector<8x128xf32> to vector<8xf32>
    %758 = vector.shape_cast %757 : vector<8xf32> to vector<8x1xf32>
    %cst_348 = arith.constant 1.280000e+02 : f32
    %759 = vector.broadcast %cst_348 : f32 to vector<8x1xf32>
    %760 = arith.divf %758, %759 : vector<8x1xf32>
    %761 = vector.broadcast %760 : vector<8x1xf32> to vector<8x128xf32>
    %762 = arith.subf %754, %761 : vector<8x128xf32>
    %763 = arith.mulf %762, %762 : vector<8x128xf32>
    %cst_349 = arith.constant dense<0.000000e+00> : vector<8xf32>
    %764 = vector.multi_reduction <add>, %763, %cst_349 [1] : vector<8x128xf32> to vector<8xf32>
    %765 = vector.shape_cast %764 : vector<8xf32> to vector<8x1xf32>
    %cst_350 = arith.constant 1.280000e+02 : f32
    %766 = vector.broadcast %cst_350 : f32 to vector<8x1xf32>
    %767 = arith.divf %765, %766 : vector<8x1xf32>
    %cst_351 = arith.constant 9.99999974E-6 : f32
    %768 = vector.broadcast %cst_351 : f32 to vector<8x1xf32>
    %769 = arith.addf %767, %768 : vector<8x1xf32>
    %770 = math.rsqrt %769 : vector<8x1xf32>
    %771 = vector.broadcast %770 : vector<8x1xf32> to vector<8x128xf32>
    %772 = arith.mulf %762, %771 : vector<8x128xf32>
    %773 = vector.broadcast %755 : vector<1x128xf32> to vector<8x128xf32>
    %774 = arith.mulf %772, %773 : vector<8x128xf32>
    %775 = vector.broadcast %756 : vector<1x128xf32> to vector<8x128xf32>
    %776 = arith.addf %774, %775 : vector<8x128xf32>
    %c0_352 = arith.constant 0 : index
    %c0_353 = arith.constant 0 : index
    %777 = vector.load %arg40[%c0_352, %c0_353] : memref<128x128xf32, #tpu.memory_space<vmem>>, vector<128x128xf32>
    %cst_354 = arith.constant dense<0.000000e+00> : vector<8x128xf32>
    %778 = tpu.matmul %776, %777, %cst_354 {dimension_numbers = #tpu.dot_dimension_numbers<[1], [1], [0], [0], [0, 0, 1, 0], [], []>} : vector<8x128xf32>, vector<128x128xf32>, vector<8x128xf32> -> vector<8x128xf32>
    %c0_355 = arith.constant 0 : index
    %c0_356 = arith.constant 0 : index
    %779 = vector.load %arg41[%c0_355, %c0_356] : memref<8x128xf32, #tpu.memory_space<vmem>>, vector<8x128xf32>
    tpu.vector_store %arg41[%c0_355, %c0_356], %778 {strides = array<i32>} : memref<8x128xf32, #tpu.memory_space<vmem>>, vector<8x128xf32>,
    return
  }
}

</mosaic_0001>

<bundles_post_ra>
// kernel: _lambda_.1
= control target key start
LH: loop header
LB: loop body
LE: loop exit
PB: predicated region body
PF: predicated region fallthrough
CT: control target
= control target key end

     0   :  { %s4982_s6 = smov 1   ;;  %s4983_s10 = smov 2   ;;  %s5740_s0 = inlined_call_operand.smem [shape: u32[42], index: -1, kind: input, shape index: {}] }
   0x1   :  { %s5054_s5 = sld [smem:[%s5740_s0]]   ;;  %s4984_s14 = smov 3  }
   0x2   :  { %s5059_s9 = sld [smem:[%s5740_s0 + %s4982_s6]]   ;;  %s4985_s18 = smov 4  }
   0x3   :  { %s5064_s13 = sld [smem:[%s5740_s0 + %s4983_s10]]   ;;  %s4986_s22 = smov 5  }
   0x4   :  { %s5069_s17 = sld [smem:[%s5740_s0 + %s4984_s14]]   ;;  %s4987_s26 = smov 6  }
   0x5   :  { %s5074_s21 = sld [smem:[%s5740_s0 + %s4985_s18]]   ;;  %s4988_s30 = smov 7  }
   0x6   :  { %s5079_s25 = sld [smem:[%s5740_s0 + %s4986_s22]]   ;;  %s4989_s4 = smov 8  }
   0x7   :  { %s5084_s29 = sld [smem:[%s5740_s0 + %s4987_s26]]   ;;  %s4990_s10 = smov 9  }
   0x8   :  { %s5089_s3 = sld [smem:[%s5740_s0 + %s4988_s30]]   ;;  %s4991_s15 = smov 10  }
   0x9   :  { %s5094_s8 = sld [smem:[%s5740_s0 + %s4989_s4]]   ;;  %s4992_s20 = smov 11  }
   0xa   :  { %s5099_s14 = sld [smem:[%s5740_s0 + %s4990_s10]]   ;;  %s4993_s26 = smov 12  }
   0xb   :  { %s5104_s19 = sld [smem:[%s5740_s0 + %s4991_s15]]   ;;  %s4994_s1 = smov 13  }
   0xc   :  { %5758 = sst [smem:[#allocation31_spill]] %s5079_s25  ;;  %s4995_s7 = smov 14  }
   0xd   :  { %5759 = sst [smem:[#allocation32_spill]] %s5084_s29  ;;  %s4996_s15 = smov 15  }
   0xe   :  { %s5109_s24 = sld [smem:[%s5740_s0 + %s4992_s20]]   ;;  %s4997_s22 = smov 16  }
   0xf   :  { %5760 = sst [smem:[#allocation33_spill]] %s5094_s8  ;;  %s4998_s28 = smov 17  }
  0x10   :  { %s5114_s30 = sld [smem:[%s5740_s0 + %s4993_s26]]  }
  0x11   :  { %5761 = sst [smem:[#allocation34_spill]] %s5104_s19 }
  0x12   :  { %s5119_s6 = sld [smem:[%s5740_s0 + %s4994_s1]]  }
  0x13   :  { %s5124_s12 = sld [smem:[%s5740_s0 + %s4995_s7]]   ;;  %s4999_s7 = smov 18  }
  0x14   :  { %5762 = sst [smem:[#allocation35_spill]] %s5109_s24 }
  0x15   :  { %s5129_s20 = sld [smem:[%s5740_s0 + %s4996_s15]]   ;;  %s5000_s15 = smov 19  }
  0x16   :  { %5763 = sst [smem:[#allocation36_spill]] %s5114_s30 }
  0x17   :  { %s5134_s27 = sld [smem:[%s5740_s0 + %s4997_s22]]   ;;  %s5001_s22 = smov 20  }
  0x18   :  { %s5139_s4 = sld [smem:[%s5740_s0 + %s4998_s28]]   ;;  %s5002_s28 = smov 21  }
  0x19   :  { %5764 = sst [smem:[#allocation37_spill]] %s5124_s12 }
  0x1a   :  { %s5144_s12 = sld [smem:[%s5740_s0 + %s4999_s7]]   ;;  %s5003_s7 = smov 22  }
  0x1b   :  { %s5149_s30 = sld [smem:[%s5740_s0 + %s5000_s15]]   ;;  %s5004_s15 = smov 23  }
  0x1c   :  { %s5169_s24 = sld [smem:[%s5740_s0 + %s5004_s15]]   ;;  %s5008_s15 = smov 27  }
  0x1d   :  { %5765 = sst [smem:[#allocation38_spill]] %s5134_s27 }
  0x1e   :  { %5766 = sst [smem:[#allocation39_spill]] %s5139_s4 }
  0x1f   :  { %s5154_s27 = sld [smem:[%s5740_s0 + %s5001_s22]]   ;;  %s5005_s22 = smov 24  }
  0x20   :  { %5767 = sst [smem:[#allocation40_spill]] %s5144_s12 }
  0x21   :  { %s5159_s4 = sld [smem:[%s5740_s0 + %s5002_s28]]   ;;  %s5006_s28 = smov 25  }
  0x22   :  { %s5164_s12 = sld [smem:[%s5740_s0 + %s5003_s7]]   ;;  %s5007_s7 = smov 26  }
  0x23   :  { %5771 = sst [smem:[#allocation44_spill]] %s5169_s24 }
  0x24   :  { %s5189_s24 = sld [smem:[%s5740_s0 + %s5008_s15]]   ;;  %s5012_s15 = smov 31  }
  0x25   :  { %5768 = sst [smem:[#allocation41_spill]] %s5154_s27 }
  0x26   :  { %s5174_s27 = sld [smem:[%s5740_s0 + %s5005_s22]]   ;;  %s5009_s22 = smov 28  }
  0x27   :  { %5769 = sst [smem:[#allocation42_spill]] %s5159_s4 }
  0x28   :  { %5770 = sst [smem:[#allocation43_spill]] %s5164_s12 }
  0x29   :  { %s5179_s4 = sld [smem:[%s5740_s0 + %s5006_s28]]   ;;  %s5010_s28 = smov 29  }
  0x2a   :  { %s5184_s12 = sld [smem:[%s5740_s0 + %s5007_s7]]   ;;  %s5011_s7 = smov 30  }
  0x2b   :  { %5773 = sst [smem:[#allocation46_spill]] %s5189_s24 }
  0x2c   :  { %s5194_s19 = sld [smem:[%s5740_s0 + %s5009_s22]]   ;;  %s5013_s22 = smov 32  }
  0x2d   :  { %s5204_s8 = sld [smem:[%s5740_s0 + %s5011_s7]]   ;;  %s5015_s7 = smov 34  }
  0x2e   :  { %s5209_s24 = sld [smem:[%s5740_s0 + %s5012_s15]]   ;;  %s5016_s15 = smov 35  }
  0x2f   :  { %5772 = sst [smem:[#allocation45_spill]] %s5179_s4 }
  0x30   :  { %s5199_s4 = sld [smem:[%s5740_s0 + %s5010_s28]]   ;;  %s5014_s28 = smov 33  }
  0x31   :  { %s5224_s29 = sld [smem:[%s5740_s0 + %s5015_s7]]   ;;  %s5019_s7 = smov 38  }
  0x32   :  { %5774 = sst [smem:[#allocation47_spill]] %s5194_s19 }
  0x33   :  { %s5214_s19 = sld [smem:[%s5740_s0 + %s5013_s22]]   ;;  %s5017_s22 = smov 36  }
  0x34   :  { %5776 = sst [smem:[#allocation49_spill]] %s5209_s24 }
  0x35   :  { %s5229_s24 = sld [smem:[%s5740_s0 + %s5016_s15]]   ;;  %s5020_s15 = smov 39  }
  0x36   :  { %5775 = sst [smem:[#allocation48_spill]] %s5199_s4 }
  0x37   :  { %s5219_s4 = sld [smem:[%s5740_s0 + %s5014_s28]]   ;;  %s5018_s28 = smov 37  }
  0x38   :  { %5778 = sst [smem:[#allocation51_spill]] %s5224_s29 }
  0x39   :  { %s5234_s25 = sld [smem:[%s5740_s0 + %s5017_s22]]   ;;  %s5021_s22 = smov 40  }
  0x3a   :  { %s5244_s29 = sld [smem:[%s5740_s0 + %s5019_s7]]  }
  0x3b   :  { %5779 = sst [smem:[#allocation52_spill]] %s5229_s24 }
  0x3c   :  { %s5249_s24 = sld [smem:[%s5740_s0 + %s5020_s15]]  }
  0x3d   :  { %5777 = sst [smem:[#allocation50_spill]] %s5219_s4 }
  0x3e   :  { %s5239_s4 = sld [smem:[%s5740_s0 + %s5018_s28]]   ;;  %s5022_s28 = smov 41  }
  0x3f   :  { %5780 = sst [smem:[#allocation53_spill]] %s5234_s25 }
  0x40   :  { %s5254_s25 = sld [smem:[%s5740_s0 + %s5021_s22]]  }
  0x44   :  { %5781 = sst [smem:[#allocation54_spill]] %s5239_s4 }
  0x45   :  { %s5259_s4 = sld [smem:[%s5740_s0 + %s5022_s28]]  }
  0x46   :  { %88 = vsyncpa [#allocation3], 0 }
  0x47   :  { %89 = vsyncpa [#allocation6], 0 }
  0x48   :  { %90 = vsyncpa [#allocation9], 0 }
  0x49   :  { %91 = vsyncpa [#allocation12], 0 }
  0x4a   :  { %92 = vsyncpa [#allocation15], 0 }
  0x4b   :  { %93 = vsyncpa [#allocation18], 0 }
  0x4c   :  { %94 = vsyncpa [#allocation21], 0  ;;  %s125_s7 = sshll.u32 %s5089_s3, 4  ;;  %s126_s7 = int_to_ptr.hbm [resolvable:$true] %s125_s7 }
  0x4d   :  { %95 = vsyncpa [#allocation4], 0  ;;  %s5023_s10 = smov [#allocation5]   ;;  %s159_s15 = sshll.u32 %s5119_s6, 4  ;;  %s160_s15 = int_to_ptr.hbm [resolvable:$true] %s159_s15 }
  0x4e   :  { %s127_s11 = sshll.u32 %s5023_s10, 4  ;;  %s4654_s0 = sshra.s32 %s126_s7, 4  ;;  %s128_s11 = int_to_ptr.vmem [resolvable:$true] %s127_s11  ;;  %s4655_s0 = int_to_ptr.hbm [resolvable:$true] %s4654_s0 }
  0x4f   :  { %s4656_s16 = scalar_lea.hbm %s4655_s0, 768  ;;  %s4658_s18 = scalar_lea.hbm %s5089_s3, 768 }
  0x50   :  { %p4657_p0 = scmp.ne.s32.totalorder %s4655_s0, %s4656_s16  ;;  %p4659_p1 = scmp.lt.s32.totalorder %s4655_s0, %s5089_s3 }
  0x51   :  { %p4660_p2 = scmp.lt.s32.totalorder %s4658_s18, %s4656_s16 }
  0x53   :  { %p4661_p3 = por %p4660_p2, %p4659_p1 }
  0x55   :  { %p4662_p4 = pnand %p4661_p3, %p4657_p0 }
  0x57   :  { %4665 = shalt.err (!%p4662_p4)
}
  0x58   :  { %s5024_s22 = smov 384   ;;  %s5025_s23 = smov 24  }
  0x59   :  { %133 = dma.hbm_to_vmem [thread:$0]  %s126_s7, 12288, %s128_s11, [#allocation6], %s5024_s22, %s5024_s22, %s5025_s23  }
  0x5a   :  { %s5026_s26 = smov [#allocation8]   ;;  %s4678_s1 = sshra.s32 %s160_s15, 4  ;;  %s4679_s1 = int_to_ptr.hbm [resolvable:$true] %s4678_s1 }
  0x5b   :  { %s161_s28 = sshll.u32 %s5026_s26, 4  ;;  %s4680_s2 = scalar_lea.hbm %s4679_s1, 1024  ;;  %s162_s28 = int_to_ptr.vmem [resolvable:$true] %s161_s28 }
  0x5c   :  { %p4681_p5 = scmp.ne.s32.totalorder %s4679_s1, %s4680_s2  ;;  %s4682_s3 = scalar_lea.hbm %s5119_s6, 1024 }
  0x5d   :  { %p4683_p6 = scmp.lt.s32.totalorder %s4679_s1, %s5119_s6  ;;  %p4684_p7 = scmp.lt.s32.totalorder %s4682_s3, %s4680_s2 }
  0x5f   :  { %p4685_p8 = por %p4684_p7, %p4683_p6 }
  0x61   :  { %p4686_p9 = pnand %p4685_p8, %p4681_p5 }
  0x63   :  { %4689 = shalt.err (!%p4686_p9)
}
  0x64   :  { %s5027_s10 = smov 512   ;;  %s5028_s7 = smov 32  }
  0x65   :  { %167 = dma.hbm_to_vmem [thread:$0]  %s160_s15, 16384, %s162_s28, [#allocation9], %s5027_s10, %s5027_s10, %s5028_s7  }
  0x66   :  { %s193_s11 = sshll.u32 %s5149_s30, 4  ;;  %s5029_s0 = smov [#allocation11]   ;;  %s194_s11 = int_to_ptr.hbm [resolvable:$true] %s193_s11 }
  0x67   :  { %s195_s16 = sshll.u32 %s5029_s0, 4  ;;  %s229_s6 = sshll.u32 %s5184_s12, 4  ;;  %s196_s16 = int_to_ptr.vmem [resolvable:$true] %s195_s16  ;;  %s230_s6 = int_to_ptr.hbm [resolvable:$true] %s229_s6 }
  0x68   :  { %s4702_s18 = sshra.s32 %s194_s11, 4  ;;  %s4706_s1 = scalar_lea.hbm %s5149_s30, 128  ;;  %s4703_s18 = int_to_ptr.hbm [resolvable:$true] %s4702_s18 }
  0x69   :  { %s4704_s26 = scalar_lea.hbm %s4703_s18, 128  ;;  %p4707_p11 = scmp.lt.s32.totalorder %s4703_s18, %s5149_s30 }
  0x6a   :  { %p4705_p10 = scmp.ne.s32.totalorder %s4703_s18, %s4704_s26  ;;  %p4708_p12 = scmp.lt.s32.totalorder %s4706_s1, %s4704_s26 }
  0x6c   :  { %p4709_p13 = por %p4708_p12, %p4707_p11 }
  0x6e   :  { %p4710_p0 = pnand %p4709_p13, %p4705_p10 }
  0x70   :  { %4713 = shalt.err (!%p4710_p0)
}
  0x71   :  { %s5030_s2 = smov 128   ;;  %s5031_s15 = smov 8  }
  0x72   :  { %201 = dma.hbm_to_vmem [thread:$0]  %s194_s11, 2048, %s196_s16, [#allocation12], %s5030_s2, %s5030_s2, %s5031_s15  }
  0x73   :  { %s5032_s28 = smov [#allocation14]   ;;  %s263_s0 = sshll.u32 %s5214_s19, 4  ;;  %s5281_s0 = int_to_ptr.hbm [resolvable:$true] %s263_s0 }
  0x74   :  { %s231_s3 = sshll.u32 %s5032_s28, 4  ;;  %s4726_s30 = sshra.s32 %s230_s6, 4  ;;  %s232_s3 = int_to_ptr.vmem [resolvable:$true] %s231_s3  ;;  %s4727_s30 = int_to_ptr.hbm [resolvable:$true] %s4726_s30 }
  0x75   :  { %s4728_s18 = scalar_lea.hbm %s4727_s30, 256  ;;  %s4730_s26 = scalar_lea.hbm %s5184_s12, 256 }
  0x76   :  { %p4729_p1 = scmp.ne.s32.totalorder %s4727_s30, %s4728_s18  ;;  %p4731_p2 = scmp.lt.s32.totalorder %s4727_s30, %s5184_s12 }
  0x77   :  { %p4732_p3 = scmp.lt.s32.totalorder %s4730_s26, %s4728_s18 }
  0x79   :  { %p4733_p4 = por %p4732_p3, %p4731_p2 }
  0x7b   :  { %p4734_p5 = pnand %p4733_p4, %p4729_p1 }
  0x7d   :  { %4737 = shalt.err (!%p4734_p5)
}
  0x7e   :  { %237 = dma.hbm_to_vmem [thread:$0]  %s230_s6, 4096, %s232_s3, [#allocation15], %s5030_s2, %s5030_s2, %s5031_s15  }
  0x7f   :  { %s102_s11 = sshll.u32 %s5059_s9, 4  ;;  %s5033_s16 = smov [#allocation17]   ;;  %s5289_s11 = int_to_ptr.hbm [resolvable:$true] %s102_s11 }
  0x80   :  { %s265_s1 = sshll.u32 %s5033_s16, 4  ;;  %s4750_s28 = sshra.s32 %s5281_s0, 4  ;;  %s266_s1 = int_to_ptr.vmem [resolvable:$true] %s265_s1  ;;  %s4751_s28 = int_to_ptr.hbm [resolvable:$true] %s4750_s28 }
  0x81   :  { %s4752_s12 = scalar_lea.hbm %s4751_s28, 1024  ;;  %s4754_s30 = scalar_lea.hbm %s5214_s19, 1024 }
  0x82   :  { %p4753_p6 = scmp.ne.s32.totalorder %s4751_s28, %s4752_s12  ;;  %p4755_p7 = scmp.lt.s32.totalorder %s4751_s28, %s5214_s19 }
  0x83   :  { %p4756_p8 = scmp.lt.s32.totalorder %s4754_s30, %s4752_s12 }
  0x85   :  { %p4757_p9 = por %p4756_p8, %p4755_p7 }
  0x87   :  { %p4758_p10 = pnand %p4757_p9, %p4753_p6 }
  0x89   :  { %4761 = shalt.err (!%p4758_p10)
}
  0x8a   :  { %271 = dma.hbm_to_vmem [thread:$0]  %s5281_s0, 16384, %s266_s1, [#allocation18], %s5030_s2, %s5030_s2, %s5031_s15  }
  0x8b   :  { %s5034_s6 = smov [#allocation2]   ;;  %s140_s18 = sshll.u32 %s5099_s14, 4  ;;  %s5299_s18 = int_to_ptr.hbm [resolvable:$true] %s140_s18 }
  0x8c   :  { %s104_s3 = sshll.u32 %s5034_s6, 4  ;;  %s4774_s19 = sshra.s32 %s5289_s11, 4  ;;  %s105_s3 = int_to_ptr.vmem [resolvable:$true] %s104_s3  ;;  %s4775_s19 = int_to_ptr.hbm [resolvable:$true] %s4774_s19 }
  0x8d   :  { %s4776_s26 = scalar_lea.hbm %s4775_s19, 192  ;;  %s4778_s16 = scalar_lea.hbm %s5059_s9, 192 }
  0x8e   :  { %p4777_p11 = scmp.ne.s32.totalorder %s4775_s19, %s4776_s26  ;;  %p4779_p12 = scmp.lt.s32.totalorder %s4775_s19, %s5059_s9 }
  0x8f   :  { %p4780_p13 = scmp.lt.s32.totalorder %s4778_s16, %s4776_s26 }
  0x91   :  { %p4781_p0 = por %p4780_p13, %p4779_p12 }
  0x93   :  { %p4782_p1 = pnand %p4781_p0, %p4777_p11 }
  0x95   :  { %4785 = shalt.err (!%p4782_p1)
}
  0x96   :  { %110 = dma.hbm_to_vmem [thread:$0]  %s5289_s11, 3072, %s105_s3, [#allocation3], %s5030_s2, %s5030_s2, %s5031_s15  }
  0x97   :  { %s174_s0 = sshll.u32 %s5129_s20, 4  ;;  %s5035_s1 = smov [#allocation7]   ;;  %s5309_s0 = int_to_ptr.hbm [resolvable:$true] %s174_s0 }
  0x98   :  { %s142_s28 = sshll.u32 %s5035_s1, 4  ;;  %s4798_s9 = sshra.s32 %s5299_s18, 4  ;;  %s143_s28 = int_to_ptr.vmem [resolvable:$true] %s142_s28  ;;  %s4799_s9 = int_to_ptr.hbm [resolvable:$true] %s4798_s9 }
  0x99   :  { %s4800_s12 = scalar_lea.hbm %s4799_s9, 256  ;;  %s4802_s30 = scalar_lea.hbm %s5099_s14, 256 }
  0x9a   :  { %p4801_p2 = scmp.ne.s32.totalorder %s4799_s9, %s4800_s12  ;;  %p4803_p3 = scmp.lt.s32.totalorder %s4799_s9, %s5099_s14 }
  0x9b   :  { %p4804_p4 = scmp.lt.s32.totalorder %s4802_s30, %s4800_s12 }
  0x9d   :  { %p4805_p5 = por %p4804_p4, %p4803_p3 }
  0x9f   :  { %p4806_p6 = pnand %p4805_p5, %p4801_p2 }
  0xa1   :  { %4809 = shalt.err (!%p4806_p6)
}
  0xa2   :  { %148 = dma.hbm_to_vmem [thread:$0]  %s5299_s18, 4096, %s143_s28, [#allocation6], %s5030_s2, %s5030_s2, %s5031_s15  }
  0xa3   :  { %s5036_s11 = smov [#allocation10]   ;;  %s214_s3 = sshll.u32 %s5174_s27, 4  ;;  %s5319_s3 = int_to_ptr.hbm [resolvable:$true] %s214_s3 }
  0xa4   :  { %s176_s6 = sshll.u32 %s5036_s11, 4  ;;  %s4822_s14 = sshra.s32 %s5309_s0, 4  ;;  %s177_s6 = int_to_ptr.vmem [resolvable:$true] %s176_s6  ;;  %s4823_s14 = int_to_ptr.hbm [resolvable:$true] %s4822_s14 }
  0xa5   :  { %s4824_s19 = scalar_lea.hbm %s4823_s14, 1024  ;;  %s4826_s26 = scalar_lea.hbm %s5129_s20, 1024 }
  0xa6   :  { %p4825_p7 = scmp.ne.s32.totalorder %s4823_s14, %s4824_s19  ;;  %p4827_p8 = scmp.lt.s32.totalorder %s4823_s14, %s5129_s20 }
  0xa7   :  { %p4828_p9 = scmp.lt.s32.totalorder %s4826_s26, %s4824_s19 }
  0xa9   :  { %p4829_p10 = por %p4828_p9, %p4827_p8 }
  0xab   :  { %p4830_p11 = pnand %p4829_p10, %p4825_p7 }
  0xad   :  { %4833 = shalt.err (!%p4830_p11)
}
  0xae   :  { %182 = dma.hbm_to_vmem [thread:$0]  %s5309_s0, 16384, %s177_s6, [#allocation9], %s5030_s2, %s5030_s2, %s5031_s15  }
  0xaf   :  { %s248_s18 = sshll.u32 %s5204_s8, 4  ;;  %s5037_s16 = smov [#allocation13]   ;;  %s5329_s18 = int_to_ptr.hbm [resolvable:$true] %s248_s18 }
  0xb0   :  { %s216_s1 = sshll.u32 %s5037_s16, 4  ;;  %s4846_s20 = sshra.s32 %s5319_s3, 4  ;;  %s217_s1 = int_to_ptr.vmem [resolvable:$true] %s216_s1  ;;  %s4847_s20 = int_to_ptr.hbm [resolvable:$true] %s4846_s20 }
  0xb1   :  { %s4848_s28 = scalar_lea.hbm %s4847_s20, 768  ;;  %s4850_s9 = scalar_lea.hbm %s5174_s27, 768 }
  0xb2   :  { %p4849_p12 = scmp.ne.s32.totalorder %s4847_s20, %s4848_s28  ;;  %p4851_p13 = scmp.lt.s32.totalorder %s4847_s20, %s5174_s27 }
  0xb3   :  { %p4852_p0 = scmp.lt.s32.totalorder %s4850_s9, %s4848_s28 }
  0xb5   :  { %p4853_p1 = por %p4852_p0, %p4851_p13 }
  0xb7   :  { %p4854_p2 = pnand %p4853_p1, %p4849_p12 }
  0xb9   :  { %4857 = shalt.err (!%p4854_p2)
}
  0xba   :  { %222 = dma.hbm_to_vmem [thread:$0]  %s5319_s3, 12288, %s217_s1, [#allocation12], %s5024_s22, %s5024_s22, %s5025_s23  }
  0xbb   :  { %s5038_s0 = smov [#allocation16]   ;;  %s286_s30 = sshll.u32 %s5244_s29, 4  ;;  %s5339_s30 = int_to_ptr.hbm [resolvable:$true] %s286_s30 }
  0xbc   :  { %s250_s12 = sshll.u32 %s5038_s0, 4  ;;  %s4870_s27 = sshra.s32 %s5329_s18, 4  ;;  %s251_s12 = int_to_ptr.vmem [resolvable:$true] %s250_s12  ;;  %s4871_s27 = int_to_ptr.hbm [resolvable:$true] %s4870_s27 }
  0xbd   :  { %s4872_s11 = scalar_lea.hbm %s4871_s27, 1024  ;;  %s4874_s6 = scalar_lea.hbm %s5204_s8, 1024 }
  0xbe   :  { %p4873_p3 = scmp.ne.s32.totalorder %s4871_s27, %s4872_s11  ;;  %p4875_p4 = scmp.lt.s32.totalorder %s4871_s27, %s5204_s8 }
  0xbf   :  { %p4876_p5 = scmp.lt.s32.totalorder %s4874_s6, %s4872_s11 }
  0xc1   :  { %p4877_p6 = por %p4876_p5, %p4875_p4 }
  0xc3   :  { %p4878_p7 = pnand %p4877_p6, %p4873_p3 }
  0xc5   :  { %4881 = shalt.err (!%p4878_p7)
}
  0xc6   :  { %256 = dma.hbm_to_vmem [thread:$0]  %s5329_s18, 16384, %s251_s12, [#allocation15], %s5027_s10, %s5027_s10, %s5028_s7  }
  0xc7   :  { %s301_s22 = sshll.u32 %s5254_s25, 4  ;;  %s5039_s23 = smov [#allocation19]   ;;  %s5349_s22 = int_to_ptr.hbm [resolvable:$true] %s301_s22 }
  0xc8   :  { %s288_s3 = sshll.u32 %s5039_s23, 4  ;;  %s4894_s8 = sshra.s32 %s5339_s30, 4  ;;  %s289_s3 = int_to_ptr.vmem [resolvable:$true] %s288_s3  ;;  %s4895_s8 = int_to_ptr.hbm [resolvable:$true] %s4894_s8 }
  0xc9   :  { %s4896_s14 = scalar_lea.hbm %s4895_s8, 128  ;;  %s4898_s19 = scalar_lea.hbm %s5244_s29, 128 }
  0xca   :  { %p4897_p8 = scmp.ne.s32.totalorder %s4895_s8, %s4896_s14  ;;  %p4899_p9 = scmp.lt.s32.totalorder %s4895_s8, %s5244_s29 }
  0xcb   :  { %p4900_p10 = scmp.lt.s32.totalorder %s4898_s19, %s4896_s14 }
  0xcd   :  { %p4901_p11 = por %p4900_p10, %p4899_p9 }
  0xcf   :  { %p4902_p12 = pnand %p4901_p11, %p4897_p8 }
  0xd1   :  { %4905 = shalt.err (!%p4902_p12)
}
  0xd2   :  { %294 = dma.hbm_to_vmem [thread:$0]  %s5339_s30, 2048, %s289_s3, [#allocation18], %s5030_s2, %s5030_s2, %s5031_s15  }
  0xd3   :  { %s5040_s10 = smov [#allocation20]   ;;  %s4918_s18 = sshra.s32 %s5349_s22, 4  ;;  %s4919_s18 = int_to_ptr.hbm [resolvable:$true] %s4918_s18 }
  0xd4   :  { %s303_s26 = sshll.u32 %s5040_s10, 4  ;;  %s4920_s16 = scalar_lea.hbm %s4919_s18, 128  ;;  %s304_s26 = int_to_ptr.vmem [resolvable:$true] %s303_s26 }
  0xd5   :  { %p4921_p13 = scmp.ne.s32.totalorder %s4919_s18, %s4920_s16  ;;  %s4922_s29 = scalar_lea.hbm %s5254_s25, 128 }
  0xd6   :  { %p4923_p0 = scmp.lt.s32.totalorder %s4919_s18, %s5254_s25  ;;  %p4924_p1 = scmp.lt.s32.totalorder %s4922_s29, %s4920_s16 }
  0xd8   :  { %p4925_p2 = por %p4924_p1, %p4923_p0 }
  0xda   :  { %p4926_p3 = pnand %p4925_p2, %p4921_p13 }
  0xdc   :  { %4929 = shalt.err (!%p4926_p3)
}
  0xdd   :  { %309 = dma.hbm_to_vmem [thread:$0]  %s5349_s22, 2048, %s304_s26, [#allocation21], %s5030_s2, %s5030_s2, %s5031_s15  }
  0xde   :  { %4966 = dma.done.wait [#allocation3], 3072  }
  0xdf   :  { %4967 = vsyncadd [#allocation3], 4294964224 }
  0xe0   :  { %4968 = dma.done.wait [#allocation6], 16384  }
  0xe1   :  { %4969 = vsyncadd [#allocation6], 4294950912 }
  0xe2   :  { %4970 = dma.done.wait [#allocation9], 32768  }
  0xe3   :  { %4971 = vsyncadd [#allocation9], 4294934528 }
  0xe4   :  { %4972 = dma.done.wait [#allocation12], 14336  }
  0xe5   :  { %4973 = vsyncadd [#allocation12], 4294952960 }
  0xe6   :  { %4974 = dma.done.wait [#allocation15], 20480  }
  0xe7   :  { %4975 = vsyncadd [#allocation15], 4294946816 }
  0xe8   :  { %4976 = dma.done.wait [#allocation18], 18432  }
  0xe9   :  { %4977 = vsyncadd [#allocation18], 4294948864 }
  0xea   :  { %4978 = dma.done.wait [#allocation21], 2048  }
  0xeb   :  { %4979 = vsyncadd [#allocation21], 4294965248  ;;  %v375_v0 = vld [vmem:[#allocation2 + $0x78] sm:$0xff]  ;;  %v374_v1 = vld [vmem:[#allocation2 + $0x70] sm:$0xff]  ;;  %vm388_vm0 = vcmask 523264   ;;  %v432_v26 = vlaneseq  ;;  %vm444_vm3 = vcmask 1044480  }
  0xec   :  { %392 = vmatpush.msra.mxu0 %v375_v0  ;;  %v373_v2 = vld [vmem:[#allocation2 + $0x68] sm:$0xff]  ;;  %v383_v3 = vld [vmem:[#allocation2 + $0xb8] sm:$0xff]  ;;  %v372_v4 = vld [vmem:[#allocation2 + $0x60] sm:$0xff]  ;;  %v5041_v39 = vmov 128.0   ;;  %vm615_vm8 = vcmask 261120   ;;  %vm643_vm9 = vcmask 36864  }
  0xed   :  { %420 = vmatpush.msra.mxu1 %v383_v3  ;;  %v382_v5 = vld [vmem:[#allocation2 + $0xb0] sm:$0xff]  ;;  %v381_v6 = vld [vmem:[#allocation2 + $0xa8] sm:$0xff]  ;;  %v371_v7 = vld [vmem:[#allocation2 + $0x58] sm:$0xff]  ;;  %v5368_v27 = vshrl.u32 %v432_v26, 7  ;;  %v5370_v28 = vand.u32 127, %v432_v26  ;;  %4536 = vrcp.f32 %v5041_v39  ;;  %s5043_s25 = smov 64  }
  0xee   :  { %393 = vmatpush.msra.mxu0 %v374_v1  ;;  %v370_v8 = vld [vmem:[#allocation2 + $0x50] sm:$0xff]  ;;  %v380_v9 = vld [vmem:[#allocation2 + $0xa0] sm:$0xff]  ;;  %v369_v10 = vld [vmem:[#allocation2 + $0x48] sm:$0xff]  ;;  %vm655_vm10 = vcmask 39936   ;;  %s5785_s2 = sld [smem:[#allocation34_spill]]  ;;  %s5045_s26 = smov [#allocation22]  }
  0xef   :  { %421 = vmatpush.msra.mxu1 %v382_v5  ;;  %v379_v11 = vld [vmem:[#allocation2 + $0x98] sm:$0xff]  ;;  %v378_v12 = vld [vmem:[#allocation2 + $0x90] sm:$0xff]  ;;  %v368_v13 = vld [vmem:[#allocation2 + $0x40] sm:$0xff]  ;;  %vm2415_vm1 = vcmp.le.s32.totalorder %v5370_v28, %v5368_v27  ;;  %vm434_vm2 = vcmp.eq.s32.totalorder %v5368_v27, 0  ;;  %s5786_s15 = sld [smem:[#allocation35_spill]]  ;;  %s4294_s18 = sshll.u32 %s5045_s26, 4  ;;  %s4295_s18 = int_to_ptr.vmem [resolvable:$true] %s4294_s18 }
  0xf0   :  { %394 = vmatpush.msra.mxu0 %v373_v2  ;;  %v377_v14 = vld [vmem:[#allocation2 + $0x88] sm:$0xff]  ;;  %v367_v15 = vld [vmem:[#allocation2 + $0x38] sm:$0xff]  ;;  %v376_v16 = vld [vmem:[#allocation2 + $0x80] sm:$0xff]  ;;  %s5787_s1 = sld [smem:[#allocation36_spill]]  ;;  %s4296_s16 = sshll.u32 %s5259_s4, 4  ;;  %s4297_s16 = int_to_ptr.hbm [resolvable:$true] %s4296_s16 }
  0xf1   :  { %422 = vmatpush.msra.mxu1 %v381_v6  ;;  %v366_v17 = vld [vmem:[#allocation2 + $0x30] sm:$0xff]  ;;  %v359_v18 = vld [vmem:[%s5054_s5 + $0x8] sm:$0x1f]  ;;  %v364_v20 = vld [vmem:[#allocation2 + $0x20] sm:$0xff]  ;;  %s5788_s20 = sld [smem:[#allocation37_spill]]  ;;  %s4954_s29 = sshra.s32 %s4297_s16, 4  ;;  %s4955_s29 = int_to_ptr.hbm [resolvable:$true] %s4954_s29 }
  0xf2   :  { %395 = vmatpush.msra.mxu0 %v372_v4  ;;  %v365_v19 = vld [vmem:[#allocation2 + $0x28] sm:$0xff]  ;;  %v363_v21 = vld [vmem:[#allocation2 + $0x18] sm:$0xff]  ;;  %v362_v22 = vld [vmem:[#allocation2 + $0x10] sm:$0xff]  ;;  %s5789_s28 = sld [smem:[#allocation38_spill]]  ;;  %p4959_p5 = scmp.lt.s32.totalorder %s4955_s29, %s5259_s4 }
  0xf3   :  { %423 = vmatpush.msra.mxu1 %v380_v9  ;;  %v361_v23 = vld [vmem:[#allocation2 + $0x8] sm:$0xff]  ;;  %v360_v24 = vld [vmem:[#allocation2] sm:$0xff]  ;;  %v524_v41 = vld [vmem:[#allocation5 + $0x150] sm:$0xff]  ;;  %v4537_v43 = vpop.eup %4536  ;;  %s5790_s9 = sld [smem:[#allocation53_spill]] }
  0xf4   :  { %396 = vmatpush.msra.mxu0 %v371_v7  ;;  %v358_v25 = vld [vmem:[%s5054_s5] sm:$0x1f]  ;;  %v527_v40 = vld [vmem:[#allocation5 + $0x168] sm:$0xff]  ;;  %v521_v42 = vld [vmem:[#allocation5 + $0x138] sm:$0xff]  ;;  %v449_v47 = vmul.f32 128.0, %v4537_v43  ;;  %vm453_vm4 = vweird.f32 %v4537_v43  ;;  %s5782_s5 = sld [smem:[#allocation31_spill]] }
  0xf5   :  { %424 = vmatpush.msra.mxu1 %v379_v11  ;;  %v4506_v29 = vld [vmem:[%s5064_s13] ss:$0 sm:$0xff]  ;;  %538 = vmatpush.msra.mxu3 %v527_v40  ;;  %v529_v45 = vld [vmem:[#allocation5 + $0x178] sm:$0xff]  ;;  %v515_v48 = vld [vmem:[#allocation5 + $0x108] sm:$0xff]  ;;  %s5783_s13 = sld [smem:[#allocation32_spill]] }
  0xf6   :  { %397 = vmatpush.msra.mxu0 %v370_v8  ;;  %v4507_v33 = vld [vmem:[%s5069_s17] ss:$0 sm:$0xff]  ;;  %v512_v49 = vld [vmem:[#allocation5 + $0xf0] sm:$0xff]  ;;  %v450_v50 = vsub.f32 1.0, %v449_v47  ;;  %v509_v51 = vld [vmem:[#allocation5 + $0xd8] sm:$0xff]  ;;  %s5784_s17 = sld [smem:[#allocation33_spill]] }
  0xf7   :  { %425 = vmatpush.msra.mxu1 %v378_v12  ;;  %v440_v35 = vld [vmem:[%s5074_s21] sm:$0x1f]  ;;  %539 = vmatpush.msra.mxu3 %v524_v41  ;;  %v503_v54 = vld [vmem:[#allocation5 + $0xa8] sm:$0xff]  ;;  %v500_v55 = vld [vmem:[#allocation5 + $0x90] sm:$0xff]  ;;  %s5042_s21 = smov 96   ;;  %s5791_s0 = sld [smem:[#allocation39_spill]] }
  0xf8   :  { %398 = vmatpush.msra.mxu0 %v369_v10  ;;  %v518_v44 = vld [vmem:[#allocation5 + $0x120] sm:$0xff]  ;;  %v451_v53 = vmul.f32 %v4537_v43, %v450_v50  ;;  %v497_v57 = vld [vmem:[#allocation5 + $0x78] sm:$0xff]  ;;  %v491_v60 = vld [vmem:[#allocation5 + $0x48] sm:$0xff]  ;;  %s5792_s12 = sld [smem:[#allocation40_spill]] }
  0xf9   :  { %426 = vmatpush.msra.mxu1 %v377_v14  ;;  %v526_v46 = vld [vmem:[#allocation5 + $0x160] sm:$0xff]  ;;  %540 = vmatpush.msra.mxu3 %v521_v42  ;;  %v488_v2 = vld [vmem:[#allocation5 + $0x30] sm:$0xff]  ;;  %v523_v3 = vld [vmem:[#allocation5 + $0x148] sm:$0xff]  ;;  %s5793_s30 = sld [smem:[#allocation41_spill]] }
  0xfa   :  { %399 = vmatpush.msra.mxu0 %v368_v13  ;;  %v506_v52 = vld [vmem:[#allocation5 + $0xc0] sm:$0xff]  ;;  %v452_v56 = vadd.f32 %v4537_v43, %v451_v53  ;;  %v485_v4 = vld [vmem:[#allocation5 + $0x18] sm:$0xff]  ;;  %v520_v5 = vld [vmem:[#allocation5 + $0x130] sm:$0xff]  ;;  %s5794_s27 = sld [smem:[#allocation54_spill]] }
  0xfb   :  { %427 = vmatpush.msra.mxu1 %v376_v16  ;;  %541 = vmatpush.msra.mxu3 %v518_v44  ;;  %v494_v58 = vld [vmem:[#allocation5 + $0x60] sm:$0xff]  ;;  %v528_v7 = vld [vmem:[#allocation5 + $0x170] sm:$0xff]  ;;  %v517_v8 = vld [vmem:[#allocation5 + $0x118] sm:$0xff]  ;;  %s5795_s11 = sld [smem:[#allocation42_spill]] }
  0xfc   :  { %400 = vmatpush.msra.mxu0 %v367_v15  ;;  %4353 = vmatmul.msk.f32.vlgmr.msra.gmra.mxu1 %vm388_vm0, %v359_v18  ;;  %v5382_v59 = vsel %vm453_vm4, %v4537_v43, %v452_v56  ;;  %v482_v6 = vld [vmem:[#allocation5] sm:$0xff]  ;;  %v525_v9 = vld [vmem:[#allocation5 + $0x158] sm:$0xff]  ;;  %v511_v12 = vld [vmem:[#allocation5 + $0xe8] sm:$0xff]  ;;  %s5797_s6 = sld [smem:[#allocation44_spill]] }
  0xfd   :  { %578 = vmatpush.msrb.mxu1 %v529_v45  ;;  %542 = vmatpush.msra.mxu3 %v515_v48  ;;  %v514_v10 = vld [vmem:[#allocation5 + $0x100] sm:$0xff]  ;;  %v519_v13 = vld [vmem:[#allocation5 + $0x128] sm:$0xff]  ;;  %v508_v14 = vld [vmem:[#allocation5 + $0xd0] sm:$0xff]  ;;  %s5798_s22 = sld [smem:[#allocation45_spill]] }
  0xfe   :  { %401 = vmatpush.msra.mxu0 %v366_v17  ;;  %v522_v11 = vld [vmem:[#allocation5 + $0x140] sm:$0xff]  ;;  %v516_v15 = vld [vmem:[#allocation5 + $0x110] sm:$0xff]  ;;  %v505_v16 = vld [vmem:[#allocation5 + $0xb8] sm:$0xff]  ;;  %s5799_s23 = sld [smem:[#allocation46_spill]] }
  0xff   :  { %579 = vmatpush.msrb.mxu1 %v526_v46  ;;  %543 = vmatpush.msra.mxu3 %v512_v49  ;;  %v513_v17 = vld [vmem:[#allocation5 + $0xf8] sm:$0xff]  ;;  %v502_v18 = vld [vmem:[#allocation5 + $0xa0] sm:$0xff]  ;;  %v483_v39 = vld [vmem:[#allocation5 + $0x8] sm:$0xff]  ;;  %s5800_s3 = sld [smem:[#allocation47_spill]] }
 0x100   :  { %402 = vmatpush.msra.mxu0 %v365_v19  ;;  %v510_v19 = vld [vmem:[#allocation5 + $0xe0] sm:$0xff]  ;;  %s5801_s8 = sld [smem:[#allocation48_spill]] }
 0x101   :  { %544 = vmatpush.msra.mxu3 %v509_v51  ;;  %580 = vmatpush.msrb.mxu1 %v523_v3  ;;  %v490_v26 = vld [vmem:[#allocation5 + $0x40] sm:$0xff]  ;;  %s5802_s14 = sld [smem:[#allocation49_spill]] }
 0x102   :  { %403 = vmatpush.msra.mxu0 %v364_v20  ;;  %v499_v20 = vld [vmem:[#allocation5 + $0x88] sm:$0xff]  ;;  %v4508_v47 = vld [vmem:[%s5782_s5] ss:$0 sm:$0xff]  ;;  %s5803_s19 = sld [smem:[#allocation50_spill]] }
 0x103   :  { %545 = vmatpush.msra.mxu3 %v506_v52  ;;  %581 = vmatpush.msrb.mxu1 %v520_v5  ;;  %v4509_v50 = vld [vmem:[%s5783_s13] ss:$0 sm:$0xff]  ;;  %s5805_s10 = sld [smem:[#allocation52_spill]] }
 0x104   :  { %404 = vmatpush.msra.mxu0 %v363_v21  ;;  %v507_v21 = vld [vmem:[#allocation5 + $0xc8] sm:$0xff]  ;;  %v530_v53 = vld [vmem:[%s5784_s17] sm:$0x7] }
 0x105   :  { %546 = vmatpush.msra.mxu3 %v503_v54  ;;  %582 = vmatpush.msrb.mxu1 %v517_v8  ;;  %v534_v54 = vperm.slane %v530_v53, 2 }
 0x106   :  { %405 = vmatpush.msra.mxu0 %v362_v22  ;;  %v496_v22 = vld [vmem:[#allocation5 + $0x70] sm:$0xff] }
 0x107   :  { %547 = vmatpush.msra.mxu3 %v500_v55  ;;  %583 = vmatpush.msrb.mxu1 %v514_v10 }
 0x108   :  { %406 = vmatpush.msra.mxu0 %v361_v23  ;;  %v504_v23 = vld [vmem:[#allocation5 + $0xb0] sm:$0xff] }
 0x109   :  { %548 = vmatpush.msra.mxu3 %v497_v57  ;;  %584 = vmatpush.msrb.mxu1 %v511_v12 }
 0x10a   :  { %407 = vmatpush.msra.mxu0 %v360_v24  ;;  %v493_v24 = vld [vmem:[#allocation5 + $0x58] sm:$0xff] }
 0x10b   :  { %408 = vmatmul.f32.vlgmr.msra.gmra.mxu0 %v358_v25  ;;  %549 = vmatpush.msra.mxu3 %v494_v58  ;;  %v501_v25 = vld [vmem:[#allocation5 + $0x98] sm:$0xff]  ;;  %v533_v58 = vperm.slane %v530_v53, 1 }
 0x10c   :  { %585 = vmatpush.msrb.mxu1 %v508_v14  ;;  %v600_v14 = vld [vmem:[#allocation7 + $0x10] sm:$0xff] }
 0x10d   :  { %550 = vmatpush.msra.mxu3 %v491_v60  ;;  %v532_v60 = vperm.slane %v530_v53, 0 }
 0x10e   :  { %586 = vmatpush.msrb.mxu1 %v505_v16  ;;  %v598_v16 = vld [vmem:[#allocation7] sm:$0xff] }
 0x10f   :  { %551 = vmatpush.msra.mxu3 %v488_v2 }
 0x110   :  { %587 = vmatpush.msrb.mxu1 %v502_v18 }
 0x111   :  { %552 = vmatpush.msra.mxu3 %v485_v4 }
 0x112   :  { %588 = vmatpush.msrb.mxu1 %v499_v20 }
 0x113   :  { %553 = vmatpush.msra.mxu3 %v482_v6 }
 0x114   :  { %589 = vmatpush.msrb.mxu1 %v496_v22 }
 0x115   :  { %558 = vmatpush.msrb.mxu3 %v528_v7 }
 0x116   :  { %590 = vmatpush.msrb.mxu1 %v493_v24 }
 0x117   :  { %559 = vmatpush.msrb.mxu3 %v525_v9 }
 0x118   :  { %591 = vmatpush.msrb.mxu1 %v490_v26 }
 0x119   :  { %560 = vmatpush.msrb.mxu3 %v522_v11 }
 0x11b   :  { %561 = vmatpush.msrb.mxu3 %v519_v13  ;;  %v601_v13 = vld [vmem:[#allocation7 + $0x18] sm:$0xff] }
 0x11d   :  { %562 = vmatpush.msrb.mxu3 %v516_v15  ;;  %v599_v15 = vld [vmem:[#allocation7 + $0x8] sm:$0xff] }
 0x11f   :  { %563 = vmatpush.msrb.mxu3 %v513_v17 }
 0x121   :  { %564 = vmatpush.msrb.mxu3 %v510_v19 }
 0x123   :  { %565 = vmatpush.msrb.mxu3 %v507_v21 }
 0x125   :  { %566 = vmatpush.msrb.mxu3 %v504_v23 }
 0x127   :  { %567 = vmatpush.msrb.mxu3 %v501_v25 }
 0x179   :  { %v429_v31 = vpop.f32.mrf.mxu1 }
 0x188   :  { %v409_v30 = vpop.f32.mrf.mxu0 }
 0x189   :  { %v410_v32 = vadd.f32 %v4506_v29, %v409_v30  ;;  %v498_v29 = vld [vmem:[#allocation5 + $0x80] sm:$0xff]  ;;  %v487_v30 = vld [vmem:[#allocation5 + $0x28] sm:$0xff] }
 0x18a   :  { %568 = vmatpush.msrb.mxu3 %v498_v29  ;;  %592 = vmatpush.msrb.mxu1 %v487_v30  ;;  %v605_v30 = vld [vmem:[#allocation7 + $0x38] sm:$0xff] }
 0x18b   :  { %v430_v34 = vadd.f32 %v429_v31, %v410_v32  ;;  %v495_v31 = vld [vmem:[#allocation5 + $0x68] sm:$0xff]  ;;  %v484_v32 = vld [vmem:[#allocation5 + $0x10] sm:$0xff] }
 0x18c   :  { %569 = vmatpush.msrb.mxu3 %v495_v31  ;;  %593 = vmatpush.msrb.mxu1 %v484_v32  ;;  %v604_v31 = vld [vmem:[#allocation7 + $0x30] sm:$0xff] }
 0x18d   :  { %v439_v36 = vsel %vm434_vm2, %v4507_v33, %v430_v34  ;;  %v492_v33 = vld [vmem:[#allocation5 + $0x50] sm:$0xff]  ;;  %v489_v34 = vld [vmem:[#allocation5 + $0x38] sm:$0xff] }
 0x18e   :  { %v5378_v37 = vadd.f32 %v440_v35, %v439_v36  ;;  %570 = vmatpush.msrb.mxu3 %v492_v33  ;;  %v486_v35 = vld [vmem:[#allocation5 + $0x20] sm:$0xff]  ;;  %764 = vmatpush.msra.mxu1 %v605_v30  ;;  %v603_v33 = vld [vmem:[#allocation7 + $0x28] sm:$0xff] }
 0x18f   :  { %v1070_v30 = vld [vmem:[#allocation8 + $0x1c0] sm:$0xff] }
 0x190   :  { %v445_v38 = vsel %vm444_vm3, %v5378_v37, 0.0  ;;  %571 = vmatpush.msrb.mxu3 %v489_v34  ;;  %765 = vmatpush.msra.mxu1 %v604_v31  ;;  %v1071_v31 = vld [vmem:[#allocation8 + $0x1c8] sm:$0xff] }
 0x191   :  { %446 = vadd.xlane.f32.xlu0 %v445_v38 }
 0x192   :  { %572 = vmatpush.msrb.mxu3 %v486_v35  ;;  %766 = vmatpush.msra.mxu1 %v603_v33  ;;  %v1073_v33 = vld [vmem:[#allocation8 + $0x1d8] sm:$0xff] }
 0x194   :  { %573 = vmatpush.msrb.mxu3 %v483_v39 }
 0x204   :  { %v447_v61 = vpop.xlane.xlu0 %446 }
 0x205   :  { %v455_v62 = vmul.f32 %v5382_v59, %v447_v61 }
 0x207   :  { %v5386_v63 = vsub.f32 %v5378_v37, %v455_v62 }
 0x209   :  { %v457_v0 = vmul.f32 %v5386_v63, %v5386_v63 }
 0x20b   :  { %v458_v1 = vsel %vm444_vm3, %v457_v0, 0.0 }
 0x20c   :  { %459 = vadd.xlane.f32.xlu0 %v458_v1 }
 0x27f   :  { %v460_v36 = vpop.xlane.xlu0 %459 }
 0x280   :  { %v461_v38 = vmul.f32 %v460_v36, %v5382_v59 }
 0x282   :  { %v462_v40 = vadd.f32 1e-05, %v461_v38 }
 0x284   :  { %4538 = vrsqrt.f32 %v462_v40  ;;  %vm469_vm6 = vweird.f32 %v462_v40 }
 0x28a   :  { %v4539_v41 = vpop.eup %4538 }
 0x28b   :  { %v464_v42 = vmul.f32 %v4539_v41, %v462_v40  ;;  %vm470_vm5 = vweird.f32 %v4539_v41  ;;  %v602_v40 = vld [vmem:[#allocation7 + $0x20] sm:$0xff] }
 0x28c   :  { %vm471_vm7 = vmor %vm469_vm6, %vm470_vm5  ;;  %767 = vmatpush.msra.mxu1 %v602_v40  ;;  %v1067_v40 = vld [vmem:[#allocation8 + $0x1a8] sm:$0xff] }
 0x28d   :  { %v465_v43 = vmul.f32 %v4539_v41, %v464_v42 }
 0x28f   :  { %v466_v44 = vmul.f32 0.5, %v465_v43 }
 0x291   :  { %v467_v45 = vsub.f32 1.5, %v466_v44 }
 0x293   :  { %v468_v46 = vmul.f32 %v4539_v41, %v467_v45 }
 0x295   :  { %v472_v48 = vsel %vm471_vm7, %v4539_v41, %v468_v46 }
 0x296   :  { %v473_v49 = vmul.f32 %v472_v48, %v5386_v63 }
 0x298   :  { %v477_v51 = vmul.f32 %v4508_v47, %v473_v49 }
 0x29a   :  { %v481_v52 = vadd.f32 %v4509_v50, %v477_v51 }
 0x29c   :  { %554 = vmatmul.f32.vlgmr.msra.gmra.mxu3 %v481_v52  ;;  %594 = vmatmul.f32.vlgmr.msrb.gmra.mxu1 %v481_v52 }
 0x29d   :  { %787 = vmatpush.msra.mxu3 %v601_v13 }
 0x29f   :  { %788 = vmatpush.msra.mxu3 %v600_v14 }
 0x2a1   :  { %789 = vmatpush.msra.mxu3 %v599_v15 }
 0x2a3   :  { %790 = vmatpush.msra.mxu3 %v598_v16 }
 0x2a4   :  { %574 = vmatmul.f32.vlgmr.msrb.gmra.mxu3 %v481_v52 }
 0x319   :  { %v595_v55 = vpop.f32.mrf.mxu1 }
 0x31a   :  { %v5396_v56 = vadd.f32 %v595_v55, %v534_v54 }
 0x31c   :  { %4356 = vmatpush.msk.msra.mxu2 %vm444_vm3, %v5396_v56 }
 0x31f   :  { %v555_v57 = vpop.f32.mrf.mxu3 }
 0x320   :  { %v556_v63 = vadd.f32 %v555_v57, %v532_v60 }
 0x327   :  { %v575_v61 = vpop.f32.mrf.mxu3 }
 0x328   :  { %v576_v62 = vadd.f32 %v575_v61, %v533_v58 }
 0x32a   :  { %684 = vrot.lane.b32.xlu1 %v576_v62, %s5042_s21  ;;  %4354 = vmatpush.xpose.msk.msrb.mxu0 %vm615_vm8, %v576_v62 }
 0x32d   :  { %4355 = vmatmul.msk.f32.vlgmr.msrb.gmra.mxu0 %vm615_vm8, %v556_v63 }
 0x332   :  { %682 = vrot.lane.b32.xlu1 %v556_v63, %s5042_s21 }
 0x39c   :  { %v685_v0 = vpop.permute.xlu1 %684 }
 0x39d   :  { %4358 = vmatpush.xpose.msk.msra.mxu0 %vm615_vm8, %v685_v0 }
 0x3a4   :  { %v683_v1 = vpop.permute.xlu1 %682 }
 0x3a5   :  { %4359 = vmatmul.msk.f32.vlgmr.msra.gmra.mxu0 %vm615_vm8, %v683_v1 }
 0x3aa   :  { %v639_v2 = vpop.f32.mrf.mxu0 }
 0x3ab   :  { %v642_v3 = vmul.f32 0.17677669, %v639_v2 }
 0x3ad   :  { %v644_v4 = vsel %vm643_vm9, %v642_v3, -inf }
 0x3ae   :  { %645 = vmax.xlane.f32.xlu2 %v644_v4 }
 0x421   :  { %v646_v5 = vpop.xlane.xlu2 %645 }
 0x422   :  { %v647_v6 = vsub.f32 %v642_v3, %v646_v5  ;;  %v707_v7 = vpop.f32.mrf.mxu0  ;;  %v613_v5 = vld [vmem:[#allocation7 + $0x78] sm:$0xff] }
 0x423   :  { %v710_v8 = vmul.f32 0.17677669, %v707_v7  ;;  %v611_v7 = vld [vmem:[#allocation7 + $0x68] sm:$0xff] }
 0x424   :  { %v648_v9 = vmul.f32 1.442695, %v647_v6  ;;  %v612_v6 = vld [vmem:[#allocation7 + $0x70] sm:$0xff] }
 0x425   :  { %v711_v10 = vsel %vm643_vm9, %v710_v8, -inf }
 0x426   :  { %4540 = vpow2.f32 %v648_v9  ;;  %712 = vmax.xlane.f32.xlu0 %v711_v10  ;;  %v608_v9 = vld [vmem:[#allocation7 + $0x50] sm:$0xff]  ;;  %v607_v10 = vld [vmem:[#allocation7 + $0x48] sm:$0xff] }
 0x42c   :  { %v4541_v11 = vpop.eup %4540 }
 0x42d   :  { %v650_v12 = vsel %vm643_vm9, %v4541_v11, 0.0 }
 0x42e   :  { %651 = vadd.xlane.f32.xlu2 %v650_v12 }
 0x43a   :  { %797 = vrot.lane.b32.xlu0 %v576_v62, %s5043_s25 }
 0x442   :  { %795 = vrot.lane.b32.xlu0 %v556_v63, %s5043_s25 }
 0x446   :  { %722 = vrot.lane.b32.xlu2 %v5396_v56, %s5042_s21 }
 0x44e   :  { %888 = vrot.lane.b32.xlu2 %v576_v62, %s5028_s7 }
 0x456   :  { %886 = vrot.lane.b32.xlu2 %v556_v63, %s5028_s7 }
 0x499   :  { %v713_v17 = vpop.xlane.xlu0 %712 }
 0x49a   :  { %v714_v18 = vsub.f32 %v710_v8, %v713_v17  ;;  %v609_v8 = vld [vmem:[#allocation7 + $0x58] sm:$0xff] }
 0x49b   :  { %877 = vmatpush.msrb.mxu2 %v609_v8  ;;  %v1034_v8 = vld [vmem:[#allocation8 + $0xa0] sm:$0xff] }
 0x49c   :  { %v715_v19 = vmul.f32 1.442695, %v714_v18  ;;  %v4510_v18 = vld [vmem:[%s5785_s2] ss:$0 sm:$0xff] }
 0x49d   :  { %878 = vmatpush.msrb.mxu2 %v608_v9  ;;  %v1035_v9 = vld [vmem:[#allocation8 + $0xa8] sm:$0xff] }
 0x49e   :  { %4542 = vpow2.f32 %v715_v19 }
 0x49f   :  { %879 = vmatpush.msrb.mxu2 %v607_v10  ;;  %v1036_v10 = vld [vmem:[#allocation8 + $0xb0] sm:$0xff] }
 0x4a1   :  { %v652_v20 = vpop.xlane.xlu2 %651 }
 0x4a2   :  { %4544 = vrcp.f32 %v652_v20 }
 0x4a4   :  { %v4543_v21 = vpop.eup %4542 }
 0x4a5   :  { %v717_v22 = vsel %vm643_vm9, %v4543_v21, 0.0 }
 0x4a6   :  { %718 = vadd.xlane.f32.xlu1 %v717_v22 }
 0x4a8   :  { %v4545_v23 = vpop.eup %4544 }
 0x4a9   :  { %v723_v24 = vpop.permute.xlu2 %722  ;;  %v654_v25 = vmul.f32 %v4545_v23, %v4541_v11  ;;  %v606_v11 = vld [vmem:[#allocation7 + $0x40] sm:$0xff] }
 0x4aa   :  { %4360 = vmatpush.msk.msrb.mxu0 %vm444_vm3, %v723_v24  ;;  %880 = vmatpush.msrb.mxu2 %v606_v11  ;;  %v1074_v24 = vld [vmem:[#allocation8 + $0x1e0] sm:$0xff]  ;;  %v1037_v11 = vld [vmem:[#allocation8 + $0xb8] sm:$0xff] }
 0x4ab   :  { %4357 = vmatmul.msk.f32.vlgmr.msra.gmra.mxu2 %vm655_vm10, %v654_v25  ;;  %v1075_v25 = vld [vmem:[#allocation8 + $0x1e8] sm:$0xff] }
 0x4ac   :  { %v798_v26 = vpop.permute.xlu0 %797  ;;  %1088 = vmatpush.msra.mxu2 %v1074_v24  ;;  %v1025_v24 = vld [vmem:[#allocation8 + $0x58] sm:$0xff] }
 0x4ad   :  { %4364 = vmatpush.xpose.msk.msra.mxu0 %vm615_vm8, %v798_v26  ;;  %v1076_v26 = vld [vmem:[#allocation8 + $0x1f0] sm:$0xff] }
 0x4ae   :  { %1089 = vmatpush.msra.mxu2 %v1070_v30  ;;  %v1021_v30 = vld [vmem:[#allocation8 + $0x38] sm:$0xff] }
 0x4b1   :  { %v889_v29 = vpop.permute.xlu2 %888 }
 0x4b2   :  { %4369 = vmatpush.xpose.msk.msrb.mxu3 %vm615_vm8, %v889_v29  ;;  %v1077_v29 = vld [vmem:[#allocation8 + $0x1f8] sm:$0xff] }
 0x4b4   :  { %v796_v36 = vpop.permute.xlu0 %795 }
 0x4b9   :  { %v887_v39 = vpop.permute.xlu2 %886 }
 0x519   :  { %v719_v32 = vpop.xlane.xlu1 %718 }
 0x51a   :  { %4546 = vrcp.f32 %v719_v32  ;;  %v1072_v32 = vld [vmem:[#allocation8 + $0x1d0] sm:$0xff] }
 0x520   :  { %v4547_v34 = vpop.eup %4546 }
 0x521   :  { %v721_v35 = vmul.f32 %v4547_v34, %v4543_v21 }
 0x523   :  { %4361 = vmatmul.msk.f32.vlgmr.msrb.gmra.mxu0 %vm655_vm10, %v721_v35 }
 0x52b   :  { %4365 = vmatmul.msk.f32.vlgmr.msra.gmra.mxu0 %vm615_vm8, %v796_v36 }
 0x52e   :  { %v679_v38 = vpop.f32.mrf.mxu2 }
 0x52f   :  { %4363 = vmatmul.msk.f32.vlgmr.msra.gmra.mxu3 %vm615_vm8, %v679_v38 }
 0x530   :  { %1108 = vmatpush.msra.mxu3 %v1075_v25  ;;  %v1018_v25 = vld [vmem:[#allocation8 + $0x20] sm:$0xff] }
 0x532   :  { %1109 = vmatpush.msra.mxu3 %v1071_v31  ;;  %v1014_v31 = vld [vmem:[#allocation8] sm:$0xff] }
 0x534   :  { %1110 = vmatpush.msra.mxu3 %v1067_v40  ;;  %v1249_v40 = vld [vmem:[#allocation10 + $0x168] sm:$0xff] }
 0x537   :  { %4370 = vmatmul.msk.f32.vlgmr.msrb.gmra.mxu3 %vm615_vm8, %v887_v39  ;;  %v1066_v39 = vld [vmem:[#allocation8 + $0x1a0] sm:$0xff] }
 0x538   :  { %1090 = vmatpush.msra.mxu2 %v1066_v39  ;;  %v1266_v39 = vld [vmem:[#allocation10 + $0x1f0] sm:$0xff] }
 0x5a0   :  { %v746_v41 = vpop.f32.mrf.mxu0 }
 0x5a1   :  { %4362 = vmatmul.msk.f32.vlgmr.msra.gmra.mxu1 %vm615_vm8, %v746_v41  ;;  %v1068_v41 = vld [vmem:[#allocation8 + $0x1b0] sm:$0xff] }
 0x5a8   :  { %v820_v42 = vpop.f32.mrf.mxu0 }
 0x5a9   :  { %v823_v43 = vmul.f32 0.17677669, %v820_v42  ;;  %v1069_v42 = vld [vmem:[#allocation8 + $0x1b8] sm:$0xff] }
 0x5ab   :  { %v824_v44 = vsel %vm643_vm9, %v823_v43, -inf }
 0x5ac   :  { %825 = vmax.xlane.f32.xlu0 %v824_v44  ;;  %v1063_v44 = vld [vmem:[#allocation8 + $0x188] sm:$0xff] }
 0x5ad   :  { %1111 = vmatpush.msra.mxu3 %v1063_v44  ;;  %v1235_v44 = vld [vmem:[#allocation10 + $0xf8] sm:$0xff] }
 0x5b2   :  { %v792_v45 = vpop.f32.mrf.mxu3 }
 0x5ba   :  { %v911_v46 = vpop.f32.mrf.mxu3 }
 0x5bb   :  { %v914_v47 = vmul.f32 0.17677669, %v911_v46  ;;  %v1065_v46 = vld [vmem:[#allocation8 + $0x198] sm:$0xff] }
 0x5bd   :  { %v915_v48 = vsel %vm643_vm9, %v914_v47, -inf }
 0x5be   :  { %916 = vmax.xlane.f32.xlu2 %v915_v48  ;;  %v1059_v48 = vld [vmem:[#allocation8 + $0x168] sm:$0xff] }
 0x5bf   :  { %1112 = vmatpush.msra.mxu3 %v1059_v48 }
 0x5c0   :  { %926 = vrot.lane.b32.xlu0 %v5396_v56, %s5028_s7 }
 0x61e   :  { %v769_v13 = vpop.f32.mrf.mxu1 }
 0x61f   :  { %v826_v49 = vpop.xlane.xlu0 %825  ;;  %v793_v15 = vadd.f32 %v792_v45, %v769_v13  ;;  %v1064_v45 = vld [vmem:[#allocation8 + $0x190] sm:$0xff]  ;;  %v1031_v13 = vld [vmem:[#allocation8 + $0x88] sm:$0xff] }
 0x620   :  { %v827_v50 = vsub.f32 %v823_v43, %v826_v49  ;;  %v1062_v43 = vld [vmem:[#allocation8 + $0x180] sm:$0xff]  ;;  %v1060_v49 = vld [vmem:[#allocation8 + $0x170] sm:$0xff] }
 0x621   :  { %1091 = vmatpush.msra.mxu2 %v1062_v43  ;;  %v1219_v43 = vld [vmem:[#allocation10 + $0x78] sm:$0xff] }
 0x622   :  { %v828_v51 = vmul.f32 1.442695, %v827_v50  ;;  %v1061_v50 = vld [vmem:[#allocation8 + $0x178] sm:$0xff] }
 0x624   :  { %4548 = vpow2.f32 %v828_v51  ;;  %v1054_v51 = vld [vmem:[#allocation8 + $0x140] sm:$0xff] }
 0x62a   :  { %v4549_v52 = vpop.eup %4548 }
 0x62b   :  { %v830_v53 = vsel %vm643_vm9, %v4549_v52, 0.0 }
 0x62c   :  { %831 = vadd.xlane.f32.xlu1 %v830_v53  ;;  %v1056_v53 = vld [vmem:[#allocation8 + $0x150] sm:$0xff] }
 0x631   :  { %v917_v54 = vpop.xlane.xlu2 %916 }
 0x632   :  { %v918_v55 = vsub.f32 %v914_v47, %v917_v54  ;;  %v927_v57 = vpop.permute.xlu0 %926  ;;  %v1058_v47 = vld [vmem:[#allocation8 + $0x160] sm:$0xff]  ;;  %v1057_v54 = vld [vmem:[#allocation8 + $0x158] sm:$0xff] }
 0x633   :  { %4371 = vmatpush.msk.msrb.mxu0 %vm444_vm3, %v927_v57  ;;  %1092 = vmatpush.msra.mxu2 %v1058_v47  ;;  %v1051_v57 = vld [vmem:[#allocation8 + $0x128] sm:$0xff]  ;;  %v1264_v47 = vld [vmem:[#allocation10 + $0x1e0] sm:$0xff] }
 0x634   :  { %v919_v58 = vmul.f32 1.442695, %v918_v55  ;;  %v1050_v55 = vld [vmem:[#allocation8 + $0x120] sm:$0xff] }
 0x635   :  { %1128 = vmatpush.msra.mxu0 %v1076_v26  ;;  %1093 = vmatpush.msra.mxu2 %v1054_v51  ;;  %v1019_v26 = vld [vmem:[#allocation8 + $0x28] sm:$0xff] }
 0x636   :  { %4550 = vpow2.f32 %v919_v58  ;;  %v1052_v58 = vld [vmem:[#allocation8 + $0x130] sm:$0xff] }
 0x637   :  { %1129 = vmatpush.msra.mxu0 %v1072_v32  ;;  %1094 = vmatpush.msra.mxu2 %v1050_v55  ;;  %v1015_v32 = vld [vmem:[#allocation8 + $0x8] sm:$0xff]  ;;  %v4511_v55 = vld [vmem:[%s5786_s15] ss:$0 sm:$0xff] }
 0x639   :  { %1130 = vmatpush.msra.mxu0 %v1068_v41 }
 0x63b   :  { %1131 = vmatpush.msra.mxu0 %v1064_v45 }
 0x63c   :  { %v4551_v60 = vpop.eup %4550 }
 0x63d   :  { %v921_v61 = vsel %vm643_vm9, %v4551_v60, 0.0  ;;  %1132 = vmatpush.msra.mxu0 %v1060_v49 }
 0x63e   :  { %922 = vadd.xlane.f32.xlu1 %v921_v61  ;;  %v1046_v61 = vld [vmem:[#allocation8 + $0x100] sm:$0xff] }
 0x63f   :  { %1133 = vmatpush.msra.mxu0 %v1056_v53  ;;  %1095 = vmatpush.msra.mxu2 %v1046_v61 }
 0x641   :  { %1134 = vmatpush.msra.mxu0 %v1052_v58 }
 0x657   :  { %835 = vrot.lane.b32.xlu1 %v5396_v56, %s5043_s25  ;;  %v610_v56 = vld [vmem:[#allocation7 + $0x60] sm:$0xff] }
 0x69f   :  { %v832_v62 = vpop.xlane.xlu1 %831 }
 0x6b1   :  { %v923_v63 = vpop.xlane.xlu1 %922 }
 0x6b2   :  { %4552 = vrcp.f32 %v923_v63  ;;  %v1048_v63 = vld [vmem:[#allocation8 + $0x110] sm:$0xff] }
 0x6b3   :  { %4554 = vrcp.f32 %v832_v62  ;;  %v1047_v62 = vld [vmem:[#allocation8 + $0x108] sm:$0xff]  ;;  %1135 = vmatpush.msra.mxu0 %v1048_v63  ;;  %v1218_v63 = vld [vmem:[#allocation10 + $0x70] sm:$0xff] }
 0x6b8   :  { %v4553_v0 = vpop.eup %4552 }
 0x6b9   :  { %v925_v1 = vmul.f32 %v4553_v0, %v4551_v60  ;;  %v4555_v2 = vpop.eup %4554  ;;  %v1053_v60 = vld [vmem:[#allocation8 + $0x138] sm:$0xff] }
 0x6ba   :  { %v834_v3 = vmul.f32 %v4555_v2, %v4549_v52  ;;  %v1055_v52 = vld [vmem:[#allocation8 + $0x148] sm:$0xff]  ;;  %v1049_v0 = vld [vmem:[#allocation8 + $0x118] sm:$0xff] }
 0x6bb   :  { %4372 = vmatmul.msk.f32.vlgmr.msrb.gmra.mxu0 %vm655_vm10, %v925_v1  ;;  %1113 = vmatpush.msra.mxu3 %v1055_v52  ;;  %v1042_v1 = vld [vmem:[#allocation8 + $0xe0] sm:$0xff]  ;;  %v1043_v2 = vld [vmem:[#allocation8 + $0xe8] sm:$0xff] }
 0x6bc   :  { %1096 = vmatpush.msra.mxu2 %v1042_v1  ;;  %v1247_v1 = vld [vmem:[#allocation10 + $0x158] sm:$0xff] }
 0x6bd   :  { %1114 = vmatpush.msra.mxu3 %v1051_v57 }
 0x6bf   :  { %1115 = vmatpush.msra.mxu3 %v1047_v62 }
 0x6c1   :  { %1116 = vmatpush.msra.mxu3 %v1043_v2  ;;  %v1263_v2 = vld [vmem:[#allocation10 + $0x1d8] sm:$0xff] }
 0x6c9   :  { %v836_v4 = vpop.permute.xlu1 %835 }
 0x6ca   :  { %4366 = vmatpush.msk.msrb.mxu1 %vm444_vm3, %v836_v4  ;;  %v1045_v4 = vld [vmem:[#allocation8 + $0xf8] sm:$0xff] }
 0x6cb   :  { %4367 = vmatmul.msk.f32.vlgmr.msrb.gmra.mxu1 %vm655_vm10, %v834_v3  ;;  %v1044_v3 = vld [vmem:[#allocation8 + $0xf0] sm:$0xff] }
 0x6cc   :  { %968 = vmatpush.msra.mxu1 %v613_v5  ;;  %1136 = vmatpush.msra.mxu0 %v1044_v3  ;;  %v1038_v5 = vld [vmem:[#allocation8 + $0xc0] sm:$0xff]  ;;  %v1217_v3 = vld [vmem:[#allocation10 + $0x68] sm:$0xff] }
 0x6cd   :  { %1097 = vmatpush.msra.mxu2 %v1038_v5  ;;  %v1246_v5 = vld [vmem:[#allocation10 + $0x150] sm:$0xff] }
 0x6ce   :  { %969 = vmatpush.msra.mxu1 %v612_v6  ;;  %v1039_v6 = vld [vmem:[#allocation8 + $0xc8] sm:$0xff] }
 0x6cf   :  { %1117 = vmatpush.msra.mxu3 %v1039_v6  ;;  %1098 = vmatpush.msra.mxu2 %v1034_v8  ;;  %v1216_v6 = vld [vmem:[#allocation10 + $0x60] sm:$0xff]  ;;  %v1261_v8 = vld [vmem:[#allocation10 + $0x1c8] sm:$0xff] }
 0x6d0   :  { %970 = vmatpush.msra.mxu1 %v611_v7  ;;  %v1040_v7 = vld [vmem:[#allocation8 + $0xd0] sm:$0xff] }
 0x6d1   :  { %1137 = vmatpush.msra.mxu0 %v1040_v7  ;;  %1118 = vmatpush.msra.mxu3 %v1035_v9  ;;  %v1232_v7 = vld [vmem:[#allocation10 + $0xe0] sm:$0xff]  ;;  %v1215_v9 = vld [vmem:[#allocation10 + $0x58] sm:$0xff] }
 0x6d2   :  { %971 = vmatpush.msra.mxu1 %v610_v56  ;;  %v1041_v56 = vld [vmem:[#allocation8 + $0xd8] sm:$0xff] }
 0x6d3   :  { %1138 = vmatpush.msra.mxu0 %v1036_v10  ;;  %1119 = vmatpush.msra.mxu3 %v1031_v13  ;;  %v1231_v10 = vld [vmem:[#allocation10 + $0xd8] sm:$0xff]  ;;  %v1214_v13 = vld [vmem:[#allocation10 + $0x50] sm:$0xff] }
 0x6d4   :  { %1148 = vmatpush.msrb.mxu1 %v1077_v29  ;;  %v1020_v29 = vld [vmem:[#allocation8 + $0x30] sm:$0xff] }
 0x6d6   :  { %1149 = vmatpush.msrb.mxu1 %v1073_v33  ;;  %v1016_v33 = vld [vmem:[#allocation8 + $0x10] sm:$0xff] }
 0x6d8   :  { %1150 = vmatpush.msrb.mxu1 %v1069_v42  ;;  %v1265_v42 = vld [vmem:[#allocation10 + $0x1e8] sm:$0xff] }
 0x6da   :  { %1151 = vmatpush.msrb.mxu1 %v1065_v46  ;;  %v1248_v46 = vld [vmem:[#allocation10 + $0x160] sm:$0xff] }
 0x6dc   :  { %1152 = vmatpush.msrb.mxu1 %v1061_v50 }
 0x6de   :  { %1153 = vmatpush.msrb.mxu1 %v1057_v54 }
 0x6e0   :  { %1154 = vmatpush.msrb.mxu1 %v1053_v60  ;;  %v4512_v60 = vld [vmem:[%s5787_s1] ss:$0 sm:$0xff] }
 0x6e2   :  { %1155 = vmatpush.msrb.mxu1 %v1049_v0  ;;  %v1234_v0 = vld [vmem:[#allocation10 + $0xf0] sm:$0xff] }
 0x6e4   :  { %1156 = vmatpush.msrb.mxu1 %v1045_v4  ;;  %v1233_v4 = vld [vmem:[#allocation10 + $0xe8] sm:$0xff] }
 0x6e6   :  { %1157 = vmatpush.msrb.mxu1 %v1041_v56  ;;  %v1245_v56 = vld [vmem:[#allocation10 + $0x148] sm:$0xff] }
 0x6e8   :  { %1158 = vmatpush.msrb.mxu1 %v1037_v11  ;;  %v1244_v11 = vld [vmem:[#allocation10 + $0x140] sm:$0xff] }
 0x738   :  { %v950_v12 = vpop.f32.mrf.mxu0 }
 0x739   :  { %4373 = vmatmul.msk.f32.vlgmr.msra.gmra.mxu1 %vm615_vm8, %v950_v12  ;;  %v1030_v12 = vld [vmem:[#allocation8 + $0x80] sm:$0xff] }
 0x73a   :  { %1099 = vmatpush.msra.mxu2 %v1030_v12  ;;  %v1260_v12 = vld [vmem:[#allocation10 + $0x1c0] sm:$0xff] }
 0x748   :  { %v859_v14 = vpop.f32.mrf.mxu1 }
 0x749   :  { %4368 = vmatmul.msk.f32.vlgmr.msrb.gmra.mxu2 %vm615_vm8, %v859_v14  ;;  %v1032_v14 = vld [vmem:[#allocation8 + $0x90] sm:$0xff] }
 0x74a   :  { %1139 = vmatpush.msra.mxu0 %v1032_v14  ;;  %v1230_v14 = vld [vmem:[#allocation10 + $0xd0] sm:$0xff] }
 0x7b6   :  { %v973_v19 = vpop.f32.mrf.mxu1 }
 0x7cc   :  { %v882_v16 = vpop.f32.mrf.mxu2 }
 0x7cd   :  { %v885_v17 = vadd.f32 %v882_v16, %v793_v15  ;;  %v1033_v15 = vld [vmem:[#allocation8 + $0x98] sm:$0xff]  ;;  %v1026_v16 = vld [vmem:[#allocation8 + $0x60] sm:$0xff] }
 0x7ce   :  { %1159 = vmatpush.msrb.mxu1 %v1033_v15  ;;  %1100 = vmatpush.msra.mxu2 %v1026_v16  ;;  %v1243_v15 = vld [vmem:[#allocation10 + $0x138] sm:$0xff] }
 0x7cf   :  { %v976_v20 = vadd.f32 %v973_v19, %v885_v17  ;;  %v1027_v17 = vld [vmem:[#allocation8 + $0x68] sm:$0xff]  ;;  %v1029_v19 = vld [vmem:[#allocation8 + $0x78] sm:$0xff] }
 0x7d0   :  { %1120 = vmatpush.msra.mxu3 %v1027_v17  ;;  %1160 = vmatpush.msrb.mxu1 %v1029_v19  ;;  %v1259_v16 = vld [vmem:[#allocation10 + $0x1b8] sm:$0xff]  ;;  %v1213_v17 = vld [vmem:[#allocation10 + $0x48] sm:$0xff]  ;;  %v1242_v19 = vld [vmem:[#allocation10 + $0x130] sm:$0xff] }
 0x7d1   :  { %v980_v21 = vadd.f32 %v4510_v18, %v976_v20  ;;  %v1028_v18 = vld [vmem:[#allocation8 + $0x70] sm:$0xff]  ;;  %v1022_v20 = vld [vmem:[#allocation8 + $0x40] sm:$0xff] }
 0x7d2   :  { %1140 = vmatpush.msra.mxu0 %v1028_v18  ;;  %1101 = vmatpush.msra.mxu2 %v1022_v20  ;;  %v1229_v18 = vld [vmem:[#allocation10 + $0xc8] sm:$0xff]  ;;  %v1258_v20 = vld [vmem:[#allocation10 + $0x1b0] sm:$0xff] }
 0x7d3   :  { %v5441_v22 = vadd.f32 %v980_v21, %v5378_v37  ;;  %v1023_v21 = vld [vmem:[#allocation8 + $0x48] sm:$0xff]  ;;  %1161 = vmatpush.msrb.mxu1 %v1025_v24 }
 0x7d4   :  { %1121 = vmatpush.msra.mxu3 %v1023_v21  ;;  %1102 = vmatpush.msra.mxu2 %v1018_v25  ;;  %v1212_v21 = vld [vmem:[#allocation10 + $0x40] sm:$0xff]  ;;  %v1241_v24 = vld [vmem:[#allocation10 + $0x128] sm:$0xff] }
 0x7d5   :  { %v984_v23 = vsel %vm444_vm3, %v5441_v22, 0.0  ;;  %1162 = vmatpush.msrb.mxu1 %v1021_v30  ;;  %v1257_v25 = vld [vmem:[#allocation10 + $0x1a8] sm:$0xff]  ;;  %v1240_v30 = vld [vmem:[#allocation10 + $0x120] sm:$0xff] }
 0x7d6   :  { %985 = vadd.xlane.f32.xlu2 %v984_v23  ;;  %v1024_v23 = vld [vmem:[#allocation8 + $0x50] sm:$0xff]  ;;  %1122 = vmatpush.msra.mxu3 %v1019_v26  ;;  %v1211_v26 = vld [vmem:[#allocation10 + $0x38] sm:$0xff] }
 0x7d7   :  { %1141 = vmatpush.msra.mxu0 %v1024_v23  ;;  %1103 = vmatpush.msra.mxu2 %v1014_v31  ;;  %v1228_v23 = vld [vmem:[#allocation10 + $0xc0] sm:$0xff] }
 0x7d8   :  { %1123 = vmatpush.msra.mxu3 %v1015_v32  ;;  %v1256_v31 = vld [vmem:[#allocation10 + $0x1a0] sm:$0xff]  ;;  %v1210_v32 = vld [vmem:[#allocation10 + $0x30] sm:$0xff] }
 0x7d9   :  { %1142 = vmatpush.msra.mxu0 %v1020_v29  ;;  %1268 = vmatpush.msrb.mxu2 %v1219_v43  ;;  %v1227_v29 = vld [vmem:[#allocation10 + $0xb8] sm:$0xff]  ;;  %v1237_v43 = vld [vmem:[#allocation10 + $0x108] sm:$0xff] }
 0x7da   :  { %1288 = vmatpush.msrb.mxu3 %v1235_v44  ;;  %v1253_v44 = vld [vmem:[#allocation10 + $0x188] sm:$0xff] }
 0x7db   :  { %1143 = vmatpush.msra.mxu0 %v1016_v33  ;;  %1269 = vmatpush.msrb.mxu2 %v1218_v63  ;;  %v1226_v33 = vld [vmem:[#allocation10 + $0xb0] sm:$0xff] }
 0x7dc   :  { %1289 = vmatpush.msrb.mxu3 %v1234_v0 }
 0x7dd   :  { %1270 = vmatpush.msrb.mxu2 %v1217_v3 }
 0x7de   :  { %1290 = vmatpush.msrb.mxu3 %v1233_v4 }
 0x7df   :  { %1271 = vmatpush.msrb.mxu2 %v1216_v6 }
 0x7e0   :  { %1291 = vmatpush.msrb.mxu3 %v1232_v7 }
 0x7e1   :  { %1272 = vmatpush.msrb.mxu2 %v1215_v9 }
 0x7e2   :  { %1292 = vmatpush.msrb.mxu3 %v1231_v10 }
 0x7e3   :  { %1273 = vmatpush.msrb.mxu2 %v1214_v13 }
 0x7e4   :  { %1293 = vmatpush.msrb.mxu3 %v1230_v14 }
 0x7e5   :  { %1274 = vmatpush.msrb.mxu2 %v1213_v17 }
 0x7e6   :  { %1294 = vmatpush.msrb.mxu3 %v1229_v18 }
 0x7e7   :  { %1275 = vmatpush.msrb.mxu2 %v1212_v21 }
 0x7e8   :  { %1295 = vmatpush.msrb.mxu3 %v1228_v23 }
 0x7e9   :  { %1276 = vmatpush.msrb.mxu2 %v1211_v26 }
 0x7ea   :  { %1296 = vmatpush.msrb.mxu3 %v1227_v29 }
 0x7eb   :  { %1277 = vmatpush.msrb.mxu2 %v1210_v32 }
 0x7ec   :  { %1297 = vmatpush.msrb.mxu3 %v1226_v33 }
 0x849   :  { %v986_v37 = vpop.xlane.xlu2 %985 }
 0x84a   :  { %v987_v34 = vmul.f32 %v986_v37, %v5382_v59  ;;  %v1017_v37 = vld [vmem:[#allocation8 + $0x18] sm:$0xff] }
 0x84b   :  { %1163 = vmatpush.msrb.mxu1 %v1017_v37  ;;  %v1239_v37 = vld [vmem:[#allocation10 + $0x118] sm:$0xff] }
 0x84c   :  { %v5447_v35 = vsub.f32 %v5441_v22, %v987_v34  ;;  %v1251_v34 = vld [vmem:[#allocation10 + $0x178] sm:$0xff] }
 0x84d   :  { %1308 = vmatpush.msrb.mxu0 %v1251_v34  ;;  %v1255_v34 = vld [vmem:[#allocation10 + $0x198] sm:$0xff] }
 0x84e   :  { %v989_v36 = vmul.f32 %v5447_v35, %v5447_v35 }
 0x850   :  { %v990_v38 = vsel %vm444_vm3, %v989_v36, 0.0  ;;  %v1267_v36 = vld [vmem:[#allocation10 + $0x1f8] sm:$0xff] }
 0x851   :  { %991 = vadd.xlane.f32.xlu1 %v990_v38  ;;  %v1250_v38 = vld [vmem:[#allocation10 + $0x170] sm:$0xff]  ;;  %1328 = vmatpush.msra.mxu1 %v1267_v36  ;;  %v1209_v36 = vld [vmem:[#allocation10 + $0x28] sm:$0xff] }
 0x852   :  { %1309 = vmatpush.msrb.mxu0 %v1250_v38  ;;  %v1225_v38 = vld [vmem:[#allocation10 + $0xa8] sm:$0xff]  ;;  %1278 = vmatpush.msrb.mxu2 %v1209_v36 }
 0x853   :  { %1329 = vmatpush.msra.mxu1 %v1266_v39  ;;  %v1238_v39 = vld [vmem:[#allocation10 + $0x110] sm:$0xff]  ;;  %1298 = vmatpush.msrb.mxu3 %v1225_v38 }
 0x854   :  { %1310 = vmatpush.msrb.mxu0 %v1249_v40  ;;  %v1254_v40 = vld [vmem:[#allocation10 + $0x190] sm:$0xff] }
 0x855   :  { %1330 = vmatpush.msra.mxu1 %v1265_v42  ;;  %v1224_v42 = vld [vmem:[#allocation10 + $0xa0] sm:$0xff] }
 0x856   :  { %1311 = vmatpush.msrb.mxu0 %v1248_v46  ;;  %v1223_v46 = vld [vmem:[#allocation10 + $0x98] sm:$0xff]  ;;  %1299 = vmatpush.msrb.mxu3 %v1224_v42 }
 0x857   :  { %1331 = vmatpush.msra.mxu1 %v1264_v47  ;;  %v1236_v47 = vld [vmem:[#allocation10 + $0x100] sm:$0xff] }
 0x858   :  { %1312 = vmatpush.msrb.mxu0 %v1247_v1  ;;  %1300 = vmatpush.msrb.mxu3 %v1223_v46 }
 0x859   :  { %1332 = vmatpush.msra.mxu1 %v1263_v2 }
 0x85a   :  { %1313 = vmatpush.msrb.mxu0 %v1246_v5 }
 0x85c   :  { %1314 = vmatpush.msrb.mxu0 %v1245_v56 }
 0x85e   :  { %1315 = vmatpush.msrb.mxu0 %v1244_v11 }
 0x860   :  { %1316 = vmatpush.msrb.mxu0 %v1243_v15 }
 0x862   :  { %1317 = vmatpush.msrb.mxu0 %v1242_v19 }
 0x864   :  { %1318 = vmatpush.msrb.mxu0 %v1241_v24 }
 0x866   :  { %1319 = vmatpush.msrb.mxu0 %v1240_v30 }
 0x868   :  { %1320 = vmatpush.msrb.mxu0 %v1239_v37 }
 0x86a   :  { %1321 = vmatpush.msrb.mxu0 %v1238_v39 }
 0x86c   :  { %1322 = vmatpush.msrb.mxu0 %v1237_v43 }
 0x86e   :  { %1323 = vmatpush.msrb.mxu0 %v1236_v47 }
 0x8c4   :  { %v992_v41 = vpop.xlane.xlu1 %991 }
 0x8c5   :  { %v993_v45 = vmul.f32 %v992_v41, %v5382_v59  ;;  %v1208_v41 = vld [vmem:[#allocation10 + $0x20] sm:$0xff] }
 0x8c6   :  { %1279 = vmatpush.msrb.mxu2 %v1208_v41 }
 0x8c7   :  { %v994_v48 = vadd.f32 1e-05, %v993_v45  ;;  %v1207_v45 = vld [vmem:[#allocation10 + $0x18] sm:$0xff] }
 0x8c8   :  { %1280 = vmatpush.msrb.mxu2 %v1207_v45 }
 0x8c9   :  { %4556 = vrsqrt.f32 %v994_v48  ;;  %vm1001_vm12 = vweird.f32 %v994_v48 }
 0x8cf   :  { %v4557_v49 = vpop.eup %4556 }
 0x8d0   :  { %v996_v50 = vmul.f32 %v4557_v49, %v994_v48  ;;  %vm1002_vm11 = vweird.f32 %v4557_v49  ;;  %v1252_v48 = vld [vmem:[#allocation10 + $0x180] sm:$0xff] }
 0x8d1   :  { %vm1003_vm13 = vmor %vm1001_vm12, %vm1002_vm11  ;;  %vm2608_vm12 = vcmask 64512  }
 0x8d2   :  { %v997_v51 = vmul.f32 %v4557_v49, %v996_v50  ;;  %v1222_v50 = vld [vmem:[#allocation10 + $0x90] sm:$0xff] }
 0x8d3   :  { %1301 = vmatpush.msrb.mxu3 %v1222_v50 }
 0x8d4   :  { %v998_v52 = vmul.f32 0.5, %v997_v51  ;;  %v1205_v51 = vld [vmem:[#allocation10 + $0x8] sm:$0xff] }
 0x8d6   :  { %v999_v53 = vsub.f32 1.5, %v998_v52  ;;  %v1078_v52 = vld [vmem:[%s5788_s20] sm:$0xf] }
 0x8d7   :  { %v1080_v0 = vperm.slane %v1078_v52, 0  ;;  %v1081_v1 = vperm.slane %v1078_v52, 1 }
 0x8d8   :  { %v1000_v54 = vmul.f32 %v4557_v49, %v999_v53  ;;  %v1221_v53 = vld [vmem:[#allocation10 + $0x88] sm:$0xff] }
 0x8d9   :  { %1302 = vmatpush.msrb.mxu3 %v1221_v53 }
 0x8da   :  { %v1004_v57 = vsel %vm1003_vm13, %v4557_v49, %v1000_v54  ;;  %v1206_v49 = vld [vmem:[#allocation10 + $0x10] sm:$0xff]  ;;  %v1204_v54 = vld [vmem:[#allocation10] sm:$0xff] }
 0x8db   :  { %v1005_v58 = vmul.f32 %v1004_v57, %v5447_v35  ;;  %v1262_v35 = vld [vmem:[#allocation10 + $0x1d0] sm:$0xff]  ;;  %1281 = vmatpush.msrb.mxu2 %v1206_v49  ;;  %v1082_v57 = vperm.slane %v1078_v52, 2 }
 0x8dc   :  { %1333 = vmatpush.msra.mxu1 %v1262_v35 }
 0x8dd   :  { %v1009_v61 = vmul.f32 %v4511_v55, %v1005_v58  ;;  %v1220_v55 = vld [vmem:[#allocation10 + $0x80] sm:$0xff]  ;;  %1282 = vmatpush.msrb.mxu2 %v1205_v51  ;;  %v1083_v58 = vperm.slane %v1078_v52, 3 }
 0x8de   :  { %1334 = vmatpush.msra.mxu1 %v1261_v8  ;;  %1303 = vmatpush.msrb.mxu3 %v1220_v55  ;;  %v4513_v51 = vld [vmem:[%s5789_s28] ss:$0 sm:$0xff]  ;;  %v1434_v55 = vld [vmem:[#allocation5 + $0x2e8] sm:$0xff] }
 0x8df   :  { %v1013_v62 = vadd.f32 %v4512_v60, %v1009_v61  ;;  %1283 = vmatpush.msrb.mxu2 %v1204_v54 }
 0x8e0   :  { %1335 = vmatpush.msra.mxu1 %v1260_v12 }
 0x8e1   :  { %1104 = vmatmul.f32.vlgmr.msra.gmra.mxu2 %v1013_v62  ;;  %1124 = vmatmul.f32.vlgmr.msra.gmra.mxu3 %v1013_v62 }
 0x8e2   :  { %1144 = vmatmul.f32.vlgmr.msra.gmra.mxu0 %v1013_v62  ;;  %1164 = vmatmul.f32.vlgmr.msrb.gmra.mxu1 %v1013_v62 }
 0x8e3   :  { %1336 = vmatpush.msra.mxu1 %v1259_v16  ;;  %1446 = vmatpush.msra.mxu2 %v1434_v55 }
 0x8e5   :  { %1337 = vmatpush.msra.mxu1 %v1258_v20 }
 0x8e7   :  { %1338 = vmatpush.msra.mxu1 %v1257_v25 }
 0x8e9   :  { %1339 = vmatpush.msra.mxu1 %v1256_v31 }
 0x8eb   :  { %1340 = vmatpush.msra.mxu1 %v1255_v34 }
 0x8ed   :  { %1341 = vmatpush.msra.mxu1 %v1254_v40 }
 0x8ef   :  { %1342 = vmatpush.msra.mxu1 %v1253_v44 }
 0x8f1   :  { %1343 = vmatpush.msra.mxu1 %v1252_v48 }
 0x95f   :  { %v1145_v60 = vpop.f32.mrf.mxu0  ;;  %v1165_v61 = vpop.f32.mrf.mxu1 }
 0x960   :  { %v1146_v62 = vadd.f32 %v1145_v60, %v1082_v57  ;;  %v1166_v63 = vadd.f32 %v1165_v61, %v1083_v58  ;;  %v1435_v57 = vld [vmem:[#allocation5 + $0x2f0] sm:$0xff]  ;;  %v1436_v58 = vld [vmem:[#allocation5 + $0x2f8] sm:$0xff] }
 0x961   :  { %1466 = vmatpush.msra.mxu3 %v1435_v57  ;;  %v1431_v60 = vld [vmem:[#allocation5 + $0x2d0] sm:$0xff]  ;;  %v1432_v61 = vld [vmem:[#allocation5 + $0x2d8] sm:$0xff]  ;;  %1486 = vmatpush.msra.mxu0 %v1436_v58  ;;  %v4514_v58 = vld [vmem:[%s5782_s5 + $0x1] ss:$0 sm:$0xff]  ;;  %s4956_s5 = scalar_lea.hbm %s4955_s29, 8 }
 0x962   :  { %v1174_v2 = vmul.f32 0.044715, %v1146_v62  ;;  %v1175_v3 = vmul.f32 0.044715, %v1166_v63  ;;  %v1170_v29 = vmul.f32 0.5, %v1146_v62  ;;  %v1171_v31 = vmul.f32 0.5, %v1166_v63  ;;  %1447 = vmatpush.msra.mxu2 %v1431_v60  ;;  %p4957_p4 = scmp.ne.s32.totalorder %s4955_s29, %s4956_s5 }
 0x963   :  { %1467 = vmatpush.msra.mxu3 %v1432_v61 }
 0x964   :  { %v1178_v4 = vmul.f32 %v1174_v2, %v1146_v62  ;;  %v1179_v5 = vmul.f32 %v1175_v3, %v1166_v63  ;;  %v1105_v35 = vpop.f32.mrf.mxu2  ;;  %v1125_v6 = vpop.f32.mrf.mxu3  ;;  %v1428_v3 = vld [vmem:[#allocation5 + $0x2b8] sm:$0xff] }
 0x965   :  { %v1106_v7 = vadd.f32 %v1105_v35, %v1080_v0  ;;  %v1126_v56 = vadd.f32 %v1125_v6, %v1081_v1  ;;  %1448 = vmatpush.msra.mxu2 %v1428_v3  ;;  %v1425_v35 = vld [vmem:[#allocation5 + $0x2a0] sm:$0xff]  ;;  %v1426_v6 = vld [vmem:[#allocation5 + $0x2a8] sm:$0xff] }
 0x966   :  { %v1182_v8 = vmul.f32 %v1178_v4, %v1146_v62  ;;  %v1183_v9 = vmul.f32 %v1179_v5, %v1166_v63  ;;  %v1429_v4 = vld [vmem:[#allocation5 + $0x2c0] sm:$0xff]  ;;  %v1430_v5 = vld [vmem:[#allocation5 + $0x2c8] sm:$0xff] }
 0x967   :  { %v1172_v10 = vmul.f32 0.044715, %v1106_v7  ;;  %v1173_v11 = vmul.f32 0.044715, %v1126_v56  ;;  %v1168_v38 = vmul.f32 0.5, %v1106_v7  ;;  %v1169_v40 = vmul.f32 0.5, %v1126_v56  ;;  %1468 = vmatpush.msra.mxu3 %v1429_v4  ;;  %1449 = vmatpush.msra.mxu2 %v1425_v35 }
 0x968   :  { %v1186_v12 = vadd.f32 %v1182_v8, %v1146_v62  ;;  %v1187_v13 = vadd.f32 %v1183_v9, %v1166_v63  ;;  %v1433_v62 = vld [vmem:[#allocation5 + $0x2e0] sm:$0xff]  ;;  %v1423_v8 = vld [vmem:[#allocation5 + $0x290] sm:$0xff]  ;;  %v1424_v9 = vld [vmem:[#allocation5 + $0x298] sm:$0xff] }
 0x969   :  { %v1176_v14 = vmul.f32 %v1172_v10, %v1106_v7  ;;  %v1177_v15 = vmul.f32 %v1173_v11, %v1126_v56  ;;  %1487 = vmatpush.msra.mxu0 %v1433_v62  ;;  %1469 = vmatpush.msra.mxu3 %v1426_v6  ;;  %v1419_v10 = vld [vmem:[#allocation5 + $0x270] sm:$0xff]  ;;  %v1420_v11 = vld [vmem:[#allocation5 + $0x278] sm:$0xff]  ;;  %v4515_v62 = vld [vmem:[%s5783_s13 + $0x1] ss:$0 sm:$0xff]  ;;  %s4958_s13 = scalar_lea.hbm %s5259_s4, 8 }
 0x96a   :  { %v1190_v16 = vmul.f32 0.7978846, %v1186_v12  ;;  %v1191_v17 = vmul.f32 0.7978846, %v1187_v13  ;;  %v1421_v12 = vld [vmem:[#allocation5 + $0x280] sm:$0xff]  ;;  %v1416_v13 = vld [vmem:[#allocation5 + $0x258] sm:$0xff]  ;;  %p4960_p6 = scmp.lt.s32.totalorder %s4958_s13, %s4956_s5 }
 0x96b   :  { %v1180_v18 = vmul.f32 %v1176_v14, %v1106_v7  ;;  %v1181_v19 = vmul.f32 %v1177_v15, %v1126_v56  ;;  %1488 = vmatpush.msra.mxu0 %v1430_v5  ;;  %1470 = vmatpush.msra.mxu3 %v1423_v8  ;;  %v1417_v14 = vld [vmem:[#allocation5 + $0x260] sm:$0xff]  ;;  %v1418_v15 = vld [vmem:[#allocation5 + $0x268] sm:$0xff] }
 0x96c   :  { %4558 = vtanh.f32 %v1190_v16  ;;  %v1413_v16 = vld [vmem:[#allocation5 + $0x240] sm:$0xff]  ;;  %p4961_p7 = por %p4960_p6, %p4959_p5 }
 0x96d   :  { %4560 = vtanh.f32 %v1191_v17  ;;  %v1184_v20 = vadd.f32 %v1180_v18, %v1106_v7  ;;  %v1185_v21 = vadd.f32 %v1181_v19, %v1126_v56  ;;  %v1427_v7 = vld [vmem:[#allocation5 + $0x2b0] sm:$0xff]  ;;  %v1422_v56 = vld [vmem:[#allocation5 + $0x288] sm:$0xff]  ;;  %1471 = vmatpush.msra.mxu3 %v1420_v11  ;;  %v1510_v11 = vld [vmem:[#allocation7 + $0x98] sm:$0xff] }
 0x96e   :  { %1489 = vmatpush.msra.mxu0 %v1427_v7  ;;  %1450 = vmatpush.msra.mxu2 %v1422_v56  ;;  %v1414_v17 = vld [vmem:[#allocation5 + $0x248] sm:$0xff]  ;;  %v1415_v18 = vld [vmem:[#allocation5 + $0x250] sm:$0xff]  ;;  %p4962_p8 = pnand %p4961_p7, %p4957_p4 }
 0x96f   :  { %v1188_v23 = vmul.f32 0.7978846, %v1184_v20  ;;  %v1189_v24 = vmul.f32 0.7978846, %v1185_v21  ;;  %1472 = vmatpush.msra.mxu3 %v1417_v14  ;;  %v1410_v19 = vld [vmem:[#allocation5 + $0x228] sm:$0xff]  ;;  %v1411_v20 = vld [vmem:[#allocation5 + $0x230] sm:$0xff] }
 0x970   :  { %1490 = vmatpush.msra.mxu0 %v1424_v9  ;;  %1451 = vmatpush.msra.mxu2 %v1419_v10  ;;  %v1412_v21 = vld [vmem:[#allocation5 + $0x238] sm:$0xff]  ;;  %v1507_v14 = vld [vmem:[#allocation7 + $0x80] sm:$0xff] }
 0x971   :  { %4562 = vtanh.f32 %v1188_v23  ;;  %1473 = vmatpush.msra.mxu3 %v1414_v17  ;;  %v1407_v23 = vld [vmem:[#allocation5 + $0x210] sm:$0xff] }
 0x972   :  { %v4559_v25 = vpop.eup %4558  ;;  %4564 = vtanh.f32 %v1189_v24  ;;  %1491 = vmatpush.msra.mxu0 %v1421_v12  ;;  %1452 = vmatpush.msra.mxu2 %v1416_v13  ;;  %v1408_v24 = vld [vmem:[#allocation5 + $0x218] sm:$0xff]  ;;  %v1509_v12 = vld [vmem:[#allocation7 + $0x90] sm:$0xff]  ;;  %v1508_v13 = vld [vmem:[#allocation7 + $0x88] sm:$0xff] }
 0x973   :  { %v4561_v26 = vpop.eup %4560  ;;  %v1198_v30 = vadd.f32 1.0, %v4559_v25  ;;  %1474 = vmatpush.msra.mxu3 %v1411_v20  ;;  %v1409_v25 = vld [vmem:[#allocation5 + $0x220] sm:$0xff] }
 0x974   :  { %v1199_v32 = vadd.f32 1.0, %v4561_v26  ;;  %1492 = vmatpush.msra.mxu0 %v1418_v15  ;;  %1453 = vmatpush.msra.mxu2 %v1413_v16  ;;  %v1404_v26 = vld [vmem:[#allocation5 + $0x1f8] sm:$0xff] }
 0x975   :  { %v1202_v33 = vmul.f32 %v1198_v30, %v1170_v29  ;;  %1475 = vmatpush.msra.mxu3 %v1408_v24  ;;  %v1405_v29 = vld [vmem:[#allocation5 + $0x200] sm:$0xff]  ;;  %v1406_v30 = vld [vmem:[#allocation5 + $0x208] sm:$0xff] }
 0x976   :  { %v1203_v37 = vmul.f32 %v1199_v32, %v1171_v31  ;;  %1493 = vmatpush.msra.mxu0 %v1415_v18  ;;  %1454 = vmatpush.msra.mxu2 %v1410_v19  ;;  %v1401_v31 = vld [vmem:[#allocation5 + $0x1e0] sm:$0xff]  ;;  %v1402_v32 = vld [vmem:[#allocation5 + $0x1e8] sm:$0xff] }
 0x977   :  { %v4563_v34 = vpop.eup %4562  ;;  %1324 = vmatmul.f32.vlgmr.msrb.gmra.mxu0 %v1202_v33  ;;  %1476 = vmatpush.msra.mxu3 %v1405_v29  ;;  %v1403_v33 = vld [vmem:[#allocation5 + $0x1f0] sm:$0xff] }
 0x978   :  { %v4565_v36 = vpop.eup %4564  ;;  %1344 = vmatmul.f32.vlgmr.msra.gmra.mxu1 %v1203_v37  ;;  %v1196_v39 = vadd.f32 1.0, %v4563_v34  ;;  %1494 = vmatpush.msra.mxu0 %v1412_v21  ;;  %v1398_v37 = vld [vmem:[#allocation5 + $0x1c8] sm:$0xff]  ;;  %v1399_v34 = vld [vmem:[#allocation5 + $0x1d0] sm:$0xff] }
 0x979   :  { %v1197_v41 = vadd.f32 1.0, %v4565_v36  ;;  %1455 = vmatpush.msra.mxu2 %v1407_v23  ;;  %1477 = vmatpush.msra.mxu3 %v1402_v32  ;;  %v1400_v36 = vld [vmem:[#allocation5 + $0x1d8] sm:$0xff] }
 0x97a   :  { %v1200_v42 = vmul.f32 %v1196_v39, %v1168_v38  ;;  %1495 = vmatpush.msra.mxu0 %v1409_v25  ;;  %v1395_v38 = vld [vmem:[#allocation5 + $0x1b0] sm:$0xff]  ;;  %v1396_v39 = vld [vmem:[#allocation5 + $0x1b8] sm:$0xff] }
 0x97b   :  { %v1201_v43 = vmul.f32 %v1197_v41, %v1169_v40  ;;  %1456 = vmatpush.msra.mxu2 %v1404_v26  ;;  %1478 = vmatpush.msra.mxu3 %v1399_v34  ;;  %v1397_v40 = vld [vmem:[#allocation5 + $0x1c0] sm:$0xff]  ;;  %v1392_v41 = vld [vmem:[#allocation5 + $0x198] sm:$0xff] }
 0x97c   :  { %1284 = vmatmul.f32.vlgmr.msrb.gmra.mxu2 %v1200_v42  ;;  %1496 = vmatpush.msra.mxu0 %v1406_v30  ;;  %v1393_v42 = vld [vmem:[#allocation5 + $0x1a0] sm:$0xff] }
 0x97d   :  { %1304 = vmatmul.f32.vlgmr.msrb.gmra.mxu3 %v1201_v43  ;;  %1457 = vmatpush.msra.mxu2 %v1401_v31  ;;  %v1394_v43 = vld [vmem:[#allocation5 + $0x1a8] sm:$0xff] }
 0x97e   :  { %1497 = vmatpush.msra.mxu0 %v1403_v33  ;;  %1479 = vmatpush.msra.mxu3 %v1396_v39 }
 0x97f   :  { %1458 = vmatpush.msra.mxu2 %v1398_v37 }
 0x980   :  { %1498 = vmatpush.msra.mxu0 %v1400_v36  ;;  %1480 = vmatpush.msra.mxu3 %v1393_v42 }
 0x981   :  { %1459 = vmatpush.msra.mxu2 %v1395_v38 }
 0x982   :  { %1499 = vmatpush.msra.mxu0 %v1397_v40 }
 0x983   :  { %1460 = vmatpush.msra.mxu2 %v1392_v41 }
 0x984   :  { %1500 = vmatpush.msra.mxu0 %v1394_v43 }
 0x9f4   :  { %v1325_v47 = vpop.f32.mrf.mxu0 }
 0x9f5   :  { %v1345_v49 = vpop.f32.mrf.mxu1 }
 0x9ff   :  { %v1285_v44 = vpop.f32.mrf.mxu2 }
 0xa00   :  { %v1305_v45 = vpop.f32.mrf.mxu3 }
 0xa01   :  { %v1306_v46 = vadd.f32 %v1305_v45, %v1285_v44  ;;  %v1389_v44 = vld [vmem:[#allocation5 + $0x180] sm:$0xff]  ;;  %v1390_v45 = vld [vmem:[#allocation5 + $0x188] sm:$0xff] }
 0xa02   :  { %1461 = vmatpush.msra.mxu2 %v1389_v44  ;;  %1481 = vmatpush.msra.mxu3 %v1390_v45 }
 0xa03   :  { %v1326_v48 = vadd.f32 %v1325_v47, %v1306_v46  ;;  %v1391_v46 = vld [vmem:[#allocation5 + $0x190] sm:$0xff] }
 0xa04   :  { %1501 = vmatpush.msra.mxu0 %v1391_v46  ;;  %1694 = vmatpush.msrb.mxu3 %v1510_v11  ;;  %v1515_v11 = vld [vmem:[#allocation7 + $0xc0] sm:$0xff] }
 0xa05   :  { %v1346_v50 = vadd.f32 %v1345_v49, %v1326_v48 }
 0xa06   :  { %1695 = vmatpush.msrb.mxu3 %v1509_v12  ;;  %v1522_v12 = vld [vmem:[#allocation7 + $0xf8] sm:$0xff] }
 0xa07   :  { %v1348_v52 = vadd.f32 %v1346_v50, %v5441_v22 }
 0xa08   :  { %1696 = vmatpush.msrb.mxu3 %v1508_v13  ;;  %v1521_v13 = vld [vmem:[#allocation7 + $0xf0] sm:$0xff] }
 0xa09   :  { %v5459_v53 = vadd.f32 %v4513_v51, %v1348_v52 }
 0xa0a   :  { %1697 = vmatpush.msrb.mxu3 %v1507_v14 }
 0xa0b   :  { %v1358_v54 = vsel %vm444_vm3, %v5459_v53, 0.0 }
 0xa0c   :  { %1359 = vadd.xlane.f32.xlu2 %v1358_v54 }
 0xa7f   :  { %v1360_v63 = vpop.xlane.xlu2 %1359 }
 0xa80   :  { %v1361_v22 = vmul.f32 %v1360_v63, %v5382_v59 }
 0xa82   :  { %v5465_v0 = vsub.f32 %v5459_v53, %v1361_v22 }
 0xa84   :  { %v1363_v1 = vmul.f32 %v5465_v0, %v5465_v0 }
 0xa86   :  { %v1364_v2 = vsel %vm444_vm3, %v1363_v1, 0.0  ;;  %v4376_v1 = vld [vmem:[%s5784_s17 + $0x3] sm:$0x7] }
 0xa87   :  { %1365 = vadd.xlane.f32.xlu2 %v1364_v2  ;;  %v1440_v2 = vperm.slane %v4376_v1, 0  ;;  %v1441_v3 = vperm.slane %v4376_v1, 1  ;;  %v1442_v4 = vperm.slane %v4376_v1, 2 }
 0xafa   :  { %v1366_v47 = vpop.xlane.xlu2 %1365 }
 0xafb   :  { %v1367_v48 = vmul.f32 %v1366_v47, %v5382_v59 }
 0xafd   :  { %v1368_v49 = vadd.f32 1e-05, %v1367_v48 }
 0xaff   :  { %4566 = vrsqrt.f32 %v1368_v49  ;;  %vm1375_vm15 = vweird.f32 %v1368_v49 }
 0xb05   :  { %v4567_v50 = vpop.eup %4566 }
 0xb06   :  { %v1370_v51 = vmul.f32 %v4567_v50, %v1368_v49  ;;  %vm1376_vm14 = vweird.f32 %v4567_v50 }
 0xb07   :  { %vm1377_vm0 = vmor %vm1375_vm15, %vm1376_vm14 }
 0xb08   :  { %v1371_v52 = vmul.f32 %v4567_v50, %v1370_v51 }
 0xb0a   :  { %v1372_v54 = vmul.f32 0.5, %v1371_v52 }
 0xb0c   :  { %v1373_v55 = vsub.f32 1.5, %v1372_v54 }
 0xb0e   :  { %v1374_v57 = vmul.f32 %v4567_v50, %v1373_v55 }
 0xb10   :  { %v1378_v60 = vsel %vm1377_vm0, %v4567_v50, %v1374_v57 }
 0xb11   :  { %v1379_v61 = vmul.f32 %v1378_v60, %v5465_v0 }
 0xb13   :  { %v1383_v63 = vmul.f32 %v4514_v58, %v1379_v61 }
 0xb15   :  { %v1387_v22 = vadd.f32 %v4515_v62, %v1383_v63 }
 0xb17   :  { %1462 = vmatmul.f32.vlgmr.msra.gmra.mxu2 %v1387_v22  ;;  %1482 = vmatmul.f32.vlgmr.msra.gmra.mxu3 %v1387_v22 }
 0xb18   :  { %1502 = vmatmul.f32.vlgmr.msra.gmra.mxu0 %v1387_v22 }
 0xb95   :  { %v1503_v5 = vpop.f32.mrf.mxu0 }
 0xb96   :  { %v5475_v8 = vadd.f32 %v1503_v5, %v1442_v4 }
 0xb9a   :  { %v1463_v35 = vpop.f32.mrf.mxu2  ;;  %v1483_v6 = vpop.f32.mrf.mxu3 }
 0xb9b   :  { %v1464_v7 = vadd.f32 %v1463_v35, %v1440_v2  ;;  %v1484_v56 = vadd.f32 %v1483_v6, %v1441_v3  ;;  %v1514_v35 = vld [vmem:[#allocation7 + $0xb8] sm:$0xff]  ;;  %v1513_v6 = vld [vmem:[#allocation7 + $0xb0] sm:$0xff] }
 0xb9c   :  { %1671 = vmatpush.msrb.mxu2 %v1514_v35  ;;  %v1963_v35 = vld [vmem:[#allocation8 + $0x338] sm:$0xff] }
 0xb9d   :  { %4378 = vmatpush.xpose.msk.msrb.mxu1 %vm615_vm8, %v1484_v56  ;;  %1589 = vrot.lane.b32.xlu1 %v1464_v7, %s5042_s21 }
 0xb9e   :  { %1672 = vmatpush.msrb.mxu2 %v1513_v6  ;;  %v1956_v6 = vld [vmem:[#allocation8 + $0x300] sm:$0xff] }
 0xba0   :  { %4379 = vmatmul.msk.f32.vlgmr.msrb.gmra.mxu1 %vm615_vm8, %v1464_v7 }
 0xba1   :  { %4380 = vmatpush.msk.msra.mxu1 %vm444_vm3, %v5475_v8 }
 0xba5   :  { %1793 = vrot.lane.b32.xlu1 %v1464_v7, %s5028_s7 }
 0xc0f   :  { %v1590_v29 = vpop.permute.xlu1 %1589 }
 0xc17   :  { %v1794_v32 = vpop.permute.xlu1 %1793 }
 0xc1d   :  { %v1548_v0 = vpop.f32.mrf.mxu1 }
 0xc1e   :  { %v1551_v9 = vmul.f32 0.17677669, %v1548_v0  ;;  %v1518_v0 = vld [vmem:[#allocation7 + $0xd8] sm:$0xff] }
 0xc20   :  { %v1552_v10 = vsel %vm643_vm9, %v1551_v9, -inf }
 0xc21   :  { %1553 = vmax.xlane.f32.xlu0 %v1552_v10  ;;  %v1516_v10 = vld [vmem:[#allocation7 + $0xc8] sm:$0xff] }
 0xc35   :  { %1795 = vrot.lane.b32.xlu0 %v1484_v56, %s5028_s7 }
 0xc94   :  { %v1554_v15 = vpop.xlane.xlu0 %1553 }
 0xc95   :  { %v1555_v16 = vsub.f32 %v1551_v9, %v1554_v15  ;;  %v1517_v9 = vld [vmem:[#allocation7 + $0xd0] sm:$0xff] }
 0xc97   :  { %v1556_v17 = vmul.f32 1.442695, %v1555_v16 }
 0xc99   :  { %4568 = vpow2.f32 %v1556_v17 }
 0xc9f   :  { %v4569_v18 = vpop.eup %4568 }
 0xca0   :  { %v1558_v19 = vsel %vm643_vm9, %v4569_v18, 0.0 }
 0xca1   :  { %1559 = vadd.xlane.f32.xlu2 %v1558_v19 }
 0xca7   :  { %v1796_v20 = vpop.permute.xlu0 %1795 }
 0xca8   :  { %4393 = vmatpush.xpose.msk.msra.mxu3 %vm615_vm8, %v1796_v20  ;;  %v1519_v20 = vld [vmem:[#allocation7 + $0xe0] sm:$0xff] }
 0xcb9   :  { %1591 = vrot.lane.b32.xlu2 %v1484_v56, %s5042_s21 }
 0xcc1   :  { %1704 = vrot.lane.b32.xlu2 %v1484_v56, %s5043_s25  ;;  %v1511_v56 = vld [vmem:[#allocation7 + $0xa0] sm:$0xff] }
 0xcc9   :  { %1702 = vrot.lane.b32.xlu2 %v1464_v7, %s5043_s25  ;;  %v1512_v7 = vld [vmem:[#allocation7 + $0xa8] sm:$0xff] }
 0xcca   :  { %1673 = vmatpush.msrb.mxu2 %v1512_v7  ;;  %v1957_v7 = vld [vmem:[#allocation8 + $0x308] sm:$0xff] }
 0xccc   :  { %1674 = vmatpush.msrb.mxu2 %v1511_v56  ;;  %v1958_v56 = vld [vmem:[#allocation8 + $0x310] sm:$0xff] }
 0xcce   :  { %1784 = vmatpush.msra.mxu2 %v1518_v0  ;;  %v1959_v0 = vld [vmem:[#allocation8 + $0x318] sm:$0xff] }
 0xcd0   :  { %1785 = vmatpush.msra.mxu2 %v1517_v9  ;;  %v1952_v9 = vld [vmem:[#allocation8 + $0x2e0] sm:$0xff] }
 0xcd2   :  { %1786 = vmatpush.msra.mxu2 %v1516_v10  ;;  %v1953_v10 = vld [vmem:[#allocation8 + $0x2e8] sm:$0xff] }
 0xcd4   :  { %1787 = vmatpush.msra.mxu2 %v1515_v11  ;;  %v1954_v11 = vld [vmem:[#allocation8 + $0x2f0] sm:$0xff] }
 0xd14   :  { %v1560_v21 = vpop.xlane.xlu2 %1559 }
 0xd15   :  { %4570 = vrcp.f32 %v1560_v21 }
 0xd1b   :  { %v4571_v23 = vpop.eup %4570 }
 0xd1c   :  { %v1562_v24 = vmul.f32 %v4571_v23, %v4569_v18  ;;  %v1592_v25 = vpop.permute.xlu2 %1591 }
 0xd1d   :  { %4382 = vmatpush.xpose.msk.msrb.mxu1 %vm615_vm8, %v1592_v25 }
 0xd1e   :  { %4381 = vmatmul.msk.f32.vlgmr.msra.gmra.mxu1 %vm655_vm10, %v1562_v24 }
 0xd24   :  { %v1705_v26 = vpop.permute.xlu2 %1704 }
 0xd25   :  { %4388 = vmatpush.xpose.msk.msrb.mxu0 %vm615_vm8, %v1705_v26 }
 0xd26   :  { %4383 = vmatmul.msk.f32.vlgmr.msrb.gmra.mxu1 %vm615_vm8, %v1590_v29  ;;  %v4516_v29 = vld [vmem:[%s5785_s2 + $0x1] ss:$0 sm:$0xff] }
 0xd2c   :  { %v1703_v30 = vpop.permute.xlu2 %1702 }
 0xd2d   :  { %4389 = vmatmul.msk.f32.vlgmr.msrb.gmra.mxu0 %vm615_vm8, %v1703_v30 }
 0xd9b   :  { %v1586_v31 = vpop.f32.mrf.mxu1 }
 0xd9c   :  { %4387 = vmatmul.msk.f32.vlgmr.msrb.gmra.mxu3 %vm615_vm8, %v1586_v31 }
 0xda3   :  { %v1614_v33 = vpop.f32.mrf.mxu1 }
 0xda4   :  { %v1617_v37 = vmul.f32 0.17677669, %v1614_v33  ;;  %4394 = vmatmul.msk.f32.vlgmr.msra.gmra.mxu3 %vm615_vm8, %v1794_v32 }
 0xda6   :  { %v1618_v34 = vsel %vm643_vm9, %v1617_v37, -inf }
 0xda7   :  { %1619 = vmax.xlane.f32.xlu2 %v1618_v34  ;;  %v1984_v34 = vld [vmem:[#allocation8 + $0x3e0] sm:$0xff] }
 0xdaa   :  { %v1727_v36 = vpop.f32.mrf.mxu0 }
 0xdab   :  { %v1730_v38 = vmul.f32 0.17677669, %v1727_v36  ;;  %v1985_v36 = vld [vmem:[#allocation8 + $0x3e8] sm:$0xff] }
 0xdac   :  { %2019 = vmatpush.msrb.mxu3 %v1985_v36  ;;  %v1928_v36 = vld [vmem:[#allocation8 + $0x220] sm:$0xff] }
 0xdad   :  { %v1731_v39 = vsel %vm643_vm9, %v1730_v38, -inf }
 0xdae   :  { %1732 = vmax.xlane.f32.xlu1 %v1731_v39  ;;  %v1987_v39 = vld [vmem:[#allocation8 + $0x3f8] sm:$0xff] }
 0xe1a   :  { %v1620_v40 = vpop.xlane.xlu2 %1619 }
 0xe1b   :  { %v1621_v41 = vsub.f32 %v1617_v37, %v1620_v40  ;;  %v1980_v40 = vld [vmem:[#allocation8 + $0x3c0] sm:$0xff] }
 0xe1d   :  { %v1622_v42 = vmul.f32 1.442695, %v1621_v41  ;;  %v1981_v41 = vld [vmem:[#allocation8 + $0x3c8] sm:$0xff] }
 0xe1e   :  { %2020 = vmatpush.msrb.mxu3 %v1981_v41  ;;  %v1924_v41 = vld [vmem:[#allocation8 + $0x200] sm:$0xff] }
 0xe1f   :  { %4572 = vpow2.f32 %v1622_v42  ;;  %v5499_v43 = vpop.f32.mrf.mxu3  ;;  %v1982_v42 = vld [vmem:[#allocation8 + $0x3d0] sm:$0xff] }
 0xe21   :  { %v1733_v44 = vpop.xlane.xlu1 %1732 }
 0xe22   :  { %v1734_v45 = vsub.f32 %v1730_v38, %v1733_v44  ;;  %v1986_v38 = vld [vmem:[#allocation8 + $0x3f0] sm:$0xff] }
 0xe24   :  { %v1735_v46 = vmul.f32 1.442695, %v1734_v45 }
 0xe25   :  { %v4573_v47 = vpop.eup %4572 }
 0xe26   :  { %4574 = vpow2.f32 %v1735_v46  ;;  %v1624_v48 = vsel %vm643_vm9, %v4573_v47, 0.0 }
 0xe27   :  { %1625 = vadd.xlane.f32.xlu2 %v1624_v48  ;;  %v1818_v49 = vpop.f32.mrf.mxu3  ;;  %v1976_v48 = vld [vmem:[#allocation8 + $0x3a0] sm:$0xff] }
 0xe28   :  { %v1821_v50 = vmul.f32 0.17677669, %v1818_v49  ;;  %v1977_v49 = vld [vmem:[#allocation8 + $0x3a8] sm:$0xff] }
 0xe29   :  { %2021 = vmatpush.msrb.mxu3 %v1977_v49  ;;  %v2161_v49 = vld [vmem:[#allocation10 + $0x368] sm:$0xff] }
 0xe2a   :  { %v1822_v51 = vsel %vm643_vm9, %v1821_v50, -inf }
 0xe2b   :  { %1823 = vmax.xlane.f32.xlu0 %v1822_v51  ;;  %v1979_v51 = vld [vmem:[#allocation8 + $0x3b8] sm:$0xff] }
 0xe2c   :  { %v4575_v52 = vpop.eup %4574 }
 0xe2d   :  { %v1737_v54 = vsel %vm643_vm9, %v4575_v52, 0.0 }
 0xe2e   :  { %1738 = vadd.xlane.f32.xlu1 %v1737_v54  ;;  %v1973_v54 = vld [vmem:[#allocation8 + $0x388] sm:$0xff] }
 0xe2f   :  { %2022 = vmatpush.msrb.mxu3 %v1973_v54  ;;  %v2147_v54 = vld [vmem:[#allocation10 + $0x2f8] sm:$0xff] }
 0xe3f   :  { %1629 = vrot.lane.b32.xlu0 %v5475_v8, %s5042_s21 }
 0xe47   :  { %1742 = vrot.lane.b32.xlu1 %v5475_v8, %s5043_s25 }
 0xe9a   :  { %v1626_v60 = vpop.xlane.xlu2 %1625 }
 0xe9e   :  { %v1824_v55 = vpop.xlane.xlu0 %1823 }
 0xe9f   :  { %v1825_v57 = vsub.f32 %v1821_v50, %v1824_v55  ;;  %v1978_v50 = vld [vmem:[#allocation8 + $0x3b0] sm:$0xff] }
 0xea0   :  { %v1974_v55 = vld [vmem:[#allocation8 + $0x390] sm:$0xff] }
 0xea1   :  { %v1826_v58 = vmul.f32 1.442695, %v1825_v57  ;;  %v1739_v63 = vpop.xlane.xlu1 %1738  ;;  %v1975_v57 = vld [vmem:[#allocation8 + $0x398] sm:$0xff] }
 0xea3   :  { %4576 = vpow2.f32 %v1826_v58  ;;  %v1968_v58 = vld [vmem:[#allocation8 + $0x360] sm:$0xff] }
 0xea4   :  { %4578 = vrcp.f32 %v1626_v60  ;;  %v1969_v60 = vld [vmem:[#allocation8 + $0x368] sm:$0xff] }
 0xea5   :  { %4580 = vrcp.f32 %v1739_v63  ;;  %2023 = vmatpush.msrb.mxu3 %v1969_v60  ;;  %v1964_v63 = vld [vmem:[#allocation8 + $0x340] sm:$0xff] }
 0xea9   :  { %v4577_v61 = vpop.eup %4576 }
 0xeaa   :  { %v1828_v62 = vsel %vm643_vm9, %v4577_v61, 0.0  ;;  %v4579_v22 = vpop.eup %4578 }
 0xeab   :  { %1829 = vadd.xlane.f32.xlu2 %v1828_v62  ;;  %v1628_v1 = vmul.f32 %v4579_v22, %v4573_v47  ;;  %v4581_v3 = vpop.eup %4580  ;;  %v1971_v62 = vld [vmem:[#allocation8 + $0x378] sm:$0xff]  ;;  %v1965_v22 = vld [vmem:[#allocation8 + $0x348] sm:$0xff] }
 0xeac   :  { %v1741_v4 = vmul.f32 %v4581_v3, %v4575_v52  ;;  %v1972_v52 = vld [vmem:[#allocation8 + $0x380] sm:$0xff]  ;;  %2024 = vmatpush.msrb.mxu3 %v1965_v22 }
 0xead   :  { %v1960_v3 = vld [vmem:[#allocation8 + $0x320] sm:$0xff] }
 0xeb1   :  { %v1630_v2 = vpop.permute.xlu0 %1629 }
 0xeb2   :  { %4384 = vmatpush.msk.msra.mxu1 %vm444_vm3, %v1630_v2  ;;  %v1967_v2 = vld [vmem:[#allocation8 + $0x358] sm:$0xff] }
 0xeb3   :  { %4385 = vmatmul.msk.f32.vlgmr.msra.gmra.mxu1 %vm655_vm10, %v1628_v1  ;;  %v1966_v1 = vld [vmem:[#allocation8 + $0x350] sm:$0xff] }
 0xeb9   :  { %v1743_v5 = vpop.permute.xlu1 %1742 }
 0xeba   :  { %4390 = vmatpush.msk.msrb.mxu1 %vm444_vm3, %v1743_v5  ;;  %v1962_v5 = vld [vmem:[#allocation8 + $0x330] sm:$0xff] }
 0xebb   :  { %4391 = vmatmul.msk.f32.vlgmr.msrb.gmra.mxu1 %vm655_vm10, %v1741_v4  ;;  %v1961_v4 = vld [vmem:[#allocation8 + $0x328] sm:$0xff] }
 0xebc   :  { %1875 = vmatpush.msra.mxu1 %v1522_v12  ;;  %2025 = vmatpush.msrb.mxu3 %v1961_v4  ;;  %v1955_v12 = vld [vmem:[#allocation8 + $0x2f8] sm:$0xff] }
 0xebe   :  { %1876 = vmatpush.msra.mxu1 %v1521_v13  ;;  %2026 = vmatpush.msrb.mxu3 %v1957_v7  ;;  %v1948_v13 = vld [vmem:[#allocation8 + $0x2c0] sm:$0xff] }
 0xec0   :  { %2027 = vmatpush.msrb.mxu3 %v1953_v10  ;;  %v2175_v10 = vld [vmem:[#allocation10 + $0x3d8] sm:$0xff] }
 0xec3   :  { %1833 = vrot.lane.b32.xlu2 %v5475_v8, %s5028_s7  ;;  %v1520_v8 = vld [vmem:[#allocation7 + $0xe8] sm:$0xff] }
 0xec4   :  { %1877 = vmatpush.msra.mxu1 %v1520_v8  ;;  %v1949_v8 = vld [vmem:[#allocation8 + $0x2c8] sm:$0xff] }
 0xec5   :  { %2028 = vmatpush.msrb.mxu3 %v1949_v8  ;;  %v2128_v8 = vld [vmem:[#allocation10 + $0x260] sm:$0xff] }
 0xec6   :  { %1878 = vmatpush.msra.mxu1 %v1519_v20  ;;  %v1940_v20 = vld [vmem:[#allocation8 + $0x280] sm:$0xff] }
 0xec8   :  { %2059 = vmatpush.msrb.mxu1 %v1987_v39  ;;  %v1930_v39 = vld [vmem:[#allocation8 + $0x230] sm:$0xff] }
 0xf1e   :  { %v1830_v14 = vpop.xlane.xlu2 %1829 }
 0xf1f   :  { %4582 = vrcp.f32 %v1830_v14  ;;  %v1950_v14 = vld [vmem:[#allocation8 + $0x2d0] sm:$0xff] }
 0xf25   :  { %v4583_v15 = vpop.eup %4582 }
 0xf26   :  { %v1832_v16 = vmul.f32 %v4583_v15, %v4577_v61  ;;  %v1834_v17 = vpop.permute.xlu2 %1833  ;;  %v1970_v61 = vld [vmem:[#allocation8 + $0x370] sm:$0xff]  ;;  %v1951_v15 = vld [vmem:[#allocation8 + $0x2d8] sm:$0xff] }
 0xf27   :  { %4395 = vmatpush.msk.msra.mxu0 %vm444_vm3, %v1834_v17  ;;  %v1945_v17 = vld [vmem:[#allocation8 + $0x2a8] sm:$0xff] }
 0xf28   :  { %4396 = vmatmul.msk.f32.vlgmr.msra.gmra.mxu0 %vm655_vm10, %v1832_v16  ;;  %v1944_v16 = vld [vmem:[#allocation8 + $0x2a0] sm:$0xff]  ;;  %2029 = vmatpush.msrb.mxu3 %v1945_v17  ;;  %v2127_v17 = vld [vmem:[#allocation10 + $0x258] sm:$0xff] }
 0xf29   :  { %2039 = vmatpush.msrb.mxu0 %v1986_v38  ;;  %v1929_v38 = vld [vmem:[#allocation8 + $0x228] sm:$0xff] }
 0xf2b   :  { %2040 = vmatpush.msrb.mxu0 %v1982_v42  ;;  %v1925_v42 = vld [vmem:[#allocation8 + $0x208] sm:$0xff] }
 0xf2d   :  { %2041 = vmatpush.msrb.mxu0 %v1978_v50 }
 0xf2f   :  { %2042 = vmatpush.msrb.mxu0 %v1974_v55 }
 0xf30   :  { %v1653_v18 = vpop.f32.mrf.mxu1 }
 0xf31   :  { %4386 = vmatmul.msk.f32.vlgmr.msrb.gmra.mxu2 %vm615_vm8, %v1653_v18  ;;  %2043 = vmatpush.msrb.mxu0 %v1970_v61  ;;  %v1946_v18 = vld [vmem:[#allocation8 + $0x2b0] sm:$0xff] }
 0xf32   :  { %1999 = vmatpush.msrb.mxu2 %v1984_v34  ;;  %v1935_v34 = vld [vmem:[#allocation8 + $0x258] sm:$0xff] }
 0xf33   :  { %2044 = vmatpush.msrb.mxu0 %v1966_v1 }
 0xf34   :  { %2000 = vmatpush.msrb.mxu2 %v1980_v40  ;;  %v1931_v40 = vld [vmem:[#allocation8 + $0x238] sm:$0xff] }
 0xf35   :  { %2045 = vmatpush.msrb.mxu0 %v1962_v5 }
 0xf36   :  { %2001 = vmatpush.msrb.mxu2 %v1976_v48  ;;  %v2178_v48 = vld [vmem:[#allocation10 + $0x3f0] sm:$0xff] }
 0xf37   :  { %2046 = vmatpush.msrb.mxu0 %v1958_v56  ;;  %v2130_v56 = vld [vmem:[#allocation10 + $0x270] sm:$0xff] }
 0xf38   :  { %v1766_v19 = vpop.f32.mrf.mxu1  ;;  %2002 = vmatpush.msrb.mxu2 %v1972_v52  ;;  %v2131_v52 = vld [vmem:[#allocation10 + $0x278] sm:$0xff] }
 0xf39   :  { %4392 = vmatmul.msk.f32.vlgmr.msra.gmra.mxu2 %vm615_vm8, %v1766_v19  ;;  %2047 = vmatpush.msrb.mxu0 %v1954_v11  ;;  %v1947_v19 = vld [vmem:[#allocation8 + $0x2b8] sm:$0xff]  ;;  %v2129_v11 = vld [vmem:[#allocation10 + $0x268] sm:$0xff] }
 0xf3a   :  { %2003 = vmatpush.msrb.mxu2 %v1968_v58  ;;  %v2176_v58 = vld [vmem:[#allocation10 + $0x3e0] sm:$0xff] }
 0xf3b   :  { %2048 = vmatpush.msrb.mxu0 %v1950_v14  ;;  %v2144_v14 = vld [vmem:[#allocation10 + $0x2e0] sm:$0xff] }
 0xf3c   :  { %2004 = vmatpush.msrb.mxu2 %v1964_v63 }
 0xf3d   :  { %2049 = vmatpush.msrb.mxu0 %v1946_v18  ;;  %v2143_v18 = vld [vmem:[#allocation10 + $0x2d8] sm:$0xff] }
 0xf3e   :  { %2005 = vmatpush.msrb.mxu2 %v1960_v3  ;;  %v4517_v3 = vld [vmem:[%s5786_s15 + $0x1] ss:$0 sm:$0xff] }
 0xf40   :  { %2006 = vmatpush.msrb.mxu2 %v1956_v6 }
 0xf42   :  { %2007 = vmatpush.msrb.mxu2 %v1952_v9  ;;  %v2159_v9 = vld [vmem:[#allocation10 + $0x358] sm:$0xff] }
 0xf44   :  { %2008 = vmatpush.msrb.mxu2 %v1948_v13  ;;  %v2158_v13 = vld [vmem:[#allocation10 + $0x350] sm:$0xff] }
 0xf46   :  { %2009 = vmatpush.msrb.mxu2 %v1944_v16  ;;  %v2173_v16 = vld [vmem:[#allocation10 + $0x3c8] sm:$0xff] }
 0xf48   :  { %2010 = vmatpush.msrb.mxu2 %v1940_v20  ;;  %v2172_v20 = vld [vmem:[#allocation10 + $0x3c0] sm:$0xff] }
 0xfa5   :  { %v1857_v21 = vpop.f32.mrf.mxu0 }
 0xfa6   :  { %4397 = vmatmul.msk.f32.vlgmr.msra.gmra.mxu1 %vm615_vm8, %v1857_v21  ;;  %v1941_v21 = vld [vmem:[#allocation8 + $0x288] sm:$0xff] }
 0xfa7   :  { %2030 = vmatpush.msrb.mxu3 %v1941_v21  ;;  %v2126_v21 = vld [vmem:[#allocation10 + $0x250] sm:$0xff] }
 0xfb4   :  { %v1676_v23 = vpop.f32.mrf.mxu2 }
 0xfb5   :  { %v1700_v25 = vadd.f32 %v5499_v43, %v1676_v23  ;;  %v1983_v43 = vld [vmem:[#allocation8 + $0x3d8] sm:$0xff]  ;;  %v1942_v23 = vld [vmem:[#allocation8 + $0x290] sm:$0xff] }
 0xfb6   :  { %2060 = vmatpush.msrb.mxu1 %v1983_v43  ;;  %2050 = vmatpush.msrb.mxu0 %v1942_v23  ;;  %v1926_v43 = vld [vmem:[#allocation8 + $0x210] sm:$0xff] }
 0xfb7   :  { %v2142_v23 = vld [vmem:[#allocation10 + $0x2d0] sm:$0xff] }
 0xfb8   :  { %2061 = vmatpush.msrb.mxu1 %v1979_v51  ;;  %v2177_v51 = vld [vmem:[#allocation10 + $0x3e8] sm:$0xff] }
 0xfba   :  { %2062 = vmatpush.msrb.mxu1 %v1975_v57  ;;  %v2160_v57 = vld [vmem:[#allocation10 + $0x360] sm:$0xff] }
 0xfbc   :  { %v1789_v24 = vpop.f32.mrf.mxu2  ;;  %2063 = vmatpush.msrb.mxu1 %v1971_v62 }
 0xfbd   :  { %v1792_v26 = vadd.f32 %v1789_v24, %v1700_v25  ;;  %v1943_v24 = vld [vmem:[#allocation8 + $0x298] sm:$0xff]  ;;  %v1936_v25 = vld [vmem:[#allocation8 + $0x260] sm:$0xff] }
 0xfbe   :  { %2064 = vmatpush.msrb.mxu1 %v1967_v2  ;;  %2011 = vmatpush.msrb.mxu2 %v1936_v25  ;;  %v2171_v25 = vld [vmem:[#allocation10 + $0x3b8] sm:$0xff] }
 0xfc0   :  { %2065 = vmatpush.msrb.mxu1 %v1963_v35  ;;  %v4518_v35 = vld [vmem:[%s5787_s1 + $0x1] ss:$0 sm:$0xff] }
 0xfc2   :  { %2066 = vmatpush.msrb.mxu1 %v1959_v0  ;;  %v2146_v0 = vld [vmem:[#allocation10 + $0x2f0] sm:$0xff] }
 0xfc4   :  { %2067 = vmatpush.msrb.mxu1 %v1955_v12  ;;  %v2145_v12 = vld [vmem:[#allocation10 + $0x2e8] sm:$0xff] }
 0xfc6   :  { %2068 = vmatpush.msrb.mxu1 %v1951_v15  ;;  %v2157_v15 = vld [vmem:[#allocation10 + $0x348] sm:$0xff] }
 0xfc8   :  { %2069 = vmatpush.msrb.mxu1 %v1947_v19  ;;  %v2156_v19 = vld [vmem:[#allocation10 + $0x340] sm:$0xff] }
 0xfca   :  { %2070 = vmatpush.msrb.mxu1 %v1943_v24  ;;  %v2155_v24 = vld [vmem:[#allocation10 + $0x338] sm:$0xff] }
0x1023   :  { %v1880_v30 = vpop.f32.mrf.mxu1 }
0x1024   :  { %v1883_v31 = vadd.f32 %v1880_v30, %v1792_v26  ;;  %v1937_v26 = vld [vmem:[#allocation8 + $0x268] sm:$0xff]  ;;  %v1939_v30 = vld [vmem:[#allocation8 + $0x278] sm:$0xff] }
0x1025   :  { %2031 = vmatpush.msrb.mxu3 %v1937_v26  ;;  %2071 = vmatpush.msrb.mxu1 %v1939_v30  ;;  %v2125_v26 = vld [vmem:[#allocation10 + $0x248] sm:$0xff]  ;;  %v2154_v30 = vld [vmem:[#allocation10 + $0x330] sm:$0xff] }
0x1026   :  { %v1887_v32 = vadd.f32 %v4516_v29, %v1883_v31  ;;  %v1938_v29 = vld [vmem:[#allocation8 + $0x270] sm:$0xff]  ;;  %v1932_v31 = vld [vmem:[#allocation8 + $0x240] sm:$0xff] }
0x1027   :  { %2051 = vmatpush.msrb.mxu0 %v1938_v29  ;;  %2012 = vmatpush.msrb.mxu2 %v1932_v31  ;;  %v2141_v29 = vld [vmem:[#allocation10 + $0x2c8] sm:$0xff]  ;;  %v2170_v31 = vld [vmem:[#allocation10 + $0x3b0] sm:$0xff] }
0x1028   :  { %v5523_v33 = vadd.f32 %v1887_v32, %v5459_v53  ;;  %v1933_v32 = vld [vmem:[#allocation8 + $0x248] sm:$0xff]  ;;  %2072 = vmatpush.msrb.mxu1 %v1935_v34 }
0x1029   :  { %2032 = vmatpush.msrb.mxu3 %v1933_v32  ;;  %2013 = vmatpush.msrb.mxu2 %v1928_v36  ;;  %v2124_v32 = vld [vmem:[#allocation10 + $0x240] sm:$0xff]  ;;  %v2153_v34 = vld [vmem:[#allocation10 + $0x328] sm:$0xff] }
0x102a   :  { %v1893_v37 = vsel %vm444_vm3, %v5523_v33, 0.0  ;;  %2073 = vmatpush.msrb.mxu1 %v1931_v40  ;;  %v2169_v36 = vld [vmem:[#allocation10 + $0x3a8] sm:$0xff]  ;;  %v2152_v40 = vld [vmem:[#allocation10 + $0x320] sm:$0xff] }
0x102b   :  { %1894 = vadd.xlane.f32.xlu0 %v1893_v37  ;;  %v1934_v37 = vld [vmem:[#allocation8 + $0x250] sm:$0xff]  ;;  %2033 = vmatpush.msrb.mxu3 %v1929_v38  ;;  %v2123_v38 = vld [vmem:[#allocation10 + $0x238] sm:$0xff] }
0x102c   :  { %2052 = vmatpush.msrb.mxu0 %v1934_v37  ;;  %2014 = vmatpush.msrb.mxu2 %v1924_v41  ;;  %v2140_v37 = vld [vmem:[#allocation10 + $0x2c0] sm:$0xff] }
0x102d   :  { %2034 = vmatpush.msrb.mxu3 %v1925_v42  ;;  %v2168_v41 = vld [vmem:[#allocation10 + $0x3a0] sm:$0xff]  ;;  %v2122_v42 = vld [vmem:[#allocation10 + $0x230] sm:$0xff] }
0x102e   :  { %2053 = vmatpush.msrb.mxu0 %v1930_v39  ;;  %2180 = vmatpush.msra.mxu2 %v2131_v52  ;;  %v2139_v39 = vld [vmem:[#allocation10 + $0x2b8] sm:$0xff]  ;;  %v2149_v52 = vld [vmem:[#allocation10 + $0x308] sm:$0xff] }
0x102f   :  { %2200 = vmatpush.msra.mxu3 %v2147_v54  ;;  %v2165_v54 = vld [vmem:[#allocation10 + $0x388] sm:$0xff] }
0x1030   :  { %2054 = vmatpush.msrb.mxu0 %v1926_v43  ;;  %2181 = vmatpush.msra.mxu2 %v2130_v56  ;;  %v2138_v43 = vld [vmem:[#allocation10 + $0x2b0] sm:$0xff] }
0x1031   :  { %2201 = vmatpush.msra.mxu3 %v2146_v0 }
0x1032   :  { %2182 = vmatpush.msra.mxu2 %v2129_v11 }
0x1033   :  { %2202 = vmatpush.msra.mxu3 %v2145_v12 }
0x1034   :  { %2183 = vmatpush.msra.mxu2 %v2128_v8 }
0x1035   :  { %2203 = vmatpush.msra.mxu3 %v2144_v14 }
0x1036   :  { %2184 = vmatpush.msra.mxu2 %v2127_v17 }
0x1037   :  { %2204 = vmatpush.msra.mxu3 %v2143_v18 }
0x1038   :  { %2185 = vmatpush.msra.mxu2 %v2126_v21 }
0x1039   :  { %2205 = vmatpush.msra.mxu3 %v2142_v23 }
0x103a   :  { %2186 = vmatpush.msra.mxu2 %v2125_v26 }
0x103b   :  { %2206 = vmatpush.msra.mxu3 %v2141_v29 }
0x103c   :  { %2187 = vmatpush.msra.mxu2 %v2124_v32 }
0x103d   :  { %2207 = vmatpush.msra.mxu3 %v2140_v37 }
0x103e   :  { %2188 = vmatpush.msra.mxu2 %v2123_v38 }
0x103f   :  { %2208 = vmatpush.msra.mxu3 %v2139_v39 }
0x1040   :  { %2189 = vmatpush.msra.mxu2 %v2122_v42 }
0x1041   :  { %2209 = vmatpush.msra.mxu3 %v2138_v43 }
0x109e   :  { %v1895_v53 = vpop.xlane.xlu0 %1894 }
0x109f   :  { %v1896_v44 = vmul.f32 %v1895_v53, %v5382_v59  ;;  %v1927_v53 = vld [vmem:[#allocation8 + $0x218] sm:$0xff] }
0x10a0   :  { %2074 = vmatpush.msrb.mxu1 %v1927_v53  ;;  %v2151_v53 = vld [vmem:[#allocation10 + $0x318] sm:$0xff] }
0x10a1   :  { %v5529_v45 = vsub.f32 %v5523_v33, %v1896_v44  ;;  %v2163_v44 = vld [vmem:[#allocation10 + $0x378] sm:$0xff] }
0x10a2   :  { %2220 = vmatpush.msra.mxu0 %v2163_v44  ;;  %v2167_v44 = vld [vmem:[#allocation10 + $0x398] sm:$0xff] }
0x10a3   :  { %v1898_v46 = vmul.f32 %v5529_v45, %v5529_v45 }
0x10a5   :  { %v1899_v47 = vsel %vm444_vm3, %v1898_v46, 0.0  ;;  %v2179_v46 = vld [vmem:[#allocation10 + $0x3f8] sm:$0xff] }
0x10a6   :  { %1900 = vadd.xlane.f32.xlu1 %v1899_v47  ;;  %v2162_v47 = vld [vmem:[#allocation10 + $0x370] sm:$0xff]  ;;  %2240 = vmatpush.msra.mxu1 %v2179_v46  ;;  %v2121_v46 = vld [vmem:[#allocation10 + $0x228] sm:$0xff] }
0x10a7   :  { %2221 = vmatpush.msra.mxu0 %v2162_v47  ;;  %v2137_v47 = vld [vmem:[#allocation10 + $0x2a8] sm:$0xff]  ;;  %2190 = vmatpush.msra.mxu2 %v2121_v46 }
0x10a8   :  { %2241 = vmatpush.msra.mxu1 %v2178_v48  ;;  %v2150_v48 = vld [vmem:[#allocation10 + $0x310] sm:$0xff]  ;;  %2210 = vmatpush.msra.mxu3 %v2137_v47 }
0x10a9   :  { %2222 = vmatpush.msra.mxu0 %v2161_v49  ;;  %v2166_v49 = vld [vmem:[#allocation10 + $0x390] sm:$0xff] }
0x10aa   :  { %2242 = vmatpush.msra.mxu1 %v2177_v51  ;;  %v2136_v51 = vld [vmem:[#allocation10 + $0x2a0] sm:$0xff] }
0x10ab   :  { %2223 = vmatpush.msra.mxu0 %v2160_v57  ;;  %v2135_v57 = vld [vmem:[#allocation10 + $0x298] sm:$0xff]  ;;  %2211 = vmatpush.msra.mxu3 %v2136_v51 }
0x10ac   :  { %2243 = vmatpush.msra.mxu1 %v2176_v58  ;;  %v2148_v58 = vld [vmem:[#allocation10 + $0x300] sm:$0xff] }
0x10ad   :  { %2224 = vmatpush.msra.mxu0 %v2159_v9  ;;  %2212 = vmatpush.msra.mxu3 %v2135_v57 }
0x10ae   :  { %2244 = vmatpush.msra.mxu1 %v2175_v10 }
0x10af   :  { %2225 = vmatpush.msra.mxu0 %v2158_v13 }
0x10b1   :  { %2226 = vmatpush.msra.mxu0 %v2157_v15 }
0x10b3   :  { %2227 = vmatpush.msra.mxu0 %v2156_v19 }
0x10b5   :  { %2228 = vmatpush.msra.mxu0 %v2155_v24 }
0x10b7   :  { %2229 = vmatpush.msra.mxu0 %v2154_v30 }
0x10b9   :  { %2230 = vmatpush.msra.mxu0 %v2153_v34 }
0x10bb   :  { %2231 = vmatpush.msra.mxu0 %v2152_v40 }
0x10bd   :  { %2232 = vmatpush.msra.mxu0 %v2151_v53 }
0x10bf   :  { %2233 = vmatpush.msra.mxu0 %v2150_v48 }
0x10c1   :  { %2234 = vmatpush.msra.mxu0 %v2149_v52 }
0x10c3   :  { %2235 = vmatpush.msra.mxu0 %v2148_v58 }
0x1119   :  { %v1901_v50 = vpop.xlane.xlu1 %1900 }
0x111a   :  { %v1902_v55 = vmul.f32 %v1901_v50, %v5382_v59  ;;  %v2120_v50 = vld [vmem:[#allocation10 + $0x220] sm:$0xff] }
0x111b   :  { %2191 = vmatpush.msra.mxu2 %v2120_v50 }
0x111c   :  { %v1903_v60 = vadd.f32 1e-05, %v1902_v55  ;;  %v2119_v55 = vld [vmem:[#allocation10 + $0x218] sm:$0xff] }
0x111d   :  { %2192 = vmatpush.msra.mxu2 %v2119_v55 }
0x111e   :  { %4584 = vrsqrt.f32 %v1903_v60  ;;  %vm1910_vm4 = vweird.f32 %v1903_v60 }
0x1124   :  { %v4585_v61 = vpop.eup %4584 }
0x1125   :  { %v1905_v62 = vmul.f32 %v4585_v61, %v1903_v60  ;;  %vm1911_vm2 = vweird.f32 %v4585_v61  ;;  %v2164_v60 = vld [vmem:[#allocation10 + $0x380] sm:$0xff] }
0x1126   :  { %vm1912_vm5 = vmor %vm1910_vm4, %vm1911_vm2 }
0x1127   :  { %v1906_v63 = vmul.f32 %v4585_v61, %v1905_v62  ;;  %v2134_v62 = vld [vmem:[#allocation10 + $0x290] sm:$0xff] }
0x1128   :  { %2213 = vmatpush.msra.mxu3 %v2134_v62 }
0x1129   :  { %v1907_v22 = vmul.f32 0.5, %v1906_v63  ;;  %v2117_v63 = vld [vmem:[#allocation10 + $0x208] sm:$0xff] }
0x112b   :  { %v1908_v1 = vsub.f32 1.5, %v1907_v22  ;;  %v4400_v22 = vld [vmem:[%s5788_s20 + $0x4] sm:$0xf] }
0x112c   :  { %v1991_v0 = vperm.slane %v4400_v22, 0  ;;  %v1992_v9 = vperm.slane %v4400_v22, 1 }
0x112d   :  { %v1909_v2 = vmul.f32 %v4585_v61, %v1908_v1  ;;  %v2133_v1 = vld [vmem:[#allocation10 + $0x288] sm:$0xff] }
0x112e   :  { %2214 = vmatpush.msra.mxu3 %v2133_v1 }
0x112f   :  { %v1913_v4 = vsel %vm1912_vm5, %v4585_v61, %v1909_v2  ;;  %v2118_v61 = vld [vmem:[#allocation10 + $0x210] sm:$0xff]  ;;  %v2116_v2 = vld [vmem:[#allocation10 + $0x200] sm:$0xff] }
0x1130   :  { %v1914_v5 = vmul.f32 %v1913_v4, %v5529_v45  ;;  %v2174_v45 = vld [vmem:[#allocation10 + $0x3d0] sm:$0xff]  ;;  %2193 = vmatpush.msra.mxu2 %v2118_v61  ;;  %v1993_v4 = vperm.slane %v4400_v22, 2 }
0x1131   :  { %2245 = vmatpush.msra.mxu1 %v2174_v45 }
0x1132   :  { %v1918_v6 = vmul.f32 %v4517_v3, %v1914_v5  ;;  %v2132_v3 = vld [vmem:[#allocation10 + $0x280] sm:$0xff]  ;;  %2194 = vmatpush.msra.mxu2 %v2117_v63  ;;  %v1994_v5 = vperm.slane %v4400_v22, 3 }
0x1133   :  { %2246 = vmatpush.msra.mxu1 %v2173_v16  ;;  %2215 = vmatpush.msra.mxu3 %v2132_v3  ;;  %v4519_v63 = vld [vmem:[%s5789_s28 + $0x1] ss:$0 sm:$0xff]  ;;  %v2314_v3 = vld [vmem:[#allocation11 + $0x78] sm:$0xff] }
0x1134   :  { %v1922_v7 = vadd.f32 %v4518_v35, %v1918_v6  ;;  %2195 = vmatpush.msra.mxu2 %v2116_v2 }
0x1135   :  { %2247 = vmatpush.msra.mxu1 %v2172_v20 }
0x1136   :  { %2015 = vmatmul.f32.vlgmr.msrb.gmra.mxu2 %v1922_v7  ;;  %2035 = vmatmul.f32.vlgmr.msrb.gmra.mxu3 %v1922_v7 }
0x1137   :  { %2055 = vmatmul.f32.vlgmr.msrb.gmra.mxu0 %v1922_v7  ;;  %2075 = vmatmul.f32.vlgmr.msrb.gmra.mxu1 %v1922_v7 }
0x1138   :  { %2248 = vmatpush.msra.mxu1 %v2171_v25  ;;  %2316 = vmatpush.msrb.mxu2 %v2314_v3  ;;  %v2379_v3 = vld [vmem:[#allocation19 + $0x30] sm:$0xff] }
0x113a   :  { %2249 = vmatpush.msra.mxu1 %v2170_v31 }
0x113c   :  { %2250 = vmatpush.msra.mxu1 %v2169_v36 }
0x113e   :  { %2251 = vmatpush.msra.mxu1 %v2168_v41 }
0x1140   :  { %2252 = vmatpush.msra.mxu1 %v2167_v44 }
0x1142   :  { %2253 = vmatpush.msra.mxu1 %v2166_v49 }
0x1144   :  { %2254 = vmatpush.msra.mxu1 %v2165_v54 }
0x1146   :  { %2255 = vmatpush.msra.mxu1 %v2164_v60 }
0x11b4   :  { %v2056_v35 = vpop.f32.mrf.mxu0  ;;  %v2076_v6 = vpop.f32.mrf.mxu1 }
0x11b5   :  { %v2057_v7 = vadd.f32 %v2056_v35, %v1993_v4  ;;  %v2077_v56 = vadd.f32 %v2076_v6, %v1994_v5  ;;  %v2313_v4 = vld [vmem:[#allocation11 + $0x70] sm:$0xff] }
0x11b6   :  { %2317 = vmatpush.msrb.mxu2 %v2313_v4  ;;  %v2378_v4 = vld [vmem:[#allocation19 + $0x28] sm:$0xff] }
0x11b7   :  { %v2085_v10 = vmul.f32 0.044715, %v2057_v7  ;;  %v2086_v11 = vmul.f32 0.044715, %v2077_v56  ;;  %v2081_v39 = vmul.f32 0.5, %v2057_v7  ;;  %v2082_v41 = vmul.f32 0.5, %v2077_v56 }
0x11b9   :  { %v2089_v12 = vmul.f32 %v2085_v10, %v2057_v7  ;;  %v2090_v13 = vmul.f32 %v2086_v11, %v2077_v56  ;;  %v2016_v45 = vpop.f32.mrf.mxu2  ;;  %v2036_v8 = vpop.f32.mrf.mxu3  ;;  %v2309_v10 = vld [vmem:[#allocation11 + $0x50] sm:$0xff]  ;;  %v2308_v11 = vld [vmem:[#allocation11 + $0x48] sm:$0xff] }
0x11ba   :  { %v2017_v14 = vadd.f32 %v2016_v45, %v1991_v0  ;;  %v2037_v15 = vadd.f32 %v2036_v8, %v1992_v9  ;;  %v2311_v0 = vld [vmem:[#allocation11 + $0x60] sm:$0xff]  ;;  %v2310_v9 = vld [vmem:[#allocation11 + $0x58] sm:$0xff]  ;;  %v2305_v45 = vld [vmem:[#allocation11 + $0x30] sm:$0xff] }
0x11bb   :  { %v2093_v16 = vmul.f32 %v2089_v12, %v2057_v7  ;;  %v2094_v17 = vmul.f32 %v2090_v13, %v2077_v56  ;;  %v2307_v12 = vld [vmem:[#allocation11 + $0x40] sm:$0xff]  ;;  %v2306_v13 = vld [vmem:[#allocation11 + $0x38] sm:$0xff]  ;;  %v2304_v8 = vld [vmem:[#allocation11 + $0x28] sm:$0xff] }
0x11bc   :  { %v2083_v18 = vmul.f32 0.044715, %v2017_v14  ;;  %v2084_v19 = vmul.f32 0.044715, %v2037_v15  ;;  %v2079_v47 = vmul.f32 0.5, %v2017_v14  ;;  %v2080_v49 = vmul.f32 0.5, %v2037_v15 }
0x11bd   :  { %v2097_v20 = vadd.f32 %v2093_v16, %v2057_v7  ;;  %v2098_v21 = vadd.f32 %v2094_v17, %v2077_v56  ;;  %v2301_v16 = vld [vmem:[#allocation11 + $0x10] sm:$0xff]  ;;  %v2300_v17 = vld [vmem:[#allocation11 + $0x8] sm:$0xff] }
0x11be   :  { %v2087_v23 = vmul.f32 %v2083_v18, %v2017_v14  ;;  %v2088_v24 = vmul.f32 %v2084_v19, %v2037_v15  ;;  %v2299_v18 = vld [vmem:[#allocation11] sm:$0xff]  ;;  %v2351_v19 = vld [vmem:[%s5790_s9 + $0x178] sm:$0xff] }
0x11bf   :  { %v2101_v25 = vmul.f32 0.7978846, %v2097_v20  ;;  %v2102_v26 = vmul.f32 0.7978846, %v2098_v21  ;;  %v2350_v20 = vld [vmem:[%s5790_s9 + $0x160] sm:$0xff]  ;;  %2353 = vmatpush.msrb.mxu3 %v2351_v19  ;;  %v2349_v21 = vld [vmem:[%s5790_s9 + $0x148] sm:$0xff] }
0x11c0   :  { %v2091_v29 = vmul.f32 %v2087_v23, %v2017_v14  ;;  %v2092_v30 = vmul.f32 %v2088_v24, %v2037_v15  ;;  %v2494_v19 = vld [vmem:[#allocation13 + $0x178] sm:$0xff] }
0x11c1   :  { %4586 = vtanh.f32 %v2101_v25  ;;  %2354 = vmatpush.msrb.mxu3 %v2350_v20  ;;  %v2348_v25 = vld [vmem:[%s5790_s9 + $0x130] sm:$0xff] }
0x11c2   :  { %4588 = vtanh.f32 %v2102_v26  ;;  %v2095_v31 = vadd.f32 %v2091_v29, %v2017_v14  ;;  %v2096_v32 = vadd.f32 %v2092_v30, %v2037_v15  ;;  %v2303_v14 = vld [vmem:[#allocation11 + $0x20] sm:$0xff]  ;;  %v2302_v15 = vld [vmem:[#allocation11 + $0x18] sm:$0xff]  ;;  %v2489_v20 = vld [vmem:[#allocation13 + $0x150] sm:$0xff] }
0x11c3   :  { %2355 = vmatpush.msrb.mxu3 %v2349_v21  ;;  %v2347_v29 = vld [vmem:[%s5790_s9 + $0x118] sm:$0xff]  ;;  %v2346_v30 = vld [vmem:[%s5790_s9 + $0x100] sm:$0xff] }
0x11c4   :  { %v2099_v37 = vmul.f32 0.7978846, %v2095_v31  ;;  %v2100_v34 = vmul.f32 0.7978846, %v2096_v32  ;;  %v2345_v31 = vld [vmem:[%s5790_s9 + $0xe8] sm:$0xff]  ;;  %v2344_v32 = vld [vmem:[%s5790_s9 + $0xd0] sm:$0xff] }
0x11c5   :  { %2356 = vmatpush.msrb.mxu3 %v2348_v25  ;;  %v2490_v21 = vld [vmem:[#allocation13 + $0x158] sm:$0xff] }
0x11c6   :  { %4590 = vtanh.f32 %v2099_v37 }
0x11c7   :  { %v4587_v36 = vpop.eup %4586  ;;  %4592 = vtanh.f32 %v2100_v34  ;;  %2357 = vmatpush.msrb.mxu3 %v2347_v29  ;;  %v2343_v34 = vld [vmem:[%s5790_s9 + $0xb8] sm:$0xff] }
0x11c8   :  { %v4589_v38 = vpop.eup %4588  ;;  %v2109_v40 = vadd.f32 1.0, %v4587_v36 }
0x11c9   :  { %v2110_v42 = vadd.f32 1.0, %v4589_v38  ;;  %2358 = vmatpush.msrb.mxu3 %v2346_v30  ;;  %v2342_v38 = vld [vmem:[%s5790_s9 + $0xa0] sm:$0xff]  ;;  %v2486_v30 = vld [vmem:[#allocation13 + $0x138] sm:$0xff] }
0x11ca   :  { %v2113_v43 = vmul.f32 %v2109_v40, %v2081_v39  ;;  %v2341_v40 = vld [vmem:[%s5790_s9 + $0x88] sm:$0xff] }
0x11cb   :  { %v2114_v53 = vmul.f32 %v2110_v42, %v2082_v41  ;;  %2359 = vmatpush.msrb.mxu3 %v2345_v31  ;;  %v2340_v42 = vld [vmem:[%s5790_s9 + $0x70] sm:$0xff]  ;;  %v2487_v31 = vld [vmem:[#allocation13 + $0x140] sm:$0xff] }
0x11cc   :  { %v4591_v44 = vpop.eup %4590  ;;  %2236 = vmatmul.f32.vlgmr.msra.gmra.mxu0 %v2113_v43 }
0x11cd   :  { %v4593_v46 = vpop.eup %4592  ;;  %2256 = vmatmul.f32.vlgmr.msra.gmra.mxu1 %v2114_v53  ;;  %v2107_v48 = vadd.f32 1.0, %v4591_v44  ;;  %2360 = vmatpush.msrb.mxu3 %v2344_v32  ;;  %v2339_v53 = vld [vmem:[%s5790_s9 + $0x58] sm:$0xff]  ;;  %v2488_v32 = vld [vmem:[#allocation13 + $0x148] sm:$0xff] }
0x11ce   :  { %v2108_v50 = vadd.f32 1.0, %v4593_v46  ;;  %v4520_v46 = vld [vmem:[%s5791_s0] ss:$0 sm:$0xff] }
0x11cf   :  { %v2111_v51 = vmul.f32 %v2107_v48, %v2079_v47  ;;  %2361 = vmatpush.msrb.mxu3 %v2343_v34  ;;  %v2338_v47 = vld [vmem:[%s5790_s9 + $0x40] sm:$0xff]  ;;  %v2484_v34 = vld [vmem:[#allocation13 + $0x128] sm:$0xff] }
0x11d0   :  { %v2112_v52 = vmul.f32 %v2108_v50, %v2080_v49  ;;  %v4521_v50 = vld [vmem:[%s5792_s12] ss:$0 sm:$0xff] }
0x11d1   :  { %2196 = vmatmul.f32.vlgmr.msra.gmra.mxu2 %v2111_v51  ;;  %2362 = vmatpush.msrb.mxu3 %v2342_v38  ;;  %v2480_v38 = vld [vmem:[#allocation13 + $0x108] sm:$0xff] }
0x11d2   :  { %2216 = vmatmul.f32.vlgmr.msra.gmra.mxu3 %v2112_v52 }
0x11d3   :  { %2363 = vmatpush.msrb.mxu3 %v2341_v40  ;;  %v2482_v40 = vld [vmem:[#allocation13 + $0x118] sm:$0xff] }
0x11d5   :  { %2364 = vmatpush.msrb.mxu3 %v2340_v42  ;;  %v2478_v42 = vld [vmem:[#allocation13 + $0xf8] sm:$0xff] }
0x11d7   :  { %2365 = vmatpush.msrb.mxu3 %v2339_v53  ;;  %v2474_v53 = vld [vmem:[#allocation13 + $0xd8] sm:$0xff] }
0x11d9   :  { %2366 = vmatpush.msrb.mxu3 %v2338_v47  ;;  %v2471_v47 = vld [vmem:[#allocation13 + $0xc0] sm:$0xff] }
0x1249   :  { %v2237_v58 = vpop.f32.mrf.mxu0 }
0x124a   :  { %v2257_v61 = vpop.f32.mrf.mxu1 }
0x1254   :  { %v2197_v54 = vpop.f32.mrf.mxu2 }
0x1255   :  { %v2217_v55 = vpop.f32.mrf.mxu3 }
0x1256   :  { %v2218_v57 = vadd.f32 %v2217_v55, %v2197_v54  ;;  %v2337_v54 = vld [vmem:[%s5790_s9 + $0x28] sm:$0xff]  ;;  %v2336_v55 = vld [vmem:[%s5790_s9 + $0x10] sm:$0xff] }
0x1257   :  { %2367 = vmatpush.msrb.mxu3 %v2337_v54  ;;  %v2465_v54 = vld [vmem:[#allocation13 + $0x90] sm:$0xff] }
0x1258   :  { %v2238_v60 = vadd.f32 %v2237_v58, %v2218_v57  ;;  %v2388_v57 = vld [vmem:[#allocation19 + $0x78] sm:$0xff]  ;;  %v2387_v58 = vld [vmem:[#allocation19 + $0x70] sm:$0xff] }
0x1259   :  { %2368 = vmatpush.msrb.mxu3 %v2336_v55  ;;  %2390 = vmatpush.msrb.mxu0 %v2388_v57  ;;  %v2466_v55 = vld [vmem:[#allocation13 + $0x98] sm:$0xff]  ;;  %v2467_v57 = vld [vmem:[#allocation13 + $0xa0] sm:$0xff] }
0x125a   :  { %v2258_v62 = vadd.f32 %v2257_v61, %v2238_v60  ;;  %v2386_v60 = vld [vmem:[#allocation19 + $0x68] sm:$0xff]  ;;  %v2385_v61 = vld [vmem:[#allocation19 + $0x60] sm:$0xff] }
0x125b   :  { %2391 = vmatpush.msrb.mxu0 %v2387_v58  ;;  %2543 = vmatpush.msra.mxu3 %v2494_v19  ;;  %v2462_v58 = vld [vmem:[#allocation13 + $0x78] sm:$0xff] }
0x125c   :  { %v2260_v22 = vadd.f32 %v2258_v62, %v5523_v33  ;;  %v2312_v33 = vld [vmem:[#allocation11 + $0x68] sm:$0xff]  ;;  %v2384_v62 = vld [vmem:[#allocation19 + $0x58] sm:$0xff] }
0x125d   :  { %2318 = vmatpush.msrb.mxu2 %v2312_v33  ;;  %2392 = vmatpush.msrb.mxu0 %v2386_v60  ;;  %v2463_v60 = vld [vmem:[#allocation13 + $0x80] sm:$0xff] }
0x125e   :  { %v2266_v1 = vadd.f32 %v4519_v63, %v2260_v22  ;;  %v2383_v63 = vld [vmem:[#allocation19 + $0x50] sm:$0xff]  ;;  %v2382_v22 = vld [vmem:[#allocation19 + $0x48] sm:$0xff] }
0x125f   :  { %2319 = vmatpush.msrb.mxu2 %v2311_v0  ;;  %2393 = vmatpush.msrb.mxu0 %v2385_v61  ;;  %v2374_v0 = vld [vmem:[#allocation19 + $0x8] sm:$0xff] }
0x1260   :  { %v2269_v2 = vsel %vm444_vm3, %v2266_v1, 0.0  ;;  %v2464_v61 = vld [vmem:[#allocation13 + $0x88] sm:$0xff] }
0x1261   :  { %2270 = vadd.xlane.f32.xlu2 %v2269_v2  ;;  %2320 = vmatpush.msrb.mxu2 %v2310_v9  ;;  %v2380_v2 = vld [vmem:[#allocation19 + $0x38] sm:$0xff]  ;;  %v2373_v9 = vld [vmem:[#allocation19] sm:$0xff] }
0x1262   :  { %2394 = vmatpush.msrb.mxu0 %v2384_v62  ;;  %v2459_v62 = vld [vmem:[#allocation13 + $0x60] sm:$0xff] }
0x1263   :  { %2321 = vmatpush.msrb.mxu2 %v2309_v10  ;;  %v2352_v10 = vld [vmem:[%s5794_s27 + $0x2] sm:$0x1] }
0x1264   :  { %2395 = vmatpush.msrb.mxu0 %v2383_v63  ;;  %v2460_v63 = vld [vmem:[#allocation13 + $0x68] sm:$0xff] }
0x1265   :  { %2322 = vmatpush.msrb.mxu2 %v2308_v11 }
0x1266   :  { %2396 = vmatpush.msrb.mxu0 %v2382_v22  ;;  %v2461_v22 = vld [vmem:[#allocation13 + $0x70] sm:$0xff] }
0x1267   :  { %2323 = vmatpush.msrb.mxu2 %v2307_v12 }
0x1269   :  { %2324 = vmatpush.msrb.mxu2 %v2306_v13  ;;  %v2389_v13 = vld [vmem:[%s5249_s24] sm:$0x1]  ;;  %s5796_s24 = sld [smem:[#allocation43_spill]] }
0x126b   :  { %2325 = vmatpush.msrb.mxu2 %v2305_v45 }
0x126d   :  { %2326 = vmatpush.msrb.mxu2 %v2304_v8 }
0x126f   :  { %2327 = vmatpush.msrb.mxu2 %v2303_v14  ;;  %v2410_v14 = vld [vmem:[%s5795_s11] sm:$0xff] }
0x1271   :  { %2328 = vmatpush.msrb.mxu2 %v2302_v15 }
0x1273   :  { %2329 = vmatpush.msrb.mxu2 %v2301_v16 }
0x1275   :  { %2330 = vmatpush.msrb.mxu2 %v2300_v17  ;;  %v2492_v17 = vld [vmem:[#allocation13 + $0x168] sm:$0xff] }
0x1276   :  { %2503 = vmatpush.msrb.mxu1 %v2492_v17 }
0x1277   :  { %2331 = vmatpush.msrb.mxu2 %v2299_v18  ;;  %v2493_v18 = vld [vmem:[#allocation13 + $0x170] sm:$0xff] }
0x1278   :  { %2504 = vmatpush.msrb.mxu1 %v2489_v20 }
0x1279   :  { %2523 = vmatpush.msra.mxu2 %v2493_v18  ;;  %v4522_v18 = vld [vmem:[%s5796_s24] ss:$0 sm:$0xff] }
0x127a   :  { %2505 = vmatpush.msrb.mxu1 %v2486_v30 }
0x127b   :  { %2524 = vmatpush.msra.mxu2 %v2490_v21  ;;  %v4523_v21 = vld [vmem:[%s5797_s6] ss:$0 sm:$0xff] }
0x127d   :  { %2525 = vmatpush.msra.mxu2 %v2487_v31 }
0x127f   :  { %2526 = vmatpush.msra.mxu2 %v2484_v34 }
0x12d4   :  { %v2271_v5 = vpop.xlane.xlu2 %2270 }
0x12d5   :  { %v2272_v35 = vmul.f32 %v2271_v5, %v5382_v59  ;;  %v2377_v5 = vld [vmem:[#allocation19 + $0x20] sm:$0xff] }
0x12d7   :  { %v5543_v6 = vsub.f32 %v2266_v1, %v2272_v35  ;;  %v2381_v1 = vld [vmem:[#allocation19 + $0x40] sm:$0xff]  ;;  %v2376_v35 = vld [vmem:[#allocation19 + $0x18] sm:$0xff] }
0x12d8   :  { %2397 = vmatpush.msrb.mxu0 %v2381_v1  ;;  %v2456_v1 = vld [vmem:[#allocation13 + $0x48] sm:$0xff] }
0x12d9   :  { %v2274_v7 = vmul.f32 %v5543_v6, %v5543_v6 }
0x12da   :  { %2398 = vmatpush.msrb.mxu0 %v2380_v2  ;;  %v2457_v2 = vld [vmem:[#allocation13 + $0x50] sm:$0xff] }
0x12db   :  { %v2275_v56 = vsel %vm444_vm3, %v2274_v7, 0.0  ;;  %v2315_v7 = vld [vmem:[%s5793_s30] sm:$0x1] }
0x12dc   :  { %2276 = vadd.xlane.f32.xlu0 %v2275_v56  ;;  %2399 = vmatpush.msrb.mxu0 %v2379_v3  ;;  %v2458_v3 = vld [vmem:[#allocation13 + $0x58] sm:$0xff] }
0x12de   :  { %2400 = vmatpush.msrb.mxu0 %v2378_v4  ;;  %v2453_v4 = vld [vmem:[#allocation13 + $0x30] sm:$0xff] }
0x12e0   :  { %2401 = vmatpush.msrb.mxu0 %v2377_v5  ;;  %v2454_v5 = vld [vmem:[#allocation13 + $0x38] sm:$0xff] }
0x12e2   :  { %2402 = vmatpush.msrb.mxu0 %v2376_v35  ;;  %v2455_v35 = vld [vmem:[#allocation13 + $0x40] sm:$0xff] }
0x134f   :  { %v2277_v23 = vpop.xlane.xlu0 %2276 }
0x1350   :  { %v2278_v24 = vmul.f32 %v2277_v23, %v5382_v59  ;;  %v2491_v23 = vld [vmem:[#allocation13 + $0x160] sm:$0xff] }
0x1351   :  { %2544 = vmatpush.msra.mxu3 %v2491_v23 }
0x1352   :  { %v2279_v26 = vadd.f32 1e-05, %v2278_v24 }
0x1353   :  { %2545 = vmatpush.msra.mxu3 %v2488_v32 }
0x1354   :  { %4594 = vrsqrt.f32 %v2279_v26  ;;  %vm2286_vm6 = vweird.f32 %v2279_v26 }
0x135a   :  { %v4595_v37 = vpop.eup %4594 }
0x135b   :  { %v2281_v36 = vmul.f32 %v4595_v37, %v2279_v26  ;;  %vm2287_vm3 = vweird.f32 %v4595_v37 }
0x135c   :  { %vm2288_vm7 = vmor %vm2286_vm6, %vm2287_vm3 }
0x135d   :  { %v2282_v39 = vmul.f32 %v4595_v37, %v2281_v36  ;;  %v2485_v36 = vld [vmem:[#allocation13 + $0x130] sm:$0xff] }
0x135e   :  { %2546 = vmatpush.msra.mxu3 %v2485_v36 }
0x135f   :  { %v2283_v41 = vmul.f32 0.5, %v2282_v39  ;;  %v2481_v39 = vld [vmem:[#allocation13 + $0x110] sm:$0xff] }
0x1360   :  { %2527 = vmatpush.msra.mxu2 %v2481_v39  ;;  %2547 = vmatpush.msra.mxu3 %v2482_v40 }
0x1361   :  { %v2284_v43 = vsub.f32 1.5, %v2283_v41  ;;  %v2477_v41 = vld [vmem:[#allocation13 + $0xf0] sm:$0xff] }
0x1362   :  { %2528 = vmatpush.msra.mxu2 %v2478_v42 }
0x1363   :  { %v2285_v44 = vmul.f32 %v4595_v37, %v2284_v43  ;;  %v2479_v43 = vld [vmem:[#allocation13 + $0x100] sm:$0xff] }
0x1364   :  { %2548 = vmatpush.msra.mxu3 %v2479_v43  ;;  %v5044_v43 = vmov -1e+09  }
0x1365   :  { %v2289_v48 = vsel %vm2288_vm7, %v4595_v37, %v2285_v44  ;;  %v2483_v37 = vld [vmem:[#allocation13 + $0x120] sm:$0xff] }
0x1366   :  { %v2290_v49 = vmul.f32 %v2289_v48, %v5543_v6  ;;  %v2375_v6 = vld [vmem:[#allocation19 + $0x10] sm:$0xff]  ;;  %2506 = vmatpush.msrb.mxu1 %v2483_v37  ;;  %v2475_v44 = vld [vmem:[#allocation13 + $0xe0] sm:$0xff]  ;;  %v2472_v48 = vld [vmem:[#allocation13 + $0xc8] sm:$0xff] }
0x1367   :  { %2403 = vmatpush.msrb.mxu0 %v2375_v6  ;;  %2529 = vmatpush.msra.mxu2 %v2475_v44  ;;  %v2450_v6 = vld [vmem:[#allocation13 + $0x18] sm:$0xff] }
0x1368   :  { %v2294_v51 = vmul.f32 %v4520_v46, %v2290_v49  ;;  %2507 = vmatpush.msrb.mxu1 %v2480_v38  ;;  %v2476_v46 = vld [vmem:[#allocation13 + $0xe8] sm:$0xff]  ;;  %v2473_v49 = vld [vmem:[#allocation13 + $0xd0] sm:$0xff] }
0x1369   :  { %2404 = vmatpush.msrb.mxu0 %v2374_v0  ;;  %2549 = vmatpush.msra.mxu3 %v2476_v46  ;;  %v2448_v0 = vld [vmem:[#allocation13 + $0x8] sm:$0xff] }
0x136a   :  { %v2298_v52 = vadd.f32 %v4521_v50, %v2294_v51  ;;  %2508 = vmatpush.msrb.mxu1 %v2477_v41  ;;  %2530 = vmatpush.msra.mxu2 %v2472_v48  ;;  %v2468_v50 = vld [vmem:[#allocation13 + $0xa8] sm:$0xff]  ;;  %v2469_v51 = vld [vmem:[#allocation13 + $0xb0] sm:$0xff] }
0x136b   :  { %2405 = vmatpush.msrb.mxu0 %v2373_v9  ;;  %2550 = vmatpush.msra.mxu3 %v2473_v49  ;;  %v2449_v9 = vld [vmem:[#allocation13 + $0x10] sm:$0xff] }
0x136c   :  { %2332 = vmatmul.f32.vlgmr.msrb.gmra.mxu2 %v2298_v52  ;;  %2509 = vmatpush.msrb.mxu1 %v2474_v53  ;;  %v2470_v52 = vld [vmem:[#allocation13 + $0xb8] sm:$0xff]  ;;  %v5604_v53 = vsel %vm2415_vm1, 0.0, %v5044_v43 }
0x136d   :  { %2531 = vmatpush.msra.mxu2 %v2469_v51  ;;  %2551 = vmatpush.msra.mxu3 %v2470_v52 }
0x136e   :  { %2510 = vmatpush.msrb.mxu1 %v2471_v47 }
0x136f   :  { %2532 = vmatpush.msra.mxu2 %v2466_v55  ;;  %2552 = vmatpush.msra.mxu3 %v2467_v57 }
0x1370   :  { %2511 = vmatpush.msrb.mxu1 %v2468_v50 }
0x1371   :  { %2533 = vmatpush.msra.mxu2 %v2463_v60  ;;  %2553 = vmatpush.msra.mxu3 %v2464_v61 }
0x1372   :  { %2512 = vmatpush.msrb.mxu1 %v2465_v54 }
0x1373   :  { %2534 = vmatpush.msra.mxu2 %v2460_v63  ;;  %2554 = vmatpush.msra.mxu3 %v2461_v22 }
0x1374   :  { %2513 = vmatpush.msrb.mxu1 %v2462_v58 }
0x1375   :  { %2535 = vmatpush.msra.mxu2 %v2457_v2  ;;  %2555 = vmatpush.msra.mxu3 %v2458_v3  ;;  %v2570_v2 = vld [vmem:[#allocation14 + $0x38] sm:$0xff]  ;;  %v2569_v3 = vld [vmem:[#allocation14 + $0x30] sm:$0xff] }
0x1376   :  { %2514 = vmatpush.msrb.mxu1 %v2459_v62 }
0x1377   :  { %2536 = vmatpush.msra.mxu2 %v2454_v5  ;;  %2556 = vmatpush.msra.mxu3 %v2455_v35  ;;  %v2568_v5 = vld [vmem:[#allocation14 + $0x28] sm:$0xff] }
0x1378   :  { %2515 = vmatpush.msrb.mxu1 %v2456_v1 }
0x137a   :  { %2516 = vmatpush.msrb.mxu1 %v2453_v4 }
0x137c   :  { %2517 = vmatpush.msrb.mxu1 %v2450_v6  ;;  %v2567_v6 = vld [vmem:[#allocation14 + $0x20] sm:$0xff] }
0x13ef   :  { %v2333_v56 = vpop.f32.mrf.mxu2 }
0x13f0   :  { %v2334_v33 = vadd.f32 %v2333_v56, %v2315_v7  ;;  %v2451_v7 = vld [vmem:[#allocation13 + $0x20] sm:$0xff]  ;;  %v2452_v56 = vld [vmem:[#allocation13 + $0x28] sm:$0xff] }
0x13f1   :  { %2537 = vmatpush.msra.mxu2 %v2451_v7  ;;  %2557 = vmatpush.msra.mxu3 %v2452_v56 }
0x13f2   :  { %2369 = vmatmul.f32.vlgmr.msrb.gmra.mxu3 %v2334_v33  ;;  %v2447_v33 = vld [vmem:[#allocation13] sm:$0xff] }
0x13f3   :  { %2518 = vmatpush.msrb.mxu1 %v2447_v33  ;;  %2538 = vmatpush.msra.mxu2 %v2448_v0 }
0x13f4   :  { %2558 = vmatpush.msra.mxu3 %v2449_v9 }
0x1475   :  { %v2370_v11 = vpop.f32.mrf.mxu3 }
0x1476   :  { %v2371_v12 = vadd.f32 %v2370_v11, %v2352_v10 }
0x1478   :  { %2406 = vmatmul.f32.vlgmr.msrb.gmra.mxu0 %v2371_v12 }
0x14f5   :  { %v2407_v45 = vpop.f32.mrf.mxu0 }
0x14f6   :  { %v2408_v8 = vadd.f32 %v2407_v45, %v2389_v13 }
0x14f8   :  { %v2411_v15 = vperm.slane %v2408_v8, 0 }
0x14fa   :  { %v5572_v16 = vadd.f32 %v2411_v15, %v2410_v14 }
0x14fc   :  { %2419 = vadd.xlane.f32.xlu0 %v5572_v16 }
0x156f   :  { %v2420_v24 = vpop.xlane.xlu0 %2419 }
0x1570   :  { %v2421_v25 = vmul.f32 %v2420_v24, %v5382_v59 }
0x1572   :  { %v5577_v26 = vsub.f32 %v5572_v16, %v2421_v25  ;;  %v2495_v25 = vld [vmem:[%s5798_s22] sm:$0x7] }
0x1573   :  { %v2498_v32 = vperm.slane %v2495_v25, 1  ;;  %v2499_v37 = vperm.slane %v2495_v25, 2 }
0x1574   :  { %v2423_v29 = vmul.f32 %v5577_v26, %v5577_v26 }
0x1576   :  { %2424 = vadd.xlane.f32.xlu1 %v2423_v29  ;;  %v2497_v29 = vperm.slane %v2495_v25, 0 }
0x15e9   :  { %v2425_v10 = vpop.xlane.xlu1 %2424 }
0x15ea   :  { %v2426_v11 = vmul.f32 %v2425_v10, %v5382_v59 }
0x15ec   :  { %v2427_v12 = vadd.f32 1e-05, %v2426_v11 }
0x15ee   :  { %4596 = vrsqrt.f32 %v2427_v12  ;;  %vm2434_vm10 = vweird.f32 %v2427_v12 }
0x15f4   :  { %v4597_v13 = vpop.eup %4596 }
0x15f5   :  { %v2429_v45 = vmul.f32 %v4597_v13, %v2427_v12  ;;  %vm2435_vm9 = vweird.f32 %v4597_v13 }
0x15f6   :  { %vm2436_vm11 = vmor %vm2434_vm10, %vm2435_vm9 }
0x15f7   :  { %v2430_v8 = vmul.f32 %v4597_v13, %v2429_v45 }
0x15f9   :  { %v2431_v14 = vmul.f32 0.5, %v2430_v8 }
0x15fb   :  { %v2432_v15 = vsub.f32 1.5, %v2431_v14  ;;  %v2566_v14 = vld [vmem:[#allocation14 + $0x18] sm:$0xff] }
0x15fd   :  { %v2433_v17 = vmul.f32 %v4597_v13, %v2432_v15  ;;  %v2565_v15 = vld [vmem:[#allocation14 + $0x10] sm:$0xff] }
0x15ff   :  { %v2437_v19 = vsel %vm2436_vm11, %v4597_v13, %v2433_v17  ;;  %v2564_v17 = vld [vmem:[#allocation14 + $0x8] sm:$0xff] }
0x1600   :  { %v2438_v20 = vmul.f32 %v2437_v19, %v5577_v26 }
0x1602   :  { %v2442_v23 = vmul.f32 %v4522_v18, %v2438_v20  ;;  %v2563_v18 = vld [vmem:[#allocation14] sm:$0xff] }
0x1604   :  { %v2446_v24 = vadd.f32 %v4523_v21, %v2442_v23 }
0x1606   :  { %2519 = vmatmul.f32.vlgmr.msrb.gmra.mxu1 %v2446_v24  ;;  %2539 = vmatmul.f32.vlgmr.msra.gmra.mxu2 %v2446_v24 }
0x1607   :  { %2559 = vmatmul.f32.vlgmr.msra.gmra.mxu3 %v2446_v24 }
0x1683   :  { %v2520_v30 = vpop.f32.mrf.mxu1 }
0x1684   :  { %v2521_v31 = vadd.f32 %v2520_v30, %v2497_v29 }
0x1686   :  { %2643 = vrot.lane.b32.xlu0 %v2521_v31, %s5042_s21 }
0x1689   :  { %v2540_v34 = vpop.f32.mrf.mxu2 }
0x168a   :  { %v2541_v36 = vadd.f32 %v2540_v34, %v2498_v32  ;;  %v2560_v38 = vpop.f32.mrf.mxu3 }
0x168b   :  { %v5587_v39 = vadd.f32 %v2560_v38, %v2499_v37 }
0x168c   :  { %2645 = vrot.lane.b32.xlu2 %v2541_v36, %s5042_s21  ;;  %4402 = vmatpush.xpose.msk.msra.mxu0 %vm615_vm8, %v2541_v36 }
0x168d   :  { %2638 = vmatpush.msra.mxu1 %v5587_v39 }
0x168e   :  { %2685 = vrot.lane.b32.xlu0 %v5587_v39, %s5042_s21 }
0x168f   :  { %4403 = vmatmul.msk.f32.vlgmr.msra.gmra.mxu0 %vm615_vm8, %v2521_v31 }
0x1696   :  { %2850 = vrot.lane.b32.xlu0 %v2541_v36, %s5028_s7 }
0x169e   :  { %2757 = vrot.lane.b32.xlu0 %v2521_v31, %s5043_s25 }
0x16a6   :  { %2848 = vrot.lane.b32.xlu0 %v2521_v31, %s5028_s7 }
0x16e6   :  { %v2646_v26 = vpop.permute.xlu2 %2645 }
0x16e7   :  { %4405 = vmatpush.xpose.msk.msrb.mxu0 %vm615_vm8, %v2646_v26 }
0x16eb   :  { %2726 = vmatpush.msra.mxu0 %v2570_v2 }
0x16ed   :  { %2727 = vmatpush.msra.mxu0 %v2569_v3 }
0x16ef   :  { %2728 = vmatpush.msra.mxu0 %v2568_v5  ;;  %v3035_v5 = vld [vmem:[#allocation16 + $0x1e8] sm:$0xff] }
0x16f1   :  { %2729 = vmatpush.msra.mxu0 %v2567_v6  ;;  %v3037_v6 = vld [vmem:[#allocation16 + $0x1f8] sm:$0xff] }
0x16f8   :  { %v2644_v40 = vpop.permute.xlu0 %2643 }
0x16f9   :  { %4406 = vmatmul.msk.f32.vlgmr.msrb.gmra.mxu0 %vm615_vm8, %v2644_v40 }
0x1700   :  { %v2686_v41 = vpop.permute.xlu0 %2685 }
0x1701   :  { %2706 = vmatpush.msrb.mxu1 %v2686_v41 }
0x1708   :  { %v2851_v42 = vpop.permute.xlu0 %2850 }
0x1709   :  { %4414 = vmatpush.xpose.msk.msrb.mxu3 %vm615_vm8, %v2851_v42 }
0x170c   :  { %v2603_v44 = vpop.f32.mrf.mxu0 }
0x170d   :  { %v2606_v46 = vmul.f32 0.17677669, %v2603_v44  ;;  %v2574_v44 = vld [vmem:[#allocation14 + $0x58] sm:$0xff]  ;;  %3068 = vmatpush.msra.mxu3 %v3035_v5  ;;  %v2980_v5 = vld [vmem:[#allocation16 + $0x30] sm:$0xff] }
0x170e   :  { %2839 = vmatpush.msrb.mxu2 %v2574_v44  ;;  %v3005_v44 = vld [vmem:[#allocation16 + $0xf8] sm:$0xff] }
0x170f   :  { %v2607_v47 = vadd.f32 %v2606_v46, %v5604_v53  ;;  %v2573_v46 = vld [vmem:[#allocation14 + $0x50] sm:$0xff] }
0x1710   :  { %v5607_v48 = vpop.permute.xlu0 %2757  ;;  %2840 = vmatpush.msrb.mxu2 %v2573_v46  ;;  %v2998_v46 = vld [vmem:[#allocation16 + $0xc0] sm:$0xff] }
0x1711   :  { %v2609_v49 = vsel %vm2608_vm12, %v2607_v47, -inf }
0x1712   :  { %2610 = vmax.xlane.f32.xlu1 %v2609_v49 }
0x1718   :  { %v2849_v50 = vpop.permute.xlu0 %2848 }
0x1719   :  { %4415 = vmatmul.msk.f32.vlgmr.msrb.gmra.mxu3 %vm615_vm8, %v2849_v50 }
0x1776   :  { %v2668_v51 = vpop.f32.mrf.mxu0 }
0x1777   :  { %v2671_v52 = vmul.f32 0.17677669, %v2668_v51 }
0x1779   :  { %v2672_v54 = vadd.f32 %v2671_v52, %v5604_v53  ;;  %v2578_v52 = vld [vmem:[#allocation14 + $0x78] sm:$0xff] }
0x177b   :  { %v2673_v27 = vsel %vm2608_vm12, %v2672_v54, -inf }
0x177c   :  { %2674 = vmax.xlane.f32.xlu1 %v2673_v27  ;;  %v2576_v27 = vld [vmem:[#allocation14 + $0x68] sm:$0xff] }
0x1785   :  { %v2611_v28 = vpop.xlane.xlu1 %2610 }
0x1786   :  { %v2612_v55 = vsub.f32 %v2607_v47, %v2611_v28  ;;  %v2572_v47 = vld [vmem:[#allocation14 + $0x48] sm:$0xff] }
0x1787   :  { %2841 = vmatpush.msrb.mxu2 %v2572_v47  ;;  %v2999_v47 = vld [vmem:[#allocation16 + $0xc8] sm:$0xff] }
0x1788   :  { %v2613_v57 = vmul.f32 1.442695, %v2612_v55  ;;  %v2571_v55 = vld [vmem:[#allocation14 + $0x40] sm:$0xff] }
0x1789   :  { %2842 = vmatpush.msrb.mxu2 %v2571_v55  ;;  %v2993_v55 = vld [vmem:[#allocation16 + $0x98] sm:$0xff] }
0x178a   :  { %4598 = vpow2.f32 %v2613_v57 }
0x1790   :  { %v4599_v58 = vpop.eup %4598 }
0x1791   :  { %v2615_v60 = vsel %vm2608_vm12, %v4599_v58, 0.0 }
0x1792   :  { %2616 = vadd.xlane.f32.xlu1 %v2615_v60 }
0x179c   :  { %v2873_v61 = vpop.f32.mrf.mxu3 }
0x179d   :  { %v2876_v62 = vmul.f32 0.17677669, %v2873_v61 }
0x179f   :  { %v2877_v63 = vadd.f32 %v2876_v62, %v5604_v53 }
0x17a1   :  { %v2878_v22 = vsel %vm2608_vm12, %v2877_v63, -inf }
0x17ab   :  { %2759 = vrot.lane.b32.xlu1 %v2541_v36, %s5043_s25 }
0x17d5   :  { %2879 = vmax.xlane.f32.xlu1 %v2878_v22 }
0x17ef   :  { %v2675_v1 = vpop.xlane.xlu1 %2674 }
0x17f0   :  { %v2676_v4 = vsub.f32 %v2672_v54, %v2675_v1  ;;  %v2577_v54 = vld [vmem:[#allocation14 + $0x70] sm:$0xff] }
0x17f2   :  { %v2677_v35 = vmul.f32 1.442695, %v2676_v4  ;;  %v3034_v4 = vld [vmem:[#allocation16 + $0x1e0] sm:$0xff] }
0x17f3   :  { %3048 = vmatpush.msra.mxu2 %v3034_v4  ;;  %v2979_v4 = vld [vmem:[#allocation16 + $0x28] sm:$0xff] }
0x17f4   :  { %4600 = vpow2.f32 %v2677_v35  ;;  %v3036_v35 = vld [vmem:[#allocation16 + $0x1f0] sm:$0xff] }
0x17fa   :  { %v4601_v7 = vpop.eup %4600 }
0x17fb   :  { %v2679_v56 = vsel %vm2608_vm12, %v4601_v7, 0.0 }
0x17fc   :  { %2680 = vadd.xlane.f32.xlu2 %v2679_v56  ;;  %v3031_v56 = vld [vmem:[#allocation16 + $0x1c8] sm:$0xff] }
0x17fd   :  { %3069 = vmatpush.msra.mxu3 %v3031_v56  ;;  %v2976_v56 = vld [vmem:[#allocation16 + $0x10] sm:$0xff] }
0x1805   :  { %v2617_v33 = vpop.xlane.xlu1 %2616 }
0x1806   :  { %4602 = vrcp.f32 %v2617_v33  ;;  %v3032_v33 = vld [vmem:[#allocation16 + $0x1d0] sm:$0xff] }
0x180c   :  { %v4603_v0 = vpop.eup %4602 }
0x180d   :  { %v2619_v9 = vmul.f32 %v4603_v0, %v4599_v58  ;;  %v3033_v0 = vld [vmem:[#allocation16 + $0x1d8] sm:$0xff] }
0x180f   :  { %4404 = vmatmul.msk.f32.vlgmr.msra.gmra.mxu1 %vm2608_vm12, %v2619_v9 }
0x1810   :  { %2749 = vmatpush.msra.mxu1 %v2566_v14  ;;  %v3022_v14 = vld [vmem:[#allocation16 + $0x180] sm:$0xff] }
0x1812   :  { %2750 = vmatpush.msra.mxu1 %v2565_v15  ;;  %v3023_v15 = vld [vmem:[#allocation16 + $0x188] sm:$0xff] }
0x1814   :  { %2751 = vmatpush.msra.mxu1 %v2564_v17  ;;  %v3024_v17 = vld [vmem:[#allocation16 + $0x190] sm:$0xff] }
0x1816   :  { %2752 = vmatpush.msra.mxu1 %v2563_v18  ;;  %v3025_v18 = vld [vmem:[#allocation16 + $0x198] sm:$0xff] }
0x181d   :  { %v2760_v10 = vpop.permute.xlu1 %2759 }
0x181e   :  { %4410 = vmatpush.xpose.msk.msrb.mxu0 %vm615_vm8, %v2760_v10 }
0x1848   :  { %v2880_v11 = vpop.xlane.xlu1 %2879 }
0x1849   :  { %v2881_v12 = vsub.f32 %v2877_v63, %v2880_v11  ;;  %v4524_v63 = vld [vmem:[%s5799_s23] ss:$0 sm:$0xff] }
0x184b   :  { %v2882_v13 = vmul.f32 1.442695, %v2881_v12  ;;  %v3026_v12 = vld [vmem:[#allocation16 + $0x1a0] sm:$0xff] }
0x184d   :  { %4604 = vpow2.f32 %v2882_v13  ;;  %v3027_v13 = vld [vmem:[#allocation16 + $0x1a8] sm:$0xff] }
0x184e   :  { %3070 = vmatpush.msra.mxu3 %v3027_v13 }
0x1850   :  { %3071 = vmatpush.msra.mxu3 %v3023_v15 }
0x1853   :  { %v4605_v45 = vpop.eup %4604 }
0x1854   :  { %v2884_v8 = vsel %vm2608_vm12, %v4605_v45, 0.0 }
0x1855   :  { %2885 = vadd.xlane.f32.xlu2 %v2884_v8  ;;  %v3029_v8 = vld [vmem:[#allocation16 + $0x1b8] sm:$0xff] }
0x186f   :  { %v2681_v19 = vpop.xlane.xlu2 %2680 }
0x1870   :  { %4606 = vrcp.f32 %v2681_v19  ;;  %v3018_v19 = vld [vmem:[#allocation16 + $0x160] sm:$0xff] }
0x1876   :  { %v4607_v20 = vpop.eup %4606 }
0x1877   :  { %v2683_v21 = vmul.f32 %v4607_v20, %v4601_v7  ;;  %v3030_v7 = vld [vmem:[#allocation16 + $0x1c0] sm:$0xff]  ;;  %v3019_v20 = vld [vmem:[#allocation16 + $0x168] sm:$0xff] }
0x1878   :  { %3049 = vmatpush.msra.mxu2 %v3030_v7  ;;  %3072 = vmatpush.msra.mxu3 %v3019_v20  ;;  %v2975_v7 = vld [vmem:[#allocation16 + $0x8] sm:$0xff] }
0x1879   :  { %4407 = vmatmul.msk.f32.vlgmr.msrb.gmra.mxu1 %vm2608_vm12, %v2683_v21  ;;  %v3020_v21 = vld [vmem:[#allocation16 + $0x170] sm:$0xff] }
0x187a   :  { %3050 = vmatpush.msra.mxu2 %v3026_v12  ;;  %v3209_v12 = vld [vmem:[#allocation17 + $0x168] sm:$0xff] }
0x187c   :  { %3051 = vmatpush.msra.mxu2 %v3022_v14  ;;  %v3195_v14 = vld [vmem:[#allocation17 + $0xf8] sm:$0xff] }
0x187e   :  { %3052 = vmatpush.msra.mxu2 %v3018_v19 }
0x188c   :  { %v2640_v23 = vpop.f32.mrf.mxu1 }
0x188d   :  { %4409 = vmatmul.msk.f32.vlgmr.msra.gmra.mxu1 %vm615_vm8, %v2640_v23  ;;  %v3021_v23 = vld [vmem:[#allocation16 + $0x178] sm:$0xff] }
0x18c8   :  { %v2886_v38 = vpop.xlane.xlu2 %2885 }
0x18f6   :  { %v2708_v24 = vpop.f32.mrf.mxu1 }
0x18f7   :  { %4408 = vmatmul.msk.f32.vlgmr.msra.gmra.mxu0 %vm615_vm8, %v2708_v24  ;;  %v3014_v24 = vld [vmem:[#allocation16 + $0x140] sm:$0xff] }
0x18f8   :  { %3053 = vmatpush.msra.mxu2 %v3014_v24 }
0x18ff   :  { %4411 = vmatmul.msk.f32.vlgmr.msrb.gmra.mxu0 %vm615_vm8, %v5607_v48 }
0x190a   :  { %v2754_v57 = vpop.f32.mrf.mxu1 }
0x1974   :  { %v2731_v25 = vpop.f32.mrf.mxu0 }
0x1975   :  { %v2755_v60 = vadd.f32 %v2754_v57, %v2731_v25  ;;  %v3015_v25 = vld [vmem:[#allocation16 + $0x148] sm:$0xff]  ;;  %v2986_v57 = vld [vmem:[#allocation16 + $0x60] sm:$0xff] }
0x1976   :  { %3073 = vmatpush.msra.mxu3 %v3015_v25 }
0x197c   :  { %v2782_v29 = vpop.f32.mrf.mxu0 }
0x197d   :  { %v2785_v30 = vmul.f32 0.17677669, %v2782_v29  ;;  %v3016_v29 = vld [vmem:[#allocation16 + $0x150] sm:$0xff] }
0x197f   :  { %v2786_v31 = vadd.f32 %v2785_v30, %v5604_v53  ;;  %v3017_v30 = vld [vmem:[#allocation16 + $0x158] sm:$0xff] }
0x1981   :  { %v2787_v32 = vsel %vm2608_vm12, %v2786_v31, -inf }
0x1982   :  { %2788 = vmax.xlane.f32.xlu0 %v2787_v32  ;;  %v3011_v32 = vld [vmem:[#allocation16 + $0x128] sm:$0xff] }
0x1983   :  { %3074 = vmatpush.msra.mxu3 %v3011_v32 }
0x1996   :  { %2889 = vrot.lane.b32.xlu0 %v5587_v39, %s5028_s7 }
0x19f5   :  { %v2789_v37 = vpop.xlane.xlu0 %2788 }
0x19f6   :  { %v2790_v34 = vsub.f32 %v2786_v31, %v2789_v37  ;;  %v3010_v31 = vld [vmem:[#allocation16 + $0x120] sm:$0xff]  ;;  %v3012_v37 = vld [vmem:[#allocation16 + $0x130] sm:$0xff] }
0x19f7   :  { %3054 = vmatpush.msra.mxu2 %v3010_v31 }
0x19f8   :  { %v2791_v36 = vmul.f32 1.442695, %v2790_v34  ;;  %v3013_v34 = vld [vmem:[#allocation16 + $0x138] sm:$0xff] }
0x19fa   :  { %4608 = vpow2.f32 %v2791_v36  ;;  %v3006_v36 = vld [vmem:[#allocation16 + $0x100] sm:$0xff] }
0x19fb   :  { %4610 = vrcp.f32 %v2886_v38  ;;  %v3007_v38 = vld [vmem:[#allocation16 + $0x108] sm:$0xff]  ;;  %3055 = vmatpush.msra.mxu2 %v3006_v36 }
0x19fc   :  { %3075 = vmatpush.msra.mxu3 %v3007_v38  ;;  %v3178_v38 = vld [vmem:[#allocation17 + $0x70] sm:$0xff] }
0x1a00   :  { %v4609_v26 = vpop.eup %4608 }
0x1a01   :  { %v2793_v40 = vsel %vm2608_vm12, %v4609_v26, 0.0  ;;  %v4611_v41 = vpop.eup %4610 }
0x1a02   :  { %2794 = vadd.xlane.f32.xlu2 %v2793_v40  ;;  %v2888_v42 = vmul.f32 %v4611_v41, %v4605_v45  ;;  %v3028_v45 = vld [vmem:[#allocation16 + $0x1b0] sm:$0xff]  ;;  %v3009_v40 = vld [vmem:[#allocation16 + $0x118] sm:$0xff]  ;;  %v3002_v41 = vld [vmem:[#allocation16 + $0xe0] sm:$0xff] }
0x1a03   :  { %3056 = vmatpush.msra.mxu2 %v3002_v41  ;;  %v3223_v41 = vld [vmem:[#allocation17 + $0x1d8] sm:$0xff] }
0x1a05   :  { %3057 = vmatpush.msra.mxu2 %v2998_v46  ;;  %v3176_v46 = vld [vmem:[#allocation17 + $0x60] sm:$0xff] }
0x1a08   :  { %v2890_v43 = vpop.permute.xlu0 %2889 }
0x1a09   :  { %2910 = vmatpush.msra.mxu0 %v2890_v43  ;;  %v3004_v43 = vld [vmem:[#allocation16 + $0xf0] sm:$0xff] }
0x1a0a   :  { %4416 = vmatmul.msk.f32.vlgmr.msra.gmra.mxu0 %vm2608_vm12, %v2888_v42  ;;  %v3003_v42 = vld [vmem:[#allocation16 + $0xe8] sm:$0xff] }
0x1a0b   :  { %3088 = vmatpush.msrb.mxu0 %v3036_v35  ;;  %3076 = vmatpush.msra.mxu3 %v3003_v42  ;;  %v2981_v35 = vld [vmem:[#allocation16 + $0x38] sm:$0xff]  ;;  %v3177_v42 = vld [vmem:[#allocation17 + $0x68] sm:$0xff] }
0x1a0d   :  { %3089 = vmatpush.msrb.mxu0 %v3032_v33  ;;  %3077 = vmatpush.msra.mxu3 %v2999_v47  ;;  %v2977_v33 = vld [vmem:[#allocation16 + $0x18] sm:$0xff]  ;;  %v3192_v47 = vld [vmem:[#allocation17 + $0xe0] sm:$0xff] }
0x1a0f   :  { %3090 = vmatpush.msrb.mxu0 %v3028_v45  ;;  %v3225_v45 = vld [vmem:[#allocation17 + $0x1e8] sm:$0xff] }
0x1a11   :  { %3091 = vmatpush.msrb.mxu0 %v3024_v17  ;;  %v3208_v17 = vld [vmem:[#allocation17 + $0x160] sm:$0xff] }
0x1a13   :  { %3092 = vmatpush.msrb.mxu0 %v3020_v21 }
0x1a15   :  { %3093 = vmatpush.msrb.mxu0 %v3016_v29 }
0x1a17   :  { %3094 = vmatpush.msrb.mxu0 %v3012_v37  ;;  %v4526_v37 = vld [vmem:[%s5801_s8] ss:$0 sm:$0xff] }
0x1a1a   :  { %2798 = vrot.lane.b32.xlu2 %v5587_v39, %s5043_s25  ;;  %v2575_v39 = vld [vmem:[#allocation14 + $0x60] sm:$0xff] }
0x1a75   :  { %v2795_v48 = vpop.xlane.xlu2 %2794 }
0x1a76   :  { %4612 = vrcp.f32 %v2795_v48  ;;  %v3000_v48 = vld [vmem:[#allocation16 + $0xd0] sm:$0xff] }
0x1a7c   :  { %v4613_v49 = vpop.eup %4612 }
0x1a7d   :  { %v2797_v50 = vmul.f32 %v4613_v49, %v4609_v26  ;;  %v2799_v51 = vpop.permute.xlu2 %2798  ;;  %v3008_v26 = vld [vmem:[#allocation16 + $0x110] sm:$0xff]  ;;  %v3001_v49 = vld [vmem:[#allocation16 + $0xd8] sm:$0xff] }
0x1a7e   :  { %2819 = vmatpush.msrb.mxu1 %v2799_v51  ;;  %3095 = vmatpush.msrb.mxu0 %v3008_v26  ;;  %v2995_v51 = vld [vmem:[#allocation16 + $0xa8] sm:$0xff]  ;;  %v3194_v26 = vld [vmem:[#allocation17 + $0xf0] sm:$0xff] }
0x1a7f   :  { %4412 = vmatmul.msk.f32.vlgmr.msrb.gmra.mxu1 %vm2608_vm12, %v2797_v50  ;;  %v2994_v50 = vld [vmem:[#allocation16 + $0xa0] sm:$0xff]  ;;  %3078 = vmatpush.msra.mxu3 %v2995_v51  ;;  %v3191_v51 = vld [vmem:[#allocation17 + $0xd8] sm:$0xff] }
0x1a80   :  { %2930 = vmatpush.msra.mxu1 %v2578_v52  ;;  %3096 = vmatpush.msrb.mxu0 %v3004_v43  ;;  %v2996_v52 = vld [vmem:[#allocation16 + $0xb0] sm:$0xff]  ;;  %v3193_v43 = vld [vmem:[#allocation17 + $0xe8] sm:$0xff] }
0x1a81   :  { %3058 = vmatpush.msra.mxu2 %v2994_v50  ;;  %v3175_v50 = vld [vmem:[#allocation17 + $0x58] sm:$0xff] }
0x1a82   :  { %2931 = vmatpush.msra.mxu1 %v2577_v54  ;;  %3097 = vmatpush.msrb.mxu0 %v3000_v48  ;;  %v2997_v54 = vld [vmem:[#allocation16 + $0xb8] sm:$0xff]  ;;  %v3205_v48 = vld [vmem:[#allocation17 + $0x148] sm:$0xff] }
0x1a84   :  { %2932 = vmatpush.msra.mxu1 %v2576_v27  ;;  %3098 = vmatpush.msrb.mxu0 %v2996_v52  ;;  %v2990_v27 = vld [vmem:[#allocation16 + $0x80] sm:$0xff] }
0x1a85   :  { %3059 = vmatpush.msra.mxu2 %v2990_v27  ;;  %v3204_v52 = vld [vmem:[#allocation17 + $0x140] sm:$0xff]  ;;  %v3174_v27 = vld [vmem:[#allocation17 + $0x50] sm:$0xff] }
0x1a86   :  { %2933 = vmatpush.msra.mxu1 %v2575_v39  ;;  %v2991_v39 = vld [vmem:[#allocation16 + $0x88] sm:$0xff] }
0x1a87   :  { %v2912_v28 = vpop.f32.mrf.mxu0  ;;  %3079 = vmatpush.msra.mxu3 %v2991_v39  ;;  %3060 = vmatpush.msra.mxu2 %v2986_v57  ;;  %v3190_v39 = vld [vmem:[#allocation17 + $0xd0] sm:$0xff]  ;;  %v3173_v57 = vld [vmem:[#allocation17 + $0x48] sm:$0xff] }
0x1a88   :  { %4417 = vmatmul.msk.f32.vlgmr.msra.gmra.mxu1 %vm615_vm8, %v2912_v28  ;;  %v2992_v28 = vld [vmem:[#allocation16 + $0x90] sm:$0xff] }
0x1a89   :  { %3108 = vmatpush.msrb.mxu1 %v3037_v6  ;;  %3099 = vmatpush.msrb.mxu0 %v2992_v28  ;;  %v2974_v6 = vld [vmem:[#allocation16] sm:$0xff]  ;;  %v3203_v28 = vld [vmem:[#allocation17 + $0x138] sm:$0xff] }
0x1a8b   :  { %3109 = vmatpush.msrb.mxu1 %v3033_v0  ;;  %v3211_v0 = vld [vmem:[#allocation17 + $0x178] sm:$0xff] }
0x1a8d   :  { %3110 = vmatpush.msrb.mxu1 %v3029_v8  ;;  %v3179_v8 = vld [vmem:[#allocation17 + $0x78] sm:$0xff] }
0x1a8f   :  { %3111 = vmatpush.msrb.mxu1 %v3025_v18  ;;  %v3224_v18 = vld [vmem:[#allocation17 + $0x1e0] sm:$0xff] }
0x1a91   :  { %3112 = vmatpush.msrb.mxu1 %v3021_v23 }
0x1a93   :  { %3113 = vmatpush.msrb.mxu1 %v3017_v30  ;;  %v4525_v30 = vld [vmem:[%s5800_s3] ss:$0 sm:$0xff] }
0x1a95   :  { %3114 = vmatpush.msrb.mxu1 %v3013_v34 }
0x1a97   :  { %3115 = vmatpush.msrb.mxu1 %v3009_v40  ;;  %v3207_v40 = vld [vmem:[#allocation17 + $0x158] sm:$0xff] }
0x1a99   :  { %3116 = vmatpush.msrb.mxu1 %v3005_v44  ;;  %v3206_v44 = vld [vmem:[#allocation17 + $0x150] sm:$0xff] }
0x1a9b   :  { %3117 = vmatpush.msrb.mxu1 %v3001_v49  ;;  %v3221_v49 = vld [vmem:[#allocation17 + $0x1c8] sm:$0xff] }
0x1a9d   :  { %3118 = vmatpush.msrb.mxu1 %v2997_v54  ;;  %v3220_v54 = vld [vmem:[#allocation17 + $0x1c0] sm:$0xff] }
0x1a9f   :  { %3119 = vmatpush.msrb.mxu1 %v2993_v55  ;;  %v3219_v55 = vld [vmem:[#allocation17 + $0x1b8] sm:$0xff] }
0x1afc   :  { %v2821_v58 = vpop.f32.mrf.mxu1 }
0x1afd   :  { %4413 = vmatmul.msk.f32.vlgmr.msrb.gmra.mxu2 %vm615_vm8, %v2821_v58  ;;  %v2987_v58 = vld [vmem:[#allocation16 + $0x68] sm:$0xff] }
0x1afe   :  { %3080 = vmatpush.msra.mxu3 %v2987_v58  ;;  %v3189_v58 = vld [vmem:[#allocation17 + $0xc8] sm:$0xff] }
0x1b05   :  { %v2935_v22 = vpop.f32.mrf.mxu1 }
0x1b80   :  { %v2844_v61 = vpop.f32.mrf.mxu2 }
0x1b81   :  { %v2847_v62 = vadd.f32 %v2844_v61, %v2755_v60  ;;  %v2988_v60 = vld [vmem:[#allocation16 + $0x70] sm:$0xff]  ;;  %v2989_v61 = vld [vmem:[#allocation16 + $0x78] sm:$0xff] }
0x1b82   :  { %3100 = vmatpush.msrb.mxu0 %v2988_v60  ;;  %3120 = vmatpush.msrb.mxu1 %v2989_v61  ;;  %v3202_v60 = vld [vmem:[#allocation17 + $0x130] sm:$0xff] }
0x1b83   :  { %v2938_v1 = vadd.f32 %v2935_v22, %v2847_v62  ;;  %v2982_v62 = vld [vmem:[#allocation16 + $0x40] sm:$0xff]  ;;  %v2984_v22 = vld [vmem:[#allocation16 + $0x50] sm:$0xff] }
0x1b84   :  { %3061 = vmatpush.msra.mxu2 %v2982_v62  ;;  %3101 = vmatpush.msrb.mxu0 %v2984_v22  ;;  %v3218_v61 = vld [vmem:[#allocation17 + $0x1b0] sm:$0xff]  ;;  %v3172_v62 = vld [vmem:[#allocation17 + $0x40] sm:$0xff]  ;;  %v3201_v22 = vld [vmem:[#allocation17 + $0x128] sm:$0xff] }
0x1b85   :  { %v2942_v2 = vadd.f32 %v4524_v63, %v2938_v1  ;;  %v2983_v63 = vld [vmem:[#allocation16 + $0x48] sm:$0xff]  ;;  %v2985_v1 = vld [vmem:[#allocation16 + $0x58] sm:$0xff] }
0x1b86   :  { %3081 = vmatpush.msra.mxu3 %v2983_v63  ;;  %3121 = vmatpush.msrb.mxu1 %v2985_v1  ;;  %v3188_v63 = vld [vmem:[#allocation17 + $0xc0] sm:$0xff]  ;;  %v3217_v1 = vld [vmem:[#allocation17 + $0x1a8] sm:$0xff] }
0x1b87   :  { %v5639_v3 = vadd.f32 %v2942_v2, %v5572_v16  ;;  %v2978_v2 = vld [vmem:[#allocation16 + $0x20] sm:$0xff]  ;;  %3102 = vmatpush.msrb.mxu0 %v2980_v5 }
0x1b88   :  { %3062 = vmatpush.msra.mxu2 %v2978_v2  ;;  %3082 = vmatpush.msra.mxu3 %v2979_v4  ;;  %v3171_v2 = vld [vmem:[#allocation17 + $0x38] sm:$0xff]  ;;  %v3200_v5 = vld [vmem:[#allocation17 + $0x120] sm:$0xff] }
0x1b89   :  { %2946 = vadd.xlane.f32.xlu1 %v5639_v3  ;;  %3122 = vmatpush.msrb.mxu1 %v2981_v35  ;;  %v3187_v4 = vld [vmem:[#allocation17 + $0xb8] sm:$0xff]  ;;  %v3216_v35 = vld [vmem:[#allocation17 + $0x1a0] sm:$0xff] }
0x1b8a   :  { %3063 = vmatpush.msra.mxu2 %v2974_v6  ;;  %3083 = vmatpush.msra.mxu3 %v2975_v7  ;;  %v3170_v6 = vld [vmem:[#allocation17 + $0x30] sm:$0xff] }
0x1b8b   :  { %3103 = vmatpush.msrb.mxu0 %v2976_v56  ;;  %3123 = vmatpush.msrb.mxu1 %v2977_v33  ;;  %v3186_v7 = vld [vmem:[#allocation17 + $0xb0] sm:$0xff]  ;;  %v3199_v56 = vld [vmem:[#allocation17 + $0x118] sm:$0xff] }
0x1b8c   :  { %3228 = vmatpush.msrb.mxu2 %v3179_v8  ;;  %3248 = vmatpush.msrb.mxu3 %v3195_v14  ;;  %v3215_v33 = vld [vmem:[#allocation17 + $0x198] sm:$0xff]  ;;  %v3213_v8 = vld [vmem:[#allocation17 + $0x188] sm:$0xff] }
0x1b8d   :  { %3268 = vmatpush.msra.mxu0 %v3211_v0  ;;  %v3169_v0 = vld [vmem:[#allocation17 + $0x28] sm:$0xff]  ;;  %v3167_v14 = vld [vmem:[#allocation17 + $0x18] sm:$0xff] }
0x1b8e   :  { %3229 = vmatpush.msrb.mxu2 %v3178_v38  ;;  %3249 = vmatpush.msrb.mxu3 %v3194_v26 }
0x1b90   :  { %3230 = vmatpush.msrb.mxu2 %v3177_v42  ;;  %3250 = vmatpush.msrb.mxu3 %v3193_v43 }
0x1b92   :  { %3231 = vmatpush.msrb.mxu2 %v3176_v46  ;;  %3251 = vmatpush.msrb.mxu3 %v3192_v47 }
0x1b94   :  { %3232 = vmatpush.msrb.mxu2 %v3175_v50  ;;  %3252 = vmatpush.msrb.mxu3 %v3191_v51 }
0x1b96   :  { %3233 = vmatpush.msrb.mxu2 %v3174_v27  ;;  %3253 = vmatpush.msrb.mxu3 %v3190_v39 }
0x1b98   :  { %3234 = vmatpush.msrb.mxu2 %v3173_v57  ;;  %3254 = vmatpush.msrb.mxu3 %v3189_v58 }
0x1b9a   :  { %3235 = vmatpush.msrb.mxu2 %v3172_v62  ;;  %3255 = vmatpush.msrb.mxu3 %v3188_v63 }
0x1b9c   :  { %3236 = vmatpush.msrb.mxu2 %v3171_v2  ;;  %3256 = vmatpush.msrb.mxu3 %v3187_v4 }
0x1b9e   :  { %3237 = vmatpush.msrb.mxu2 %v3170_v6  ;;  %3257 = vmatpush.msrb.mxu3 %v3186_v7 }
0x1ba0   :  { %3238 = vmatpush.msrb.mxu2 %v3169_v0 }
0x1bfc   :  { %v2947_v16 = vpop.xlane.xlu1 %2946 }
0x1bfd   :  { %v2948_v9 = vmul.f32 %v2947_v16, %v5382_v59  ;;  %v3227_v16 = vld [vmem:[#allocation17 + $0x1f8] sm:$0xff] }
0x1bfe   :  { %3288 = vmatpush.msra.mxu1 %v3227_v16  ;;  %v3185_v16 = vld [vmem:[#allocation17 + $0xa8] sm:$0xff] }
0x1bff   :  { %v5644_v10 = vsub.f32 %v5639_v3, %v2948_v9  ;;  %v3210_v9 = vld [vmem:[#allocation17 + $0x170] sm:$0xff]  ;;  %3258 = vmatpush.msrb.mxu3 %v3185_v16 }
0x1c00   :  { %3269 = vmatpush.msra.mxu0 %v3210_v9  ;;  %v3198_v9 = vld [vmem:[#allocation17 + $0x110] sm:$0xff] }
0x1c01   :  { %v2950_v11 = vmul.f32 %v5644_v10, %v5644_v10 }
0x1c02   :  { %3270 = vmatpush.msra.mxu0 %v3209_v12  ;;  %v3168_v12 = vld [vmem:[#allocation17 + $0x20] sm:$0xff] }
0x1c03   :  { %2951 = vadd.xlane.f32.xlu2 %v2950_v11  ;;  %v3226_v11 = vld [vmem:[#allocation17 + $0x1f0] sm:$0xff]  ;;  %3239 = vmatpush.msrb.mxu2 %v3168_v12 }
0x1c04   :  { %3289 = vmatpush.msra.mxu1 %v3226_v11  ;;  %3271 = vmatpush.msra.mxu0 %v3208_v17  ;;  %v3214_v11 = vld [vmem:[#allocation17 + $0x190] sm:$0xff]  ;;  %v3196_v17 = vld [vmem:[#allocation17 + $0x100] sm:$0xff] }
0x1c05   :  { %3240 = vmatpush.msrb.mxu2 %v3167_v14 }
0x1c06   :  { %3290 = vmatpush.msra.mxu1 %v3225_v45  ;;  %3272 = vmatpush.msra.mxu0 %v3207_v40  ;;  %v3197_v45 = vld [vmem:[#allocation17 + $0x108] sm:$0xff] }
0x1c08   :  { %3291 = vmatpush.msra.mxu1 %v3224_v18  ;;  %3273 = vmatpush.msra.mxu0 %v3206_v44  ;;  %v3212_v18 = vld [vmem:[#allocation17 + $0x180] sm:$0xff] }
0x1c0a   :  { %3292 = vmatpush.msra.mxu1 %v3223_v41  ;;  %3274 = vmatpush.msra.mxu0 %v3205_v48 }
0x1c0c   :  { %3275 = vmatpush.msra.mxu0 %v3204_v52 }
0x1c0e   :  { %3276 = vmatpush.msra.mxu0 %v3203_v28 }
0x1c10   :  { %3277 = vmatpush.msra.mxu0 %v3202_v60 }
0x1c12   :  { %3278 = vmatpush.msra.mxu0 %v3201_v22 }
0x1c14   :  { %3279 = vmatpush.msra.mxu0 %v3200_v5 }
0x1c16   :  { %3280 = vmatpush.msra.mxu0 %v3199_v56 }
0x1c18   :  { %3281 = vmatpush.msra.mxu0 %v3198_v9 }
0x1c1a   :  { %3282 = vmatpush.msra.mxu0 %v3197_v45 }
0x1c1c   :  { %3283 = vmatpush.msra.mxu0 %v3196_v17 }
0x1c76   :  { %v2952_v13 = vpop.xlane.xlu2 %2951 }
0x1c77   :  { %v2953_v15 = vmul.f32 %v2952_v13, %v5382_v59  ;;  %v3184_v13 = vld [vmem:[#allocation17 + $0xa0] sm:$0xff] }
0x1c78   :  { %3259 = vmatpush.msrb.mxu3 %v3184_v13 }
0x1c79   :  { %v2954_v19 = vadd.f32 1e-05, %v2953_v15  ;;  %v3183_v15 = vld [vmem:[#allocation17 + $0x98] sm:$0xff] }
0x1c7a   :  { %3260 = vmatpush.msrb.mxu3 %v3183_v15 }
0x1c7b   :  { %4614 = vrsqrt.f32 %v2954_v19  ;;  %vm2961_vm13 = vweird.f32 %v2954_v19 }
0x1c81   :  { %v4615_v20 = vpop.eup %4614 }
0x1c82   :  { %v2956_v21 = vmul.f32 %v4615_v20, %v2954_v19  ;;  %vm2962_vm1 = vweird.f32 %v4615_v20  ;;  %v3166_v19 = vld [vmem:[#allocation17 + $0x10] sm:$0xff] }
0x1c83   :  { %vm2963_vm14 = vmor %vm2961_vm13, %vm2962_vm1  ;;  %3241 = vmatpush.msrb.mxu2 %v3166_v19 }
0x1c84   :  { %v2957_v23 = vmul.f32 %v4615_v20, %v2956_v21  ;;  %v3165_v21 = vld [vmem:[#allocation17 + $0x8] sm:$0xff] }
0x1c85   :  { %3242 = vmatpush.msrb.mxu2 %v3165_v21 }
0x1c86   :  { %v2958_v24 = vmul.f32 0.5, %v2957_v23  ;;  %v3038_v23 = vld [vmem:[%s5802_s14] sm:$0xf] }
0x1c87   :  { %v3040_v38 = vperm.slane %v3038_v23, 0  ;;  %v3041_v26 = vperm.slane %v3038_v23, 1 }
0x1c88   :  { %v2959_v25 = vsub.f32 1.5, %v2958_v24  ;;  %v3181_v24 = vld [vmem:[#allocation17 + $0x88] sm:$0xff] }
0x1c8a   :  { %v2960_v29 = vmul.f32 %v4615_v20, %v2959_v25  ;;  %v3164_v25 = vld [vmem:[#allocation17] sm:$0xff] }
0x1c8b   :  { %3243 = vmatpush.msrb.mxu2 %v3164_v25  ;;  %v3393_v25 = vld [vmem:[#allocation13 + $0x2f0] sm:$0xff] }
0x1c8c   :  { %v2964_v31 = vsel %vm2963_vm14, %v4615_v20, %v2960_v29  ;;  %v3182_v20 = vld [vmem:[#allocation17 + $0x90] sm:$0xff]  ;;  %v3180_v29 = vld [vmem:[#allocation17 + $0x80] sm:$0xff] }
0x1c8d   :  { %v2965_v32 = vmul.f32 %v2964_v31, %v5644_v10  ;;  %v3222_v10 = vld [vmem:[#allocation17 + $0x1d0] sm:$0xff]  ;;  %3261 = vmatpush.msrb.mxu3 %v3182_v20  ;;  %v3043_v31 = vperm.slane %v3038_v23, 3  ;;  %v4527_v20 = vld [vmem:[%s5803_s19] ss:$0 sm:$0xff] }
0x1c8e   :  { %3293 = vmatpush.msra.mxu1 %v3222_v10 }
0x1c8f   :  { %v2969_v34 = vmul.f32 %v4525_v30, %v2965_v32  ;;  %3262 = vmatpush.msrb.mxu3 %v3181_v24  ;;  %v3042_v30 = vperm.slane %v3038_v23, 2  ;;  %v3392_v24 = vld [vmem:[#allocation13 + $0x2e8] sm:$0xff] }
0x1c90   :  { %3294 = vmatpush.msra.mxu1 %v3221_v49 }
0x1c91   :  { %v2973_v36 = vadd.f32 %v4526_v37, %v2969_v34  ;;  %3263 = vmatpush.msrb.mxu3 %v3180_v29  ;;  %v3394_v29 = vld [vmem:[#allocation13 + $0x2f8] sm:$0xff] }
0x1c92   :  { %3295 = vmatpush.msra.mxu1 %v3220_v54 }
0x1c93   :  { %3064 = vmatmul.f32.vlgmr.msra.gmra.mxu2 %v2973_v36  ;;  %3084 = vmatmul.f32.vlgmr.msra.gmra.mxu3 %v2973_v36 }
0x1c94   :  { %3104 = vmatmul.f32.vlgmr.msrb.gmra.mxu0 %v2973_v36  ;;  %3124 = vmatmul.f32.vlgmr.msrb.gmra.mxu1 %v2973_v36 }
0x1c95   :  { %3296 = vmatpush.msra.mxu1 %v3219_v55  ;;  %3404 = vmatpush.msra.mxu2 %v3392_v24  ;;  %v4528_v24 = vld [vmem:[%s5796_s24 + $0x1] ss:$0 sm:$0xff] }
0x1c96   :  { %3424 = vmatpush.msra.mxu3 %v3393_v25  ;;  %3444 = vmatpush.msrb.mxu0 %v3394_v29 }
0x1c97   :  { %3297 = vmatpush.msra.mxu1 %v3218_v61 }
0x1c99   :  { %3298 = vmatpush.msra.mxu1 %v3217_v1 }
0x1c9b   :  { %3299 = vmatpush.msra.mxu1 %v3216_v35 }
0x1c9d   :  { %3300 = vmatpush.msra.mxu1 %v3215_v33 }
0x1c9f   :  { %3301 = vmatpush.msra.mxu1 %v3214_v11 }
0x1ca1   :  { %3302 = vmatpush.msra.mxu1 %v3213_v8 }
0x1ca3   :  { %3303 = vmatpush.msra.mxu1 %v3212_v18 }
0x1d11   :  { %v3105_v32 = vpop.f32.mrf.mxu0  ;;  %v3125_v37 = vpop.f32.mrf.mxu1 }
0x1d12   :  { %v3106_v34 = vadd.f32 %v3105_v32, %v3042_v30  ;;  %v3126_v36 = vadd.f32 %v3125_v37, %v3043_v31  ;;  %v3389_v30 = vld [vmem:[#allocation13 + $0x2d0] sm:$0xff]  ;;  %v3390_v31 = vld [vmem:[#allocation13 + $0x2d8] sm:$0xff]  ;;  %v3391_v32 = vld [vmem:[#allocation13 + $0x2e0] sm:$0xff] }
0x1d13   :  { %3405 = vmatpush.msra.mxu2 %v3389_v30  ;;  %3425 = vmatpush.msra.mxu3 %v3390_v31  ;;  %v4529_v30 = vld [vmem:[%s5797_s6 + $0x1] ss:$0 sm:$0xff] }
0x1d14   :  { %v3134_v40 = vmul.f32 0.044715, %v3106_v34  ;;  %v3135_v41 = vmul.f32 0.044715, %v3126_v36  ;;  %v3130_v2 = vmul.f32 0.5, %v3106_v34  ;;  %v3131_v5 = vmul.f32 0.5, %v3126_v36  ;;  %3445 = vmatpush.msrb.mxu0 %v3391_v32 }
0x1d16   :  { %v3138_v42 = vmul.f32 %v3134_v40, %v3106_v34  ;;  %v3139_v43 = vmul.f32 %v3135_v41, %v3126_v36  ;;  %v3065_v44 = vpop.f32.mrf.mxu2  ;;  %v3085_v10 = vpop.f32.mrf.mxu3  ;;  %v3388_v40 = vld [vmem:[#allocation13 + $0x2c8] sm:$0xff]  ;;  %v3383_v41 = vld [vmem:[#allocation13 + $0x2a0] sm:$0xff] }
0x1d17   :  { %v3066_v46 = vadd.f32 %v3065_v44, %v3040_v38  ;;  %v3086_v47 = vadd.f32 %v3085_v10, %v3041_v26  ;;  %v3386_v38 = vld [vmem:[#allocation13 + $0x2b8] sm:$0xff]  ;;  %v3387_v26 = vld [vmem:[#allocation13 + $0x2c0] sm:$0xff]  ;;  %3446 = vmatpush.msrb.mxu0 %v3388_v40  ;;  %v3380_v44 = vld [vmem:[#allocation13 + $0x288] sm:$0xff] }
0x1d18   :  { %v3142_v48 = vmul.f32 %v3138_v42, %v3106_v34  ;;  %v3143_v49 = vmul.f32 %v3139_v43, %v3126_v36  ;;  %3406 = vmatpush.msra.mxu2 %v3386_v38  ;;  %3426 = vmatpush.msra.mxu3 %v3387_v26  ;;  %v3384_v42 = vld [vmem:[#allocation13 + $0x2a8] sm:$0xff]  ;;  %v3385_v43 = vld [vmem:[#allocation13 + $0x2b0] sm:$0xff] }
0x1d19   :  { %v3132_v50 = vmul.f32 0.044715, %v3066_v46  ;;  %v3133_v51 = vmul.f32 0.044715, %v3086_v47  ;;  %v3128_v0 = vmul.f32 0.5, %v3066_v46  ;;  %v3129_v9 = vmul.f32 0.5, %v3086_v47  ;;  %3447 = vmatpush.msrb.mxu0 %v3385_v43 }
0x1d1a   :  { %v3146_v52 = vadd.f32 %v3142_v48, %v3106_v34  ;;  %v3147_v54 = vadd.f32 %v3143_v49, %v3126_v36  ;;  %3407 = vmatpush.msra.mxu2 %v3383_v41  ;;  %3427 = vmatpush.msra.mxu3 %v3384_v42  ;;  %v3381_v10 = vld [vmem:[#allocation13 + $0x290] sm:$0xff]  ;;  %v3378_v48 = vld [vmem:[#allocation13 + $0x278] sm:$0xff]  ;;  %v3379_v49 = vld [vmem:[#allocation13 + $0x280] sm:$0xff] }
0x1d1b   :  { %v3136_v27 = vmul.f32 %v3132_v50, %v3066_v46  ;;  %v3137_v39 = vmul.f32 %v3133_v51, %v3086_v47  ;;  %v3374_v50 = vld [vmem:[#allocation13 + $0x258] sm:$0xff]  ;;  %v3375_v51 = vld [vmem:[#allocation13 + $0x260] sm:$0xff] }
0x1d1c   :  { %v3150_v28 = vmul.f32 0.7978846, %v3146_v52  ;;  %v3151_v55 = vmul.f32 0.7978846, %v3147_v54  ;;  %3408 = vmatpush.msra.mxu2 %v3380_v44  ;;  %3428 = vmatpush.msra.mxu3 %v3381_v10  ;;  %v3376_v52 = vld [vmem:[#allocation13 + $0x268] sm:$0xff]  ;;  %v3371_v54 = vld [vmem:[#allocation13 + $0x240] sm:$0xff] }
0x1d1d   :  { %v3140_v57 = vmul.f32 %v3136_v27, %v3066_v46  ;;  %v3141_v58 = vmul.f32 %v3137_v39, %v3086_v47  ;;  %v3372_v27 = vld [vmem:[#allocation13 + $0x248] sm:$0xff]  ;;  %v3373_v39 = vld [vmem:[#allocation13 + $0x250] sm:$0xff] }
0x1d1e   :  { %4616 = vtanh.f32 %v3150_v28  ;;  %3429 = vmatpush.msra.mxu3 %v3378_v48  ;;  %v3368_v28 = vld [vmem:[#allocation13 + $0x228] sm:$0xff]  ;;  %v3468_v48 = vld [vmem:[#allocation14 + $0x98] sm:$0xff] }
0x1d1f   :  { %4618 = vtanh.f32 %v3151_v55  ;;  %v3144_v60 = vadd.f32 %v3140_v57, %v3066_v46  ;;  %v3145_v61 = vadd.f32 %v3141_v58, %v3086_v47  ;;  %v3382_v46 = vld [vmem:[#allocation13 + $0x298] sm:$0xff]  ;;  %v3377_v47 = vld [vmem:[#allocation13 + $0x270] sm:$0xff] }
0x1d20   :  { %3448 = vmatpush.msrb.mxu0 %v3382_v46  ;;  %3409 = vmatpush.msra.mxu2 %v3377_v47  ;;  %v3369_v55 = vld [vmem:[#allocation13 + $0x230] sm:$0xff]  ;;  %v3370_v57 = vld [vmem:[#allocation13 + $0x238] sm:$0xff] }
0x1d21   :  { %v3148_v62 = vmul.f32 0.7978846, %v3144_v60  ;;  %v3149_v63 = vmul.f32 0.7978846, %v3145_v61  ;;  %3430 = vmatpush.msra.mxu3 %v3375_v51  ;;  %v3365_v58 = vld [vmem:[#allocation13 + $0x210] sm:$0xff]  ;;  %v3366_v60 = vld [vmem:[#allocation13 + $0x218] sm:$0xff] }
0x1d22   :  { %3449 = vmatpush.msrb.mxu0 %v3379_v49  ;;  %3410 = vmatpush.msra.mxu2 %v3374_v50  ;;  %v3367_v61 = vld [vmem:[#allocation13 + $0x220] sm:$0xff]  ;;  %v3467_v49 = vld [vmem:[#allocation14 + $0x90] sm:$0xff]  ;;  %v3466_v50 = vld [vmem:[#allocation14 + $0x88] sm:$0xff] }
0x1d23   :  { %4620 = vtanh.f32 %v3148_v62  ;;  %3431 = vmatpush.msra.mxu3 %v3372_v27  ;;  %v3362_v62 = vld [vmem:[#allocation13 + $0x1f8] sm:$0xff]  ;;  %v3465_v51 = vld [vmem:[#allocation14 + $0x80] sm:$0xff] }
0x1d24   :  { %v4617_v22 = vpop.eup %4616  ;;  %4622 = vtanh.f32 %v3149_v63  ;;  %3450 = vmatpush.msrb.mxu0 %v3376_v52  ;;  %3411 = vmatpush.msra.mxu2 %v3371_v54  ;;  %v3363_v63 = vld [vmem:[#allocation13 + $0x200] sm:$0xff] }
0x1d25   :  { %v4619_v1 = vpop.eup %4618  ;;  %v3158_v4 = vadd.f32 1.0, %v4617_v22  ;;  %3432 = vmatpush.msra.mxu3 %v3369_v55  ;;  %v3364_v22 = vld [vmem:[#allocation13 + $0x208] sm:$0xff] }
0x1d26   :  { %v3159_v35 = vadd.f32 1.0, %v4619_v1  ;;  %3451 = vmatpush.msrb.mxu0 %v3373_v39  ;;  %3412 = vmatpush.msra.mxu2 %v3368_v28  ;;  %v3359_v1 = vld [vmem:[#allocation13 + $0x1e0] sm:$0xff] }
0x1d27   :  { %v3162_v6 = vmul.f32 %v3158_v4, %v3130_v2  ;;  %3433 = vmatpush.msra.mxu3 %v3366_v60  ;;  %v3360_v2 = vld [vmem:[#allocation13 + $0x1e8] sm:$0xff]  ;;  %v3361_v4 = vld [vmem:[#allocation13 + $0x1f0] sm:$0xff] }
0x1d28   :  { %v3163_v7 = vmul.f32 %v3159_v35, %v3131_v5  ;;  %3452 = vmatpush.msrb.mxu0 %v3370_v57  ;;  %3413 = vmatpush.msra.mxu2 %v3365_v58  ;;  %v3356_v5 = vld [vmem:[#allocation13 + $0x1c8] sm:$0xff]  ;;  %v3357_v35 = vld [vmem:[#allocation13 + $0x1d0] sm:$0xff] }
0x1d29   :  { %v4621_v56 = vpop.eup %4620  ;;  %3284 = vmatmul.f32.vlgmr.msra.gmra.mxu0 %v3162_v6  ;;  %3434 = vmatpush.msra.mxu3 %v3363_v63  ;;  %v3358_v6 = vld [vmem:[#allocation13 + $0x1d8] sm:$0xff] }
0x1d2a   :  { %v4623_v33 = vpop.eup %4622  ;;  %3304 = vmatmul.f32.vlgmr.msra.gmra.mxu1 %v3163_v7  ;;  %v3156_v16 = vadd.f32 1.0, %v4621_v56  ;;  %3453 = vmatpush.msrb.mxu0 %v3367_v61  ;;  %v3353_v7 = vld [vmem:[#allocation13 + $0x1b0] sm:$0xff]  ;;  %v3354_v56 = vld [vmem:[#allocation13 + $0x1b8] sm:$0xff] }
0x1d2b   :  { %v3157_v11 = vadd.f32 1.0, %v4623_v33  ;;  %3414 = vmatpush.msra.mxu2 %v3362_v62  ;;  %3435 = vmatpush.msra.mxu3 %v3360_v2  ;;  %v3355_v33 = vld [vmem:[#allocation13 + $0x1c0] sm:$0xff] }
0x1d2c   :  { %v3160_v12 = vmul.f32 %v3156_v16, %v3128_v0  ;;  %3454 = vmatpush.msrb.mxu0 %v3364_v22  ;;  %v3350_v0 = vld [vmem:[#allocation13 + $0x198] sm:$0xff]  ;;  %v3351_v16 = vld [vmem:[#allocation13 + $0x1a0] sm:$0xff] }
0x1d2d   :  { %v3161_v13 = vmul.f32 %v3157_v11, %v3129_v9  ;;  %3415 = vmatpush.msra.mxu2 %v3359_v1  ;;  %3436 = vmatpush.msra.mxu3 %v3357_v35  ;;  %v3352_v9 = vld [vmem:[#allocation13 + $0x1a8] sm:$0xff]  ;;  %v3347_v11 = vld [vmem:[#allocation13 + $0x180] sm:$0xff] }
0x1d2e   :  { %3244 = vmatmul.f32.vlgmr.msrb.gmra.mxu2 %v3160_v12  ;;  %3455 = vmatpush.msrb.mxu0 %v3361_v4  ;;  %v3348_v12 = vld [vmem:[#allocation13 + $0x188] sm:$0xff] }
0x1d2f   :  { %3264 = vmatmul.f32.vlgmr.msrb.gmra.mxu3 %v3161_v13  ;;  %3416 = vmatpush.msra.mxu2 %v3356_v5  ;;  %v3349_v13 = vld [vmem:[#allocation13 + $0x190] sm:$0xff] }
0x1d30   :  { %3456 = vmatpush.msrb.mxu0 %v3358_v6  ;;  %3437 = vmatpush.msra.mxu3 %v3354_v56 }
0x1d31   :  { %3417 = vmatpush.msra.mxu2 %v3353_v7 }
0x1d32   :  { %3457 = vmatpush.msrb.mxu0 %v3355_v33  ;;  %3438 = vmatpush.msra.mxu3 %v3351_v16 }
0x1d33   :  { %3418 = vmatpush.msra.mxu2 %v3350_v0 }
0x1d34   :  { %3458 = vmatpush.msrb.mxu0 %v3352_v9  ;;  %3439 = vmatpush.msra.mxu3 %v3348_v12 }
0x1d35   :  { %3419 = vmatpush.msra.mxu2 %v3347_v11 }
0x1d36   :  { %3459 = vmatpush.msrb.mxu0 %v3349_v13  ;;  %3651 = vmatpush.msrb.mxu3 %v3468_v48  ;;  %v3474_v48 = vld [vmem:[#allocation14 + $0xc8] sm:$0xff] }
0x1d38   :  { %3652 = vmatpush.msrb.mxu3 %v3467_v49  ;;  %v3473_v49 = vld [vmem:[#allocation14 + $0xc0] sm:$0xff] }
0x1d3a   :  { %3653 = vmatpush.msrb.mxu3 %v3466_v50  ;;  %v3479_v50 = vld [vmem:[#allocation14 + $0xf0] sm:$0xff] }
0x1d3c   :  { %3654 = vmatpush.msrb.mxu3 %v3465_v51 }
0x1da6   :  { %v3285_v15 = vpop.f32.mrf.mxu0 }
0x1da7   :  { %v3305_v18 = vpop.f32.mrf.mxu1 }
0x1db1   :  { %v3245_v45 = vpop.f32.mrf.mxu2 }
0x1db2   :  { %v3265_v8 = vpop.f32.mrf.mxu3 }
0x1db3   :  { %v3266_v14 = vadd.f32 %v3265_v8, %v3245_v45 }
0x1db5   :  { %v3286_v17 = vadd.f32 %v3285_v15, %v3266_v14 }
0x1db7   :  { %v3306_v19 = vadd.f32 %v3305_v18, %v3286_v17 }
0x1db9   :  { %v3308_v21 = vadd.f32 %v3306_v19, %v5639_v3 }
0x1dbb   :  { %v5655_v23 = vadd.f32 %v4527_v20, %v3308_v21 }
0x1dbd   :  { %3318 = vadd.xlane.f32.xlu1 %v5655_v23 }
0x1e30   :  { %v3319_v37 = vpop.xlane.xlu1 %3318 }
0x1e31   :  { %v3320_v34 = vmul.f32 %v3319_v37, %v5382_v59  ;;  %v4420_v37 = vld [vmem:[%s5798_s22 + $0x3] sm:$0x7] }
0x1e32   :  { %v3400_v38 = vperm.slane %v4420_v37, 2 }
0x1e33   :  { %v5660_v3 = vsub.f32 %v5655_v23, %v3320_v34  ;;  %v3398_v34 = vperm.slane %v4420_v37, 0 }
0x1e35   :  { %v3322_v36 = vmul.f32 %v5660_v3, %v5660_v3 }
0x1e37   :  { %3323 = vadd.xlane.f32.xlu1 %v3322_v36  ;;  %v3399_v36 = vperm.slane %v4420_v37, 1 }
0x1eaa   :  { %v3324_v45 = vpop.xlane.xlu1 %3323 }
0x1eab   :  { %v3325_v8 = vmul.f32 %v3324_v45, %v5382_v59 }
0x1ead   :  { %v3326_v14 = vadd.f32 1e-05, %v3325_v8 }
0x1eaf   :  { %4624 = vrsqrt.f32 %v3326_v14  ;;  %vm3333_vm0 = vweird.f32 %v3326_v14 }
0x1eb5   :  { %v4625_v15 = vpop.eup %4624 }
0x1eb6   :  { %v3328_v17 = vmul.f32 %v4625_v15, %v3326_v14  ;;  %vm3334_vm15 = vweird.f32 %v4625_v15 }
0x1eb7   :  { %vm3335_vm2 = vmor %vm3333_vm0, %vm3334_vm15 }
0x1eb8   :  { %v3329_v18 = vmul.f32 %v4625_v15, %v3328_v17 }
0x1eba   :  { %v3330_v19 = vmul.f32 0.5, %v3329_v18 }
0x1ebc   :  { %v3331_v20 = vsub.f32 1.5, %v3330_v19 }
0x1ebe   :  { %v3332_v21 = vmul.f32 %v4625_v15, %v3331_v20 }
0x1ec0   :  { %v3336_v25 = vsel %vm3335_vm2, %v4625_v15, %v3332_v21 }
0x1ec1   :  { %v3337_v29 = vmul.f32 %v3336_v25, %v5660_v3 }
0x1ec3   :  { %v3341_v31 = vmul.f32 %v4528_v24, %v3337_v29 }
0x1ec5   :  { %v3345_v32 = vadd.f32 %v4529_v30, %v3341_v31 }
0x1ec7   :  { %3420 = vmatmul.f32.vlgmr.msra.gmra.mxu2 %v3345_v32  ;;  %3440 = vmatmul.f32.vlgmr.msra.gmra.mxu3 %v3345_v32 }
0x1ec8   :  { %3460 = vmatmul.f32.vlgmr.msrb.gmra.mxu0 %v3345_v32 }
0x1f45   :  { %v3461_v26 = vpop.f32.mrf.mxu0 }
0x1f46   :  { %v5669_v44 = vadd.f32 %v3461_v26, %v3400_v38 }
0x1f4a   :  { %v3421_v40 = vpop.f32.mrf.mxu2  ;;  %v3441_v41 = vpop.f32.mrf.mxu3 }
0x1f4b   :  { %v3422_v42 = vadd.f32 %v3421_v40, %v3398_v34  ;;  %v3442_v43 = vadd.f32 %v3441_v41, %v3399_v36 }
0x1f4d   :  { %4422 = vmatpush.xpose.msk.msrb.mxu1 %vm615_vm8, %v3442_v43  ;;  %3545 = vrot.lane.b32.xlu2 %v3422_v42, %s5042_s21 }
0x1f50   :  { %4423 = vmatmul.msk.f32.vlgmr.msrb.gmra.mxu1 %vm615_vm8, %v3422_v42 }
0x1f51   :  { %3540 = vmatpush.msra.mxu1 %v5669_v44 }
0x1f55   :  { %3750 = vrot.lane.b32.xlu2 %v3422_v42, %s5028_s7 }
0x1fa7   :  { %v3546_v62 = vpop.permute.xlu2 %3545 }
0x1faf   :  { %v3751_v2 = vpop.permute.xlu2 %3750 }
0x1fcd   :  { %v3506_v3 = vpop.f32.mrf.mxu1 }
0x1fce   :  { %v3509_v10 = vmul.f32 0.17677669, %v3506_v3  ;;  %v3470_v3 = vld [vmem:[#allocation14 + $0xa8] sm:$0xff] }
0x1fd0   :  { %v3510_v46 = vadd.f32 %v3509_v10, %v5604_v53  ;;  %v3469_v10 = vld [vmem:[#allocation14 + $0xa0] sm:$0xff] }
0x1fd2   :  { %v3511_v47 = vsel %vm2608_vm12, %v3510_v46, -inf }
0x1fd3   :  { %3512 = vmax.xlane.f32.xlu0 %v3511_v47  ;;  %v3475_v47 = vld [vmem:[#allocation14 + $0xd0] sm:$0xff] }
0x1fe7   :  { %3752 = vrot.lane.b32.xlu0 %v3442_v43, %s5028_s7 }
0x2046   :  { %v3513_v52 = vpop.xlane.xlu0 %3512 }
0x2047   :  { %v3514_v54 = vsub.f32 %v3510_v46, %v3513_v52  ;;  %v3476_v46 = vld [vmem:[#allocation14 + $0xd8] sm:$0xff]  ;;  %v3478_v52 = vld [vmem:[#allocation14 + $0xe8] sm:$0xff] }
0x2049   :  { %v3515_v27 = vmul.f32 1.442695, %v3514_v54 }
0x204b   :  { %4626 = vpow2.f32 %v3515_v27 }
0x2051   :  { %v4627_v39 = vpop.eup %4626 }
0x2052   :  { %v3517_v28 = vsel %vm2608_vm12, %v4627_v39, 0.0 }
0x2053   :  { %3518 = vadd.xlane.f32.xlu1 %v3517_v28 }
0x2059   :  { %v3753_v55 = vpop.permute.xlu0 %3752 }
0x205a   :  { %4434 = vmatpush.xpose.msk.msra.mxu3 %vm615_vm8, %v3753_v55 }
0x206c   :  { %3547 = vrot.lane.b32.xlu1 %v3442_v43, %s5042_s21 }
0x2074   :  { %3661 = vrot.lane.b32.xlu1 %v3442_v43, %s5043_s25  ;;  %v3471_v43 = vld [vmem:[#allocation14 + $0xb0] sm:$0xff] }
0x207c   :  { %3659 = vrot.lane.b32.xlu1 %v3422_v42, %s5043_s25  ;;  %v3472_v42 = vld [vmem:[#allocation14 + $0xb8] sm:$0xff] }
0x207d   :  { %3628 = vmatpush.msrb.mxu2 %v3472_v42  ;;  %v3914_v42 = vld [vmem:[#allocation16 + $0x318] sm:$0xff] }
0x207f   :  { %3629 = vmatpush.msrb.mxu2 %v3471_v43  ;;  %v3907_v43 = vld [vmem:[#allocation16 + $0x2e0] sm:$0xff] }
0x2081   :  { %3630 = vmatpush.msrb.mxu2 %v3470_v3  ;;  %v3908_v3 = vld [vmem:[#allocation16 + $0x2e8] sm:$0xff] }
0x2083   :  { %3631 = vmatpush.msrb.mxu2 %v3469_v10  ;;  %v3909_v10 = vld [vmem:[#allocation16 + $0x2f0] sm:$0xff] }
0x2085   :  { %3741 = vmatpush.msra.mxu2 %v3476_v46  ;;  %v3910_v46 = vld [vmem:[#allocation16 + $0x2f8] sm:$0xff] }
0x2087   :  { %3742 = vmatpush.msra.mxu2 %v3475_v47  ;;  %v3903_v47 = vld [vmem:[#allocation16 + $0x2c0] sm:$0xff] }
0x2089   :  { %3743 = vmatpush.msra.mxu2 %v3474_v48  ;;  %v3904_v48 = vld [vmem:[#allocation16 + $0x2c8] sm:$0xff] }
0x208b   :  { %3744 = vmatpush.msra.mxu2 %v3473_v49  ;;  %v3905_v49 = vld [vmem:[#allocation16 + $0x2d0] sm:$0xff] }
0x20c6   :  { %v3519_v57 = vpop.xlane.xlu1 %3518 }
0x20c7   :  { %4628 = vrcp.f32 %v3519_v57  ;;  %v3477_v57 = vld [vmem:[#allocation14 + $0xe0] sm:$0xff] }
0x20cd   :  { %v4629_v58 = vpop.eup %4628 }
0x20ce   :  { %v3521_v60 = vmul.f32 %v4629_v58, %v4627_v39 }
0x20d0   :  { %4424 = vmatmul.msk.f32.vlgmr.msra.gmra.mxu1 %vm2608_vm12, %v3521_v60 }
0x20de   :  { %v3548_v61 = vpop.permute.xlu1 %3547 }
0x20df   :  { %4425 = vmatpush.xpose.msk.msrb.mxu1 %vm615_vm8, %v3548_v61 }
0x20e2   :  { %4426 = vmatmul.msk.f32.vlgmr.msrb.gmra.mxu1 %vm615_vm8, %v3546_v62 }
0x20e6   :  { %v3662_v63 = vpop.permute.xlu1 %3661 }
0x20e7   :  { %4430 = vmatpush.xpose.msk.msra.mxu0 %vm615_vm8, %v3662_v63 }
0x20ee   :  { %v3660_v22 = vpop.permute.xlu1 %3659 }
0x20ef   :  { %4431 = vmatmul.msk.f32.vlgmr.msra.gmra.mxu0 %vm615_vm8, %v3660_v22  ;;  %v4530_v22 = vld [vmem:[%s5799_s23 + $0x1] ss:$0 sm:$0xff] }
0x214d   :  { %v3542_v1 = vpop.f32.mrf.mxu1 }
0x214e   :  { %4429 = vmatmul.msk.f32.vlgmr.msrb.gmra.mxu3 %vm615_vm8, %v3542_v1 }
0x2156   :  { %4435 = vmatmul.msk.f32.vlgmr.msra.gmra.mxu3 %vm615_vm8, %v3751_v2 }
0x215f   :  { %v3570_v4 = vpop.f32.mrf.mxu1 }
0x2160   :  { %v3573_v5 = vmul.f32 0.17677669, %v3570_v4 }
0x2162   :  { %v3574_v35 = vadd.f32 %v3573_v5, %v5604_v53 }
0x2164   :  { %v3575_v6 = vsel %vm2608_vm12, %v3574_v35, -inf }
0x2165   :  { %3576 = vmax.xlane.f32.xlu1 %v3575_v6  ;;  %v3940_v6 = vld [vmem:[#allocation16 + $0x3e8] sm:$0xff] }
0x2166   :  { %3974 = vmatpush.msrb.mxu3 %v3940_v6  ;;  %v3886_v6 = vld [vmem:[#allocation16 + $0x238] sm:$0xff] }
0x216c   :  { %v3684_v7 = vpop.f32.mrf.mxu0 }
0x216d   :  { %v3687_v56 = vmul.f32 0.17677669, %v3684_v7  ;;  %v3941_v7 = vld [vmem:[#allocation16 + $0x3f0] sm:$0xff] }
0x216f   :  { %v3688_v33 = vadd.f32 %v3687_v56, %v5604_v53  ;;  %v3942_v56 = vld [vmem:[#allocation16 + $0x3f8] sm:$0xff] }
0x2171   :  { %v3689_v0 = vsel %vm2608_vm12, %v3688_v33, -inf }
0x2172   :  { %3690 = vmax.xlane.f32.xlu2 %v3689_v0  ;;  %v3936_v0 = vld [vmem:[#allocation16 + $0x3c8] sm:$0xff] }
0x2173   :  { %3975 = vmatpush.msrb.mxu3 %v3936_v0  ;;  %v3882_v0 = vld [vmem:[#allocation16 + $0x218] sm:$0xff] }
0x21d1   :  { %v5695_v16 = vpop.f32.mrf.mxu3 }
0x21d8   :  { %v3577_v9 = vpop.xlane.xlu1 %3576 }
0x21d9   :  { %v3578_v11 = vsub.f32 %v3574_v35, %v3577_v9  ;;  %v3775_v12 = vpop.f32.mrf.mxu3  ;;  %v3939_v35 = vld [vmem:[#allocation16 + $0x3e0] sm:$0xff]  ;;  %v3938_v9 = vld [vmem:[#allocation16 + $0x3d8] sm:$0xff] }
0x21da   :  { %v3778_v13 = vmul.f32 0.17677669, %v3775_v12 }
0x21db   :  { %v3579_v45 = vmul.f32 1.442695, %v3578_v11 }
0x21dc   :  { %v3779_v8 = vadd.f32 %v3778_v13, %v5604_v53 }
0x21dd   :  { %4630 = vpow2.f32 %v3579_v45  ;;  %v3931_v45 = vld [vmem:[#allocation16 + $0x3a0] sm:$0xff] }
0x21de   :  { %v3780_v14 = vsel %vm2608_vm12, %v3779_v8, -inf }
0x21df   :  { %3781 = vmax.xlane.f32.xlu0 %v3780_v14  ;;  %v3933_v14 = vld [vmem:[#allocation16 + $0x3b0] sm:$0xff] }
0x21e3   :  { %v4631_v15 = vpop.eup %4630 }
0x21e4   :  { %v3581_v17 = vsel %vm2608_vm12, %v4631_v15, 0.0 }
0x21e5   :  { %v3691_v18 = vpop.xlane.xlu2 %3690  ;;  %3582 = vadd.xlane.f32.xlu1 %v3581_v17  ;;  %v3927_v17 = vld [vmem:[#allocation16 + $0x380] sm:$0xff] }
0x21e6   :  { %v3692_v19 = vsub.f32 %v3688_v33, %v3691_v18  ;;  %v3935_v33 = vld [vmem:[#allocation16 + $0x3c0] sm:$0xff]  ;;  %v3928_v18 = vld [vmem:[#allocation16 + $0x388] sm:$0xff] }
0x21e8   :  { %v3693_v20 = vmul.f32 1.442695, %v3692_v19  ;;  %v3929_v19 = vld [vmem:[#allocation16 + $0x390] sm:$0xff] }
0x21ea   :  { %4632 = vpow2.f32 %v3693_v20  ;;  %v3930_v20 = vld [vmem:[#allocation16 + $0x398] sm:$0xff] }
0x21f0   :  { %v4633_v21 = vpop.eup %4632 }
0x21f1   :  { %v3695_v24 = vsel %vm2608_vm12, %v4633_v21, 0.0 }
0x21f2   :  { %3696 = vadd.xlane.f32.xlu2 %v3695_v24  ;;  %v3924_v24 = vld [vmem:[#allocation16 + $0x368] sm:$0xff] }
0x21fe   :  { %3587 = vrot.lane.b32.xlu1 %v5669_v44, %s5042_s21 }
0x220a   :  { %3700 = vrot.lane.b32.xlu2 %v5669_v44, %s5043_s25 }
0x2252   :  { %v3782_v53 = vpop.xlane.xlu0 %3781 }
0x2253   :  { %v3783_v25 = vsub.f32 %v3779_v8, %v3782_v53  ;;  %v3932_v8 = vld [vmem:[#allocation16 + $0x3a8] sm:$0xff]  ;;  %v3925_v53 = vld [vmem:[#allocation16 + $0x370] sm:$0xff] }
0x2254   :  { %3976 = vmatpush.msrb.mxu3 %v3932_v8  ;;  %v4132_v8 = vld [vmem:[#allocation17 + $0x3e8] sm:$0xff] }
0x2255   :  { %v3784_v29 = vmul.f32 1.442695, %v3783_v25  ;;  %v3926_v25 = vld [vmem:[#allocation16 + $0x378] sm:$0xff] }
0x2256   :  { %3977 = vmatpush.msrb.mxu3 %v3928_v18  ;;  %v4115_v18 = vld [vmem:[#allocation17 + $0x360] sm:$0xff] }
0x2257   :  { %4634 = vpow2.f32 %v3784_v29  ;;  %v3919_v29 = vld [vmem:[#allocation16 + $0x340] sm:$0xff] }
0x2258   :  { %v3583_v32 = vpop.xlane.xlu1 %3582  ;;  %3978 = vmatpush.msrb.mxu3 %v3924_v24 }
0x2259   :  { %4636 = vrcp.f32 %v3583_v32  ;;  %v3922_v32 = vld [vmem:[#allocation16 + $0x358] sm:$0xff] }
0x225d   :  { %v4635_v30 = vpop.eup %4634 }
0x225e   :  { %v3786_v31 = vsel %vm2608_vm12, %v4635_v30, 0.0 }
0x225f   :  { %3787 = vadd.xlane.f32.xlu0 %v3786_v31  ;;  %v4637_v34 = vpop.eup %4636  ;;  %v3921_v31 = vld [vmem:[#allocation16 + $0x350] sm:$0xff] }
0x2260   :  { %v3585_v36 = vmul.f32 %v4637_v34, %v4631_v15  ;;  %v3934_v15 = vld [vmem:[#allocation16 + $0x3b8] sm:$0xff]  ;;  %v3916_v34 = vld [vmem:[#allocation16 + $0x328] sm:$0xff] }
0x2265   :  { %v3697_v37 = vpop.xlane.xlu2 %3696 }
0x2266   :  { %4638 = vrcp.f32 %v3697_v37  ;;  %v3915_v37 = vld [vmem:[#allocation16 + $0x320] sm:$0xff] }
0x226c   :  { %v4639_v40 = vpop.eup %4638 }
0x226d   :  { %v3701_v26 = vpop.permute.xlu2 %3700  ;;  %v3699_v41 = vmul.f32 %v4639_v40, %v4633_v21  ;;  %v3923_v21 = vld [vmem:[#allocation16 + $0x360] sm:$0xff]  ;;  %v3912_v40 = vld [vmem:[#allocation16 + $0x308] sm:$0xff] }
0x2270   :  { %v3588_v38 = vpop.permute.xlu1 %3587 }
0x2271   :  { %3608 = vmatpush.msra.mxu1 %v3588_v38  ;;  %v3918_v38 = vld [vmem:[#allocation16 + $0x338] sm:$0xff] }
0x2272   :  { %4427 = vmatmul.msk.f32.vlgmr.msra.gmra.mxu1 %vm2608_vm12, %v3585_v36  ;;  %v3917_v36 = vld [vmem:[#allocation16 + $0x330] sm:$0xff] }
0x2273   :  { %3721 = vmatpush.msrb.mxu1 %v3701_v26  ;;  %3791 = vrot.lane.b32.xlu0 %v5669_v44, %s5028_s7  ;;  %v3480_v44 = vld [vmem:[#allocation14 + $0xf8] sm:$0xff]  ;;  %v3911_v26 = vld [vmem:[#allocation16 + $0x300] sm:$0xff]  ;;  %s5804_s7 = sld [smem:[#allocation51_spill]] }
0x2275   :  { %3832 = vmatpush.msra.mxu1 %v3480_v44  ;;  %v3906_v44 = vld [vmem:[#allocation16 + $0x2d8] sm:$0xff] }
0x2277   :  { %3833 = vmatpush.msra.mxu1 %v3479_v50  ;;  %v3899_v50 = vld [vmem:[#allocation16 + $0x2a0] sm:$0xff] }
0x2279   :  { %3834 = vmatpush.msra.mxu1 %v3478_v52  ;;  %v3901_v52 = vld [vmem:[#allocation16 + $0x2b0] sm:$0xff] }
0x227a   :  { %4432 = vmatmul.msk.f32.vlgmr.msrb.gmra.mxu1 %vm2608_vm12, %v3699_v41  ;;  %v3913_v41 = vld [vmem:[#allocation16 + $0x310] sm:$0xff] }
0x227b   :  { %3835 = vmatpush.msra.mxu1 %v3477_v57  ;;  %v3891_v57 = vld [vmem:[#allocation16 + $0x260] sm:$0xff] }
0x227d   :  { %4014 = vmatpush.msrb.mxu1 %v3942_v56  ;;  %v3880_v56 = vld [vmem:[#allocation16 + $0x208] sm:$0xff] }
0x227f   :  { %4015 = vmatpush.msrb.mxu1 %v3938_v9  ;;  %v4134_v9 = vld [vmem:[#allocation17 + $0x3f8] sm:$0xff] }
0x2281   :  { %4016 = vmatpush.msrb.mxu1 %v3934_v15  ;;  %v4102_v15 = vld [vmem:[#allocation17 + $0x2f8] sm:$0xff] }
0x2283   :  { %4017 = vmatpush.msrb.mxu1 %v3930_v20 }
0x2285   :  { %4018 = vmatpush.msrb.mxu1 %v3926_v25 }
0x2287   :  { %4019 = vmatpush.msrb.mxu1 %v3922_v32 }
0x2289   :  { %4020 = vmatpush.msrb.mxu1 %v3918_v38 }
0x228b   :  { %4021 = vmatpush.msrb.mxu1 %v3914_v42  ;;  %v4130_v42 = vld [vmem:[#allocation17 + $0x3d8] sm:$0xff] }
0x228d   :  { %4022 = vmatpush.msrb.mxu1 %v3910_v46  ;;  %v4083_v46 = vld [vmem:[#allocation17 + $0x260] sm:$0xff] }
0x228f   :  { %4023 = vmatpush.msrb.mxu1 %v3906_v44  ;;  %v4082_v44 = vld [vmem:[#allocation17 + $0x258] sm:$0xff] }
0x22d2   :  { %v3788_v51 = vpop.xlane.xlu0 %3787 }
0x22d3   :  { %4640 = vrcp.f32 %v3788_v51  ;;  %v3900_v51 = vld [vmem:[#allocation16 + $0x2a8] sm:$0xff] }
0x22d9   :  { %v4641_v54 = vpop.eup %4640 }
0x22da   :  { %v3790_v27 = vmul.f32 %v4641_v54, %v4635_v30  ;;  %v3920_v30 = vld [vmem:[#allocation16 + $0x348] sm:$0xff]  ;;  %v3902_v54 = vld [vmem:[#allocation16 + $0x2b8] sm:$0xff] }
0x22db   :  { %3979 = vmatpush.msrb.mxu3 %v3920_v30  ;;  %4024 = vmatpush.msrb.mxu1 %v3902_v54  ;;  %v4081_v54 = vld [vmem:[#allocation17 + $0x250] sm:$0xff] }
0x22dd   :  { %3980 = vmatpush.msrb.mxu3 %v3916_v34  ;;  %v4532_v34 = vld [vmem:[%s5801_s8 + $0x1] ss:$0 sm:$0xff] }
0x22df   :  { %3981 = vmatpush.msrb.mxu3 %v3912_v40  ;;  %v4101_v40 = vld [vmem:[#allocation17 + $0x2f0] sm:$0xff] }
0x22e1   :  { %3982 = vmatpush.msrb.mxu3 %v3908_v3  ;;  %v4100_v3 = vld [vmem:[#allocation17 + $0x2e8] sm:$0xff] }
0x22e3   :  { %3983 = vmatpush.msrb.mxu3 %v3904_v48  ;;  %v4112_v48 = vld [vmem:[#allocation17 + $0x348] sm:$0xff] }
0x22e5   :  { %v3792_v39 = vpop.permute.xlu0 %3791  ;;  %3984 = vmatpush.msrb.mxu3 %v3900_v51  ;;  %v4111_v51 = vld [vmem:[#allocation17 + $0x340] sm:$0xff] }
0x22e6   :  { %3812 = vmatpush.msrb.mxu0 %v3792_v39  ;;  %v3896_v39 = vld [vmem:[#allocation16 + $0x288] sm:$0xff] }
0x22e7   :  { %4436 = vmatmul.msk.f32.vlgmr.msrb.gmra.mxu0 %vm2608_vm12, %v3790_v27  ;;  %v3895_v27 = vld [vmem:[#allocation16 + $0x280] sm:$0xff]  ;;  %3985 = vmatpush.msrb.mxu3 %v3896_v39  ;;  %v4110_v39 = vld [vmem:[#allocation17 + $0x338] sm:$0xff] }
0x22e8   :  { %3994 = vmatpush.msra.mxu0 %v3941_v7  ;;  %v3879_v7 = vld [vmem:[#allocation16 + $0x200] sm:$0xff] }
0x22ef   :  { %v3610_v28 = vpop.f32.mrf.mxu1 }
0x22f0   :  { %4428 = vmatmul.msk.f32.vlgmr.msrb.gmra.mxu2 %vm615_vm8, %v3610_v28  ;;  %v3897_v28 = vld [vmem:[#allocation16 + $0x290] sm:$0xff] }
0x22f1   :  { %3954 = vmatpush.msrb.mxu2 %v3939_v35  ;;  %v3885_v35 = vld [vmem:[#allocation16 + $0x230] sm:$0xff] }
0x22f3   :  { %3955 = vmatpush.msrb.mxu2 %v3935_v33  ;;  %v3881_v33 = vld [vmem:[#allocation16 + $0x210] sm:$0xff] }
0x22f5   :  { %3956 = vmatpush.msrb.mxu2 %v3931_v45 }
0x22f7   :  { %v3723_v55 = vpop.f32.mrf.mxu1  ;;  %3957 = vmatpush.msrb.mxu2 %v3927_v17 }
0x22f8   :  { %4433 = vmatmul.msk.f32.vlgmr.msra.gmra.mxu2 %vm615_vm8, %v3723_v55  ;;  %v3898_v55 = vld [vmem:[#allocation16 + $0x298] sm:$0xff] }
0x22f9   :  { %3958 = vmatpush.msrb.mxu2 %v3923_v21  ;;  %4025 = vmatpush.msrb.mxu1 %v3898_v55  ;;  %v4080_v55 = vld [vmem:[#allocation17 + $0x248] sm:$0xff] }
0x22fb   :  { %3959 = vmatpush.msrb.mxu2 %v3919_v29 }
0x22fd   :  { %3960 = vmatpush.msrb.mxu2 %v3915_v37 }
0x22ff   :  { %3961 = vmatpush.msrb.mxu2 %v3911_v26  ;;  %v4085_v26 = vld [vmem:[#allocation17 + $0x270] sm:$0xff] }
0x2301   :  { %3962 = vmatpush.msrb.mxu2 %v3907_v43  ;;  %v4084_v43 = vld [vmem:[#allocation17 + $0x268] sm:$0xff] }
0x2303   :  { %3963 = vmatpush.msrb.mxu2 %v3903_v47  ;;  %v4099_v47 = vld [vmem:[#allocation17 + $0x2e0] sm:$0xff] }
0x2305   :  { %3964 = vmatpush.msrb.mxu2 %v3899_v50  ;;  %v4098_v50 = vld [vmem:[#allocation17 + $0x2d8] sm:$0xff] }
0x2307   :  { %3965 = vmatpush.msrb.mxu2 %v3895_v27  ;;  %v4097_v27 = vld [vmem:[#allocation17 + $0x2d0] sm:$0xff] }
0x2309   :  { %3966 = vmatpush.msrb.mxu2 %v3891_v57  ;;  %v4096_v57 = vld [vmem:[#allocation17 + $0x2c8] sm:$0xff] }
0x2364   :  { %v3814_v58 = vpop.f32.mrf.mxu0 }
0x2365   :  { %4437 = vmatmul.msk.f32.vlgmr.msra.gmra.mxu1 %vm615_vm8, %v3814_v58  ;;  %v3892_v58 = vld [vmem:[#allocation16 + $0x268] sm:$0xff] }
0x2366   :  { %3986 = vmatpush.msrb.mxu3 %v3892_v58  ;;  %v4109_v58 = vld [vmem:[#allocation17 + $0x330] sm:$0xff] }
0x2373   :  { %v3633_v60 = vpop.f32.mrf.mxu2 }
0x2374   :  { %v3657_v62 = vadd.f32 %v5695_v16, %v3633_v60  ;;  %v3937_v16 = vld [vmem:[#allocation16 + $0x3d0] sm:$0xff] }
0x2375   :  { %3995 = vmatpush.msra.mxu0 %v3937_v16  ;;  %v3893_v60 = vld [vmem:[#allocation16 + $0x270] sm:$0xff]  ;;  %v4118_v16 = vld [vmem:[#allocation17 + $0x378] sm:$0xff] }
0x2377   :  { %3996 = vmatpush.msra.mxu0 %v3933_v14  ;;  %v4086_v14 = vld [vmem:[#allocation17 + $0x278] sm:$0xff] }
0x2379   :  { %3997 = vmatpush.msra.mxu0 %v3929_v19  ;;  %v4131_v19 = vld [vmem:[#allocation17 + $0x3e0] sm:$0xff] }
0x237b   :  { %v3746_v61 = vpop.f32.mrf.mxu2  ;;  %3998 = vmatpush.msra.mxu0 %v3925_v53 }
0x237c   :  { %v3749_v63 = vadd.f32 %v3746_v61, %v3657_v62  ;;  %v3894_v61 = vld [vmem:[#allocation16 + $0x278] sm:$0xff]  ;;  %v3887_v62 = vld [vmem:[#allocation16 + $0x240] sm:$0xff] }
0x237d   :  { %3999 = vmatpush.msra.mxu0 %v3921_v31  ;;  %4026 = vmatpush.msrb.mxu1 %v3894_v61  ;;  %v4531_v31 = vld [vmem:[%s5800_s3 + $0x1] ss:$0 sm:$0xff] }
0x237e   :  { %3967 = vmatpush.msrb.mxu2 %v3887_v62  ;;  %v4079_v61 = vld [vmem:[#allocation17 + $0x240] sm:$0xff] }
0x237f   :  { %4000 = vmatpush.msra.mxu0 %v3917_v36  ;;  %v4095_v62 = vld [vmem:[#allocation17 + $0x2c0] sm:$0xff] }
0x2381   :  { %4001 = vmatpush.msra.mxu0 %v3913_v41  ;;  %v4114_v41 = vld [vmem:[#allocation17 + $0x358] sm:$0xff] }
0x2383   :  { %4002 = vmatpush.msra.mxu0 %v3909_v10  ;;  %v4113_v10 = vld [vmem:[#allocation17 + $0x350] sm:$0xff] }
0x2385   :  { %4003 = vmatpush.msra.mxu0 %v3905_v49  ;;  %v4128_v49 = vld [vmem:[#allocation17 + $0x3c8] sm:$0xff] }
0x2387   :  { %4004 = vmatpush.msra.mxu0 %v3901_v52  ;;  %v4127_v52 = vld [vmem:[#allocation17 + $0x3c0] sm:$0xff] }
0x2389   :  { %4005 = vmatpush.msra.mxu0 %v3897_v28  ;;  %v4126_v28 = vld [vmem:[#allocation17 + $0x3b8] sm:$0xff] }
0x238b   :  { %4006 = vmatpush.msra.mxu0 %v3893_v60  ;;  %v4125_v60 = vld [vmem:[#allocation17 + $0x3b0] sm:$0xff] }
0x23e2   :  { %v3837_v1 = vpop.f32.mrf.mxu1 }
0x23e3   :  { %v3840_v2 = vadd.f32 %v3837_v1, %v3749_v63  ;;  %v3888_v63 = vld [vmem:[#allocation16 + $0x248] sm:$0xff]  ;;  %v3890_v1 = vld [vmem:[#allocation16 + $0x258] sm:$0xff] }
0x23e4   :  { %3987 = vmatpush.msrb.mxu3 %v3888_v63  ;;  %4027 = vmatpush.msrb.mxu1 %v3890_v1  ;;  %v4108_v63 = vld [vmem:[#allocation17 + $0x328] sm:$0xff]  ;;  %v4078_v1 = vld [vmem:[#allocation17 + $0x238] sm:$0xff] }
0x23e5   :  { %v3844_v4 = vadd.f32 %v4530_v22, %v3840_v2  ;;  %v3889_v22 = vld [vmem:[#allocation16 + $0x250] sm:$0xff]  ;;  %v3883_v2 = vld [vmem:[#allocation16 + $0x220] sm:$0xff] }
0x23e6   :  { %4007 = vmatpush.msra.mxu0 %v3889_v22  ;;  %3968 = vmatpush.msrb.mxu2 %v3883_v2  ;;  %v4124_v22 = vld [vmem:[#allocation17 + $0x3a8] sm:$0xff]  ;;  %v4094_v2 = vld [vmem:[#allocation17 + $0x2b8] sm:$0xff] }
0x23e7   :  { %v5717_v5 = vadd.f32 %v3844_v4, %v5655_v23  ;;  %v3884_v4 = vld [vmem:[#allocation16 + $0x228] sm:$0xff]  ;;  %4028 = vmatpush.msrb.mxu1 %v3886_v6  ;;  %v4077_v6 = vld [vmem:[#allocation17 + $0x230] sm:$0xff] }
0x23e8   :  { %3988 = vmatpush.msrb.mxu3 %v3884_v4  ;;  %4008 = vmatpush.msra.mxu0 %v3885_v35  ;;  %v4107_v4 = vld [vmem:[#allocation17 + $0x320] sm:$0xff] }
0x23e9   :  { %3850 = vadd.xlane.f32.xlu1 %v5717_v5  ;;  %3969 = vmatpush.msrb.mxu2 %v3879_v7  ;;  %v4123_v35 = vld [vmem:[#allocation17 + $0x3a0] sm:$0xff]  ;;  %v4093_v7 = vld [vmem:[#allocation17 + $0x2b0] sm:$0xff] }
0x23ea   :  { %3989 = vmatpush.msrb.mxu3 %v3880_v56  ;;  %4009 = vmatpush.msra.mxu0 %v3881_v33  ;;  %v4106_v56 = vld [vmem:[#allocation17 + $0x318] sm:$0xff] }
0x23eb   :  { %4029 = vmatpush.msrb.mxu1 %v3882_v0  ;;  %4135 = vmatpush.msra.mxu2 %v4086_v14  ;;  %v4122_v33 = vld [vmem:[#allocation17 + $0x398] sm:$0xff]  ;;  %v4076_v0 = vld [vmem:[#allocation17 + $0x228] sm:$0xff] }
0x23ec   :  { %4175 = vmatpush.msrb.mxu0 %v4118_v16  ;;  %4155 = vmatpush.msra.mxu3 %v4102_v15  ;;  %v4092_v16 = vld [vmem:[#allocation17 + $0x2a8] sm:$0xff]  ;;  %v4074_v14 = vld [vmem:[#allocation17 + $0x218] sm:$0xff] }
0x23ed   :  { %4195 = vmatpush.msra.mxu1 %v4134_v9  ;;  %4136 = vmatpush.msra.mxu2 %v4085_v26  ;;  %v4105_v9 = vld [vmem:[#allocation17 + $0x310] sm:$0xff]  ;;  %v4090_v15 = vld [vmem:[#allocation17 + $0x298] sm:$0xff] }
0x23ee   :  { %4156 = vmatpush.msra.mxu3 %v4101_v40 }
0x23ef   :  { %4137 = vmatpush.msra.mxu2 %v4084_v43 }
0x23f0   :  { %4157 = vmatpush.msra.mxu3 %v4100_v3 }
0x23f1   :  { %4138 = vmatpush.msra.mxu2 %v4083_v46 }
0x23f2   :  { %4158 = vmatpush.msra.mxu3 %v4099_v47 }
0x23f3   :  { %4139 = vmatpush.msra.mxu2 %v4082_v44 }
0x23f4   :  { %4159 = vmatpush.msra.mxu3 %v4098_v50 }
0x23f5   :  { %4140 = vmatpush.msra.mxu2 %v4081_v54 }
0x23f6   :  { %4160 = vmatpush.msra.mxu3 %v4097_v27 }
0x23f7   :  { %4141 = vmatpush.msra.mxu2 %v4080_v55 }
0x23f8   :  { %4161 = vmatpush.msra.mxu3 %v4096_v57 }
0x23f9   :  { %4142 = vmatpush.msra.mxu2 %v4079_v61 }
0x23fa   :  { %4162 = vmatpush.msra.mxu3 %v4095_v62 }
0x23fb   :  { %4143 = vmatpush.msra.mxu2 %v4078_v1 }
0x23fc   :  { %4163 = vmatpush.msra.mxu3 %v4094_v2 }
0x23fd   :  { %4144 = vmatpush.msra.mxu2 %v4077_v6 }
0x23fe   :  { %4164 = vmatpush.msra.mxu3 %v4093_v7 }
0x23ff   :  { %4145 = vmatpush.msra.mxu2 %v4076_v0 }
0x2400   :  { %4165 = vmatpush.msra.mxu3 %v4092_v16 }
0x245c   :  { %v3851_v23 = vpop.xlane.xlu1 %3850 }
0x245d   :  { %v3852_v11 = vmul.f32 %v3851_v23, %v5382_v59  ;;  %v4117_v23 = vld [vmem:[#allocation17 + $0x370] sm:$0xff] }
0x245e   :  { %4176 = vmatpush.msrb.mxu0 %v4117_v23  ;;  %v4121_v23 = vld [vmem:[#allocation17 + $0x390] sm:$0xff] }
0x245f   :  { %v5722_v12 = vsub.f32 %v5717_v5, %v3852_v11  ;;  %v4133_v11 = vld [vmem:[#allocation17 + $0x3f0] sm:$0xff] }
0x2460   :  { %4196 = vmatpush.msra.mxu1 %v4133_v11  ;;  %v4075_v11 = vld [vmem:[#allocation17 + $0x220] sm:$0xff] }
0x2461   :  { %v3854_v13 = vmul.f32 %v5722_v12, %v5722_v12  ;;  %4146 = vmatpush.msra.mxu2 %v4075_v11 }
0x2462   :  { %4197 = vmatpush.msra.mxu1 %v4132_v8  ;;  %v4120_v8 = vld [vmem:[#allocation17 + $0x388] sm:$0xff] }
0x2463   :  { %3855 = vadd.xlane.f32.xlu0 %v3854_v13  ;;  %v4116_v13 = vld [vmem:[#allocation17 + $0x368] sm:$0xff]  ;;  %4147 = vmatpush.msra.mxu2 %v4074_v14 }
0x2464   :  { %4177 = vmatpush.msrb.mxu0 %v4116_v13  ;;  %4198 = vmatpush.msra.mxu1 %v4131_v19  ;;  %v4091_v13 = vld [vmem:[#allocation17 + $0x2a0] sm:$0xff]  ;;  %v4073_v19 = vld [vmem:[#allocation17 + $0x210] sm:$0xff] }
0x2465   :  { %4166 = vmatpush.msra.mxu3 %v4091_v13  ;;  %4148 = vmatpush.msra.mxu2 %v4073_v19  ;;  %v4533_v19 = vld [vmem:[%s5803_s19 + $0x1] ss:$0 sm:$0xff] }
0x2466   :  { %4178 = vmatpush.msrb.mxu0 %v4115_v18  ;;  %4199 = vmatpush.msra.mxu1 %v4130_v42  ;;  %v4119_v18 = vld [vmem:[#allocation17 + $0x380] sm:$0xff] }
0x2467   :  { %4167 = vmatpush.msra.mxu3 %v4090_v15 }
0x2468   :  { %4179 = vmatpush.msrb.mxu0 %v4114_v41 }
0x246a   :  { %4180 = vmatpush.msrb.mxu0 %v4113_v10 }
0x246c   :  { %4181 = vmatpush.msrb.mxu0 %v4112_v48 }
0x246e   :  { %4182 = vmatpush.msrb.mxu0 %v4111_v51 }
0x2470   :  { %4183 = vmatpush.msrb.mxu0 %v4110_v39 }
0x2472   :  { %4184 = vmatpush.msrb.mxu0 %v4109_v58 }
0x2474   :  { %4185 = vmatpush.msrb.mxu0 %v4108_v63 }
0x2476   :  { %4186 = vmatpush.msrb.mxu0 %v4107_v4 }
0x2478   :  { %4187 = vmatpush.msrb.mxu0 %v4106_v56 }
0x247a   :  { %4188 = vmatpush.msrb.mxu0 %v4105_v9 }
0x24d6   :  { %v3856_v45 = vpop.xlane.xlu0 %3855 }
0x24d7   :  { %v3857_v17 = vmul.f32 %v3856_v45, %v5382_v59  ;;  %v4104_v45 = vld [vmem:[#allocation17 + $0x308] sm:$0xff] }
0x24d8   :  { %4189 = vmatpush.msrb.mxu0 %v4104_v45 }
0x24d9   :  { %v3858_v20 = vadd.f32 1e-05, %v3857_v17  ;;  %v4103_v17 = vld [vmem:[#allocation17 + $0x300] sm:$0xff] }
0x24da   :  { %4190 = vmatpush.msrb.mxu0 %v4103_v17 }
0x24db   :  { %4642 = vrsqrt.f32 %v3858_v20  ;;  %vm3865_vm4 = vweird.f32 %v3858_v20 }
0x24e1   :  { %v4643_v21 = vpop.eup %4642 }
0x24e2   :  { %v3860_v24 = vmul.f32 %v4643_v21, %v3858_v20  ;;  %vm3866_vm8 = vweird.f32 %v4643_v21  ;;  %v4089_v20 = vld [vmem:[#allocation17 + $0x290] sm:$0xff] }
0x24e3   :  { %vm3867_vm5 = vmor %vm3865_vm4, %vm3866_vm8  ;;  %4168 = vmatpush.msra.mxu3 %v4089_v20 }
0x24e4   :  { %v3861_v53 = vmul.f32 %v4643_v21, %v3860_v24  ;;  %v4440_v24 = vld [vmem:[%s5802_s14 + $0x4] sm:$0xf] }
0x24e5   :  { %v3947_v26 = vperm.slane %v4440_v24, 1 }
0x24e6   :  { %v3862_v25 = vmul.f32 0.5, %v3861_v53  ;;  %v4088_v53 = vld [vmem:[#allocation17 + $0x288] sm:$0xff] }
0x24e7   :  { %4169 = vmatpush.msra.mxu3 %v4088_v53  ;;  %v4266_v53 = vld [vmem:[#allocation20 + $0x70] sm:$0xff] }
0x24e8   :  { %v3863_v29 = vsub.f32 1.5, %v3862_v25  ;;  %v4071_v25 = vld [vmem:[#allocation17 + $0x200] sm:$0xff] }
0x24ea   :  { %v3864_v30 = vmul.f32 %v4643_v21, %v3863_v29  ;;  %v4087_v29 = vld [vmem:[#allocation17 + $0x280] sm:$0xff] }
0x24eb   :  { %4170 = vmatpush.msra.mxu3 %v4087_v29  ;;  %v4264_v29 = vld [vmem:[#allocation20 + $0x60] sm:$0xff] }
0x24ec   :  { %v3868_v32 = vsel %vm3867_vm5, %v4643_v21, %v3864_v30  ;;  %v4072_v21 = vld [vmem:[#allocation17 + $0x208] sm:$0xff]  ;;  %v3948_v30 = vperm.slane %v4440_v24, 2 }
0x24ed   :  { %v3869_v37 = vmul.f32 %v3868_v32, %v5722_v12  ;;  %v4129_v12 = vld [vmem:[#allocation17 + $0x3d0] sm:$0xff]  ;;  %4149 = vmatpush.msra.mxu2 %v4072_v21 }
0x24ee   :  { %4200 = vmatpush.msra.mxu1 %v4129_v12 }
0x24ef   :  { %v3873_v36 = vmul.f32 %v4531_v31, %v3869_v37  ;;  %v3949_v31 = vperm.slane %v4440_v24, 3  ;;  %4150 = vmatpush.msra.mxu2 %v4071_v25  ;;  %v4265_v25 = vld [vmem:[#allocation20 + $0x68] sm:$0xff] }
0x24f0   :  { %4201 = vmatpush.msra.mxu1 %v4128_v49 }
0x24f1   :  { %v3877_v38 = vadd.f32 %v4532_v34, %v3873_v36 }
0x24f2   :  { %4202 = vmatpush.msra.mxu1 %v4127_v52 }
0x24f3   :  { %3970 = vmatmul.f32.vlgmr.msrb.gmra.mxu2 %v3877_v38  ;;  %3990 = vmatmul.f32.vlgmr.msrb.gmra.mxu3 %v3877_v38 }
0x24f4   :  { %4010 = vmatmul.f32.vlgmr.msra.gmra.mxu0 %v3877_v38  ;;  %4030 = vmatmul.f32.vlgmr.msrb.gmra.mxu1 %v3877_v38  ;;  %v3946_v38 = vperm.slane %v4440_v24, 0  ;;  %v4267_v24 = vld [vmem:[#allocation20 + $0x78] sm:$0xff] }
0x24f5   :  { %4203 = vmatpush.msra.mxu1 %v4126_v28  ;;  %4268 = vmatpush.xpose.msrb.mxu2 %v4267_v24 }
0x24f7   :  { %4204 = vmatpush.msra.mxu1 %v4125_v60 }
0x24f9   :  { %4205 = vmatpush.msra.mxu1 %v4124_v22  ;;  %4269 = vmatpush.xpose.msrb.mxu2 %v4266_v53 }
0x24fb   :  { %4206 = vmatpush.msra.mxu1 %v4123_v35 }
0x24fd   :  { %4207 = vmatpush.msra.mxu1 %v4122_v33  ;;  %4270 = vmatpush.xpose.msrb.mxu2 %v4265_v25 }
0x24ff   :  { %4208 = vmatpush.msra.mxu1 %v4121_v23 }
0x2501   :  { %4209 = vmatpush.msra.mxu1 %v4120_v8  ;;  %4271 = vmatpush.xpose.msrb.mxu2 %v4264_v29 }
0x2503   :  { %4210 = vmatpush.msra.mxu1 %v4119_v18 }
0x2571   :  { %v4011_v32 = vpop.f32.mrf.mxu0  ;;  %v4031_v37 = vpop.f32.mrf.mxu1 }
0x2572   :  { %v4012_v34 = vadd.f32 %v4011_v32, %v3948_v30  ;;  %v4032_v36 = vadd.f32 %v4031_v37, %v3949_v31  ;;  %v4263_v30 = vld [vmem:[#allocation20 + $0x58] sm:$0xff]  ;;  %v4262_v31 = vld [vmem:[#allocation20 + $0x50] sm:$0xff]  ;;  %v4261_v32 = vld [vmem:[#allocation20 + $0x48] sm:$0xff] }
0x2573   :  { %4272 = vmatpush.xpose.msrb.mxu2 %v4263_v30 }
0x2574   :  { %v4040_v40 = vmul.f32 0.044715, %v4012_v34  ;;  %v4041_v41 = vmul.f32 0.044715, %v4032_v36  ;;  %v4036_v22 = vmul.f32 0.5, %v4012_v34  ;;  %v4037_v2 = vmul.f32 0.5, %v4032_v36 }
0x2576   :  { %v4044_v42 = vmul.f32 %v4040_v40, %v4012_v34  ;;  %v4045_v43 = vmul.f32 %v4041_v41, %v4032_v36  ;;  %v3971_v3 = vpop.f32.mrf.mxu2  ;;  %v3991_v10 = vpop.f32.mrf.mxu3  ;;  %v4258_v40 = vld [vmem:[#allocation20 + $0x30] sm:$0xff]  ;;  %v4257_v41 = vld [vmem:[#allocation20 + $0x28] sm:$0xff] }
0x2577   :  { %v3972_v12 = vadd.f32 %v3971_v3, %v3946_v38  ;;  %v3992_v46 = vadd.f32 %v3991_v10, %v3947_v26  ;;  %4273 = vmatpush.xpose.msrb.mxu2 %v4262_v31  ;;  %v4259_v26 = vld [vmem:[#allocation20 + $0x38] sm:$0xff]  ;;  %v4254_v3 = vld [vmem:[#allocation20 + $0x10] sm:$0xff]  ;;  %v4253_v10 = vld [vmem:[#allocation20 + $0x8] sm:$0xff] }
0x2578   :  { %v4048_v47 = vmul.f32 %v4044_v42, %v4012_v34  ;;  %v4049_v48 = vmul.f32 %v4045_v43, %v4032_v36  ;;  %v4256_v42 = vld [vmem:[#allocation20 + $0x20] sm:$0xff]  ;;  %v4255_v43 = vld [vmem:[#allocation20 + $0x18] sm:$0xff] }
0x2579   :  { %v4038_v49 = vmul.f32 0.044715, %v3972_v12  ;;  %v4039_v44 = vmul.f32 0.044715, %v3992_v46  ;;  %v4034_v33 = vmul.f32 0.5, %v3972_v12  ;;  %v4035_v16 = vmul.f32 0.5, %v3992_v46 }
0x257a   :  { %v4052_v50 = vadd.f32 %v4048_v47, %v4012_v34  ;;  %v4053_v51 = vadd.f32 %v4049_v48, %v4032_v36 }
0x257b   :  { %v4042_v52 = vmul.f32 %v4038_v49, %v3972_v12  ;;  %v4043_v54 = vmul.f32 %v4039_v44, %v3992_v46  ;;  %4274 = vmatpush.xpose.msrb.mxu2 %v4261_v32 }
0x257c   :  { %v4056_v27 = vmul.f32 0.7978846, %v4052_v50  ;;  %v4057_v39 = vmul.f32 0.7978846, %v4053_v51 }
0x257d   :  { %v4046_v28 = vmul.f32 %v4042_v52, %v3972_v12  ;;  %v4047_v55 = vmul.f32 %v4043_v54, %v3992_v46 }
0x257e   :  { %4644 = vtanh.f32 %v4056_v27  ;;  %v4534_v27 = vld [vmem:[%s5804_s7] ss:$0 sm:$0xff] }
0x257f   :  { %4646 = vtanh.f32 %v4057_v39  ;;  %v4050_v57 = vadd.f32 %v4046_v28, %v3972_v12  ;;  %v4051_v58 = vadd.f32 %v4047_v55, %v3992_v46  ;;  %v4252_v12 = vld [vmem:[#allocation20] sm:$0xff] }
0x2580   :  { %v4535_v55 = vld [vmem:[%s5805_s10] ss:$0 sm:$0xff] }
0x2581   :  { %v4054_v60 = vmul.f32 0.7978846, %v4050_v57  ;;  %v4055_v61 = vmul.f32 0.7978846, %v4051_v58 }
0x2583   :  { %4648 = vtanh.f32 %v4054_v60 }
0x2584   :  { %v4645_v62 = vpop.eup %4644  ;;  %4650 = vtanh.f32 %v4055_v61 }
0x2585   :  { %v4647_v63 = vpop.eup %4646  ;;  %v4064_v1 = vadd.f32 1.0, %v4645_v62 }
0x2586   :  { %v4065_v4 = vadd.f32 1.0, %v4647_v63 }
0x2587   :  { %v4068_v35 = vmul.f32 %v4064_v1, %v4036_v22 }
0x2588   :  { %v4069_v6 = vmul.f32 %v4065_v4, %v4037_v2 }
0x2589   :  { %v4649_v7 = vpop.eup %4648  ;;  %4191 = vmatmul.f32.vlgmr.msrb.gmra.mxu0 %v4068_v35 }
0x258a   :  { %v4651_v56 = vpop.eup %4650  ;;  %4211 = vmatmul.f32.vlgmr.msra.gmra.mxu1 %v4069_v6  ;;  %v4062_v0 = vadd.f32 1.0, %v4649_v7 }
0x258b   :  { %v4063_v9 = vadd.f32 1.0, %v4651_v56 }
0x258c   :  { %v4066_v23 = vmul.f32 %v4062_v0, %v4034_v33 }
0x258d   :  { %v4067_v11 = vmul.f32 %v4063_v9, %v4035_v16 }
0x258e   :  { %4151 = vmatmul.f32.vlgmr.msra.gmra.mxu2 %v4066_v23 }
0x258f   :  { %4171 = vmatmul.f32.vlgmr.msra.gmra.mxu3 %v4067_v11 }
0x2606   :  { %v4192_v14 = vpop.f32.mrf.mxu0 }
0x2607   :  { %v4212_v17 = vpop.f32.mrf.mxu1 }
0x2611   :  { %v4152_v13 = vpop.f32.mrf.mxu2 }
0x2612   :  { %v4172_v45 = vpop.f32.mrf.mxu3 }
0x2613   :  { %v4173_v8 = vadd.f32 %v4172_v45, %v4152_v13 }
0x2615   :  { %v4193_v15 = vadd.f32 %v4192_v14, %v4173_v8 }
0x2617   :  { %v4213_v18 = vadd.f32 %v4212_v17, %v4193_v15 }
0x2619   :  { %v4215_v20 = vadd.f32 %v4213_v18, %v5717_v5  ;;  %v4260_v5 = vld [vmem:[#allocation20 + $0x40] sm:$0xff] }
0x261a   :  { %4275 = vmatpush.xpose.msrb.mxu2 %v4260_v5 }
0x261b   :  { %v4221_v21 = vadd.f32 %v4533_v19, %v4215_v20 }
0x261d   :  { %4224 = vadd.xlane.f32.xlu2 %v4221_v21 }
0x261e   :  { %4276 = vmatpush.xpose.msrb.mxu2 %v4259_v26 }
0x2622   :  { %4277 = vmatpush.xpose.msrb.mxu2 %v4258_v40 }
0x2626   :  { %4278 = vmatpush.xpose.msrb.mxu2 %v4257_v41 }
0x262a   :  { %4279 = vmatpush.xpose.msrb.mxu2 %v4256_v42 }
0x262e   :  { %4280 = vmatpush.xpose.msrb.mxu2 %v4255_v43 }
0x2632   :  { %4281 = vmatpush.xpose.msrb.mxu2 %v4254_v3 }
0x2636   :  { %4282 = vmatpush.xpose.msrb.mxu2 %v4253_v10 }
0x263a   :  { %4283 = vmatpush.xpose.msrb.mxu2 %v4252_v12 }
0x2690   :  { %v4225_v37 = vpop.xlane.xlu2 %4224 }
0x2691   :  { %v4226_v34 = vmul.f32 %v4225_v37, %v5382_v59 }
0x2693   :  { %v4227_v36 = vsub.f32 %v4221_v21, %v4226_v34 }
0x2695   :  { %v4228_v38 = vmul.f32 %v4227_v36, %v4227_v36 }
0x2697   :  { %4229 = vadd.xlane.f32.xlu1 %v4228_v38 }
0x270a   :  { %v4230_v46 = vpop.xlane.xlu1 %4229 }
0x270b   :  { %v4231_v47 = vmul.f32 %v4230_v46, %v5382_v59 }
0x270d   :  { %v4232_v48 = vadd.f32 1e-05, %v4231_v47 }
0x270f   :  { %4652 = vrsqrt.f32 %v4232_v48  ;;  %vm4239_vm6 = vweird.f32 %v4232_v48 }
0x2715   :  { %v4653_v49 = vpop.eup %4652 }
0x2716   :  { %v4234_v44 = vmul.f32 %v4653_v49, %v4232_v48  ;;  %vm4240_vm3 = vweird.f32 %v4653_v49 }
0x2717   :  { %vm4241_vm7 = vmor %vm4239_vm6, %vm4240_vm3 }
0x2718   :  { %v4235_v50 = vmul.f32 %v4653_v49, %v4234_v44 }
0x271a   :  { %v4236_v51 = vmul.f32 0.5, %v4235_v50 }
0x271c   :  { %v4237_v52 = vsub.f32 1.5, %v4236_v51 }
0x271e   :  { %v4238_v54 = vmul.f32 %v4653_v49, %v4237_v52 }
0x2720   :  { %v4242_v39 = vsel %vm4241_vm7, %v4653_v49, %v4238_v54 }
0x2721   :  { %v4243_v28 = vmul.f32 %v4242_v39, %v4227_v36 }
0x2723   :  { %v4247_v57 = vmul.f32 %v4534_v27, %v4243_v28 }
0x2725   :  { %v4251_v59 = vadd.f32 %v4535_v55, %v4247_v57 }
0x2727   :  { %4284 = vmatmul.f32.vlgmr.msrb.gmra.mxu2 %v4251_v59 }
0x27aa   :  { %v4285_v58 = vpop.f32.mrf.mxu2 }
0x27ab   :  { %4288 = vst [vmem:[#allocation22] sm:$0xff] %v4285_v58 }
0x27ac   :  { %4965 = shalt.err (!%p4962_p8)
}
0x27ad   :  { %4299 = dma.vmem_to_hbm [thread:$0]  %s4295_s18, 128, %s4297_s16, [#allocation4]  }
0x27ae   :  { %4980 = dma.done.wait [#allocation4], 128  }
0x27af   :  { %4981 = vsyncadd [#allocation4], 4294967168 }
0x27b0   :  { %4304 = vsyncpa [#allocation3], 1 }
0x27b1   :  { %4305 = vsyncpa [#allocation6], 1 }
0x27b2   :  { %4306 = vsyncpa [#allocation9], 1 }
0x27b3   :  { %4307 = vsyncpa [#allocation12], 1 }
0x27b4   :  { %4308 = vsyncpa [#allocation15], 1 }
0x27b5   :  { %4309 = vsyncpa [#allocation18], 1 }
0x27b6   :  { %4310 = vsyncpa [#allocation21], 1 }
0x27b7   :  { %4311 = vsyncpa [#allocation4], 1 }

</bundles_post_ra>
